<compile_context>
chip_gen: v6e
topology: v6e:2x2x1
jax: 0.10.0
libtpu: 0.0.40
codegen_flags: <defaults>
</compile_context>

<pallas_src>
import functools

import jax
import jax.numpy as jnp
from jax.experimental import pallas as pl
from jax.experimental.pallas import tpu as pltpu


def _round_up(x, m):
    return ((x + m - 1) // m) * m


def _device_kind():
    try:
        return jax.devices()[0].device_kind.lower()
    except Exception:
        return ""


_KIND = _device_kind()
# v4 / v5p / v7x expose 2 TensorCores per Pallas device; v5e / v6e expose 1.
_DUAL_TC = ("v7" in _KIND) or ("v4" in _KIND) or ("v5p" in _KIND)
if "v7" in _KIND:
    _VMEM_LIMIT = 48 * 1024 * 1024      # 64 MiB physical per TC -> leave headroom
elif "v6" in _KIND or "v5e" in _KIND or "v5 lite" in _KIND:
    _VMEM_LIMIT = 96 * 1024 * 1024      # 128 MiB physical, single TC
elif "v4" in _KIND or "v5p" in _KIND:
    _VMEM_LIMIT = 64 * 1024 * 1024
else:
    _VMEM_LIMIT = 32 * 1024 * 1024      # conservative fallback


def _choose_tm(M, cap=2048):
    """Row tile (8-aligned). 1 block on single-TC chips, >=2 blocks on 2-TC chips."""
    if M <= 8:
        return M
    if _DUAL_TC:
        tm = _round_up(pl.cdiv(M, 2), 8)    # >=2 parallel blocks -> both TCs busy
        return min(tm, cap)
    return M if M <= cap else cap           # single TC: avoid extra serial grid steps


def _choose_np_tkv(N):
    """Padded token count and kv-tile size for the flash-style attention grid."""
    if N <= 1024:
        n_pad = _round_up(N, 8)
        return n_pad, n_pad                 # single kv tile
    n_pad = _round_up(N, 128)
    for tkv in (512, 256, 128):
        if n_pad % tkv == 0:
            return n_pad, tkv
    return n_pad, 128


# ----------------------------- Pallas kernels ------------------------------ #

def _matmul_bias_ln_kernel(x_ref, w_ref, b_ref, g_ref, beta_ref, o_ref, *, eps=1e-5):
    # patch-embed: (bf16 im2col patches) @ W + bias, then LayerNorm in f32.
    y = jnp.dot(x_ref[...], w_ref[...], preferred_element_type=jnp.float32) + b_ref[...]
    mu = jnp.mean(y, axis=-1, keepdims=True)
    var = jnp.mean(jnp.square(y - mu), axis=-1, keepdims=True)
    o_ref[...] = ((y - mu) * jax.lax.rsqrt(var + eps) * g_ref[...]
                  + beta_ref[...]).astype(o_ref.dtype)


def _ln_qkv_kernel(x_ref, g_ref, b_ref, wq_ref, wkv_ref, q_ref, kv_ref, *, eps=1e-5):
    # norm1 fused into the q / kv projections.  No qkv bias (qkv_bias=False);
    # softmax scale pre-folded into wq.
    x = x_ref[...].astype(jnp.float32)
    mu = jnp.mean(x, axis=-1, keepdims=True)
    var = jnp.mean(jnp.square(x - mu), axis=-1, keepdims=True)
    xn = ((x - mu) * jax.lax.rsqrt(var + eps) * g_ref[...]
          + b_ref[...]).astype(jnp.bfloat16)
    q_ref[...] = jnp.dot(xn, wq_ref[...],
                         preferred_element_type=jnp.float32).astype(q_ref.dtype)
    kv_ref[...] = jnp.dot(xn, wkv_ref[...],
                          preferred_element_type=jnp.float32).astype(kv_ref.dtype)


def _ln_matmul_kernel(x_ref, g_ref, b_ref, w_ref, wb_ref, o_ref, *, eps=1e-5, gelu=False):
    # LayerNorm (f32) fused into the following Linear (bf16 MXU, f32 accumulation).
    x = x_ref[...].astype(jnp.float32)
    mu = jnp.mean(x, axis=-1, keepdims=True)
    var = jnp.mean(jnp.square(x - mu), axis=-1, keepdims=True)
    xn = (x - mu) * jax.lax.rsqrt(var + eps) * g_ref[...] + b_ref[...]
    y = jnp.dot(xn.astype(jnp.bfloat16), w_ref[...],
                preferred_element_type=jnp.float32) + wb_ref[...]
    if gelu:  # exact GELU (matches torch.nn.GELU default)
        y = 0.5 * y * (1.0 + jax.lax.erf(y * jnp.float32(0.7071067811865476)))
    o_ref[...] = y.astype(o_ref.dtype)


def _matmul_bias_residual_kernel(x_ref, w_ref, b_ref, res_ref, o_ref):
    # fc2 + bias + residual add (residual carried bf16, added in f32).
    y = jnp.dot(x_ref[...], w_ref[...], preferred_element_type=jnp.float32)
    o_ref[...] = (res_ref[...].astype(jnp.float32) + y + b_ref[...]).astype(o_ref.dtype)


def _flash_attn_proj_residual_kernel(bias_ref, q_ref, kv_ref, res_ref, pw_ref, pb_ref,
                                     o_ref, m_sc, l_sc, acc_sc,
                                     *, num_heads, head_dim):
    # One (batch, kv-tile) step per grid point.  Online softmax over kv tiles:
    # per-head m/l plus a lane-packed (Np, dim) f32 accumulator in VMEM scratch.
    # Each head writes its P@V at a static lane offset (no concat / relayout).
    # Output projection + residual are fused at the last kv step.
    dim = num_heads * head_dim
    kv_i = pl.program_id(1)

    @pl.when(kv_i == 0)
    def _():
        m_sc[...] = jnp.full_like(m_sc, -jnp.inf)
        l_sc[...] = jnp.zeros_like(l_sc)
        acc_sc[...] = jnp.zeros_like(acc_sc)

    q = q_ref[0]        # (Np, dim)    bf16 (scale folded into the weights)
    kv = kv_ref[0]      # (tkv, 2*dim) bf16
    for h in range(num_heads):
        lo, hi = h * head_dim, (h + 1) * head_dim
        qh = q[:, lo:hi]
        kh = kv[:, lo:hi]
        vh = kv[:, dim + lo:dim + hi]
        # q @ k^T via dot_general contracting last dims (no materialized k.T).
        s = jax.lax.dot_general(qh, kh, (((1,), (1,)), ((), ())),
                                preferred_element_type=jnp.float32)
        s = s + bias_ref[h].astype(jnp.float32)           # bf16 bias -> f32 scores
        m_prev = m_sc[h]
        m_new = jnp.maximum(m_prev, jnp.max(s, axis=-1, keepdims=True))
        alpha = jnp.exp(m_prev - m_new)
        p = jnp.exp(s - m_new)
        l_sc[h] = alpha * l_sc[h] + jnp.sum(p, axis=-1, keepdims=True)
        acc_sc[:, lo:hi] = alpha * acc_sc[:, lo:hi] + jnp.dot(
            p.astype(jnp.bfloat16), vh, preferred_element_type=jnp.float32)
        m_sc[h] = m_new

    @pl.when(kv_i == pl.num_programs(1) - 1)
    def _():
        for h in range(num_heads):
            lo, hi = h * head_dim, (h + 1) * head_dim
            inv = pl.reciprocal(l_sc[h], approx=True)     # approx=False for strict parity
            acc_sc[:, lo:hi] = acc_sc[:, lo:hi] * inv
        proj = jnp.dot(acc_sc[...].astype(jnp.bfloat16), pw_ref[...],
                       preferred_element_type=jnp.float32) + pb_ref[...]
        o_ref[0] = (res_ref[0].astype(jnp.float32) + proj).astype(o_ref.dtype)


# ----------------------------- Pallas wrappers ------------------------------ #

def pallas_matmul_bias_ln(x2d, w_bf16, b, gamma, beta):
    M, K = x2d.shape
    N = w_bf16.shape[1]
    tm = _choose_tm(M)
    return pl.pallas_call(
        _matmul_bias_ln_kernel,
        out_shape=jax.ShapeDtypeStruct((M, N), jnp.bfloat16),
        grid=(pl.cdiv(M, tm),),
        in_specs=[
            pl.BlockSpec((tm, K), lambda i: (i, 0)),
            pl.BlockSpec((K, N), lambda i: (0, 0)),
            pl.BlockSpec((1, N), lambda i: (0, 0)),
            pl.BlockSpec((1, N), lambda i: (0, 0)),
            pl.BlockSpec((1, N), lambda i: (0, 0)),
        ],
        out_specs=pl.BlockSpec((tm, N), lambda i: (i, 0)),
        compiler_params=pltpu.CompilerParams(
            dimension_semantics=("parallel",), vmem_limit_bytes=_VMEM_LIMIT),
    )(x2d, w_bf16, b.reshape(1, N), gamma.reshape(1, N), beta.reshape(1, N))


def pallas_ln_qkv(x2d, gamma, beta, wq_bf16, wkv_bf16):
    M, K = x2d.shape
    dq, dkv = wq_bf16.shape[1], wkv_bf16.shape[1]
    tm = _choose_tm(M)
    return pl.pallas_call(
        _ln_qkv_kernel,
        out_shape=(jax.ShapeDtypeStruct((M, dq), jnp.bfloat16),
                   jax.ShapeDtypeStruct((M, dkv), jnp.bfloat16)),
        grid=(pl.cdiv(M, tm),),
        in_specs=[
            pl.BlockSpec((tm, K), lambda i: (i, 0)),
            pl.BlockSpec((1, K), lambda i: (0, 0)),
            pl.BlockSpec((1, K), lambda i: (0, 0)),
            pl.BlockSpec((K, dq), lambda i: (0, 0)),
            pl.BlockSpec((K, dkv), lambda i: (0, 0)),
        ],
        out_specs=(pl.BlockSpec((tm, dq), lambda i: (i, 0)),
                   pl.BlockSpec((tm, dkv), lambda i: (i, 0))),
        compiler_params=pltpu.CompilerParams(
            dimension_semantics=("parallel",), vmem_limit_bytes=_VMEM_LIMIT),
    )(x2d, gamma.reshape(1, K), beta.reshape(1, K), wq_bf16, wkv_bf16)


def pallas_ln_matmul(x2d, gamma, beta, w_bf16, wb, *, gelu=False,
                     out_dtype=jnp.bfloat16):
    M, K = x2d.shape
    N = w_bf16.shape[1]
    tm = _choose_tm(M)
    return pl.pallas_call(
        functools.partial(_ln_matmul_kernel, gelu=gelu),
        out_shape=jax.ShapeDtypeStruct((M, N), out_dtype),
        grid=(pl.cdiv(M, tm),),
        in_specs=[
            pl.BlockSpec((tm, K), lambda i: (i, 0)),
            pl.BlockSpec((1, K), lambda i: (0, 0)),
            pl.BlockSpec((1, K), lambda i: (0, 0)),
            pl.BlockSpec((K, N), lambda i: (0, 0)),
            pl.BlockSpec((1, N), lambda i: (0, 0)),
        ],
        out_specs=pl.BlockSpec((tm, N), lambda i: (i, 0)),
        compiler_params=pltpu.CompilerParams(
            dimension_semantics=("parallel",), vmem_limit_bytes=_VMEM_LIMIT),
    )(x2d, gamma.reshape(1, K), beta.reshape(1, K), w_bf16, wb.reshape(1, N))


def pallas_matmul_bias_residual(x2d, w_bf16, b, res2d):
    M, K = x2d.shape
    N = w_bf16.shape[1]
    tm = _choose_tm(M)
    return pl.pallas_call(
        _matmul_bias_residual_kernel,
        out_shape=jax.ShapeDtypeStruct((M, N), jnp.float32),
        grid=(pl.cdiv(M, tm),),
        in_specs=[
            pl.BlockSpec((tm, K), lambda i: (i, 0)),
            pl.BlockSpec((K, N), lambda i: (0, 0)),
            pl.BlockSpec((1, N), lambda i: (0, 0)),
            pl.BlockSpec((tm, N), lambda i: (i, 0)),
        ],
        out_specs=pl.BlockSpec((tm, N), lambda i: (i, 0)),
        compiler_params=pltpu.CompilerParams(
            dimension_semantics=("parallel",), vmem_limit_bytes=_VMEM_LIMIT),
    )(x2d, w_bf16, b.reshape(1, N), res2d)


def pallas_flash_attention(q, kv, rel_bias, residual, proj_w_bf16, proj_b,
                           *, num_heads, tkv):
    B, n_pad, dim = q.shape
    nh = rel_bias.shape[0]
    n_kv = n_pad // tkv
    head_dim = dim // num_heads
    kern = functools.partial(_flash_attn_proj_residual_kernel,
                             num_heads=num_heads, head_dim=head_dim)
    # TODO(synk): if B is odd / 1 on a 2-TC chip, add a q-row tile grid axis so
    #             both TensorCores get work.
    return pl.pallas_call(
        kern,
        out_shape=jax.ShapeDtypeStruct((B, n_pad, dim), jnp.bfloat16),
        grid=(B, n_kv),
        in_specs=[
            pl.BlockSpec((nh, n_pad, tkv), lambda b, k: (0, 0, k)),       # bf16 bias
            pl.BlockSpec((1, n_pad, dim), lambda b, k: (b, 0, 0)),        # q (full)
            pl.BlockSpec((1, tkv, 2 * dim), lambda b, k: (b, k, 0)),      # k/v tile
            pl.BlockSpec((1, n_pad, dim), lambda b, k: (b, 0, 0)),        # residual
            pl.BlockSpec((dim, dim), lambda b, k: (0, 0)),
            pl.BlockSpec((1, dim), lambda b, k: (0, 0)),
        ],
        out_specs=pl.BlockSpec((1, n_pad, dim), lambda b, k: (b, 0, 0)),
        scratch_shapes=[
            pltpu.VMEM((num_heads, n_pad, 1), jnp.float32),   # running max m
            pltpu.VMEM((num_heads, n_pad, 1), jnp.float32),   # running sum l
            pltpu.VMEM((n_pad, dim), jnp.float32),            # lane-packed accumulator
        ],
        compiler_params=pltpu.CompilerParams(
            dimension_semantics=("parallel", "arbitrary"),
            vmem_limit_bytes=_VMEM_LIMIT),
    )(rel_bias, q, kv, residual, proj_w_bf16, proj_b.reshape(1, dim))


# ------------------------- parameter / index setup -------------------------- #

def make_rel_index(h, w, extra):
    """Replicates RelativeAttention.relative_position_index."""
    num_rel = (2 * h - 1) * (2 * w - 1) + 1
    coords = jnp.stack(jnp.meshgrid(jnp.arange(h), jnp.arange(w), indexing="ij"))
    cf = coords.reshape(2, -1)
    rel = cf[:, :, None] - cf[:, None, :]
    rel = jnp.transpose(rel, (1, 2, 0))
    rel = rel.at[:, :, 0].add(h - 1)
    rel = rel.at[:, :, 1].add(w - 1)
    rel = rel.at[:, :, 0].multiply(2 * w - 1)
    idx = rel.sum(-1)
    idx = jnp.pad(idx, ((extra, 0), (extra, 0)), constant_values=num_rel - 1)
    return idx.astype(jnp.int32)


def precompute_rel_bias(table, grid_hw, extra, num_heads, n_pad):
    """(heads, Np, Np) bf16 bias, computed ONCE; padded key columns masked."""
    h, w = grid_hw
    N = h * w + extra
    idx = make_rel_index(h, w, extra)
    bias = table[idx.reshape(-1)].reshape(N, N, num_heads)
    bias = jnp.transpose(bias, (2, 0, 1))                  # (heads, N, N)
    pad = n_pad - N
    if pad:
        bias = jnp.pad(bias, ((0, 0), (0, pad), (0, pad)))
        bias = bias.at[:, :, N:].set(-1e9)                 # mask padded keys
    return bias.astype(jnp.bfloat16)


def init_params(key, input_dim, output_dim, num_heads, mlp_ratio, grid_hw):
    dim = output_dim
    hidden = int(dim * mlp_ratio)
    h, w = grid_hw
    num_rel = (2 * h - 1) * (2 * w - 1) + 1
    ks = jax.random.split(key, 8)
    fan_out = 3 * 3 * dim  # conv init: normal(0, sqrt(2/fan_out))
    return {
        "conv_w": jax.random.normal(ks[0], (dim, input_dim, 3, 3), jnp.float32)
                  * jnp.sqrt(2.0 / fan_out),
        "conv_b": jnp.zeros((dim,), jnp.float32),
        "pe_ln_g": jnp.ones((dim,), jnp.float32),
        "pe_ln_b": jnp.zeros((dim,), jnp.float32),
        "norm1_g": jnp.ones((dim,), jnp.float32),
        "norm1_b": jnp.zeros((dim,), jnp.float32),
        "norm2_g": jnp.ones((dim,), jnp.float32),
        "norm2_b": jnp.zeros((dim,), jnp.float32),
        "rel_bias_table": 0.02 * jax.random.normal(ks[1], (num_rel, num_heads), jnp.float32),
        "qkv_w": 0.02 * jax.random.normal(ks[2], (dim, 3 * dim), jnp.float32),
        "proj_w": 0.02 * jax.random.normal(ks[3], (dim, dim), jnp.float32),
        "proj_b": jnp.zeros((dim,), jnp.float32),
        "fc1_w": 0.02 * jax.random.normal(ks[4], (dim, hidden), jnp.float32),
        "fc1_b": jnp.zeros((hidden,), jnp.float32),
        "fc2_w": 0.02 * jax.random.normal(ks[5], (hidden, dim), jnp.float32),
        "fc2_b": jnp.zeros((dim,), jnp.float32),
    }


def cast_matmul_weights(params, num_heads):
    """bf16 copies of all MXU weights (once, at the wrapper boundary); scale folded."""
    p = dict(params)
    dim = params["conv_w"].shape[0]
    head_dim = dim // num_heads
    scale = float(head_dim) ** -0.5
    p["conv_w_mat"] = params["conv_w"].reshape(dim, -1).T.astype(jnp.bfloat16)
    # softmax scale folded into q columns: removes heads*Np^2 VPU mults per batch.
    p["wq_bf16"] = (params["qkv_w"][:, :dim] * scale).astype(jnp.bfloat16)
    p["wkv_bf16"] = params["qkv_w"][:, dim:].astype(jnp.bfloat16)
    for k in ("proj_w", "fc1_w", "fc2_w"):
        p[k + "_bf16"] = params[k].astype(jnp.bfloat16)
    return p


# ------------------------------ forward pass -------------------------------- #

def relative_mhsa_block(x, extra_tokens, params, rel_bias, *, num_heads,
                        n_valid, n_pad, tkv):
    """stride=2 path: x is (B, input_dim, H, W) NCHW -> (B, N, dim)."""
    B, Cin, H, W = x.shape
    dim = params["conv_w"].shape[0]
    Ho, Wo = (H - 1) // 2 + 1, (W - 1) // 2 + 1

    # --- OverlapPatchEmbed: conv3x3/s2/p1 as bf16 im2col + fused matmul+bias+LN ---
    # TODO(synk): at production image sizes replace this XLA im2col with a Pallas
    #             kernel that DMAs 3x3/s2 windows (avoids ~9x HBM expansion).
    xb = x.astype(jnp.bfloat16)
    xp = jnp.pad(xb, ((0, 0), (0, 0), (1, 1), (1, 1)))
    cols = [xp[:, :, kh:kh + 2 * Ho - 1:2, kw:kw + 2 * Wo - 1:2]
            for kh in range(3) for kw in range(3)]
    patches = jnp.stack(cols, axis=2)                        # (B, Cin, 9, Ho, Wo)
    patches = patches.transpose(0, 3, 4, 1, 2).reshape(B * Ho * Wo, Cin * 9)
    tokens = pallas_matmul_bias_ln(patches, params["conv_w_mat"], params["conv_b"],
                                   params["pe_ln_g"], params["pe_ln_b"])
    tokens = tokens.reshape(B, Ho * Wo, dim)                 # bf16

    # prepend extra tokens, pad token count to the attention tile size (bf16).
    # TODO(synk): could be fused into the patch-embed out_spec (token offset) to
    #             save one (B, Np, dim) HBM copy.
    ext = [jnp.broadcast_to(t.astype(jnp.bfloat16), (B, t.shape[1], dim))
           for t in extra_tokens]
    x_tok = jnp.concatenate(ext + [tokens], axis=1)          # (B, N, dim)
    assert x_tok.shape[1] == n_valid
    if n_pad > n_valid:
        x_tok = jnp.pad(x_tok, ((0, 0), (0, n_pad - n_valid), (0, 0)))
    Np = n_pad
    identity = x_tok                                         # (B, Np, dim) bf16

    # --- norm1 -> q / kv projections (fused, no qkv bias, scale in wq) ---
    q2d, kv2d = pallas_ln_qkv(x_tok.reshape(B * Np, dim),
                              params["norm1_g"], params["norm1_b"],
                              params["wq_bf16"], params["wkv_bf16"])
    q = q2d.reshape(B, Np, dim)
    kv = kv2d.reshape(B, Np, 2 * dim)

    # --- flash-style attention + output projection + residual (fused) ---
    x_tok = pallas_flash_attention(q, kv, rel_bias, identity,
                                   params["proj_w_bf16"], params["proj_b"],
                                   num_heads=num_heads, tkv=tkv)

    # --- norm2 -> fc1 + GELU (fused); fc2 + residual (fused) ---
    h1 = pallas_ln_matmul(x_tok.reshape(B * Np, dim),
                          params["norm2_g"], params["norm2_b"],
                          params["fc1_w_bf16"], params["fc1_b"],
                          gelu=True, out_dtype=jnp.bfloat16)
    out = pallas_matmul_bias_residual(h1, params["fc2_w_bf16"], params["fc2_b"],
                                      x_tok.reshape(B * Np, dim))
    return out.reshape(B, Np, dim)[:, :n_valid, :]


# --------------------------------- driver ----------------------------------- #

if __name__ == "__main__":
    key = jax.random.PRNGKey(0)
    k_x, k_p, k_e = jax.random.split(key, 3)

    # small config: stride=2, input (B, C, H, W) = (2, 8, 16, 16) -> 8x8 grid,
    # dim=64, heads=4, one extra (class) token -> N = 65 (padded to 72).
    B, Cin, H, W = 2, 8, 16, 16
    dim, num_heads, extra_token_num, mlp_ratio = 64, 4, 1, 4.0
    Ho, Wo = (H - 1) // 2 + 1, (W - 1) // 2 + 1

    x = jax.random.normal(k_x, (B, Cin, H, W), jnp.float32)
    params = cast_matmul_weights(
        init_params(k_p, Cin, dim, num_heads, mlp_ratio, (Ho, Wo)), num_heads)
    cls_token = 0.02 * jax.random.normal(k_e, (1, 1, dim), jnp.float32)

    N = Ho * Wo + extra_token_num
    Np, tkv = _choose_np_tkv(N)
    rel_bias = precompute_rel_bias(params["rel_bias_table"], (Ho, Wo),
                                   extra_token_num, num_heads, Np)

    fwd = jax.jit(functools.partial(relative_mhsa_block, num_heads=num_heads,
                                    n_valid=N, n_pad=Np, tkv=tkv))
    out = jax.block_until_ready(fwd(x, [cls_token], params, rel_bias))

    assert out.shape == (B, N, dim), out.shape
    assert bool(jnp.all(jnp.isfinite(out)))
    print("KERNEL_OK")
</pallas_src>

<mosaic_0001>
module attributes {stable_mosaic.version = 11 : i64} {
  func.func @_matmul_bias_ln_kernel(%arg0: i32, %arg1: memref<128x72xbf16, #tpu.memory_space<vmem>>, %arg2: memref<72x64xbf16, #tpu.memory_space<vmem>>, %arg3: memref<1x64xf32, #tpu.memory_space<vmem>>, %arg4: memref<1x64xf32, #tpu.memory_space<vmem>>, %arg5: memref<1x64xf32, #tpu.memory_space<vmem>>, %arg6: memref<128x64xbf16, #tpu.memory_space<vmem>>) attributes {dimension_semantics = [#tpu.dimension_semantics<parallel>], iteration_bounds = array<i64: 1>, scalar_prefetch = 0 : i64, scratch_operands = 0 : i64, tpu.core_type = #tpu.core_type<tc>, window_params = [{transform_indices = @transform_0, window_bounds = array<i64: 128, 72>}, {pipeline_mode = #tpu.pipeline_mode<synchronous>, transform_indices = @transform_1, window_bounds = array<i64: 72, 64>}, {pipeline_mode = #tpu.pipeline_mode<synchronous>, transform_indices = @transform_2, window_bounds = array<i64: 1, 64>}, {pipeline_mode = #tpu.pipeline_mode<synchronous>, transform_indices = @transform_3, window_bounds = array<i64: 1, 64>}, {pipeline_mode = #tpu.pipeline_mode<synchronous>, transform_indices = @transform_4, window_bounds = array<i64: 1, 64>}, {transform_indices = @transform_5, window_bounds = array<i64: 128, 64>}]} {
    %c0 = arith.constant 0 : index
    %c0_0 = arith.constant 0 : index
    %0 = vector.load %arg1[%c0, %c0_0] : memref<128x72xbf16, #tpu.memory_space<vmem>>, vector<128x72xbf16>
    %c0_1 = arith.constant 0 : index
    %c0_2 = arith.constant 0 : index
    %1 = vector.load %arg2[%c0_1, %c0_2] : memref<72x64xbf16, #tpu.memory_space<vmem>>, vector<72x64xbf16>
    %cst = arith.constant dense<0.000000e+00> : vector<128x64xf32>
    %2 = tpu.matmul %0, %1, %cst {dimension_numbers = #tpu.dot_dimension_numbers<[1], [0], [0], [1], [0, 0, 1, 1], [], []>} : vector<128x72xbf16>, vector<72x64xbf16>, vector<128x64xf32> -> vector<128x64xf32>
    %c0_3 = arith.constant 0 : index
    %c0_4 = arith.constant 0 : index
    %3 = vector.load %arg3[%c0_3, %c0_4] : memref<1x64xf32, #tpu.memory_space<vmem>>, vector<1x64xf32>
    %4 = vector.broadcast %3 : vector<1x64xf32> to vector<128x64xf32>
    %5 = arith.addf %2, %4 : vector<128x64xf32>
    %cst_5 = arith.constant dense<0.000000e+00> : vector<128xf32>
    %6 = vector.multi_reduction <add>, %5, %cst_5 [1] : vector<128x64xf32> to vector<128xf32>
    %7 = vector.shape_cast %6 : vector<128xf32> to vector<128x1xf32>
    %cst_6 = arith.constant 6.400000e+01 : f32
    %8 = vector.broadcast %cst_6 : f32 to vector<128x1xf32>
    %9 = arith.divf %7, %8 : vector<128x1xf32>
    %10 = vector.broadcast %9 : vector<128x1xf32> to vector<128x64xf32>
    %11 = arith.subf %5, %10 : vector<128x64xf32>
    %12 = arith.mulf %11, %11 : vector<128x64xf32>
    %cst_7 = arith.constant dense<0.000000e+00> : vector<128xf32>
    %13 = vector.multi_reduction <add>, %12, %cst_7 [1] : vector<128x64xf32> to vector<128xf32>
    %14 = vector.shape_cast %13 : vector<128xf32> to vector<128x1xf32>
    %cst_8 = arith.constant 6.400000e+01 : f32
    %15 = vector.broadcast %cst_8 : f32 to vector<128x1xf32>
    %16 = arith.divf %14, %15 : vector<128x1xf32>
    %17 = vector.broadcast %9 : vector<128x1xf32> to vector<128x64xf32>
    %18 = arith.subf %5, %17 : vector<128x64xf32>
    %cst_9 = arith.constant 9.99999974E-6 : f32
    %19 = vector.broadcast %cst_9 : f32 to vector<128x1xf32>
    %20 = arith.addf %16, %19 : vector<128x1xf32>
    %21 = math.rsqrt %20 : vector<128x1xf32>
    %22 = vector.broadcast %21 : vector<128x1xf32> to vector<128x64xf32>
    %23 = arith.mulf %18, %22 : vector<128x64xf32>
    %c0_10 = arith.constant 0 : index
    %c0_11 = arith.constant 0 : index
    %24 = vector.load %arg4[%c0_10, %c0_11] : memref<1x64xf32, #tpu.memory_space<vmem>>, vector<1x64xf32>
    %25 = vector.broadcast %24 : vector<1x64xf32> to vector<128x64xf32>
    %26 = arith.mulf %23, %25 : vector<128x64xf32>
    %c0_12 = arith.constant 0 : index
    %c0_13 = arith.constant 0 : index
    %27 = vector.load %arg5[%c0_12, %c0_13] : memref<1x64xf32, #tpu.memory_space<vmem>>, vector<1x64xf32>
    %28 = vector.broadcast %27 : vector<1x64xf32> to vector<128x64xf32>
    %29 = arith.addf %26, %28 : vector<128x64xf32>
    %30 = arith.truncf %29 : vector<128x64xf32> to vector<128x64xbf16>
    %c0_14 = arith.constant 0 : index
    %c0_15 = arith.constant 0 : index
    %31 = vector.load %arg6[%c0_14, %c0_15] : memref<128x64xbf16, #tpu.memory_space<vmem>>, vector<128x64xbf16>
    tpu.vector_store %arg6[%c0_14, %c0_15], %30 {strides = array<i32>} : memref<128x64xbf16, #tpu.memory_space<vmem>>, vector<128x64xbf16>,
    return
  }
  func.func @transform_0(%arg0: i32) -> (i32, i32) {
    %c0_i32 = arith.constant 0 : i32
    %c0_i32_0 = arith.constant 0 : i32
    return %arg0, %c0_i32 : i32, i32
  }
  func.func @transform_1(%arg0: i32) -> (i32, i32) {
    %c0_i32 = arith.constant 0 : i32
    %c0_i32_0 = arith.constant 0 : i32
    %c0_i32_1 = arith.constant 0 : i32
    return %c0_i32, %c0_i32_0 : i32, i32
  }
  func.func @transform_2(%arg0: i32) -> (i32, i32) {
    %c0_i32 = arith.constant 0 : i32
    %c0_i32_0 = arith.constant 0 : i32
    %c0_i32_1 = arith.constant 0 : i32
    return %c0_i32, %c0_i32_0 : i32, i32
  }
  func.func @transform_3(%arg0: i32) -> (i32, i32) {
    %c0_i32 = arith.constant 0 : i32
    %c0_i32_0 = arith.constant 0 : i32
    %c0_i32_1 = arith.constant 0 : i32
    return %c0_i32, %c0_i32_0 : i32, i32
  }
  func.func @transform_4(%arg0: i32) -> (i32, i32) {
    %c0_i32 = arith.constant 0 : i32
    %c0_i32_0 = arith.constant 0 : i32
    %c0_i32_1 = arith.constant 0 : i32
    return %c0_i32, %c0_i32_0 : i32, i32
  }
  func.func @transform_5(%arg0: i32) -> (i32, i32) {
    %c0_i32 = arith.constant 0 : i32
    %c0_i32_0 = arith.constant 0 : i32
    return %arg0, %c0_i32 : i32, i32
  }
}

module attributes {stable_mosaic.version = 11 : i64} {
  func.func @_ln_qkv_kernel(%arg0: i32, %arg1: memref<144x64xbf16, #tpu.memory_space<vmem>>, %arg2: memref<1x64xf32, #tpu.memory_space<vmem>>, %arg3: memref<1x64xf32, #tpu.memory_space<vmem>>, %arg4: memref<64x64xbf16, #tpu.memory_space<vmem>>, %arg5: memref<64x128xbf16, #tpu.memory_space<vmem>>, %arg6: memref<144x64xbf16, #tpu.memory_space<vmem>>, %arg7: memref<144x128xbf16, #tpu.memory_space<vmem>>) attributes {dimension_semantics = [#tpu.dimension_semantics<parallel>], iteration_bounds = array<i64: 1>, scalar_prefetch = 0 : i64, scratch_operands = 0 : i64, tpu.core_type = #tpu.core_type<tc>, window_params = [{transform_indices = @transform_0, window_bounds = array<i64: 144, 64>}, {pipeline_mode = #tpu.pipeline_mode<synchronous>, transform_indices = @transform_1, window_bounds = array<i64: 1, 64>}, {pipeline_mode = #tpu.pipeline_mode<synchronous>, transform_indices = @transform_2, window_bounds = array<i64: 1, 64>}, {pipeline_mode = #tpu.pipeline_mode<synchronous>, transform_indices = @transform_3, window_bounds = array<i64: 64, 64>}, {pipeline_mode = #tpu.pipeline_mode<synchronous>, transform_indices = @transform_4, window_bounds = array<i64: 64, 128>}, {transform_indices = @transform_5, window_bounds = array<i64: 144, 64>}, {transform_indices = @transform_6, window_bounds = array<i64: 144, 128>}]} {
    %c0 = arith.constant 0 : index
    %c0_0 = arith.constant 0 : index
    %0 = vector.load %arg1[%c0, %c0_0] : memref<144x64xbf16, #tpu.memory_space<vmem>>, vector<144x64xbf16>
    %1 = arith.extf %0 : vector<144x64xbf16> to vector<144x64xf32>
    %cst = arith.constant dense<0.000000e+00> : vector<144xf32>
    %2 = vector.multi_reduction <add>, %1, %cst [1] : vector<144x64xf32> to vector<144xf32>
    %3 = vector.shape_cast %2 : vector<144xf32> to vector<144x1xf32>
    %cst_1 = arith.constant 6.400000e+01 : f32
    %4 = vector.broadcast %cst_1 : f32 to vector<144x1xf32>
    %5 = arith.divf %3, %4 : vector<144x1xf32>
    %6 = vector.broadcast %5 : vector<144x1xf32> to vector<144x64xf32>
    %7 = arith.subf %1, %6 : vector<144x64xf32>
    %8 = arith.mulf %7, %7 : vector<144x64xf32>
    %cst_2 = arith.constant dense<0.000000e+00> : vector<144xf32>
    %9 = vector.multi_reduction <add>, %8, %cst_2 [1] : vector<144x64xf32> to vector<144xf32>
    %10 = vector.shape_cast %9 : vector<144xf32> to vector<144x1xf32>
    %cst_3 = arith.constant 6.400000e+01 : f32
    %11 = vector.broadcast %cst_3 : f32 to vector<144x1xf32>
    %12 = arith.divf %10, %11 : vector<144x1xf32>
    %13 = vector.broadcast %5 : vector<144x1xf32> to vector<144x64xf32>
    %14 = arith.subf %1, %13 : vector<144x64xf32>
    %cst_4 = arith.constant 9.99999974E-6 : f32
    %15 = vector.broadcast %cst_4 : f32 to vector<144x1xf32>
    %16 = arith.addf %12, %15 : vector<144x1xf32>
    %17 = math.rsqrt %16 : vector<144x1xf32>
    %18 = vector.broadcast %17 : vector<144x1xf32> to vector<144x64xf32>
    %19 = arith.mulf %14, %18 : vector<144x64xf32>
    %c0_5 = arith.constant 0 : index
    %c0_6 = arith.constant 0 : index
    %20 = vector.load %arg2[%c0_5, %c0_6] : memref<1x64xf32, #tpu.memory_space<vmem>>, vector<1x64xf32>
    %21 = vector.broadcast %20 : vector<1x64xf32> to vector<144x64xf32>
    %22 = arith.mulf %19, %21 : vector<144x64xf32>
    %c0_7 = arith.constant 0 : index
    %c0_8 = arith.constant 0 : index
    %23 = vector.load %arg3[%c0_7, %c0_8] : memref<1x64xf32, #tpu.memory_space<vmem>>, vector<1x64xf32>
    %24 = vector.broadcast %23 : vector<1x64xf32> to vector<144x64xf32>
    %25 = arith.addf %22, %24 : vector<144x64xf32>
    %26 = arith.truncf %25 : vector<144x64xf32> to vector<144x64xbf16>
    %c0_9 = arith.constant 0 : index
    %c0_10 = arith.constant 0 : index
    %27 = vector.load %arg4[%c0_9, %c0_10] : memref<64x64xbf16, #tpu.memory_space<vmem>>, vector<64x64xbf16>
    %cst_11 = arith.constant dense<0.000000e+00> : vector<144x64xf32>
    %28 = tpu.matmul %26, %27, %cst_11 {dimension_numbers = #tpu.dot_dimension_numbers<[1], [0], [0], [1], [0, 0, 1, 1], [], []>} : vector<144x64xbf16>, vector<64x64xbf16>, vector<144x64xf32> -> vector<144x64xf32>
    %29 = arith.truncf %28 : vector<144x64xf32> to vector<144x64xbf16>
    %c0_12 = arith.constant 0 : index
    %c0_13 = arith.constant 0 : index
    %30 = vector.load %arg6[%c0_12, %c0_13] : memref<144x64xbf16, #tpu.memory_space<vmem>>, vector<144x64xbf16>
    tpu.vector_store %arg6[%c0_12, %c0_13], %29 {strides = array<i32>} : memref<144x64xbf16, #tpu.memory_space<vmem>>, vector<144x64xbf16>,
    %c0_14 = arith.constant 0 : index
    %c0_15 = arith.constant 0 : index
    %31 = vector.load %arg5[%c0_14, %c0_15] : memref<64x128xbf16, #tpu.memory_space<vmem>>, vector<64x128xbf16>
    %cst_16 = arith.constant dense<0.000000e+00> : vector<144x128xf32>
    %32 = tpu.matmul %26, %31, %cst_16 {dimension_numbers = #tpu.dot_dimension_numbers<[1], [0], [0], [1], [0, 0, 1, 1], [], []>} : vector<144x64xbf16>, vector<64x128xbf16>, vector<144x128xf32> -> vector<144x128xf32>
    %33 = arith.truncf %32 : vector<144x128xf32> to vector<144x128xbf16>
    %c0_17 = arith.constant 0 : index
    %c0_18 = arith.constant 0 : index
    %34 = vector.load %arg7[%c0_17, %c0_18] : memref<144x128xbf16, #tpu.memory_space<vmem>>, vector<144x128xbf16>
    tpu.vector_store %arg7[%c0_17, %c0_18], %33 {strides = array<i32>} : memref<144x128xbf16, #tpu.memory_space<vmem>>, vector<144x128xbf16>,
    return
  }
  func.func @transform_0(%arg0: i32) -> (i32, i32) {
    %c0_i32 = arith.constant 0 : i32
    %c0_i32_0 = arith.constant 0 : i32
    return %arg0, %c0_i32 : i32, i32
  }
  func.func @transform_1(%arg0: i32) -> (i32, i32) {
    %c0_i32 = arith.constant 0 : i32
    %c0_i32_0 = arith.constant 0 : i32
    %c0_i32_1 = arith.constant 0 : i32
    return %c0_i32, %c0_i32_0 : i32, i32
  }
  func.func @transform_2(%arg0: i32) -> (i32, i32) {
    %c0_i32 = arith.constant 0 : i32
    %c0_i32_0 = arith.constant 0 : i32
    %c0_i32_1 = arith.constant 0 : i32
    return %c0_i32, %c0_i32_0 : i32, i32
  }
  func.func @transform_3(%arg0: i32) -> (i32, i32) {
    %c0_i32 = arith.constant 0 : i32
    %c0_i32_0 = arith.constant 0 : i32
    %c0_i32_1 = arith.constant 0 : i32
    return %c0_i32, %c0_i32_0 : i32, i32
  }
  func.func @transform_4(%arg0: i32) -> (i32, i32) {
    %c0_i32 = arith.constant 0 : i32
    %c0_i32_0 = arith.constant 0 : i32
    %c0_i32_1 = arith.constant 0 : i32
    return %c0_i32, %c0_i32_0 : i32, i32
  }
  func.func @transform_5(%arg0: i32) -> (i32, i32) {
    %c0_i32 = arith.constant 0 : i32
    %c0_i32_0 = arith.constant 0 : i32
    return %arg0, %c0_i32 : i32, i32
  }
  func.func @transform_6(%arg0: i32) -> (i32, i32) {
    %c0_i32 = arith.constant 0 : i32
    %c0_i32_0 = arith.constant 0 : i32
    return %arg0, %c0_i32 : i32, i32
  }
}

module attributes {stable_mosaic.version = 11 : i64} {
  func.func @_flash_attn_proj_residual_kernel(%arg0: i32, %arg1: i32, %arg2: memref<4x72x72xbf16, #tpu.memory_space<vmem>>, %arg3: memref<1x72x64xbf16, #tpu.memory_space<vmem>>, %arg4: memref<1x72x128xbf16, #tpu.memory_space<vmem>>, %arg5: memref<1x72x64xbf16, #tpu.memory_space<vmem>>, %arg6: memref<64x64xbf16, #tpu.memory_space<vmem>>, %arg7: memref<1x64xf32, #tpu.memory_space<vmem>>, %arg8: memref<1x72x64xbf16, #tpu.memory_space<vmem>>, %arg9: memref<4x72x1xf32, #tpu.memory_space<vmem>>, %arg10: memref<4x72x1xf32, #tpu.memory_space<vmem>>, %arg11: memref<72x64xf32, #tpu.memory_space<vmem>>) attributes {dimension_semantics = [#tpu.dimension_semantics<parallel>, #tpu.dimension_semantics<arbitrary>], iteration_bounds = array<i64: 2, 1>, scalar_prefetch = 0 : i64, scratch_operands = 3 : i64, tpu.core_type = #tpu.core_type<tc>, window_params = [{transform_indices = @transform_0, window_bounds = array<i64: 4, 72, 72>}, {transform_indices = @transform_1, window_bounds = array<i64: 1, 72, 64>}, {transform_indices = @transform_2, window_bounds = array<i64: 1, 72, 128>}, {transform_indices = @transform_3, window_bounds = array<i64: 1, 72, 64>}, {pipeline_mode = #tpu.pipeline_mode<synchronous>, transform_indices = @transform_4, window_bounds = array<i64: 64, 64>}, {pipeline_mode = #tpu.pipeline_mode<synchronous>, transform_indices = @transform_5, window_bounds = array<i64: 1, 64>}, {transform_indices = @transform_6, window_bounds = array<i64: 1, 72, 64>}]} {
    %c0_i32 = arith.constant 0 : i32
    %0 = arith.cmpi eq, %arg1, %c0_i32 : i32
    %1 = arith.extui %0 : i1 to i32
    %c0_i32_0 = arith.constant 0 : i32
    %2 = arith.cmpi ne, %1, %c0_i32_0 : i32
    scf.if %2 {
      %cst_93 = arith.constant 0xFF800000 : f32
      %158 = vector.broadcast %cst_93 : f32 to vector<4x72x1xf32>
      %c0_94 = arith.constant 0 : index
      %c0_95 = arith.constant 0 : index
      %c0_96 = arith.constant 0 : index
      %159 = vector.load %arg9[%c0_94, %c0_95, %c0_96] : memref<4x72x1xf32, #tpu.memory_space<vmem>>, vector<4x72x1xf32>
      tpu.vector_store %arg9[%c0_94, %c0_95, %c0_96], %158 {strides = array<i32>} : memref<4x72x1xf32, #tpu.memory_space<vmem>>, vector<4x72x1xf32>,
      %cst_97 = arith.constant 0.000000e+00 : f32
      %160 = vector.broadcast %cst_97 : f32 to vector<4x72x1xf32>
      %c0_98 = arith.constant 0 : index
      %c0_99 = arith.constant 0 : index
      %c0_100 = arith.constant 0 : index
      %161 = vector.load %arg10[%c0_98, %c0_99, %c0_100] : memref<4x72x1xf32, #tpu.memory_space<vmem>>, vector<4x72x1xf32>
      tpu.vector_store %arg10[%c0_98, %c0_99, %c0_100], %160 {strides = array<i32>} : memref<4x72x1xf32, #tpu.memory_space<vmem>>, vector<4x72x1xf32>,
      %cst_101 = arith.constant 0.000000e+00 : f32
      %162 = vector.broadcast %cst_101 : f32 to vector<72x64xf32>
      %c0_102 = arith.constant 0 : index
      %c0_103 = arith.constant 0 : index
      %163 = vector.load %arg11[%c0_102, %c0_103] : memref<72x64xf32, #tpu.memory_space<vmem>>, vector<72x64xf32>
      tpu.vector_store %arg11[%c0_102, %c0_103], %162 {strides = array<i32>} : memref<72x64xf32, #tpu.memory_space<vmem>>, vector<72x64xf32>,
    } else {
    }
    %c0 = arith.constant 0 : index
    %c0_1 = arith.constant 0 : index
    %c0_2 = arith.constant 0 : index
    %3 = vector.load %arg3[%c0, %c0_1, %c0_2] : memref<1x72x64xbf16, #tpu.memory_space<vmem>>, vector<1x72x64xbf16>
    %4 = vector.shape_cast %3 : vector<1x72x64xbf16> to vector<72x64xbf16>
    %c0_3 = arith.constant 0 : index
    %c0_4 = arith.constant 0 : index
    %c0_5 = arith.constant 0 : index
    %5 = vector.load %arg4[%c0_3, %c0_4, %c0_5] : memref<1x72x128xbf16, #tpu.memory_space<vmem>>, vector<1x72x128xbf16>
    %6 = vector.shape_cast %5 : vector<1x72x128xbf16> to vector<72x128xbf16>
    %7 = vector.extract_strided_slice %4 {offsets = [0, 0], sizes = [72, 16], strides = [1, 1]} : vector<72x64xbf16> to vector<72x16xbf16>
    %8 = vector.extract_strided_slice %6 {offsets = [0, 0], sizes = [72, 16], strides = [1, 1]} : vector<72x128xbf16> to vector<72x16xbf16>
    %9 = vector.extract_strided_slice %6 {offsets = [0, 64], sizes = [72, 16], strides = [1, 1]} : vector<72x128xbf16> to vector<72x16xbf16>
    %cst = arith.constant dense<0.000000e+00> : vector<72x72xf32>
    %10 = tpu.matmul %7, %8, %cst {dimension_numbers = #tpu.dot_dimension_numbers<[1], [1], [0], [0], [0, 0, 1, 0], [], []>} : vector<72x16xbf16>, vector<72x16xbf16>, vector<72x72xf32> -> vector<72x72xf32>
    %c0_6 = arith.constant 0 : index
    %c0_7 = arith.constant 0 : index
    %c0_8 = arith.constant 0 : index
    %11 = vector.load %arg2[%c0_6, %c0_7, %c0_8] : memref<4x72x72xbf16, #tpu.memory_space<vmem>>, vector<1x72x72xbf16>
    %12 = vector.shape_cast %11 : vector<1x72x72xbf16> to vector<72x72xbf16>
    %13 = arith.extf %12 : vector<72x72xbf16> to vector<72x72xf32>
    %14 = arith.addf %10, %13 : vector<72x72xf32>
    %c0_9 = arith.constant 0 : index
    %c0_10 = arith.constant 0 : index
    %c0_11 = arith.constant 0 : index
    %15 = vector.load %arg9[%c0_9, %c0_10, %c0_11] : memref<4x72x1xf32, #tpu.memory_space<vmem>>, vector<1x72x1xf32>
    %16 = vector.shape_cast %15 : vector<1x72x1xf32> to vector<72x1xf32>
    %cst_12 = arith.constant dense<0xFF800000> : vector<72xf32>
    %17 = vector.multi_reduction <maximumf>, %14, %cst_12 [1] : vector<72x72xf32> to vector<72xf32>
    %18 = vector.shape_cast %17 : vector<72xf32> to vector<72x1xf32>
    %19 = arith.maximumf %16, %18 : vector<72x1xf32>
    %20 = arith.subf %16, %19 : vector<72x1xf32>
    %21 = math.exp %20 : vector<72x1xf32>
    %22 = vector.broadcast %19 : vector<72x1xf32> to vector<72x72xf32>
    %23 = arith.subf %14, %22 : vector<72x72xf32>
    %24 = math.exp %23 : vector<72x72xf32>
    %c0_13 = arith.constant 0 : index
    %c0_14 = arith.constant 0 : index
    %c0_15 = arith.constant 0 : index
    %25 = vector.load %arg10[%c0_13, %c0_14, %c0_15] : memref<4x72x1xf32, #tpu.memory_space<vmem>>, vector<1x72x1xf32>
    %26 = vector.shape_cast %25 : vector<1x72x1xf32> to vector<72x1xf32>
    %27 = arith.mulf %21, %26 : vector<72x1xf32>
    %cst_16 = arith.constant dense<0.000000e+00> : vector<72xf32>
    %28 = vector.multi_reduction <add>, %24, %cst_16 [1] : vector<72x72xf32> to vector<72xf32>
    %29 = vector.shape_cast %28 : vector<72xf32> to vector<72x1xf32>
    %30 = arith.addf %27, %29 : vector<72x1xf32>
    %c0_17 = arith.constant 0 : index
    %c0_18 = arith.constant 0 : index
    %c0_19 = arith.constant 0 : index
    %31 = vector.load %arg10[%c0_17, %c0_18, %c0_19] : memref<4x72x1xf32, #tpu.memory_space<vmem>>, vector<1x72x1xf32>
    %32 = vector.shape_cast %31 : vector<1x72x1xf32> to vector<72x1xf32>
    %33 = vector.shape_cast %30 : vector<72x1xf32> to vector<1x72x1xf32>
    tpu.vector_store %arg10[%c0_17, %c0_18, %c0_19], %33 {strides = array<i32>} : memref<4x72x1xf32, #tpu.memory_space<vmem>>, vector<1x72x1xf32>,
    %c0_20 = arith.constant 0 : index
    %c0_21 = arith.constant 0 : index
    %34 = vector.load %arg11[%c0_20, %c0_21] : memref<72x64xf32, #tpu.memory_space<vmem>>, vector<72x16xf32>
    %35 = vector.broadcast %21 : vector<72x1xf32> to vector<72x16xf32>
    %36 = arith.mulf %35, %34 : vector<72x16xf32>
    %37 = arith.truncf %24 : vector<72x72xf32> to vector<72x72xbf16>
    %cst_22 = arith.constant dense<0.000000e+00> : vector<72x16xf32>
    %38 = tpu.matmul %37, %9, %cst_22 {dimension_numbers = #tpu.dot_dimension_numbers<[1], [0], [0], [1], [0, 0, 1, 1], [], []>} : vector<72x72xbf16>, vector<72x16xbf16>, vector<72x16xf32> -> vector<72x16xf32>
    %39 = arith.addf %36, %38 : vector<72x16xf32>
    %c0_23 = arith.constant 0 : index
    %c0_24 = arith.constant 0 : index
    %40 = vector.load %arg11[%c0_23, %c0_24] : memref<72x64xf32, #tpu.memory_space<vmem>>, vector<72x16xf32>
    tpu.vector_store %arg11[%c0_23, %c0_24], %39 {strides = array<i32>} : memref<72x64xf32, #tpu.memory_space<vmem>>, vector<72x16xf32>,
    %c0_25 = arith.constant 0 : index
    %c0_26 = arith.constant 0 : index
    %c0_27 = arith.constant 0 : index
    %41 = vector.load %arg9[%c0_25, %c0_26, %c0_27] : memref<4x72x1xf32, #tpu.memory_space<vmem>>, vector<1x72x1xf32>
    %42 = vector.shape_cast %41 : vector<1x72x1xf32> to vector<72x1xf32>
    %43 = vector.shape_cast %19 : vector<72x1xf32> to vector<1x72x1xf32>
    tpu.vector_store %arg9[%c0_25, %c0_26, %c0_27], %43 {strides = array<i32>} : memref<4x72x1xf32, #tpu.memory_space<vmem>>, vector<1x72x1xf32>,
    %44 = vector.extract_strided_slice %4 {offsets = [0, 16], sizes = [72, 16], strides = [1, 1]} : vector<72x64xbf16> to vector<72x16xbf16>
    %45 = vector.extract_strided_slice %6 {offsets = [0, 16], sizes = [72, 16], strides = [1, 1]} : vector<72x128xbf16> to vector<72x16xbf16>
    %46 = vector.extract_strided_slice %6 {offsets = [0, 80], sizes = [72, 16], strides = [1, 1]} : vector<72x128xbf16> to vector<72x16xbf16>
    %cst_28 = arith.constant dense<0.000000e+00> : vector<72x72xf32>
    %47 = tpu.matmul %44, %45, %cst_28 {dimension_numbers = #tpu.dot_dimension_numbers<[1], [1], [0], [0], [0, 0, 1, 0], [], []>} : vector<72x16xbf16>, vector<72x16xbf16>, vector<72x72xf32> -> vector<72x72xf32>
    %c1 = arith.constant 1 : index
    %c0_29 = arith.constant 0 : index
    %c0_30 = arith.constant 0 : index
    %48 = vector.load %arg2[%c1, %c0_29, %c0_30] : memref<4x72x72xbf16, #tpu.memory_space<vmem>>, vector<1x72x72xbf16>
    %49 = vector.shape_cast %48 : vector<1x72x72xbf16> to vector<72x72xbf16>
    %50 = arith.extf %49 : vector<72x72xbf16> to vector<72x72xf32>
    %51 = arith.addf %47, %50 : vector<72x72xf32>
    %c1_31 = arith.constant 1 : index
    %c0_32 = arith.constant 0 : index
    %c0_33 = arith.constant 0 : index
    %52 = vector.load %arg9[%c1_31, %c0_32, %c0_33] : memref<4x72x1xf32, #tpu.memory_space<vmem>>, vector<1x72x1xf32>
    %53 = vector.shape_cast %52 : vector<1x72x1xf32> to vector<72x1xf32>
    %cst_34 = arith.constant dense<0xFF800000> : vector<72xf32>
    %54 = vector.multi_reduction <maximumf>, %51, %cst_34 [1] : vector<72x72xf32> to vector<72xf32>
    %55 = vector.shape_cast %54 : vector<72xf32> to vector<72x1xf32>
    %56 = arith.maximumf %53, %55 : vector<72x1xf32>
    %57 = arith.subf %53, %56 : vector<72x1xf32>
    %58 = math.exp %57 : vector<72x1xf32>
    %59 = vector.broadcast %56 : vector<72x1xf32> to vector<72x72xf32>
    %60 = arith.subf %51, %59 : vector<72x72xf32>
    %61 = math.exp %60 : vector<72x72xf32>
    %c1_35 = arith.constant 1 : index
    %c0_36 = arith.constant 0 : index
    %c0_37 = arith.constant 0 : index
    %62 = vector.load %arg10[%c1_35, %c0_36, %c0_37] : memref<4x72x1xf32, #tpu.memory_space<vmem>>, vector<1x72x1xf32>
    %63 = vector.shape_cast %62 : vector<1x72x1xf32> to vector<72x1xf32>
    %64 = arith.mulf %58, %63 : vector<72x1xf32>
    %cst_38 = arith.constant dense<0.000000e+00> : vector<72xf32>
    %65 = vector.multi_reduction <add>, %61, %cst_38 [1] : vector<72x72xf32> to vector<72xf32>
    %66 = vector.shape_cast %65 : vector<72xf32> to vector<72x1xf32>
    %67 = arith.addf %64, %66 : vector<72x1xf32>
    %c1_39 = arith.constant 1 : index
    %c0_40 = arith.constant 0 : index
    %c0_41 = arith.constant 0 : index
    %68 = vector.load %arg10[%c1_39, %c0_40, %c0_41] : memref<4x72x1xf32, #tpu.memory_space<vmem>>, vector<1x72x1xf32>
    %69 = vector.shape_cast %68 : vector<1x72x1xf32> to vector<72x1xf32>
    %70 = vector.shape_cast %67 : vector<72x1xf32> to vector<1x72x1xf32>
    tpu.vector_store %arg10[%c1_39, %c0_40, %c0_41], %70 {strides = array<i32>} : memref<4x72x1xf32, #tpu.memory_space<vmem>>, vector<1x72x1xf32>,
    %c0_42 = arith.constant 0 : index
    %c16 = arith.constant 16 : index
    %71 = vector.load %arg11[%c0_42, %c16] : memref<72x64xf32, #tpu.memory_space<vmem>>, vector<72x16xf32>
    %72 = vector.broadcast %58 : vector<72x1xf32> to vector<72x16xf32>
    %73 = arith.mulf %72, %71 : vector<72x16xf32>
    %74 = arith.truncf %61 : vector<72x72xf32> to vector<72x72xbf16>
    %cst_43 = arith.constant dense<0.000000e+00> : vector<72x16xf32>
    %75 = tpu.matmul %74, %46, %cst_43 {dimension_numbers = #tpu.dot_dimension_numbers<[1], [0], [0], [1], [0, 0, 1, 1], [], []>} : vector<72x72xbf16>, vector<72x16xbf16>, vector<72x16xf32> -> vector<72x16xf32>
    %76 = arith.addf %73, %75 : vector<72x16xf32>
    %c0_44 = arith.constant 0 : index
    %c16_45 = arith.constant 16 : index
    %77 = vector.load %arg11[%c0_44, %c16_45] : memref<72x64xf32, #tpu.memory_space<vmem>>, vector<72x16xf32>
    tpu.vector_store %arg11[%c0_44, %c16_45], %76 {strides = array<i32>} : memref<72x64xf32, #tpu.memory_space<vmem>>, vector<72x16xf32>,
    %c1_46 = arith.constant 1 : index
    %c0_47 = arith.constant 0 : index
    %c0_48 = arith.constant 0 : index
    %78 = vector.load %arg9[%c1_46, %c0_47, %c0_48] : memref<4x72x1xf32, #tpu.memory_space<vmem>>, vector<1x72x1xf32>
    %79 = vector.shape_cast %78 : vector<1x72x1xf32> to vector<72x1xf32>
    %80 = vector.shape_cast %56 : vector<72x1xf32> to vector<1x72x1xf32>
    tpu.vector_store %arg9[%c1_46, %c0_47, %c0_48], %80 {strides = array<i32>} : memref<4x72x1xf32, #tpu.memory_space<vmem>>, vector<1x72x1xf32>,
    %81 = vector.extract_strided_slice %4 {offsets = [0, 32], sizes = [72, 16], strides = [1, 1]} : vector<72x64xbf16> to vector<72x16xbf16>
    %82 = vector.extract_strided_slice %6 {offsets = [0, 32], sizes = [72, 16], strides = [1, 1]} : vector<72x128xbf16> to vector<72x16xbf16>
    %83 = vector.extract_strided_slice %6 {offsets = [0, 96], sizes = [72, 16], strides = [1, 1]} : vector<72x128xbf16> to vector<72x16xbf16>
    %cst_49 = arith.constant dense<0.000000e+00> : vector<72x72xf32>
    %84 = tpu.matmul %81, %82, %cst_49 {dimension_numbers = #tpu.dot_dimension_numbers<[1], [1], [0], [0], [0, 0, 1, 0], [], []>} : vector<72x16xbf16>, vector<72x16xbf16>, vector<72x72xf32> -> vector<72x72xf32>
    %c2 = arith.constant 2 : index
    %c0_50 = arith.constant 0 : index
    %c0_51 = arith.constant 0 : index
    %85 = vector.load %arg2[%c2, %c0_50, %c0_51] : memref<4x72x72xbf16, #tpu.memory_space<vmem>>, vector<1x72x72xbf16>
    %86 = vector.shape_cast %85 : vector<1x72x72xbf16> to vector<72x72xbf16>
    %87 = arith.extf %86 : vector<72x72xbf16> to vector<72x72xf32>
    %88 = arith.addf %84, %87 : vector<72x72xf32>
    %c2_52 = arith.constant 2 : index
    %c0_53 = arith.constant 0 : index
    %c0_54 = arith.constant 0 : index
    %89 = vector.load %arg9[%c2_52, %c0_53, %c0_54] : memref<4x72x1xf32, #tpu.memory_space<vmem>>, vector<1x72x1xf32>
    %90 = vector.shape_cast %89 : vector<1x72x1xf32> to vector<72x1xf32>
    %cst_55 = arith.constant dense<0xFF800000> : vector<72xf32>
    %91 = vector.multi_reduction <maximumf>, %88, %cst_55 [1] : vector<72x72xf32> to vector<72xf32>
    %92 = vector.shape_cast %91 : vector<72xf32> to vector<72x1xf32>
    %93 = arith.maximumf %90, %92 : vector<72x1xf32>
    %94 = arith.subf %90, %93 : vector<72x1xf32>
    %95 = math.exp %94 : vector<72x1xf32>
    %96 = vector.broadcast %93 : vector<72x1xf32> to vector<72x72xf32>
    %97 = arith.subf %88, %96 : vector<72x72xf32>
    %98 = math.exp %97 : vector<72x72xf32>
    %c2_56 = arith.constant 2 : index
    %c0_57 = arith.constant 0 : index
    %c0_58 = arith.constant 0 : index
    %99 = vector.load %arg10[%c2_56, %c0_57, %c0_58] : memref<4x72x1xf32, #tpu.memory_space<vmem>>, vector<1x72x1xf32>
    %100 = vector.shape_cast %99 : vector<1x72x1xf32> to vector<72x1xf32>
    %101 = arith.mulf %95, %100 : vector<72x1xf32>
    %cst_59 = arith.constant dense<0.000000e+00> : vector<72xf32>
    %102 = vector.multi_reduction <add>, %98, %cst_59 [1] : vector<72x72xf32> to vector<72xf32>
    %103 = vector.shape_cast %102 : vector<72xf32> to vector<72x1xf32>
    %104 = arith.addf %101, %103 : vector<72x1xf32>
    %c2_60 = arith.constant 2 : index
    %c0_61 = arith.constant 0 : index
    %c0_62 = arith.constant 0 : index
    %105 = vector.load %arg10[%c2_60, %c0_61, %c0_62] : memref<4x72x1xf32, #tpu.memory_space<vmem>>, vector<1x72x1xf32>
    %106 = vector.shape_cast %105 : vector<1x72x1xf32> to vector<72x1xf32>
    %107 = vector.shape_cast %104 : vector<72x1xf32> to vector<1x72x1xf32>
    tpu.vector_store %arg10[%c2_60, %c0_61, %c0_62], %107 {strides = array<i32>} : memref<4x72x1xf32, #tpu.memory_space<vmem>>, vector<1x72x1xf32>,
    %c0_63 = arith.constant 0 : index
    %c32 = arith.constant 32 : index
    %108 = vector.load %arg11[%c0_63, %c32] : memref<72x64xf32, #tpu.memory_space<vmem>>, vector<72x16xf32>
    %109 = vector.broadcast %95 : vector<72x1xf32> to vector<72x16xf32>
    %110 = arith.mulf %109, %108 : vector<72x16xf32>
    %111 = arith.truncf %98 : vector<72x72xf32> to vector<72x72xbf16>
    %cst_64 = arith.constant dense<0.000000e+00> : vector<72x16xf32>
    %112 = tpu.matmul %111, %83, %cst_64 {dimension_numbers = #tpu.dot_dimension_numbers<[1], [0], [0], [1], [0, 0, 1, 1], [], []>} : vector<72x72xbf16>, vector<72x16xbf16>, vector<72x16xf32> -> vector<72x16xf32>
    %113 = arith.addf %110, %112 : vector<72x16xf32>
    %c0_65 = arith.constant 0 : index
    %c32_66 = arith.constant 32 : index
    %114 = vector.load %arg11[%c0_65, %c32_66] : memref<72x64xf32, #tpu.memory_space<vmem>>, vector<72x16xf32>
    tpu.vector_store %arg11[%c0_65, %c32_66], %113 {strides = array<i32>} : memref<72x64xf32, #tpu.memory_space<vmem>>, vector<72x16xf32>,
    %c2_67 = arith.constant 2 : index
    %c0_68 = arith.constant 0 : index
    %c0_69 = arith.constant 0 : index
    %115 = vector.load %arg9[%c2_67, %c0_68, %c0_69] : memref<4x72x1xf32, #tpu.memory_space<vmem>>, vector<1x72x1xf32>
    %116 = vector.shape_cast %115 : vector<1x72x1xf32> to vector<72x1xf32>
    %117 = vector.shape_cast %93 : vector<72x1xf32> to vector<1x72x1xf32>
    tpu.vector_store %arg9[%c2_67, %c0_68, %c0_69], %117 {strides = array<i32>} : memref<4x72x1xf32, #tpu.memory_space<vmem>>, vector<1x72x1xf32>,
    %118 = vector.extract_strided_slice %4 {offsets = [0, 48], sizes = [72, 16], strides = [1, 1]} : vector<72x64xbf16> to vector<72x16xbf16>
    %119 = vector.extract_strided_slice %6 {offsets = [0, 48], sizes = [72, 16], strides = [1, 1]} : vector<72x128xbf16> to vector<72x16xbf16>
    %120 = vector.extract_strided_slice %6 {offsets = [0, 112], sizes = [72, 16], strides = [1, 1]} : vector<72x128xbf16> to vector<72x16xbf16>
    %cst_70 = arith.constant dense<0.000000e+00> : vector<72x72xf32>
    %121 = tpu.matmul %118, %119, %cst_70 {dimension_numbers = #tpu.dot_dimension_numbers<[1], [1], [0], [0], [0, 0, 1, 0], [], []>} : vector<72x16xbf16>, vector<72x16xbf16>, vector<72x72xf32> -> vector<72x72xf32>
    %c3 = arith.constant 3 : index
    %c0_71 = arith.constant 0 : index
    %c0_72 = arith.constant 0 : index
    %122 = vector.load %arg2[%c3, %c0_71, %c0_72] : memref<4x72x72xbf16, #tpu.memory_space<vmem>>, vector<1x72x72xbf16>
    %123 = vector.shape_cast %122 : vector<1x72x72xbf16> to vector<72x72xbf16>
    %124 = arith.extf %123 : vector<72x72xbf16> to vector<72x72xf32>
    %125 = arith.addf %121, %124 : vector<72x72xf32>
    %c3_73 = arith.constant 3 : index
    %c0_74 = arith.constant 0 : index
    %c0_75 = arith.constant 0 : index
    %126 = vector.load %arg9[%c3_73, %c0_74, %c0_75] : memref<4x72x1xf32, #tpu.memory_space<vmem>>, vector<1x72x1xf32>
    %127 = vector.shape_cast %126 : vector<1x72x1xf32> to vector<72x1xf32>
    %cst_76 = arith.constant dense<0xFF800000> : vector<72xf32>
    %128 = vector.multi_reduction <maximumf>, %125, %cst_76 [1] : vector<72x72xf32> to vector<72xf32>
    %129 = vector.shape_cast %128 : vector<72xf32> to vector<72x1xf32>
    %130 = arith.maximumf %127, %129 : vector<72x1xf32>
    %131 = arith.subf %127, %130 : vector<72x1xf32>
    %132 = math.exp %131 : vector<72x1xf32>
    %133 = vector.broadcast %130 : vector<72x1xf32> to vector<72x72xf32>
    %134 = arith.subf %125, %133 : vector<72x72xf32>
    %135 = math.exp %134 : vector<72x72xf32>
    %c3_77 = arith.constant 3 : index
    %c0_78 = arith.constant 0 : index
    %c0_79 = arith.constant 0 : index
    %136 = vector.load %arg10[%c3_77, %c0_78, %c0_79] : memref<4x72x1xf32, #tpu.memory_space<vmem>>, vector<1x72x1xf32>
    %137 = vector.shape_cast %136 : vector<1x72x1xf32> to vector<72x1xf32>
    %138 = arith.mulf %132, %137 : vector<72x1xf32>
    %cst_80 = arith.constant dense<0.000000e+00> : vector<72xf32>
    %139 = vector.multi_reduction <add>, %135, %cst_80 [1] : vector<72x72xf32> to vector<72xf32>
    %140 = vector.shape_cast %139 : vector<72xf32> to vector<72x1xf32>
    %141 = arith.addf %138, %140 : vector<72x1xf32>
    %c3_81 = arith.constant 3 : index
    %c0_82 = arith.constant 0 : index
    %c0_83 = arith.constant 0 : index
    %142 = vector.load %arg10[%c3_81, %c0_82, %c0_83] : memref<4x72x1xf32, #tpu.memory_space<vmem>>, vector<1x72x1xf32>
    %143 = vector.shape_cast %142 : vector<1x72x1xf32> to vector<72x1xf32>
    %144 = vector.shape_cast %141 : vector<72x1xf32> to vector<1x72x1xf32>
    tpu.vector_store %arg10[%c3_81, %c0_82, %c0_83], %144 {strides = array<i32>} : memref<4x72x1xf32, #tpu.memory_space<vmem>>, vector<1x72x1xf32>,
    %c0_84 = arith.constant 0 : index
    %c48 = arith.constant 48 : index
    %145 = vector.load %arg11[%c0_84, %c48] : memref<72x64xf32, #tpu.memory_space<vmem>>, vector<72x16xf32>
    %146 = vector.broadcast %132 : vector<72x1xf32> to vector<72x16xf32>
    %147 = arith.mulf %146, %145 : vector<72x16xf32>
    %148 = arith.truncf %135 : vector<72x72xf32> to vector<72x72xbf16>
    %cst_85 = arith.constant dense<0.000000e+00> : vector<72x16xf32>
    %149 = tpu.matmul %148, %120, %cst_85 {dimension_numbers = #tpu.dot_dimension_numbers<[1], [0], [0], [1], [0, 0, 1, 1], [], []>} : vector<72x72xbf16>, vector<72x16xbf16>, vector<72x16xf32> -> vector<72x16xf32>
    %150 = arith.addf %147, %149 : vector<72x16xf32>
    %c0_86 = arith.constant 0 : index
    %c48_87 = arith.constant 48 : index
    %151 = vector.load %arg11[%c0_86, %c48_87] : memref<72x64xf32, #tpu.memory_space<vmem>>, vector<72x16xf32>
    tpu.vector_store %arg11[%c0_86, %c48_87], %150 {strides = array<i32>} : memref<72x64xf32, #tpu.memory_space<vmem>>, vector<72x16xf32>,
    %c3_88 = arith.constant 3 : index
    %c0_89 = arith.constant 0 : index
    %c0_90 = arith.constant 0 : index
    %152 = vector.load %arg9[%c3_88, %c0_89, %c0_90] : memref<4x72x1xf32, #tpu.memory_space<vmem>>, vector<1x72x1xf32>
    %153 = vector.shape_cast %152 : vector<1x72x1xf32> to vector<72x1xf32>
    %154 = vector.shape_cast %130 : vector<72x1xf32> to vector<1x72x1xf32>
    tpu.vector_store %arg9[%c3_88, %c0_89, %c0_90], %154 {strides = array<i32>} : memref<4x72x1xf32, #tpu.memory_space<vmem>>, vector<1x72x1xf32>,
    %c0_i32_91 = arith.constant 0 : i32
    %155 = arith.cmpi eq, %arg1, %c0_i32_91 : i32
    %156 = arith.extui %155 : i1 to i32
    %c0_i32_92 = arith.constant 0 : i32
    %157 = arith.cmpi ne, %156, %c0_i32_92 : i32
    scf.if %157 {
      %c0_93 = arith.constant 0 : index
      %c0_94 = arith.constant 0 : index
      %c0_95 = arith.constant 0 : index
      %158 = vector.load %arg10[%c0_93, %c0_94, %c0_95] : memref<4x72x1xf32, #tpu.memory_space<vmem>>, vector<1x72x1xf32>
      %159 = vector.shape_cast %158 : vector<1x72x1xf32> to vector<72x1xf32>
      %160 = tpu.reciprocal %159 {approx = true} : vector<72x1xf32> -> vector<72x1xf32>
      %c0_96 = arith.constant 0 : index
      %c0_97 = arith.constant 0 : index
      %161 = vector.load %arg11[%c0_96, %c0_97] : memref<72x64xf32, #tpu.memory_space<vmem>>, vector<72x16xf32>
      %162 = vector.broadcast %160 : vector<72x1xf32> to vector<72x16xf32>
      %163 = arith.mulf %161, %162 : vector<72x16xf32>
      %c0_98 = arith.constant 0 : index
      %c0_99 = arith.constant 0 : index
      %164 = vector.load %arg11[%c0_98, %c0_99] : memref<72x64xf32, #tpu.memory_space<vmem>>, vector<72x16xf32>
      tpu.vector_store %arg11[%c0_98, %c0_99], %163 {strides = array<i32>} : memref<72x64xf32, #tpu.memory_space<vmem>>, vector<72x16xf32>,
      %c1_100 = arith.constant 1 : index
      %c0_101 = arith.constant 0 : index
      %c0_102 = arith.constant 0 : index
      %165 = vector.load %arg10[%c1_100, %c0_101, %c0_102] : memref<4x72x1xf32, #tpu.memory_space<vmem>>, vector<1x72x1xf32>
      %166 = vector.shape_cast %165 : vector<1x72x1xf32> to vector<72x1xf32>
      %167 = tpu.reciprocal %166 {approx = true} : vector<72x1xf32> -> vector<72x1xf32>
      %c0_103 = arith.constant 0 : index
      %c16_104 = arith.constant 16 : index
      %168 = vector.load %arg11[%c0_103, %c16_104] : memref<72x64xf32, #tpu.memory_space<vmem>>, vector<72x16xf32>
      %169 = vector.broadcast %167 : vector<72x1xf32> to vector<72x16xf32>
      %170 = arith.mulf %168, %169 : vector<72x16xf32>
      %c0_105 = arith.constant 0 : index
      %c16_106 = arith.constant 16 : index
      %171 = vector.load %arg11[%c0_105, %c16_106] : memref<72x64xf32, #tpu.memory_space<vmem>>, vector<72x16xf32>
      tpu.vector_store %arg11[%c0_105, %c16_106], %170 {strides = array<i32>} : memref<72x64xf32, #tpu.memory_space<vmem>>, vector<72x16xf32>,
      %c2_107 = arith.constant 2 : index
      %c0_108 = arith.constant 0 : index
      %c0_109 = arith.constant 0 : index
      %172 = vector.load %arg10[%c2_107, %c0_108, %c0_109] : memref<4x72x1xf32, #tpu.memory_space<vmem>>, vector<1x72x1xf32>
      %173 = vector.shape_cast %172 : vector<1x72x1xf32> to vector<72x1xf32>
      %174 = tpu.reciprocal %173 {approx = true} : vector<72x1xf32> -> vector<72x1xf32>
      %c0_110 = arith.constant 0 : index
      %c32_111 = arith.constant 32 : index
      %175 = vector.load %arg11[%c0_110, %c32_111] : memref<72x64xf32, #tpu.memory_space<vmem>>, vector<72x16xf32>
      %176 = vector.broadcast %174 : vector<72x1xf32> to vector<72x16xf32>
      %177 = arith.mulf %175, %176 : vector<72x16xf32>
      %c0_112 = arith.constant 0 : index
      %c32_113 = arith.constant 32 : index
      %178 = vector.load %arg11[%c0_112, %c32_113] : memref<72x64xf32, #tpu.memory_space<vmem>>, vector<72x16xf32>
      tpu.vector_store %arg11[%c0_112, %c32_113], %177 {strides = array<i32>} : memref<72x64xf32, #tpu.memory_space<vmem>>, vector<72x16xf32>,
      %c3_114 = arith.constant 3 : index
      %c0_115 = arith.constant 0 : index
      %c0_116 = arith.constant 0 : index
      %179 = vector.load %arg10[%c3_114, %c0_115, %c0_116] : memref<4x72x1xf32, #tpu.memory_space<vmem>>, vector<1x72x1xf32>
      %180 = vector.shape_cast %179 : vector<1x72x1xf32> to vector<72x1xf32>
      %181 = tpu.reciprocal %180 {approx = true} : vector<72x1xf32> -> vector<72x1xf32>
      %c0_117 = arith.constant 0 : index
      %c48_118 = arith.constant 48 : index
      %182 = vector.load %arg11[%c0_117, %c48_118] : memref<72x64xf32, #tpu.memory_space<vmem>>, vector<72x16xf32>
      %183 = vector.broadcast %181 : vector<72x1xf32> to vector<72x16xf32>
      %184 = arith.mulf %182, %183 : vector<72x16xf32>
      %c0_119 = arith.constant 0 : index
      %c48_120 = arith.constant 48 : index
      %185 = vector.load %arg11[%c0_119, %c48_120] : memref<72x64xf32, #tpu.memory_space<vmem>>, vector<72x16xf32>
      tpu.vector_store %arg11[%c0_119, %c48_120], %184 {strides = array<i32>} : memref<72x64xf32, #tpu.memory_space<vmem>>, vector<72x16xf32>,
      %c0_121 = arith.constant 0 : index
      %c0_122 = arith.constant 0 : index
      %186 = vector.load %arg11[%c0_121, %c0_122] : memref<72x64xf32, #tpu.memory_space<vmem>>, vector<72x64xf32>
      %187 = arith.truncf %186 : vector<72x64xf32> to vector<72x64xbf16>
      %c0_123 = arith.constant 0 : index
      %c0_124 = arith.constant 0 : index
      %188 = vector.load %arg6[%c0_123, %c0_124] : memref<64x64xbf16, #tpu.memory_space<vmem>>, vector<64x64xbf16>
      %cst_125 = arith.constant dense<0.000000e+00> : vector<72x64xf32>
      %189 = tpu.matmul %187, %188, %cst_125 {dimension_numbers = #tpu.dot_dimension_numbers<[1], [0], [0], [1], [0, 0, 1, 1], [], []>} : vector<72x64xbf16>, vector<64x64xbf16>, vector<72x64xf32> -> vector<72x64xf32>
      %c0_126 = arith.constant 0 : index
      %c0_127 = arith.constant 0 : index
      %190 = vector.load %arg7[%c0_126, %c0_127] : memref<1x64xf32, #tpu.memory_space<vmem>>, vector<1x64xf32>
      %191 = vector.broadcast %190 : vector<1x64xf32> to vector<72x64xf32>
      %192 = arith.addf %189, %191 : vector<72x64xf32>
      %c0_128 = arith.constant 0 : index
      %c0_129 = arith.constant 0 : index
      %c0_130 = arith.constant 0 : index
      %193 = vector.load %arg5[%c0_128, %c0_129, %c0_130] : memref<1x72x64xbf16, #tpu.memory_space<vmem>>, vector<1x72x64xbf16>
      %194 = vector.shape_cast %193 : vector<1x72x64xbf16> to vector<72x64xbf16>
      %195 = arith.extf %194 : vector<72x64xbf16> to vector<72x64xf32>
      %196 = arith.addf %195, %192 : vector<72x64xf32>
      %197 = arith.truncf %196 : vector<72x64xf32> to vector<72x64xbf16>
      %c0_131 = arith.constant 0 : index
      %c0_132 = arith.constant 0 : index
      %c0_133 = arith.constant 0 : index
      %198 = vector.load %arg8[%c0_131, %c0_132, %c0_133] : memref<1x72x64xbf16, #tpu.memory_space<vmem>>, vector<1x72x64xbf16>
      %199 = vector.shape_cast %198 : vector<1x72x64xbf16> to vector<72x64xbf16>
      %200 = vector.shape_cast %197 : vector<72x64xbf16> to vector<1x72x64xbf16>
      tpu.vector_store %arg8[%c0_131, %c0_132, %c0_133], %200 {strides = array<i32>} : memref<1x72x64xbf16, #tpu.memory_space<vmem>>, vector<1x72x64xbf16>,
    } else {
    }
    return
  }
  func.func @transform_0(%arg0: i32, %arg1: i32) -> (i32, i32, i32) {
    %c0_i32 = arith.constant 0 : i32
    %c0_i32_0 = arith.constant 0 : i32
    %c0_i32_1 = arith.constant 0 : i32
    return %c0_i32, %c0_i32_0, %arg1 : i32, i32, i32
  }
  func.func @transform_1(%arg0: i32, %arg1: i32) -> (i32, i32, i32) {
    %c0_i32 = arith.constant 0 : i32
    %c0_i32_0 = arith.constant 0 : i32
    %c0_i32_1 = arith.constant 0 : i32
    return %arg0, %c0_i32, %c0_i32_0 : i32, i32, i32
  }
  func.func @transform_2(%arg0: i32, %arg1: i32) -> (i32, i32, i32) {
    %c0_i32 = arith.constant 0 : i32
    %c0_i32_0 = arith.constant 0 : i32
    return %arg0, %arg1, %c0_i32 : i32, i32, i32
  }
  func.func @transform_3(%arg0: i32, %arg1: i32) -> (i32, i32, i32) {
    %c0_i32 = arith.constant 0 : i32
    %c0_i32_0 = arith.constant 0 : i32
    %c0_i32_1 = arith.constant 0 : i32
    return %arg0, %c0_i32, %c0_i32_0 : i32, i32, i32
  }
  func.func @transform_4(%arg0: i32, %arg1: i32) -> (i32, i32) {
    %c0_i32 = arith.constant 0 : i32
    %c0_i32_0 = arith.constant 0 : i32
    %c0_i32_1 = arith.constant 0 : i32
    return %c0_i32, %c0_i32_0 : i32, i32
  }
  func.func @transform_5(%arg0: i32, %arg1: i32) -> (i32, i32) {
    %c0_i32 = arith.constant 0 : i32
    %c0_i32_0 = arith.constant 0 : i32
    %c0_i32_1 = arith.constant 0 : i32
    return %c0_i32, %c0_i32_0 : i32, i32
  }
  func.func @transform_6(%arg0: i32, %arg1: i32) -> (i32, i32, i32) {
    %c0_i32 = arith.constant 0 : i32
    %c0_i32_0 = arith.constant 0 : i32
    %c0_i32_1 = arith.constant 0 : i32
    return %arg0, %c0_i32, %c0_i32_0 : i32, i32, i32
  }
}

module attributes {stable_mosaic.version = 11 : i64} {
  func.func @_ln_matmul_kernel(%arg0: i32, %arg1: memref<144x64xbf16, #tpu.memory_space<vmem>>, %arg2: memref<1x64xf32, #tpu.memory_space<vmem>>, %arg3: memref<1x64xf32, #tpu.memory_space<vmem>>, %arg4: memref<64x256xbf16, #tpu.memory_space<vmem>>, %arg5: memref<1x256xf32, #tpu.memory_space<vmem>>, %arg6: memref<144x256xbf16, #tpu.memory_space<vmem>>) attributes {dimension_semantics = [#tpu.dimension_semantics<parallel>], iteration_bounds = array<i64: 1>, scalar_prefetch = 0 : i64, scratch_operands = 0 : i64, tpu.core_type = #tpu.core_type<tc>, window_params = [{transform_indices = @transform_0, window_bounds = array<i64: 144, 64>}, {pipeline_mode = #tpu.pipeline_mode<synchronous>, transform_indices = @transform_1, window_bounds = array<i64: 1, 64>}, {pipeline_mode = #tpu.pipeline_mode<synchronous>, transform_indices = @transform_2, window_bounds = array<i64: 1, 64>}, {pipeline_mode = #tpu.pipeline_mode<synchronous>, transform_indices = @transform_3, window_bounds = array<i64: 64, 256>}, {pipeline_mode = #tpu.pipeline_mode<synchronous>, transform_indices = @transform_4, window_bounds = array<i64: 1, 256>}, {transform_indices = @transform_5, window_bounds = array<i64: 144, 256>}]} {
    %c0 = arith.constant 0 : index
    %c0_0 = arith.constant 0 : index
    %0 = vector.load %arg1[%c0, %c0_0] : memref<144x64xbf16, #tpu.memory_space<vmem>>, vector<144x64xbf16>
    %1 = arith.extf %0 : vector<144x64xbf16> to vector<144x64xf32>
    %cst = arith.constant dense<0.000000e+00> : vector<144xf32>
    %2 = vector.multi_reduction <add>, %1, %cst [1] : vector<144x64xf32> to vector<144xf32>
    %3 = vector.shape_cast %2 : vector<144xf32> to vector<144x1xf32>
    %cst_1 = arith.constant 6.400000e+01 : f32
    %4 = vector.broadcast %cst_1 : f32 to vector<144x1xf32>
    %5 = arith.divf %3, %4 : vector<144x1xf32>
    %6 = vector.broadcast %5 : vector<144x1xf32> to vector<144x64xf32>
    %7 = arith.subf %1, %6 : vector<144x64xf32>
    %8 = arith.mulf %7, %7 : vector<144x64xf32>
    %cst_2 = arith.constant dense<0.000000e+00> : vector<144xf32>
    %9 = vector.multi_reduction <add>, %8, %cst_2 [1] : vector<144x64xf32> to vector<144xf32>
    %10 = vector.shape_cast %9 : vector<144xf32> to vector<144x1xf32>
    %cst_3 = arith.constant 6.400000e+01 : f32
    %11 = vector.broadcast %cst_3 : f32 to vector<144x1xf32>
    %12 = arith.divf %10, %11 : vector<144x1xf32>
    %13 = vector.broadcast %5 : vector<144x1xf32> to vector<144x64xf32>
    %14 = arith.subf %1, %13 : vector<144x64xf32>
    %cst_4 = arith.constant 9.99999974E-6 : f32
    %15 = vector.broadcast %cst_4 : f32 to vector<144x1xf32>
    %16 = arith.addf %12, %15 : vector<144x1xf32>
    %17 = math.rsqrt %16 : vector<144x1xf32>
    %18 = vector.broadcast %17 : vector<144x1xf32> to vector<144x64xf32>
    %19 = arith.mulf %14, %18 : vector<144x64xf32>
    %c0_5 = arith.constant 0 : index
    %c0_6 = arith.constant 0 : index
    %20 = vector.load %arg2[%c0_5, %c0_6] : memref<1x64xf32, #tpu.memory_space<vmem>>, vector<1x64xf32>
    %21 = vector.broadcast %20 : vector<1x64xf32> to vector<144x64xf32>
    %22 = arith.mulf %19, %21 : vector<144x64xf32>
    %c0_7 = arith.constant 0 : index
    %c0_8 = arith.constant 0 : index
    %23 = vector.load %arg3[%c0_7, %c0_8] : memref<1x64xf32, #tpu.memory_space<vmem>>, vector<1x64xf32>
    %24 = vector.broadcast %23 : vector<1x64xf32> to vector<144x64xf32>
    %25 = arith.addf %22, %24 : vector<144x64xf32>
    %26 = arith.truncf %25 : vector<144x64xf32> to vector<144x64xbf16>
    %c0_9 = arith.constant 0 : index
    %c0_10 = arith.constant 0 : index
    %27 = vector.load %arg4[%c0_9, %c0_10] : memref<64x256xbf16, #tpu.memory_space<vmem>>, vector<64x256xbf16>
    %cst_11 = arith.constant dense<0.000000e+00> : vector<144x256xf32>
    %28 = tpu.matmul %26, %27, %cst_11 {dimension_numbers = #tpu.dot_dimension_numbers<[1], [0], [0], [1], [0, 0, 1, 1], [], []>} : vector<144x64xbf16>, vector<64x256xbf16>, vector<144x256xf32> -> vector<144x256xf32>
    %c0_12 = arith.constant 0 : index
    %c0_13 = arith.constant 0 : index
    %29 = vector.load %arg5[%c0_12, %c0_13] : memref<1x256xf32, #tpu.memory_space<vmem>>, vector<1x256xf32>
    %30 = vector.broadcast %29 : vector<1x256xf32> to vector<144x256xf32>
    %31 = arith.addf %28, %30 : vector<144x256xf32>
    %cst_14 = arith.constant 5.000000e-01 : f32
    %32 = vector.broadcast %cst_14 : f32 to vector<144x256xf32>
    %33 = arith.mulf %32, %31 : vector<144x256xf32>
    %cst_15 = arith.constant 0.707106769 : f32
    %34 = vector.broadcast %cst_15 : f32 to vector<144x256xf32>
    %35 = arith.mulf %31, %34 : vector<144x256xf32>
    %36 = math.erf %35 : vector<144x256xf32>
    %cst_16 = arith.constant 1.000000e+00 : f32
    %37 = vector.broadcast %cst_16 : f32 to vector<144x256xf32>
    %38 = arith.addf %37, %36 : vector<144x256xf32>
    %39 = arith.mulf %33, %38 : vector<144x256xf32>
    %40 = arith.truncf %39 : vector<144x256xf32> to vector<144x256xbf16>
    %c0_17 = arith.constant 0 : index
    %c0_18 = arith.constant 0 : index
    %41 = vector.load %arg6[%c0_17, %c0_18] : memref<144x256xbf16, #tpu.memory_space<vmem>>, vector<144x256xbf16>
    tpu.vector_store %arg6[%c0_17, %c0_18], %40 {strides = array<i32>} : memref<144x256xbf16, #tpu.memory_space<vmem>>, vector<144x256xbf16>,
    return
  }
  func.func @transform_0(%arg0: i32) -> (i32, i32) {
    %c0_i32 = arith.constant 0 : i32
    %c0_i32_0 = arith.constant 0 : i32
    return %arg0, %c0_i32 : i32, i32
  }
  func.func @transform_1(%arg0: i32) -> (i32, i32) {
    %c0_i32 = arith.constant 0 : i32
    %c0_i32_0 = arith.constant 0 : i32
    %c0_i32_1 = arith.constant 0 : i32
    return %c0_i32, %c0_i32_0 : i32, i32
  }
  func.func @transform_2(%arg0: i32) -> (i32, i32) {
    %c0_i32 = arith.constant 0 : i32
    %c0_i32_0 = arith.constant 0 : i32
    %c0_i32_1 = arith.constant 0 : i32
    return %c0_i32, %c0_i32_0 : i32, i32
  }
  func.func @transform_3(%arg0: i32) -> (i32, i32) {
    %c0_i32 = arith.constant 0 : i32
    %c0_i32_0 = arith.constant 0 : i32
    %c0_i32_1 = arith.constant 0 : i32
    return %c0_i32, %c0_i32_0 : i32, i32
  }
  func.func @transform_4(%arg0: i32) -> (i32, i32) {
    %c0_i32 = arith.constant 0 : i32
    %c0_i32_0 = arith.constant 0 : i32
    %c0_i32_1 = arith.constant 0 : i32
    return %c0_i32, %c0_i32_0 : i32, i32
  }
  func.func @transform_5(%arg0: i32) -> (i32, i32) {
    %c0_i32 = arith.constant 0 : i32
    %c0_i32_0 = arith.constant 0 : i32
    return %arg0, %c0_i32 : i32, i32
  }
}

module attributes {stable_mosaic.version = 11 : i64} {
  func.func @_matmul_bias_residual_kernel(%arg0: i32, %arg1: memref<144x256xbf16, #tpu.memory_space<vmem>>, %arg2: memref<256x64xbf16, #tpu.memory_space<vmem>>, %arg3: memref<1x64xf32, #tpu.memory_space<vmem>>, %arg4: memref<144x64xbf16, #tpu.memory_space<vmem>>, %arg5: memref<144x64xf32, #tpu.memory_space<vmem>>) attributes {dimension_semantics = [#tpu.dimension_semantics<parallel>], iteration_bounds = array<i64: 1>, scalar_prefetch = 0 : i64, scratch_operands = 0 : i64, tpu.core_type = #tpu.core_type<tc>, window_params = [{transform_indices = @transform_0, window_bounds = array<i64: 144, 256>}, {pipeline_mode = #tpu.pipeline_mode<synchronous>, transform_indices = @transform_1, window_bounds = array<i64: 256, 64>}, {pipeline_mode = #tpu.pipeline_mode<synchronous>, transform_indices = @transform_2, window_bounds = array<i64: 1, 64>}, {transform_indices = @transform_3, window_bounds = array<i64: 144, 64>}, {transform_indices = @transform_4, window_bounds = array<i64: 144, 64>}]} {
    %c0 = arith.constant 0 : index
    %c0_0 = arith.constant 0 : index
    %0 = vector.load %arg1[%c0, %c0_0] : memref<144x256xbf16, #tpu.memory_space<vmem>>, vector<144x256xbf16>
    %c0_1 = arith.constant 0 : index
    %c0_2 = arith.constant 0 : index
    %1 = vector.load %arg2[%c0_1, %c0_2] : memref<256x64xbf16, #tpu.memory_space<vmem>>, vector<256x64xbf16>
    %cst = arith.constant dense<0.000000e+00> : vector<144x64xf32>
    %2 = tpu.matmul %0, %1, %cst {dimension_numbers = #tpu.dot_dimension_numbers<[1], [0], [0], [1], [0, 0, 1, 1], [], []>} : vector<144x256xbf16>, vector<256x64xbf16>, vector<144x64xf32> -> vector<144x64xf32>
    %c0_3 = arith.constant 0 : index
    %c0_4 = arith.constant 0 : index
    %3 = vector.load %arg4[%c0_3, %c0_4] : memref<144x64xbf16, #tpu.memory_space<vmem>>, vector<144x64xbf16>
    %4 = arith.extf %3 : vector<144x64xbf16> to vector<144x64xf32>
    %5 = arith.addf %4, %2 : vector<144x64xf32>
    %c0_5 = arith.constant 0 : index
    %c0_6 = arith.constant 0 : index
    %6 = vector.load %arg3[%c0_5, %c0_6] : memref<1x64xf32, #tpu.memory_space<vmem>>, vector<1x64xf32>
    %7 = vector.broadcast %6 : vector<1x64xf32> to vector<144x64xf32>
    %8 = arith.addf %5, %7 : vector<144x64xf32>
    %c0_7 = arith.constant 0 : index
    %c0_8 = arith.constant 0 : index
    %9 = vector.load %arg5[%c0_7, %c0_8] : memref<144x64xf32, #tpu.memory_space<vmem>>, vector<144x64xf32>
    tpu.vector_store %arg5[%c0_7, %c0_8], %8 {strides = array<i32>} : memref<144x64xf32, #tpu.memory_space<vmem>>, vector<144x64xf32>,
    return
  }
  func.func @transform_0(%arg0: i32) -> (i32, i32) {
    %c0_i32 = arith.constant 0 : i32
    %c0_i32_0 = arith.constant 0 : i32
    return %arg0, %c0_i32 : i32, i32
  }
  func.func @transform_1(%arg0: i32) -> (i32, i32) {
    %c0_i32 = arith.constant 0 : i32
    %c0_i32_0 = arith.constant 0 : i32
    %c0_i32_1 = arith.constant 0 : i32
    return %c0_i32, %c0_i32_0 : i32, i32
  }
  func.func @transform_2(%arg0: i32) -> (i32, i32) {
    %c0_i32 = arith.constant 0 : i32
    %c0_i32_0 = arith.constant 0 : i32
    %c0_i32_1 = arith.constant 0 : i32
    return %c0_i32, %c0_i32_0 : i32, i32
  }
  func.func @transform_3(%arg0: i32) -> (i32, i32) {
    %c0_i32 = arith.constant 0 : i32
    %c0_i32_0 = arith.constant 0 : i32
    return %arg0, %c0_i32 : i32, i32
  }
  func.func @transform_4(%arg0: i32) -> (i32, i32) {
    %c0_i32 = arith.constant 0 : i32
    %c0_i32_0 = arith.constant 0 : i32
    return %arg0, %c0_i32 : i32, i32
  }
}

</mosaic_0001>

<bundles_post_ra>
// kernel: relative_mhsa_block.5
= control target key start
LH: loop header
LB: loop body
LE: loop exit
PB: predicated region body
PF: predicated region fallthrough
CT: control target
= control target key end

     0   :  { %vm145_vm0 = vcmask 1043456   ;;  %vm120_vm1 = vcmask 588800   ;;  %vm246_vm2 = vcmask 523264   ;;  %vm566_vm3 = vcmask 519168   ;;  %s1097_s1 = inlined_call_operand.vmem [shape: bf16[72,64], index: 1, kind: input, shape index: {}]   ;;  %s1098_s0 = inlined_call_operand.vmem [shape: bf16[128,72], index: 0, kind: input, shape index: {}]   ;;  %s1099_s2 = inlined_call_operand.vmem [shape: f32[1,64], index: 2, kind: input, shape index: {}]   ;;  %s1100_s3 = inlined_call_operand.vmem [shape: f32[1,64], index: 3, kind: input, shape index: {}]   ;;  %s1101_s4 = inlined_call_operand.vmem [shape: f32[1,64], index: 4, kind: input, shape index: {}]   ;;  %s1102_s5 = inlined_call_operand.vmem [shape: bf16[128,64], index: 5, kind: output, shape index: {}]  }
   0x1   :  { %v694_v0 = vld [vmem:[%s1097_s1 + $0x20] ss:$0 sps:$4 sm:$0xff]   ;;  %v695_v1 = vld [vmem:[%s1097_s1 + $0x18] sm:$0xff]   ;;  %v696_v3 = vld [vmem:[%s1097_s1 + $0x10] sm:$0xff]  }
   0x2   :  { %692 = vmatprep.subr.msk.bf16.mxu0 %vm145_vm0, %v694_v0  ;;  %693 = vmatprep.subr.msk.bf16.mxu1 %vm145_vm0, %v694_v0  ;;  %v147_v2 = vsel %vm145_vm0, %v694_v0, 0  ;;  %v699_v4 = vld [vmem:[%s1098_s0] sm:$0xff]   ;;  %v697_v6 = vld [vmem:[%s1097_s1 + $0x8] sm:$0xff]   ;;  %v703_v10 = vld [vmem:[%s1098_s0 + $0x10] sm:$0xff]  }
   0x3   :  { %657 = vmatpush3.bf16.msra.mxu0 %v147_v2  ;;  %687 = vmatpush3.bf16.msra.mxu1 %v147_v2  ;;  %v700_v5 = vld [vmem:[%s1098_s0 + $0x20] sm:$0xff]   ;;  %v701_v8 = vld [vmem:[%s1098_s0 + $0x8] sm:$0xff]   ;;  %v705_v11 = vld [vmem:[%s1098_s0 + $0x30] sm:$0xff]  }
   0x4   :  { %658 = vmatprep.subr.bf16.mxu0 %v695_v1  ;;  %683 = vmatprep.subr.bf16.mxu1 %v695_v1  ;;  %v698_v7 = vld [vmem:[%s1097_s1] sm:$0xff]   ;;  %v702_v9 = vld [vmem:[%s1098_s0 + $0x28] sm:$0xff]   ;;  %v704_v12 = vld [vmem:[%s1098_s0 + $0x18] sm:$0xff]  }
   0x5   :  { %666 = vmatprep.mubr.msk.bf16.mxu0 %vm120_vm1, %v699_v4  ;;  %674 = vmatprep.mubr.msk.bf16.mxu1 %vm120_vm1, %v700_v5  ;;  %v706_v13 = vld [vmem:[%s1098_s0 + $0x38] sm:$0xff]   ;;  %v587_v14 = vld [vmem:[%s1099_s2] ss:$0 sm:$0xff] }
   0x7   :  { %659 = vmatpush3.bf16.msra.mxu0 %v695_v1  ;;  %688 = vmatpush3.bf16.msra.mxu1 %v695_v1 }
   0x8   :  { %660 = vmatprep.subr.bf16.mxu0 %v696_v3  ;;  %684 = vmatprep.subr.bf16.mxu1 %v696_v3 }
   0xb   :  { %661 = vmatpush3.bf16.msra.mxu0 %v696_v3  ;;  %689 = vmatpush3.bf16.msra.mxu1 %v696_v3 }
   0xc   :  { %662 = vmatprep.subr.bf16.mxu0 %v697_v6  ;;  %685 = vmatprep.subr.bf16.mxu1 %v697_v6 }
   0xf   :  { %663 = vmatpush3.bf16.msra.mxu0 %v697_v6  ;;  %690 = vmatpush3.bf16.msra.mxu1 %v697_v6 }
  0x10   :  { %664 = vmatprep.subr.bf16.mxu0 %v698_v7  ;;  %686 = vmatprep.subr.bf16.mxu1 %v698_v7 }
  0x13   :  { %665 = vmatpush3.bf16.msra.mxu0 %v698_v7  ;;  %691 = vmatpush3.bf16.msra.mxu1 %v698_v7 }
  0x16   :  { %667 = vmatmul.mubr.msk.bf16.vlgmr.msra.gmra.mxu0 %vm120_vm1, %v701_v8  ;;  %675 = vmatmul.mubr.msk.bf16.vlgmr.msra.gmra.mxu1 %vm120_vm1, %v702_v9 }
  0x17   :  { %670 = vmatprep.mubr.msk.bf16.mxu0 %vm120_vm1, %v703_v10  ;;  %678 = vmatprep.mubr.msk.bf16.mxu1 %vm120_vm1, %v705_v11 }
  0x1e   :  { %671 = vmatmul.mubr.msk.bf16.gmra.mxu0 %vm120_vm1, %v704_v12  ;;  %679 = vmatmul.mubr.msk.bf16.gmra.mxu1 %vm120_vm1, %v706_v13 }
  0xd6   :  { %v668_v15 = vpop.f32.mrf.mxu0  ;;  %v676_v16 = vpop.f32.mrf.mxu1 }
  0xd7   :  { %v819_v17 = vadd.f32 %v668_v15, %v587_v14  ;;  %v821_v18 = vadd.f32 %v676_v16, %v587_v14 }
  0xd8   :  { %v183_v19 = vpop.f32.mrf.mxu0  ;;  %v215_v20 = vpop.f32.mrf.mxu1 }
  0xd9   :  { %v823_v21 = vadd.f32 %v587_v14, %v183_v19  ;;  %v277_v22 = vsel %vm246_vm2, %v821_v18, 0.0  ;;  %v253_v23 = vsel %vm246_vm2, %v819_v17, 0.0  ;;  %v829_v29 = vadd.f32 %v587_v14, %v215_v20 }
  0xda   :  { %278 = vadd.xlane.f32.xlu0 %v277_v22  ;;  %v677_v24 = vpop.f32.mrf.mxu1  ;;  %254 = vadd.xlane.f32.xlu1 %v253_v23  ;;  %v669_v25 = vpop.f32.mrf.mxu0 }
  0xdb   :  { %v195_v26 = vadd.f32 %v669_v25, %v587_v14  ;;  %v831_v30 = vadd.f32 %v677_v24, %v587_v14  ;;  %v247_v32 = vsel %vm246_vm2, %v823_v21, 0.0  ;;  %v271_v39 = vsel %vm246_vm2, %v829_v29, 0.0 }
  0xdc   :  { %v186_v27 = vpop.f32.mrf.mxu0  ;;  %v218_v28 = vpop.f32.mrf.mxu1 }
  0xdd   :  { %v256_v31 = vsel %vm246_vm2, %v195_v26, 0.0  ;;  %v836_v36 = vadd.f32 %v587_v14, %v186_v27  ;;  %v838_v37 = vadd.f32 %v587_v14, %v218_v28  ;;  %v280_v38 = vsel %vm246_vm2, %v831_v30, 0.0 }
  0xde   :  { %257 = vadd.xlane.f32.xlu1 %v256_v31  ;;  %248 = vadd.xlane.f32.xlu0 %v247_v32  ;;  %v672_v33 = vpop.f32.mrf.mxu0  ;;  %v680_v34 = vpop.f32.mrf.mxu1 }
  0xdf   :  { %v844_v42 = vadd.f32 %v672_v33, %v587_v14  ;;  %v274_v44 = vsel %vm246_vm2, %v838_v37, 0.0  ;;  %v250_v45 = vsel %vm246_vm2, %v836_v36, 0.0  ;;  %v868_v57 = vadd.f32 %v680_v34, %v587_v14 }
  0xe0   :  { %v199_v35 = vpop.f32.mrf.mxu0  ;;  %v231_v41 = vpop.f32.mrf.mxu1 }
  0xe1   :  { %v265_v49 = vsel %vm246_vm2, %v844_v42, 0.0  ;;  %v856_v50 = vadd.f32 %v587_v14, %v199_v35  ;;  %v860_v53 = vadd.f32 %v587_v14, %v231_v41  ;;  %v289_v62 = vsel %vm246_vm2, %v868_v57, 0.0 }
  0xe2   :  { %281 = vadd.xlane.f32.xlu1 %v280_v38  ;;  %272 = vadd.xlane.f32.xlu0 %v271_v39  ;;  %v673_v40 = vpop.f32.mrf.mxu0  ;;  %v681_v47 = vpop.f32.mrf.mxu1 }
  0xe3   :  { %v846_v43 = vadd.f32 %v673_v40, %v587_v14  ;;  %v259_v56 = vsel %vm246_vm2, %v856_v50, 0.0  ;;  %v870_v58 = vadd.f32 %v681_v47, %v587_v14  ;;  %v283_v60 = vsel %vm246_vm2, %v860_v53, 0.0 }
  0xe4   :  { %v202_v46 = vpop.f32.mrf.mxu0  ;;  %v234_v52 = vpop.f32.mrf.mxu1 }
  0xe5   :  { %v268_v48 = vsel %vm246_vm2, %v846_v43, 0.0  ;;  %v858_v51 = vadd.f32 %v587_v14, %v202_v46  ;;  %v862_v54 = vadd.f32 %v587_v14, %v234_v52  ;;  %v292_v61 = vsel %vm246_vm2, %v870_v58, 0.0 }
  0xe6   :  { %275 = vadd.xlane.f32.xlu1 %v274_v44  ;;  %251 = vadd.xlane.f32.xlu0 %v250_v45 }
  0xe7   :  { %v262_v55 = vsel %vm246_vm2, %v858_v51, 0.0  ;;  %v286_v59 = vsel %vm246_vm2, %v862_v54, 0.0 }
  0xea   :  { %269 = vadd.xlane.f32.xlu1 %v268_v48  ;;  %266 = vadd.xlane.f32.xlu0 %v265_v49 }
  0xee   :  { %263 = vadd.xlane.f32.xlu1 %v262_v55  ;;  %260 = vadd.xlane.f32.xlu0 %v259_v56 }
  0xf2   :  { %287 = vadd.xlane.f32.xlu1 %v286_v59  ;;  %284 = vadd.xlane.f32.xlu0 %v283_v60 }
  0xf6   :  { %293 = vadd.xlane.f32.xlu1 %v292_v61  ;;  %290 = vadd.xlane.f32.xlu0 %v289_v62 }
 0x163   :  { %v279_v63 = vpop.xlane.xlu0 %278  ;;  %v255_v0 = vpop.xlane.xlu1 %254 }
 0x164   :  { %v306_v1 = vmul.f32 0.015625, %v279_v63  ;;  %v298_v2 = vmul.f32 0.015625, %v255_v0 }
 0x166   :  { %v881_v3 = vsub.f32 %v821_v18, %v306_v1  ;;  %v884_v4 = vsub.f32 %v819_v17, %v298_v2 }
 0x167   :  { %v258_v5 = vpop.xlane.xlu1 %257  ;;  %v249_v6 = vpop.xlane.xlu0 %248 }
 0x168   :  { %v299_v7 = vmul.f32 0.015625, %v258_v5  ;;  %v296_v8 = vmul.f32 0.015625, %v249_v6  ;;  %v330_v9 = vmul.f32 %v884_v4, %v884_v4  ;;  %v338_v13 = vmul.f32 %v881_v3, %v881_v3 }
 0x16a   :  { %v888_v10 = vsub.f32 %v195_v26, %v299_v7  ;;  %v891_v11 = vsub.f32 %v823_v21, %v296_v8  ;;  %v350_v12 = vsel %vm246_vm2, %v330_v9, 0.0  ;;  %v374_v23 = vsel %vm246_vm2, %v338_v13, 0.0 }
 0x16b   :  { %v282_v14 = vpop.xlane.xlu1 %281  ;;  %351 = vadd.xlane.f32.xlu0 %v350_v12  ;;  %v273_v15 = vpop.xlane.xlu0 %272 }
 0x16c   :  { %v307_v16 = vmul.f32 0.015625, %v282_v14  ;;  %v304_v17 = vmul.f32 0.015625, %v273_v15  ;;  %v331_v18 = vmul.f32 %v888_v10, %v888_v10  ;;  %v328_v19 = vmul.f32 %v891_v11, %v891_v11 }
 0x16e   :  { %v901_v20 = vsub.f32 %v831_v30, %v307_v16  ;;  %v904_v21 = vsub.f32 %v829_v29, %v304_v17  ;;  %v353_v22 = vsel %vm246_vm2, %v331_v18, 0.0  ;;  %v344_v31 = vsel %vm246_vm2, %v328_v19, 0.0 }
 0x16f   :  { %v276_v24 = vpop.xlane.xlu1 %275  ;;  %354 = vadd.xlane.f32.xlu1 %v353_v22  ;;  %375 = vadd.xlane.f32.xlu0 %v374_v23  ;;  %v252_v25 = vpop.xlane.xlu0 %251 }
 0x170   :  { %v305_v26 = vmul.f32 0.015625, %v276_v24  ;;  %v297_v27 = vmul.f32 0.015625, %v252_v25  ;;  %v339_v28 = vmul.f32 %v901_v20, %v901_v20  ;;  %v336_v33 = vmul.f32 %v904_v21, %v904_v21 }
 0x172   :  { %v912_v30 = vsub.f32 %v838_v37, %v305_v26  ;;  %v915_v29 = vsub.f32 %v836_v36, %v297_v27  ;;  %v377_v32 = vsel %vm246_vm2, %v339_v28, 0.0  ;;  %v368_v44 = vsel %vm246_vm2, %v336_v33, 0.0 }
 0x173   :  { %v270_v34 = vpop.xlane.xlu1 %269  ;;  %378 = vadd.xlane.f32.xlu1 %v377_v32  ;;  %345 = vadd.xlane.f32.xlu0 %v344_v31  ;;  %v267_v35 = vpop.xlane.xlu0 %266 }
 0x174   :  { %v303_v38 = vmul.f32 0.015625, %v270_v34  ;;  %v302_v39 = vmul.f32 0.015625, %v267_v35  ;;  %v329_v40 = vmul.f32 %v915_v29, %v915_v29  ;;  %v337_v37 = vmul.f32 %v912_v30, %v912_v30 }
 0x176   :  { %v925_v36 = vsub.f32 %v846_v43, %v303_v38  ;;  %v928_v41 = vsub.f32 %v844_v42, %v302_v39  ;;  %v347_v45 = vsel %vm246_vm2, %v329_v40, 0.0  ;;  %v371_v55 = vsel %vm246_vm2, %v337_v37, 0.0 }
 0x177   :  { %v264_v46 = vpop.xlane.xlu1 %263  ;;  %369 = vadd.xlane.f32.xlu0 %v368_v44  ;;  %348 = vadd.xlane.f32.xlu1 %v347_v45  ;;  %v261_v47 = vpop.xlane.xlu0 %260 }
 0x178   :  { %v301_v48 = vmul.f32 0.015625, %v264_v46  ;;  %v300_v49 = vmul.f32 0.015625, %v261_v47  ;;  %v334_v52 = vmul.f32 %v928_v41, %v928_v41  ;;  %v335_v59 = vmul.f32 %v925_v36, %v925_v36 }
 0x17a   :  { %v936_v43 = vsub.f32 %v858_v51, %v301_v48  ;;  %v939_v42 = vsub.f32 %v856_v50, %v300_v49  ;;  %v362_v56 = vsel %vm246_vm2, %v334_v52, 0.0  ;;  %v365_v2 = vsel %vm246_vm2, %v335_v59, 0.0  ;;  %v978_v59 = vld [vmem:[%s1100_s3] ss:$0 sm:$0xff] }
 0x17b   :  { %v288_v60 = vpop.xlane.xlu1 %287  ;;  %372 = vadd.xlane.f32.xlu1 %v371_v55  ;;  %363 = vadd.xlane.f32.xlu0 %v362_v56  ;;  %v285_v61 = vpop.xlane.xlu0 %284 }
 0x17c   :  { %v309_v62 = vmul.f32 0.015625, %v288_v60  ;;  %v308_v63 = vmul.f32 0.015625, %v285_v61  ;;  %v332_v0 = vmul.f32 %v939_v42, %v939_v42  ;;  %v333_v51 = vmul.f32 %v936_v43, %v936_v43 }
 0x17e   :  { %v949_v50 = vsub.f32 %v862_v54, %v309_v62  ;;  %v952_v1 = vsub.f32 %v860_v53, %v308_v63  ;;  %v356_v5 = vsel %vm246_vm2, %v332_v0, 0.0  ;;  %v359_v13 = vsel %vm246_vm2, %v333_v51, 0.0  ;;  %v984_v63 = vld [vmem:[%s1101_s4] ss:$0 sm:$0xff] }
 0x17f   :  { %v294_v6 = vpop.xlane.xlu1 %293  ;;  %366 = vadd.xlane.f32.xlu1 %v365_v2  ;;  %357 = vadd.xlane.f32.xlu0 %v356_v5  ;;  %v291_v7 = vpop.xlane.xlu0 %290 }
 0x180   :  { %v311_v8 = vmul.f32 0.015625, %v294_v6  ;;  %v310_v9 = vmul.f32 0.015625, %v291_v7  ;;  %v340_v12 = vmul.f32 %v952_v1, %v952_v1  ;;  %v341_v15 = vmul.f32 %v949_v50, %v949_v50 }
 0x182   :  { %v960_v54 = vsub.f32 %v870_v58, %v311_v8  ;;  %v963_v53 = vsub.f32 %v868_v57, %v310_v9  ;;  %v380_v14 = vsel %vm246_vm2, %v340_v12, 0.0  ;;  %v383_v17 = vsel %vm246_vm2, %v341_v15, 0.0 }
 0x183   :  { %360 = vadd.xlane.f32.xlu1 %v359_v13  ;;  %381 = vadd.xlane.f32.xlu0 %v380_v14 }
 0x184   :  { %v342_v16 = vmul.f32 %v963_v53, %v963_v53  ;;  %v343_v58 = vmul.f32 %v960_v54, %v960_v54 }
 0x186   :  { %v386_v18 = vsel %vm246_vm2, %v342_v16, 0.0  ;;  %v389_v57 = vsel %vm246_vm2, %v343_v58, 0.0 }
 0x187   :  { %384 = vadd.xlane.f32.xlu1 %v383_v17  ;;  %387 = vadd.xlane.f32.xlu0 %v386_v18 }
 0x18b   :  { %390 = vadd.xlane.f32.xlu1 %v389_v57 }
 0x1f4   :  { %v352_v19 = vpop.xlane.xlu0 %351 }
 0x1f5   :  { %v394_v22 = vmul.f32 0.015625, %v352_v19 }
 0x1f7   :  { %v410_v23 = vadd.f32 1e-05, %v394_v22 }
 0x1f8   :  { %v355_v24 = vpop.xlane.xlu1 %354  ;;  %v376_v25 = vpop.xlane.xlu0 %375 }
 0x1f9   :  { %707 = vrsqrt.f32 %v410_v23  ;;  %v395_v26 = vmul.f32 0.015625, %v355_v24  ;;  %v402_v27 = vmul.f32 0.015625, %v376_v25 }
 0x1fb   :  { %v411_v28 = vadd.f32 1e-05, %v395_v26  ;;  %v418_v31 = vadd.f32 1e-05, %v402_v27 }
 0x1fc   :  { %v379_v32 = vpop.xlane.xlu1 %378  ;;  %v346_v33 = vpop.xlane.xlu0 %345 }
 0x1fd   :  { %709 = vrsqrt.f32 %v411_v28  ;;  %v403_v34 = vmul.f32 0.015625, %v379_v32  ;;  %v392_v35 = vmul.f32 0.015625, %v346_v33 }
 0x1fe   :  { %711 = vrsqrt.f32 %v418_v31 }
 0x1ff   :  { %v419_v38 = vadd.f32 1e-05, %v403_v34  ;;  %v408_v39 = vadd.f32 1e-05, %v392_v35 }
 0x200   :  { %v349_v40 = vpop.xlane.xlu1 %348  ;;  %v370_v37 = vpop.xlane.xlu0 %369 }
 0x201   :  { %713 = vrsqrt.f32 %v419_v38  ;;  %v393_v44 = vmul.f32 0.015625, %v349_v40  ;;  %v400_v45 = vmul.f32 0.015625, %v370_v37 }
 0x202   :  { %715 = vrsqrt.f32 %v408_v39 }
 0x203   :  { %v409_v46 = vadd.f32 1e-05, %v393_v44  ;;  %v416_v47 = vadd.f32 1e-05, %v400_v45 }
 0x204   :  { %v373_v48 = vpop.xlane.xlu1 %372  ;;  %v364_v49 = vpop.xlane.xlu0 %363 }
 0x205   :  { %717 = vrsqrt.f32 %v409_v46  ;;  %v401_v52 = vmul.f32 0.015625, %v373_v48  ;;  %v398_v55 = vmul.f32 0.015625, %v364_v49 }
 0x206   :  { %v708_v56 = vpop.eup %707  ;;  %719 = vrsqrt.f32 %v416_v47 }
 0x207   :  { %v442_v60 = vmul.f32 %v708_v56, %v884_v4  ;;  %v417_v61 = vadd.f32 1e-05, %v401_v52  ;;  %v414_v62 = vadd.f32 1e-05, %v398_v55 }
 0x208   :  { %v367_v0 = vpop.xlane.xlu1 %366  ;;  %v358_v51 = vpop.xlane.xlu0 %357 }
 0x209   :  { %v465_v2 = vmul.f32 %v978_v59, %v442_v60  ;;  %721 = vrsqrt.f32 %v417_v61  ;;  %v399_v5 = vmul.f32 0.015625, %v367_v0  ;;  %v396_v6 = vmul.f32 0.015625, %v358_v51 }
 0x20a   :  { %v710_v7 = vpop.eup %709  ;;  %723 = vrsqrt.f32 %v414_v62 }
 0x20b   :  { %v712_v8 = vpop.eup %711  ;;  %v488_v9 = vadd.f32 %v984_v63, %v465_v2  ;;  %v443_v4 = vmul.f32 %v710_v7, %v888_v10  ;;  %v415_v12 = vadd.f32 1e-05, %v399_v5  ;;  %v412_v13 = vadd.f32 1e-05, %v396_v6 }
 0x20c   :  { %v450_v14 = vmul.f32 %v712_v8, %v881_v3  ;;  %v361_v15 = vpop.xlane.xlu1 %360  ;;  %v382_v16 = vpop.xlane.xlu0 %381 }
 0x20d   :  { %v629_v17 = vpack.c.bf16 %v488_v9, %v488_v9  ;;  %v466_v18 = vmul.f32 %v978_v59, %v443_v4  ;;  %725 = vrsqrt.f32 %v415_v12  ;;  %v397_v58 = vmul.f32 0.015625, %v361_v15 }
 0x20e   :  { %v714_v57 = vpop.eup %713  ;;  %v473_v19 = vmul.f32 %v978_v59, %v450_v14  ;;  %727 = vrsqrt.f32 %v412_v13  ;;  %v404_v22 = vmul.f32 0.015625, %v382_v16 }
 0x20f   :  { %v716_v23 = vpop.eup %715  ;;  %569 = vst.msk [vmem:[%s1102_s5 + $0x8] sm:$0xf] %vm566_vm3, %v629_v17  ;;  %v489_v3 = vadd.f32 %v984_v63, %v466_v18  ;;  %v451_v10 = vmul.f32 %v714_v57, %v901_v20  ;;  %v413_v24 = vadd.f32 1e-05, %v397_v58 }
 0x210   :  { %v496_v25 = vadd.f32 %v984_v63, %v473_v19  ;;  %v440_v26 = vmul.f32 %v716_v23, %v891_v11  ;;  %v420_v27 = vadd.f32 1e-05, %v404_v22  ;;  %v385_v28 = vpop.xlane.xlu1 %384  ;;  %v388_v31 = vpop.xlane.xlu0 %387 }
 0x211   :  { %v630_v32 = vpack.c.bf16 %v489_v3, %v489_v3  ;;  %v474_v33 = vmul.f32 %v978_v59, %v451_v10  ;;  %729 = vrsqrt.f32 %v413_v24  ;;  %v405_v34 = vmul.f32 0.015625, %v385_v28 }
 0x212   :  { %v718_v35 = vpop.eup %717  ;;  %v637_v38 = vpack.c.bf16 %v496_v25, %v496_v25  ;;  %v463_v39 = vmul.f32 %v978_v59, %v440_v26  ;;  %731 = vrsqrt.f32 %v420_v27  ;;  %v406_v40 = vmul.f32 0.015625, %v388_v31 }
 0x213   :  { %v720_v20 = vpop.eup %719  ;;  %570 = vst.msk [vmem:[%s1102_s5 + $0xc] sm:$0xf] %vm566_vm3, %v630_v32  ;;  %v497_v11 = vadd.f32 %v984_v63, %v474_v33  ;;  %v441_v37 = vmul.f32 %v718_v35, %v915_v29  ;;  %v421_v44 = vadd.f32 1e-05, %v405_v34 }
 0x214   :  { %577 = vst.msk [vmem:[%s1102_s5 + $0x28] sm:$0xf] %vm566_vm3, %v637_v38  ;;  %v486_v45 = vadd.f32 %v984_v63, %v463_v39  ;;  %v448_v46 = vmul.f32 %v720_v20, %v904_v21  ;;  %v422_v47 = vadd.f32 1e-05, %v406_v40  ;;  %v391_v48 = vpop.xlane.xlu1 %390 }
 0x215   :  { %v638_v49 = vpack.c.bf16 %v497_v11, %v497_v11  ;;  %v464_v52 = vmul.f32 %v978_v59, %v441_v37  ;;  %733 = vrsqrt.f32 %v421_v44  ;;  %v407_v55 = vmul.f32 0.015625, %v391_v48 }
 0x216   :  { %v722_v56 = vpop.eup %721  ;;  %v627_v60 = vpack.c.bf16 %v486_v45, %v486_v45  ;;  %v471_v29 = vmul.f32 %v978_v59, %v448_v46  ;;  %735 = vrsqrt.f32 %v422_v47 }
 0x217   :  { %v724_v61 = vpop.eup %723  ;;  %578 = vst.msk [vmem:[%s1102_s5 + $0x2c] sm:$0xf] %vm566_vm3, %v638_v49  ;;  %v487_v21 = vadd.f32 %v984_v63, %v464_v52  ;;  %v449_v62 = vmul.f32 %v722_v56, %v912_v30  ;;  %v423_v0 = vadd.f32 1e-05, %v407_v55 }
 0x218   :  { %567 = vst.msk [vmem:[%s1102_s5] sm:$0xf] %vm566_vm3, %v627_v60  ;;  %v494_v51 = vadd.f32 %v984_v63, %v471_v29  ;;  %v446_v2 = vmul.f32 %v724_v61, %v928_v41 }
 0x219   :  { %v628_v5 = vpack.c.bf16 %v487_v21, %v487_v21  ;;  %v472_v6 = vmul.f32 %v978_v59, %v449_v62  ;;  %737 = vrsqrt.f32 %v423_v0 }
 0x21a   :  { %v726_v7 = vpop.eup %725  ;;  %v635_v8 = vpack.c.bf16 %v494_v51, %v494_v51  ;;  %v469_v9 = vmul.f32 %v978_v59, %v446_v2 }
 0x21b   :  { %v728_v4 = vpop.eup %727  ;;  %568 = vst.msk [vmem:[%s1102_s5 + $0x4] sm:$0xf] %vm566_vm3, %v628_v5  ;;  %v495_v30 = vadd.f32 %v984_v63, %v472_v6  ;;  %v447_v12 = vmul.f32 %v726_v7, %v925_v36 }
 0x21c   :  { %575 = vst.msk [vmem:[%s1102_s5 + $0x20] sm:$0xf] %vm566_vm3, %v635_v8  ;;  %v492_v41 = vadd.f32 %v984_v63, %v469_v9  ;;  %v444_v13 = vmul.f32 %v728_v4, %v939_v42 }
 0x21d   :  { %v636_v14 = vpack.c.bf16 %v495_v30, %v495_v30  ;;  %v470_v15 = vmul.f32 %v978_v59, %v447_v12 }
 0x21e   :  { %v730_v16 = vpop.eup %729  ;;  %v633_v17 = vpack.c.bf16 %v492_v41, %v492_v41  ;;  %v467_v18 = vmul.f32 %v978_v59, %v444_v13 }
 0x21f   :  { %v732_v58 = vpop.eup %731  ;;  %576 = vst.msk [vmem:[%s1102_s5 + $0x24] sm:$0xf] %vm566_vm3, %v636_v14  ;;  %v493_v36 = vadd.f32 %v984_v63, %v470_v15  ;;  %v445_v57 = vmul.f32 %v730_v16, %v936_v43 }
 0x220   :  { %573 = vst.msk [vmem:[%s1102_s5 + $0x18] sm:$0xf] %vm566_vm3, %v633_v17  ;;  %v490_v42 = vadd.f32 %v984_v63, %v467_v18  ;;  %v452_v19 = vmul.f32 %v732_v58, %v952_v1 }
 0x221   :  { %v634_v22 = vpack.c.bf16 %v493_v36, %v493_v36  ;;  %v468_v23 = vmul.f32 %v978_v59, %v445_v57 }
 0x222   :  { %v734_v3 = vpop.eup %733  ;;  %v631_v10 = vpack.c.bf16 %v490_v42, %v490_v42  ;;  %v475_v24 = vmul.f32 %v978_v59, %v452_v19 }
 0x223   :  { %v736_v25 = vpop.eup %735  ;;  %574 = vst.msk [vmem:[%s1102_s5 + $0x1c] sm:$0xf] %vm566_vm3, %v634_v22  ;;  %v491_v43 = vadd.f32 %v984_v63, %v468_v23  ;;  %v453_v26 = vmul.f32 %v734_v3, %v949_v50 }
 0x224   :  { %571 = vst.msk [vmem:[%s1102_s5 + $0x10] sm:$0xf] %vm566_vm3, %v631_v10  ;;  %v498_v1 = vadd.f32 %v984_v63, %v475_v24  ;;  %v454_v27 = vmul.f32 %v736_v25, %v963_v53 }
 0x225   :  { %v632_v28 = vpack.c.bf16 %v491_v43, %v491_v43  ;;  %v476_v31 = vmul.f32 %v978_v59, %v453_v26 }
 0x226   :  { %v738_v32 = vpop.eup %737  ;;  %v639_v33 = vpack.c.bf16 %v498_v1, %v498_v1  ;;  %v477_v34 = vmul.f32 %v978_v59, %v454_v27 }
 0x227   :  { %572 = vst.msk [vmem:[%s1102_s5 + $0x14] sm:$0xf] %vm566_vm3, %v632_v28  ;;  %v499_v50 = vadd.f32 %v984_v63, %v476_v31  ;;  %v455_v35 = vmul.f32 %v738_v32, %v960_v54 }
 0x228   :  { %579 = vst.msk [vmem:[%s1102_s5 + $0x30] sm:$0xf] %vm566_vm3, %v639_v33  ;;  %v500_v53 = vadd.f32 %v984_v63, %v477_v34 }
 0x229   :  { %v640_v38 = vpack.c.bf16 %v499_v50, %v499_v50  ;;  %v478_v39 = vmul.f32 %v978_v59, %v455_v35 }
 0x22a   :  { %v641_v40 = vpack.c.bf16 %v500_v53, %v500_v53 }
 0x22b   :  { %580 = vst.msk [vmem:[%s1102_s5 + $0x34] sm:$0xf] %vm566_vm3, %v640_v38  ;;  %v501_v20 = vadd.f32 %v984_v63, %v478_v39 }
 0x22c   :  { %581 = vst.msk [vmem:[%s1102_s5 + $0x38] sm:$0xf] %vm566_vm3, %v641_v40 }
 0x22d   :  { %v642_v54 = vpack.c.bf16 %v501_v20, %v501_v20 }
 0x22f   :  { %582 = vst.msk [vmem:[%s1102_s5 + $0x3c] sm:$0xf] %vm566_vm3, %v642_v54 }

// kernel: relative_mhsa_block.6
= control target key start
LH: loop header
LB: loop body
LE: loop exit
PB: predicated region body
PF: predicated region fallthrough
CT: control target
= control target key end

     0   :  { %vm59_vm0 = vcmask 523264   ;;  %vm1202_vm1 = vmmov 0   ;;  %vm590_vm2 = vcmask 519168   ;;  %s1733_s0 = inlined_call_operand.vmem [shape: bf16[144,64], index: 0, kind: input, shape index: {}]   ;;  %s1734_s3 = inlined_call_operand.vmem [shape: bf16[64,64], index: 3, kind: input, shape index: {}]   ;;  %s1735_s4 = inlined_call_operand.vmem [shape: bf16[64,128], index: 4, kind: input, shape index: {}]   ;;  %s1736_s1 = inlined_call_operand.vmem [shape: f32[1,64], index: 1, kind: input, shape index: {}]   ;;  %s1737_s2 = inlined_call_operand.vmem [shape: f32[1,64], index: 2, kind: input, shape index: {}]   ;;  %s1738_s5 = inlined_call_operand.vmem [shape: bf16[144,64], index: 5, kind: output, shape index: {0}]   ;;  %s1739_s6 = inlined_call_operand.vmem [shape: bf16[144,128], index: 6, kind: output, shape index: {1}]  }
   0x1   :  { %v1241_v0 = vld [vmem:[%s1733_s0] sm:$0xff]   ;;  %v1246_v1 = vld [vmem:[%s1733_s0 + $0x8] sm:$0xff]   ;;  %v1255_v6 = vld [vmem:[%s1733_s0 + $0x10] sm:$0xff]  }
   0x2   :  { %v946_v2 = vunpack.c.l.bf16 %v1241_v0  ;;  %v950_v3 = vunpack.c.l.bf16 %v1246_v1  ;;  %v947_v4 = vunpack.c.h.bf16 %v1241_v0  ;;  %v951_v5 = vunpack.c.h.bf16 %v1246_v1  ;;  %v1274_v13 = vld [vmem:[%s1733_s0 + $0x18] sm:$0xff]   ;;  %v1287_v18 = vld [vmem:[%s1733_s0 + $0x20] sm:$0xff]   ;;  %v1300_v23 = vld [vmem:[%s1733_s0 + $0x28] sm:$0xff]  }
   0x3   :  { %v954_v11 = vunpack.c.l.bf16 %v1255_v6  ;;  %v955_v12 = vunpack.c.h.bf16 %v1255_v6  ;;  %v958_v16 = vunpack.c.l.bf16 %v1274_v13  ;;  %v959_v17 = vunpack.c.h.bf16 %v1274_v13  ;;  %v1313_v28 = vld [vmem:[%s1733_s0 + $0x30] sm:$0xff]   ;;  %v1326_v33 = vld [vmem:[%s1733_s0 + $0x38] sm:$0xff]   ;;  %v1339_v38 = vld [vmem:[%s1733_s0 + $0x40] sm:$0xff]  }
   0x4   :  { %v60_v7 = vsel %vm59_vm0, %v946_v2, 0.0  ;;  %v66_v8 = vsel %vm59_vm0, %v950_v3, 0.0  ;;  %v63_v9 = vsel %vm59_vm0, %v947_v4, 0.0  ;;  %v69_v10 = vsel %vm59_vm0, %v951_v5, 0.0 }
   0x5   :  { %61 = vadd.xlane.f32.xlu0 %v60_v7  ;;  %67 = vadd.xlane.f32.xlu1 %v66_v8  ;;  %v72_v14 = vsel %vm59_vm0, %v954_v11, 0.0  ;;  %v75_v15 = vsel %vm59_vm0, %v955_v12, 0.0  ;;  %v78_v19 = vsel %vm59_vm0, %v958_v16, 0.0  ;;  %v81_v20 = vsel %vm59_vm0, %v959_v17, 0.0 }
   0x6   :  { %v962_v21 = vunpack.c.l.bf16 %v1287_v18  ;;  %v963_v22 = vunpack.c.h.bf16 %v1287_v18  ;;  %v966_v26 = vunpack.c.l.bf16 %v1300_v23  ;;  %v967_v27 = vunpack.c.h.bf16 %v1300_v23 }
   0x7   :  { %v970_v31 = vunpack.c.l.bf16 %v1313_v28  ;;  %v971_v32 = vunpack.c.h.bf16 %v1313_v28  ;;  %v974_v36 = vunpack.c.l.bf16 %v1326_v33  ;;  %v975_v37 = vunpack.c.h.bf16 %v1326_v33 }
   0x8   :  { %v84_v24 = vsel %vm59_vm0, %v962_v21, 0.0  ;;  %v87_v25 = vsel %vm59_vm0, %v963_v22, 0.0  ;;  %v90_v29 = vsel %vm59_vm0, %v966_v26, 0.0  ;;  %v93_v30 = vsel %vm59_vm0, %v967_v27, 0.0 }
   0x9   :  { %64 = vadd.xlane.f32.xlu0 %v63_v9  ;;  %70 = vadd.xlane.f32.xlu1 %v69_v10  ;;  %v96_v34 = vsel %vm59_vm0, %v970_v31, 0.0  ;;  %v99_v35 = vsel %vm59_vm0, %v971_v32, 0.0  ;;  %v102_v39 = vsel %vm59_vm0, %v974_v36, 0.0  ;;  %v105_v40 = vsel %vm59_vm0, %v975_v37, 0.0 }
   0xa   :  { %v978_v41 = vunpack.c.l.bf16 %v1339_v38  ;;  %v979_v42 = vunpack.c.h.bf16 %v1339_v38 }
   0xc   :  { %v108_v43 = vsel %vm59_vm0, %v978_v41, 0.0  ;;  %v111_v44 = vsel %vm59_vm0, %v979_v42, 0.0 }
   0xd   :  { %73 = vadd.xlane.f32.xlu0 %v72_v14  ;;  %76 = vadd.xlane.f32.xlu1 %v75_v15 }
  0x11   :  { %79 = vadd.xlane.f32.xlu0 %v78_v19  ;;  %82 = vadd.xlane.f32.xlu1 %v81_v20 }
  0x15   :  { %85 = vadd.xlane.f32.xlu0 %v84_v24  ;;  %88 = vadd.xlane.f32.xlu1 %v87_v25 }
  0x19   :  { %91 = vadd.xlane.f32.xlu0 %v90_v29  ;;  %94 = vadd.xlane.f32.xlu1 %v93_v30 }
  0x1d   :  { %97 = vadd.xlane.f32.xlu0 %v96_v34  ;;  %100 = vadd.xlane.f32.xlu1 %v99_v35 }
  0x21   :  { %103 = vadd.xlane.f32.xlu0 %v102_v39  ;;  %106 = vadd.xlane.f32.xlu1 %v105_v40 }
  0x25   :  { %109 = vadd.xlane.f32.xlu0 %v108_v43  ;;  %112 = vadd.xlane.f32.xlu1 %v111_v44 }
  0x8e   :  { %v62_v45 = vpop.xlane.xlu0 %61  ;;  %v68_v46 = vpop.xlane.xlu1 %67 }
  0x8f   :  { %v115_v47 = vmul.f32 0.015625, %v62_v45  ;;  %v117_v48 = vmul.f32 0.015625, %v68_v46 }
  0x91   :  { %v1357_v49 = vsub.f32 %v946_v2, %v115_v47  ;;  %v1361_v50 = vsub.f32 %v950_v3, %v117_v48 }
  0x92   :  { %v65_v51 = vpop.xlane.xlu0 %64  ;;  %v71_v52 = vpop.xlane.xlu1 %70 }
  0x93   :  { %v116_v53 = vmul.f32 0.015625, %v65_v51  ;;  %v118_v54 = vmul.f32 0.015625, %v71_v52  ;;  %v151_v55 = vmul.f32 %v1357_v49, %v1357_v49  ;;  %v153_v56 = vmul.f32 %v1361_v50, %v1361_v50 }
  0x95   :  { %v1369_v57 = vsub.f32 %v947_v4, %v116_v53  ;;  %v1373_v58 = vsub.f32 %v951_v5, %v118_v54  ;;  %v169_v59 = vsel %vm59_vm0, %v151_v55, 0.0  ;;  %v175_v62 = vsel %vm59_vm0, %v153_v56, 0.0 }
  0x96   :  { %170 = vadd.xlane.f32.xlu0 %v169_v59  ;;  %v74_v60 = vpop.xlane.xlu0 %73  ;;  %v77_v61 = vpop.xlane.xlu1 %76 }
  0x97   :  { %v119_v63 = vmul.f32 0.015625, %v74_v60  ;;  %v120_v2 = vmul.f32 0.015625, %v77_v61  ;;  %v152_v3 = vmul.f32 %v1369_v57, %v1369_v57  ;;  %v154_v0 = vmul.f32 %v1373_v58, %v1373_v58 }
  0x99   :  { %v1383_v1 = vsub.f32 %v954_v11, %v119_v63  ;;  %v1387_v4 = vsub.f32 %v955_v12, %v120_v2  ;;  %v172_v5 = vsel %vm59_vm0, %v152_v3, 0.0  ;;  %v178_v9 = vsel %vm59_vm0, %v154_v0, 0.0 }
  0x9a   :  { %176 = vadd.xlane.f32.xlu0 %v175_v62  ;;  %173 = vadd.xlane.f32.xlu1 %v172_v5  ;;  %v80_v7 = vpop.xlane.xlu0 %79  ;;  %v83_v8 = vpop.xlane.xlu1 %82 }
  0x9b   :  { %v121_v10 = vmul.f32 0.015625, %v80_v7  ;;  %v122_v14 = vmul.f32 0.015625, %v83_v8  ;;  %v155_v15 = vmul.f32 %v1383_v1, %v1383_v1  ;;  %v156_v11 = vmul.f32 %v1387_v4, %v1387_v4  ;;  %v1157_v8 = vld [vmem:[%s1734_s3 + $0x18] sm:$0xff]  }
  0x9d   :  { %v1397_v6 = vsub.f32 %v958_v16, %v121_v10  ;;  %v1401_v12 = vsub.f32 %v959_v17, %v122_v14  ;;  %v181_v19 = vsel %vm59_vm0, %v155_v15, 0.0  ;;  %v184_v25 = vsel %vm59_vm0, %v156_v11, 0.0  ;;  %v1158_v14 = vld [vmem:[%s1735_s4 + $0x18] sm:$0xff]  }
  0x9e   :  { %179 = vadd.xlane.f32.xlu1 %v178_v9  ;;  %182 = vadd.xlane.f32.xlu0 %v181_v19  ;;  %v86_v20 = vpop.xlane.xlu0 %85  ;;  %v89_v24 = vpop.xlane.xlu1 %88 }
  0x9f   :  { %v123_v29 = vmul.f32 0.015625, %v86_v20  ;;  %v124_v30 = vmul.f32 0.015625, %v89_v24  ;;  %v157_v34 = vmul.f32 %v1397_v6, %v1397_v6  ;;  %v158_v16 = vmul.f32 %v1401_v12, %v1401_v12  ;;  %v1159_v24 = vld [vmem:[%s1734_s3 + $0x10] sm:$0xff]  }
  0xa1   :  { %v1411_v13 = vsub.f32 %v962_v21, %v123_v29  ;;  %v1415_v17 = vsub.f32 %v963_v22, %v124_v30  ;;  %v187_v35 = vsel %vm59_vm0, %v157_v34, 0.0  ;;  %v190_v43 = vsel %vm59_vm0, %v158_v16, 0.0  ;;  %v1161_v29 = vld [vmem:[%s1734_s3 + $0x8] sm:$0xff]   ;;  %v1163_v16 = vld [vmem:[%s1734_s3] sm:$0xff]  }
  0xa2   :  { %185 = vadd.xlane.f32.xlu1 %v184_v25  ;;  %188 = vadd.xlane.f32.xlu0 %v187_v35  ;;  %v92_v39 = vpop.xlane.xlu0 %91  ;;  %v95_v40 = vpop.xlane.xlu1 %94  ;;  %v1162_v34 = vld [vmem:[%s1735_s4 + $0x8] sm:$0xff]   ;;  %v1164_v35 = vld [vmem:[%s1735_s4] sm:$0xff]  }
  0xa3   :  { %v125_v44 = vmul.f32 0.015625, %v92_v39  ;;  %v126_v45 = vmul.f32 0.015625, %v95_v40  ;;  %v159_v46 = vmul.f32 %v1411_v13, %v1411_v13  ;;  %v160_v21 = vmul.f32 %v1415_v17, %v1415_v17 }
  0xa5   :  { %v1425_v18 = vsub.f32 %v966_v26, %v125_v44  ;;  %v1429_v22 = vsub.f32 %v967_v27, %v126_v45  ;;  %v193_v47 = vsel %vm59_vm0, %v159_v46, 0.0  ;;  %v196_v52 = vsel %vm59_vm0, %v160_v21, 0.0 }
  0xa6   :  { %191 = vadd.xlane.f32.xlu1 %v190_v43  ;;  %194 = vadd.xlane.f32.xlu0 %v193_v47  ;;  %v98_v48 = vpop.xlane.xlu0 %97  ;;  %v101_v51 = vpop.xlane.xlu1 %100 }
  0xa7   :  { %v127_v53 = vmul.f32 0.015625, %v98_v48  ;;  %v128_v54 = vmul.f32 0.015625, %v101_v51  ;;  %v161_v55 = vmul.f32 %v1425_v18, %v1425_v18  ;;  %v162_v26 = vmul.f32 %v1429_v22, %v1429_v22 }
  0xa9   :  { %v1439_v23 = vsub.f32 %v970_v31, %v127_v53  ;;  %v1443_v27 = vsub.f32 %v971_v32, %v128_v54  ;;  %v199_v56 = vsel %vm59_vm0, %v161_v55, 0.0  ;;  %v202_v61 = vsel %vm59_vm0, %v162_v26, 0.0 }
  0xaa   :  { %197 = vadd.xlane.f32.xlu1 %v196_v52  ;;  %200 = vadd.xlane.f32.xlu0 %v199_v56  ;;  %v104_v59 = vpop.xlane.xlu0 %103  ;;  %v107_v60 = vpop.xlane.xlu1 %106 }
  0xab   :  { %v129_v62 = vmul.f32 0.015625, %v104_v59  ;;  %v130_v63 = vmul.f32 0.015625, %v107_v60  ;;  %v163_v2 = vmul.f32 %v1439_v23, %v1439_v23  ;;  %v164_v31 = vmul.f32 %v1443_v27, %v1443_v27 }
  0xad   :  { %v1453_v28 = vsub.f32 %v974_v36, %v129_v62  ;;  %v1457_v32 = vsub.f32 %v975_v37, %v130_v63  ;;  %v205_v3 = vsel %vm59_vm0, %v163_v2, 0.0  ;;  %v208_v0 = vsel %vm59_vm0, %v164_v31, 0.0 }
  0xae   :  { %203 = vadd.xlane.f32.xlu1 %v202_v61  ;;  %206 = vadd.xlane.f32.xlu0 %v205_v3  ;;  %v110_v5 = vpop.xlane.xlu0 %109  ;;  %v113_v7 = vpop.xlane.xlu1 %112  ;;  %v1201_v37 = vmov 0.0  }
  0xaf   :  { %v131_v9 = vmul.f32 0.015625, %v110_v5  ;;  %v132_v10 = vmul.f32 0.015625, %v113_v7  ;;  %v165_v36 = vmul.f32 %v1453_v28, %v1453_v28  ;;  %v166_v33 = vmul.f32 %v1457_v32, %v1457_v32  ;;  %1067 = vmatprep.subr.bf16.mxu0 %v1201_v37  ;;  %1111 = vmatprep.subr.bf16.mxu1 %v1201_v37 }
  0xb0   :  { %1068 = vmatpush3.bf16.msra.mxu0 %v1157_v8  ;;  %1112 = vmatpush3.bf16.msra.mxu1 %v1158_v14  ;;  %v1521_v8 = vld [vmem:[%s1736_s1] ss:$0 sm:$0xff] }
  0xb1   :  { %v1475_v15 = vsub.f32 %v978_v41, %v131_v9  ;;  %v1479_v11 = vsub.f32 %v979_v42, %v132_v10  ;;  %v211_v19 = vsel %vm59_vm0, %v165_v36, 0.0  ;;  %1069 = vmatprep.subr.bf16.mxu0 %v1201_v37  ;;  %v214_v20 = vsel %vm59_vm0, %v166_v33, 0.0  ;;  %v1160_v41 = vld [vmem:[%s1735_s4 + $0x10] sm:$0xff]   ;;  %1113 = vmatprep.subr.bf16.mxu1 %v1201_v37 }
  0xb2   :  { %209 = vadd.xlane.f32.xlu1 %v208_v0  ;;  %212 = vadd.xlane.f32.xlu0 %v211_v19 }
  0xb3   :  { %v167_v38 = vmul.f32 %v1475_v15, %v1475_v15  ;;  %v168_v42 = vmul.f32 %v1479_v11, %v1479_v11  ;;  %1075 = vmatprep.mubr.msk.bf16.mxu0 %vm1202_vm1, %v1201_v37  ;;  %1119 = vmatprep.mubr.msk.bf16.mxu1 %vm1202_vm1, %v1201_v37 }
  0xb4   :  { %1070 = vmatpush3.bf16.msra.mxu0 %v1159_v24  ;;  %1114 = vmatpush3.bf16.msra.mxu1 %v1160_v41 }
  0xb5   :  { %v217_v25 = vsel %vm59_vm0, %v167_v38, 0.0  ;;  %1071 = vmatprep.subr.bf16.mxu0 %v1201_v37  ;;  %v220_v30 = vsel %vm59_vm0, %v168_v42, 0.0  ;;  %1115 = vmatprep.subr.bf16.mxu1 %v1201_v37 }
  0xb6   :  { %215 = vadd.xlane.f32.xlu1 %v214_v20  ;;  %218 = vadd.xlane.f32.xlu0 %v217_v25 }
  0xb8   :  { %1072 = vmatpush3.bf16.msra.mxu0 %v1161_v29  ;;  %1116 = vmatpush3.bf16.msra.mxu1 %v1162_v34 }
  0xb9   :  { %1073 = vmatprep.subr.bf16.mxu0 %v1201_v37  ;;  %1117 = vmatprep.subr.bf16.mxu1 %v1201_v37 }
  0xba   :  { %221 = vadd.xlane.f32.xlu1 %v220_v30 }
  0xbc   :  { %1074 = vmatpush3.bf16.msra.mxu0 %v1163_v16  ;;  %1118 = vmatpush3.bf16.msra.mxu1 %v1164_v35 }
 0x11f   :  { %v171_v39 = vpop.xlane.xlu0 %170 }
 0x120   :  { %v223_v40 = vmul.f32 0.015625, %v171_v39 }
 0x122   :  { %v241_v43 = vadd.f32 1e-05, %v223_v40 }
 0x123   :  { %v174_v44 = vpop.xlane.xlu1 %173  ;;  %v177_v45 = vpop.xlane.xlu0 %176 }
 0x124   :  { %1165 = vrsqrt.f32 %v241_v43  ;;  %v224_v46 = vmul.f32 0.015625, %v174_v44  ;;  %v225_v21 = vmul.f32 0.015625, %v177_v45 }
 0x126   :  { %v242_v47 = vadd.f32 1e-05, %v224_v46  ;;  %v243_v48 = vadd.f32 1e-05, %v225_v21 }
 0x127   :  { %v180_v51 = vpop.xlane.xlu1 %179  ;;  %v183_v52 = vpop.xlane.xlu0 %182 }
 0x128   :  { %1167 = vrsqrt.f32 %v242_v47  ;;  %v226_v53 = vmul.f32 0.015625, %v180_v51  ;;  %v227_v55 = vmul.f32 0.015625, %v183_v52 }
 0x129   :  { %1169 = vrsqrt.f32 %v243_v48 }
 0x12a   :  { %v244_v54 = vadd.f32 1e-05, %v226_v53  ;;  %v245_v60 = vadd.f32 1e-05, %v227_v55 }
 0x12b   :  { %v186_v26 = vpop.xlane.xlu1 %185  ;;  %v189_v56 = vpop.xlane.xlu0 %188 }
 0x12c   :  { %1171 = vrsqrt.f32 %v244_v54  ;;  %v228_v59 = vmul.f32 0.015625, %v186_v26  ;;  %v229_v3 = vmul.f32 0.015625, %v189_v56 }
 0x12e   :  { %v246_v61 = vadd.f32 1e-05, %v228_v59  ;;  %v247_v36 = vadd.f32 1e-05, %v229_v3 }
 0x12f   :  { %v192_v62 = vpop.xlane.xlu1 %191  ;;  %v195_v63 = vpop.xlane.xlu0 %194 }
 0x130   :  { %1173 = vrsqrt.f32 %v246_v61  ;;  %v230_v2 = vmul.f32 0.015625, %v192_v62  ;;  %v231_v25 = vmul.f32 0.015625, %v195_v63 }
 0x131   :  { %v1166_v31 = vpop.eup %1165  ;;  %1175 = vrsqrt.f32 %v245_v60 }
 0x132   :  { %v277_v0 = vmul.f32 %v1166_v31, %v1357_v49  ;;  %v248_v9 = vadd.f32 1e-05, %v230_v2  ;;  %v1528_v49 = vld [vmem:[%s1737_s2] ss:$0 sm:$0xff]  ;;  %v249_v45 = vadd.f32 1e-05, %v231_v25 }
 0x133   :  { %v198_v5 = vpop.xlane.xlu1 %197  ;;  %v201_v7 = vpop.xlane.xlu0 %200 }
 0x134   :  { %v302_v14 = vmul.f32 %v1521_v8, %v277_v0  ;;  %1177 = vrsqrt.f32 %v248_v9  ;;  %v232_v41 = vmul.f32 0.015625, %v198_v5  ;;  %v233_v53 = vmul.f32 0.015625, %v201_v7 }
 0x135   :  { %v1168_v10 = vpop.eup %1167  ;;  %1179 = vrsqrt.f32 %v247_v36 }
 0x136   :  { %v278_v33 = vmul.f32 %v1168_v10, %v1369_v57  ;;  %v1170_v19 = vpop.eup %1169  ;;  %v327_v29 = vadd.f32 %v1528_v49, %v302_v14  ;;  %v250_v39 = vadd.f32 1e-05, %v232_v41  ;;  %v251_v31 = vadd.f32 1e-05, %v233_v53 }
 0x137   :  { %v204_v20 = vpop.xlane.xlu1 %203  ;;  %v207_v24 = vpop.xlane.xlu0 %206  ;;  %v279_v30 = vmul.f32 %v1170_v19, %v1361_v50 }
 0x138   :  { %v303_v38 = vmul.f32 %v1521_v8, %v278_v33  ;;  %v234_v47 = vmul.f32 0.015625, %v204_v20  ;;  %1181 = vrsqrt.f32 %v250_v39  ;;  %v235_v7 = vmul.f32 0.015625, %v207_v24 }
 0x139   :  { %v1172_v42 = vpop.eup %1171  ;;  %v304_v46 = vmul.f32 %v1521_v8, %v279_v30  ;;  %1183 = vrsqrt.f32 %v249_v45 }
 0x13a   :  { %v328_v57 = vadd.f32 %v1528_v49, %v303_v38  ;;  %v280_v34 = vmul.f32 %v1172_v42, %v1373_v58  ;;  %v252_v56 = vadd.f32 1e-05, %v234_v47  ;;  %v253_v20 = vadd.f32 1e-05, %v235_v7 }
 0x13b   :  { %v210_v16 = vpop.xlane.xlu1 %209  ;;  %v1535_v35 = vpop.xlane.xlu0 %212  ;;  %v329_v55 = vadd.f32 %v1528_v49, %v304_v46 }
 0x13c   :  { %v345_v40 = vpack.c.bf16 %v328_v57, %v327_v29  ;;  %v305_v44 = vmul.f32 %v1521_v8, %v280_v34  ;;  %v237_v25 = vmul.f32 0.015625, %v1535_v35 }
 0x13d   :  { %v1174_v43 = vpop.eup %1173 }
 0x13e   :  { %1076 = vmatmul.mubr.msk.bf16.vlgmr.msra.gmra.mxu0 %vm59_vm0, %v345_v40  ;;  %1120 = vmatmul.mubr.msk.bf16.vlgmr.msra.gmra.mxu1 %vm59_vm0, %v345_v40  ;;  %v1176_v21 = vpop.eup %1175  ;;  %v330_v51 = vadd.f32 %v1528_v49, %v305_v44  ;;  %v282_v52 = vmul.f32 %v1174_v43, %v1387_v4  ;;  %v255_v45 = vadd.f32 1e-05, %v237_v25 }
 0x13f   :  { %v216_v50 = vpop.xlane.xlu1 %215  ;;  %v219_v48 = vpop.xlane.xlu0 %218  ;;  %1079 = vmatprep.mubr.msk.bf16.mxu0 %vm1202_vm1, %v1201_v37  ;;  %1123 = vmatprep.mubr.msk.bf16.mxu1 %vm1202_vm1, %v1201_v37  ;;  %v281_v26 = vmul.f32 %v1176_v21, %v1383_v1  ;;  %v236_v1 = vmul.f32 0.015625, %v210_v16 }
 0x140   :  { %v239_v58 = vmul.f32 0.015625, %v219_v48  ;;  %v346_v61 = vpack.c.bf16 %v330_v51, %v329_v55  ;;  %v307_v62 = vmul.f32 %v1521_v8, %v282_v52 }
 0x141   :  { %v1178_v63 = vpop.eup %1177  ;;  %v306_v4 = vmul.f32 %v1521_v8, %v281_v26  ;;  %v254_v36 = vadd.f32 1e-05, %v236_v1 }
 0x142   :  { %v257_v54 = vadd.f32 1e-05, %v239_v58  ;;  %v1180_v2 = vpop.eup %1179  ;;  %v332_v0 = vadd.f32 %v1528_v49, %v307_v62  ;;  %v284_v5 = vmul.f32 %v1178_v63, %v1401_v12 }
 0x143   :  { %v222_v59 = vpop.xlane.xlu1 %221  ;;  %v331_v9 = vadd.f32 %v1528_v49, %v306_v4  ;;  %v283_v10 = vmul.f32 %v1180_v2, %v1397_v6  ;;  %v238_v6 = vmul.f32 0.015625, %v216_v50 }
 0x144   :  { %v240_v60 = vmul.f32 0.015625, %v222_v59  ;;  %1185 = vrsqrt.f32 %v257_v54  ;;  %v309_v14 = vmul.f32 %v1521_v8, %v284_v5 }
 0x145   :  { %1187 = vrsqrt.f32 %v252_v56  ;;  %v347_v33 = vpack.c.bf16 %v332_v0, %v331_v9  ;;  %v1182_v19 = vpop.eup %1181  ;;  %v308_v41 = vmul.f32 %v1521_v8, %v283_v10  ;;  %v256_v16 = vadd.f32 1e-05, %v238_v6 }
 0x146   :  { %v258_v3 = vadd.f32 1e-05, %v240_v60  ;;  %1080 = vmatmul.mubr.msk.bf16.gmra.mxu0 %vm59_vm0, %v346_v61  ;;  %1124 = vmatmul.mubr.msk.bf16.gmra.mxu1 %vm59_vm0, %v346_v61  ;;  %v1184_v38 = vpop.eup %1183  ;;  %v334_v12 = vadd.f32 %v1528_v49, %v309_v14  ;;  %v286_v24 = vmul.f32 %v1182_v19, %v1415_v17 }
 0x147   :  { %1083 = vmatprep.mubr.msk.bf16.mxu0 %vm1202_vm1, %v1201_v37  ;;  %1127 = vmatprep.mubr.msk.bf16.mxu1 %vm1202_vm1, %v1201_v37  ;;  %v333_v29 = vadd.f32 %v1528_v49, %v308_v41  ;;  %v285_v57 = vmul.f32 %v1184_v38, %v1411_v13 }
 0x148   :  { %1189 = vrsqrt.f32 %v258_v3  ;;  %v311_v40 = vmul.f32 %v1521_v8, %v286_v24 }
 0x149   :  { %1191 = vrsqrt.f32 %v251_v31  ;;  %v348_v39 = vpack.c.bf16 %v334_v12, %v333_v29  ;;  %v310_v17 = vmul.f32 %v1521_v8, %v285_v57 }
 0x14a   :  { %1193 = vrsqrt.f32 %v254_v36  ;;  %v336_v46 = vadd.f32 %v1528_v49, %v311_v40 }
 0x14b   :  { %1195 = vrsqrt.f32 %v253_v20  ;;  %v335_v50 = vadd.f32 %v1528_v49, %v310_v17 }
 0x14c   :  { %1197 = vrsqrt.f32 %v256_v16 }
 0x14d   :  { %1199 = vrsqrt.f32 %v255_v45  ;;  %v349_v58 = vpack.c.bf16 %v336_v46, %v335_v50 }
 0x14e   :  { %1084 = vmatmul.mubr.msk.bf16.gmra.mxu0 %vm59_vm0, %v347_v33  ;;  %1128 = vmatmul.mubr.msk.bf16.gmra.mxu1 %vm59_vm0, %v347_v33 }
 0x14f   :  { %1087 = vmatprep.mubr.msk.bf16.mxu0 %vm1202_vm1, %v1201_v37  ;;  %1131 = vmatprep.mubr.msk.bf16.mxu1 %vm1202_vm1, %v1201_v37 }
 0x151   :  { %v1186_v42 = vpop.eup %1185 }
 0x152   :  { %v293_v30 = vmul.f32 %v1186_v42, %v1475_v15  ;;  %v1188_v34 = vpop.eup %1187 }
 0x153   :  { %v288_v21 = vmul.f32 %v1188_v34, %v1429_v22 }
 0x154   :  { %v318_v44 = vmul.f32 %v1521_v8, %v293_v30 }
 0x155   :  { %v1190_v43 = vpop.eup %1189  ;;  %v313_v51 = vmul.f32 %v1521_v8, %v288_v21 }
 0x156   :  { %1088 = vmatmul.mubr.msk.bf16.gmra.mxu0 %vm59_vm0, %v348_v39  ;;  %1132 = vmatmul.mubr.msk.bf16.gmra.mxu1 %vm59_vm0, %v348_v39  ;;  %v294_v35 = vmul.f32 %v1190_v43, %v1479_v11  ;;  %v1192_v13 = vpop.eup %1191  ;;  %v343_v15 = vadd.f32 %v1528_v49, %v318_v44 }
 0x157   :  { %1091 = vmatprep.mubr.msk.bf16.mxu0 %vm1202_vm1, %v1201_v37  ;;  %1135 = vmatprep.mubr.msk.bf16.mxu1 %vm1202_vm1, %v1201_v37  ;;  %v287_v11 = vmul.f32 %v1192_v13, %v1425_v18  ;;  %v1194_v53 = vpop.eup %1193  ;;  %v338_v18 = vadd.f32 %v1528_v49, %v313_v51 }
 0x158   :  { %v319_v47 = vmul.f32 %v1521_v8, %v294_v35  ;;  %v1196_v54 = vpop.eup %1195  ;;  %v290_v55 = vmul.f32 %v1194_v53, %v1443_v27 }
 0x159   :  { %v312_v22 = vmul.f32 %v1521_v8, %v287_v11  ;;  %v289_v56 = vmul.f32 %v1196_v54, %v1439_v23  ;;  %v1198_v61 = vpop.eup %1197 }
 0x15a   :  { %v344_v48 = vadd.f32 %v1528_v49, %v319_v47  ;;  %v315_v60 = vmul.f32 %v1521_v8, %v290_v55  ;;  %v1200_v63 = vpop.eup %1199  ;;  %v292_v23 = vmul.f32 %v1198_v61, %v1457_v32 }
 0x15b   :  { %v337_v26 = vadd.f32 %v1528_v49, %v312_v22  ;;  %v314_v62 = vmul.f32 %v1521_v8, %v289_v56  ;;  %v291_v31 = vmul.f32 %v1200_v63, %v1453_v28 }
 0x15c   :  { %v353_v52 = vpack.c.bf16 %v344_v48, %v343_v15  ;;  %v340_v27 = vadd.f32 %v1528_v49, %v315_v60  ;;  %v317_v4 = vmul.f32 %v1521_v8, %v292_v23 }
 0x15d   :  { %v350_v59 = vpack.c.bf16 %v338_v18, %v337_v26  ;;  %v339_v2 = vadd.f32 %v1528_v49, %v314_v62  ;;  %v316_v1 = vmul.f32 %v1521_v8, %v291_v31 }
 0x15e   :  { %1092 = vmatmul.mubr.msk.bf16.gmra.mxu0 %vm59_vm0, %v349_v58  ;;  %1136 = vmatmul.mubr.msk.bf16.gmra.mxu1 %vm59_vm0, %v349_v58  ;;  %v342_v32 = vadd.f32 %v1528_v49, %v317_v4 }
 0x15f   :  { %1095 = vmatprep.mubr.msk.bf16.mxu0 %vm1202_vm1, %v1201_v37  ;;  %1139 = vmatprep.mubr.msk.bf16.mxu1 %vm1202_vm1, %v1201_v37  ;;  %v351_v3 = vpack.c.bf16 %v340_v27, %v339_v2  ;;  %v341_v0 = vadd.f32 %v1528_v49, %v316_v1 }
 0x161   :  { %v352_v28 = vpack.c.bf16 %v342_v32, %v341_v0 }
 0x166   :  { %1096 = vmatmul.mubr.msk.bf16.gmra.mxu0 %vm59_vm0, %v350_v59  ;;  %1140 = vmatmul.mubr.msk.bf16.gmra.mxu1 %vm59_vm0, %v350_v59 }
 0x167   :  { %1099 = vmatprep.mubr.msk.bf16.mxu0 %vm1202_vm1, %v1201_v37  ;;  %1143 = vmatprep.mubr.msk.bf16.mxu1 %vm1202_vm1, %v1201_v37 }
 0x16e   :  { %1100 = vmatmul.mubr.msk.bf16.gmra.mxu0 %vm59_vm0, %v351_v3  ;;  %1144 = vmatmul.mubr.msk.bf16.gmra.mxu1 %vm59_vm0, %v351_v3 }
 0x16f   :  { %1103 = vmatprep.mubr.msk.bf16.mxu0 %vm1202_vm1, %v1201_v37  ;;  %1147 = vmatprep.mubr.msk.bf16.mxu1 %vm1202_vm1, %v1201_v37 }
 0x176   :  { %1104 = vmatmul.mubr.msk.bf16.gmra.mxu0 %vm59_vm0, %v352_v28  ;;  %1148 = vmatmul.mubr.msk.bf16.gmra.mxu1 %vm59_vm0, %v352_v28 }
 0x177   :  { %1107 = vmatprep.mubr.msk.bf16.mxu0 %vm1202_vm1, %v1201_v37  ;;  %1151 = vmatprep.mubr.msk.bf16.mxu1 %vm1202_vm1, %v1201_v37 }
 0x17e   :  { %1108 = vmatmul.mubr.msk.bf16.gmra.mxu0 %vm59_vm0, %v353_v52  ;;  %1152 = vmatmul.mubr.msk.bf16.gmra.mxu1 %vm59_vm0, %v353_v52 }
 0x1fe   :  { %v447_v8 = vpop.f32.mrf.mxu0  ;;  %v675_v5 = vpop.f32.mrf.mxu1 }
 0x1ff   :  { %v908_v7 = vpack.c.bf16 %v447_v8, %v447_v8 }
 0x200   :  { %v1077_v49 = vpop.f32.mrf.mxu0  ;;  %v1121_v9 = vpop.f32.mrf.mxu1 }
 0x201   :  { %591 = vst.msk [vmem:[%s1738_s5] sm:$0xf] %vm590_vm2, %v908_v7 }
 0x202   :  { %v450_v10 = vpop.f32.mrf.mxu0  ;;  %v678_v36 = vpop.f32.mrf.mxu1 }
 0x203   :  { %v909_v33 = vpack.c.bf16 %v450_v10, %v450_v10  ;;  %v983_v14 = vpack.c.bf16 %v678_v36, %v675_v5 }
 0x204   :  { %v1078_v37 = vpop.f32.mrf.mxu0  ;;  %v1122_v19 = vpop.f32.mrf.mxu1 }
 0x205   :  { %592 = vst.msk [vmem:[%s1738_s5 + $0x4] sm:$0xf] %vm590_vm2, %v909_v33  ;;  %984 = vst [vmem:[%s1739_s6] sm:$0xff] %v983_v14  }
 0x206   :  { %v455_v20 = vpop.f32.mrf.mxu0  ;;  %v683_v41 = vpop.f32.mrf.mxu1 }
 0x207   :  { %v910_v38 = vpack.c.bf16 %v455_v20, %v455_v20 }
 0x208   :  { %v1081_v6 = vpop.f32.mrf.mxu0  ;;  %v1125_v12 = vpop.f32.mrf.mxu1 }
 0x209   :  { %593 = vst.msk [vmem:[%s1738_s5 + $0x8] sm:$0xf] %vm590_vm2, %v910_v38 }
 0x20a   :  { %v458_v24 = vpop.f32.mrf.mxu0  ;;  %v686_v42 = vpop.f32.mrf.mxu1 }
 0x20b   :  { %v911_v25 = vpack.c.bf16 %v458_v24, %v458_v24  ;;  %v988_v29 = vpack.c.bf16 %v686_v42, %v683_v41 }
 0x20c   :  { %v1082_v57 = vpop.f32.mrf.mxu0  ;;  %v1126_v30 = vpop.f32.mrf.mxu1 }
 0x20d   :  { %594 = vst.msk [vmem:[%s1738_s5 + $0xc] sm:$0xf] %vm590_vm2, %v911_v25  ;;  %1033 = vst [vmem:[%s1739_s6 + $0x8] sm:$0xff] %v988_v29  }
 0x20e   :  { %v463_v34 = vpop.f32.mrf.mxu0  ;;  %v691_v16 = vpop.f32.mrf.mxu1 }
 0x20f   :  { %v912_v39 = vpack.c.bf16 %v463_v34, %v463_v34 }
 0x210   :  { %v1085_v40 = vpop.f32.mrf.mxu0  ;;  %v1129_v43 = vpop.f32.mrf.mxu1 }
 0x211   :  { %595 = vst.msk [vmem:[%s1738_s5 + $0x10] sm:$0xf] %vm590_vm2, %v912_v39 }
 0x212   :  { %v466_v44 = vpop.f32.mrf.mxu0  ;;  %v694_v45 = vpop.f32.mrf.mxu1 }
 0x213   :  { %v913_v17 = vpack.c.bf16 %v466_v44, %v466_v44  ;;  %v993_v35 = vpack.c.bf16 %v694_v45, %v691_v16 }
 0x214   :  { %v1086_v13 = vpop.f32.mrf.mxu0  ;;  %v1130_v15 = vpop.f32.mrf.mxu1 }
 0x215   :  { %596 = vst.msk [vmem:[%s1738_s5 + $0x14] sm:$0xf] %vm590_vm2, %v913_v17  ;;  %1034 = vst [vmem:[%s1739_s6 + $0x10] sm:$0xff] %v993_v35  }
 0x216   :  { %v471_v46 = vpop.f32.mrf.mxu0  ;;  %v699_v21 = vpop.f32.mrf.mxu1 }
 0x217   :  { %v914_v47 = vpack.c.bf16 %v471_v46, %v471_v46 }
 0x218   :  { %v1089_v50 = vpop.f32.mrf.mxu0  ;;  %v1133_v11 = vpop.f32.mrf.mxu1 }
 0x219   :  { %597 = vst.msk [vmem:[%s1738_s5 + $0x18] sm:$0xf] %vm590_vm2, %v914_v47 }
 0x21a   :  { %v474_v48 = vpop.f32.mrf.mxu0  ;;  %v702_v58 = vpop.f32.mrf.mxu1 }
 0x21b   :  { %v915_v51 = vpack.c.bf16 %v474_v48, %v474_v48  ;;  %v998_v52 = vpack.c.bf16 %v702_v58, %v699_v21 }
 0x21c   :  { %v1090_v53 = vpop.f32.mrf.mxu0  ;;  %v1134_v22 = vpop.f32.mrf.mxu1 }
 0x21d   :  { %598 = vst.msk [vmem:[%s1738_s5 + $0x1c] sm:$0xf] %vm590_vm2, %v915_v51  ;;  %1035 = vst [vmem:[%s1739_s6 + $0x18] sm:$0xff] %v998_v52  }
 0x21e   :  { %v479_v54 = vpop.f32.mrf.mxu0  ;;  %v707_v18 = vpop.f32.mrf.mxu1 }
 0x21f   :  { %v916_v55 = vpack.c.bf16 %v479_v54, %v479_v54 }
 0x220   :  { %v1093_v26 = vpop.f32.mrf.mxu0  ;;  %v1137_v56 = vpop.f32.mrf.mxu1 }
 0x221   :  { %599 = vst.msk [vmem:[%s1738_s5 + $0x20] sm:$0xf] %vm590_vm2, %v916_v55 }
 0x222   :  { %v482_v59 = vpop.f32.mrf.mxu0  ;;  %v710_v60 = vpop.f32.mrf.mxu1 }
 0x223   :  { %v917_v61 = vpack.c.bf16 %v482_v59, %v482_v59  ;;  %v1003_v62 = vpack.c.bf16 %v710_v60, %v707_v18 }
 0x224   :  { %v1094_v63 = vpop.f32.mrf.mxu0  ;;  %v1138_v27 = vpop.f32.mrf.mxu1 }
 0x225   :  { %600 = vst.msk [vmem:[%s1738_s5 + $0x24] sm:$0xf] %vm590_vm2, %v917_v61  ;;  %1036 = vst [vmem:[%s1739_s6 + $0x20] sm:$0xff] %v1003_v62  }
 0x226   :  { %v487_v23 = vpop.f32.mrf.mxu0  ;;  %v715_v2 = vpop.f32.mrf.mxu1 }
 0x227   :  { %v918_v31 = vpack.c.bf16 %v487_v23, %v487_v23 }
 0x228   :  { %v1097_v3 = vpop.f32.mrf.mxu0  ;;  %v1141_v4 = vpop.f32.mrf.mxu1 }
 0x229   :  { %601 = vst.msk [vmem:[%s1738_s5 + $0x28] sm:$0xf] %vm590_vm2, %v918_v31 }
 0x22a   :  { %v490_v1 = vpop.f32.mrf.mxu0  ;;  %v718_v32 = vpop.f32.mrf.mxu1 }
 0x22b   :  { %v919_v0 = vpack.c.bf16 %v490_v1, %v490_v1  ;;  %v1008_v28 = vpack.c.bf16 %v718_v32, %v715_v2 }
 0x22c   :  { %v1098_v8 = vpop.f32.mrf.mxu0  ;;  %v1142_v5 = vpop.f32.mrf.mxu1 }
 0x22d   :  { %602 = vst.msk [vmem:[%s1738_s5 + $0x2c] sm:$0xf] %vm590_vm2, %v919_v0  ;;  %1037 = vst [vmem:[%s1739_s6 + $0x28] sm:$0xff] %v1008_v28  }
 0x22e   :  { %v495_v7 = vpop.f32.mrf.mxu0  ;;  %v723_v49 = vpop.f32.mrf.mxu1 }
 0x22f   :  { %v920_v9 = vpack.c.bf16 %v495_v7, %v495_v7 }
 0x230   :  { %v1101_v10 = vpop.f32.mrf.mxu0  ;;  %v1145_v36 = vpop.f32.mrf.mxu1 }
 0x231   :  { %603 = vst.msk [vmem:[%s1738_s5 + $0x30] sm:$0xf] %vm590_vm2, %v920_v9 }
 0x232   :  { %v498_v33 = vpop.f32.mrf.mxu0  ;;  %v726_v14 = vpop.f32.mrf.mxu1 }
 0x233   :  { %v921_v37 = vpack.c.bf16 %v498_v33, %v498_v33  ;;  %v1013_v19 = vpack.c.bf16 %v726_v14, %v723_v49 }
 0x234   :  { %v1102_v20 = vpop.f32.mrf.mxu0  ;;  %v1146_v41 = vpop.f32.mrf.mxu1 }
 0x235   :  { %604 = vst.msk [vmem:[%s1738_s5 + $0x34] sm:$0xf] %vm590_vm2, %v921_v37  ;;  %1038 = vst [vmem:[%s1739_s6 + $0x30] sm:$0xff] %v1013_v19  }
 0x236   :  { %v503_v38 = vpop.f32.mrf.mxu0  ;;  %v731_v6 = vpop.f32.mrf.mxu1 }
 0x237   :  { %v922_v12 = vpack.c.bf16 %v503_v38, %v503_v38 }
 0x238   :  { %v1105_v24 = vpop.f32.mrf.mxu0  ;;  %v1149_v42 = vpop.f32.mrf.mxu1 }
 0x239   :  { %605 = vst.msk [vmem:[%s1738_s5 + $0x38] sm:$0xf] %vm590_vm2, %v922_v12 }
 0x23a   :  { %v506_v25 = vpop.f32.mrf.mxu0  ;;  %v734_v29 = vpop.f32.mrf.mxu1 }
 0x23b   :  { %v923_v57 = vpack.c.bf16 %v506_v25, %v506_v25  ;;  %v1018_v30 = vpack.c.bf16 %v734_v29, %v731_v6 }
 0x23c   :  { %v1106_v34 = vpop.f32.mrf.mxu0  ;;  %v1150_v16 = vpop.f32.mrf.mxu1 }
 0x23d   :  { %606 = vst.msk [vmem:[%s1738_s5 + $0x3c] sm:$0xf] %vm590_vm2, %v923_v57  ;;  %1039 = vst [vmem:[%s1739_s6 + $0x38] sm:$0xff] %v1018_v30  }
 0x23e   :  { %v511_v39 = vpop.f32.mrf.mxu0  ;;  %v739_v40 = vpop.f32.mrf.mxu1 }
 0x23f   :  { %v924_v43 = vpack.c.bf16 %v511_v39, %v511_v39 }
 0x240   :  { %v1109_v44 = vpop.f32.mrf.mxu0  ;;  %v1153_v45 = vpop.f32.mrf.mxu1 }
 0x241   :  { %607 = vst.msk [vmem:[%s1738_s5 + $0x40] sm:$0xf] %vm590_vm2, %v924_v43 }
 0x242   :  { %v514_v17 = vpop.f32.mrf.mxu0  ;;  %v742_v35 = vpop.f32.mrf.mxu1 }
 0x243   :  { %v925_v13 = vpack.c.bf16 %v514_v17, %v514_v17  ;;  %v1023_v15 = vpack.c.bf16 %v742_v35, %v739_v40 }
 0x244   :  { %v1110_v46 = vpop.f32.mrf.mxu0  ;;  %v1154_v21 = vpop.f32.mrf.mxu1 }
 0x245   :  { %608 = vst.msk [vmem:[%s1738_s5 + $0x44] sm:$0xf] %vm590_vm2, %v925_v13  ;;  %1040 = vst [vmem:[%s1739_s6 + $0x40] sm:$0xff] %v1023_v15  }

// kernel: relative_mhsa_block.8
= control target key start
LH: loop header
LB: loop body
LE: loop exit
PB: predicated region body
PF: predicated region fallthrough
CT: control target
= control target key end

     0   :  { %vm57_vm0 = vcmask 523264   ;;  %s1685_s0 = inlined_call_operand.vmem [shape: bf16[144,64], index: 0, kind: input, shape index: {}]   ;;  %s1686_s3 = inlined_call_operand.vmem [shape: bf16[64,256], index: 3, kind: input, shape index: {}]   ;;  %s1687_s1 = inlined_call_operand.vmem [shape: f32[1,64], index: 1, kind: input, shape index: {}]   ;;  %s1688_s2 = inlined_call_operand.vmem [shape: f32[1,64], index: 2, kind: input, shape index: {}]   ;;  %s1689_s4 = inlined_call_operand.vmem [shape: f32[1,256], index: 4, kind: input, shape index: {}]   ;;  %s1690_s5 = inlined_call_operand.vmem [shape: bf16[144,256], index: 5, kind: output, shape index: {}]  }
   0x1   :  { %v1134_v0 = vld [vmem:[%s1685_s0] sm:$0xff]   ;;  %v1139_v1 = vld [vmem:[%s1685_s0 + $0x8] sm:$0xff]   ;;  %v1167_v13 = vld [vmem:[%s1685_s0 + $0x10] sm:$0xff]  }
   0x2   :  { %v929_v2 = vunpack.c.l.bf16 %v1134_v0  ;;  %v933_v3 = vunpack.c.l.bf16 %v1139_v1  ;;  %v930_v4 = vunpack.c.h.bf16 %v1134_v0  ;;  %v934_v5 = vunpack.c.h.bf16 %v1139_v1  ;;  %v1148_v6 = vld [vmem:[%s1685_s0 + $0x28] sm:$0xff]   ;;  %v1180_v18 = vld [vmem:[%s1685_s0 + $0x30] sm:$0xff]   ;;  %v1193_v23 = vld [vmem:[%s1685_s0 + $0x18] sm:$0xff]  }
   0x3   :  { %v949_v11 = vunpack.c.l.bf16 %v1148_v6  ;;  %v950_v12 = vunpack.c.h.bf16 %v1148_v6  ;;  %v937_v16 = vunpack.c.l.bf16 %v1167_v13  ;;  %v938_v17 = vunpack.c.h.bf16 %v1167_v13  ;;  %v1206_v28 = vld [vmem:[%s1685_s0 + $0x38] sm:$0xff]   ;;  %v1219_v33 = vld [vmem:[%s1685_s0 + $0x20] sm:$0xff]  }
   0x4   :  { %v58_v7 = vsel %vm57_vm0, %v929_v2, 0.0  ;;  %v64_v8 = vsel %vm57_vm0, %v933_v3, 0.0  ;;  %v61_v9 = vsel %vm57_vm0, %v930_v4, 0.0  ;;  %v67_v10 = vsel %vm57_vm0, %v934_v5, 0.0  ;;  %v1232_v38 = vld [vmem:[%s1685_s0 + $0x40] sm:$0xff]  }
   0x5   :  { %59 = vadd.xlane.f32.xlu0 %v58_v7  ;;  %65 = vadd.xlane.f32.xlu1 %v64_v8  ;;  %v88_v14 = vsel %vm57_vm0, %v949_v11, 0.0  ;;  %v91_v15 = vsel %vm57_vm0, %v950_v12, 0.0  ;;  %v70_v19 = vsel %vm57_vm0, %v937_v16, 0.0  ;;  %v73_v20 = vsel %vm57_vm0, %v938_v17, 0.0 }
   0x6   :  { %v953_v21 = vunpack.c.l.bf16 %v1180_v18  ;;  %v954_v22 = vunpack.c.h.bf16 %v1180_v18  ;;  %v941_v26 = vunpack.c.l.bf16 %v1193_v23  ;;  %v942_v27 = vunpack.c.h.bf16 %v1193_v23 }
   0x7   :  { %v957_v31 = vunpack.c.l.bf16 %v1206_v28  ;;  %v958_v32 = vunpack.c.h.bf16 %v1206_v28  ;;  %v945_v36 = vunpack.c.l.bf16 %v1219_v33  ;;  %v946_v37 = vunpack.c.h.bf16 %v1219_v33 }
   0x8   :  { %v94_v24 = vsel %vm57_vm0, %v953_v21, 0.0  ;;  %v97_v25 = vsel %vm57_vm0, %v954_v22, 0.0  ;;  %v76_v29 = vsel %vm57_vm0, %v941_v26, 0.0  ;;  %v79_v30 = vsel %vm57_vm0, %v942_v27, 0.0 }
   0x9   :  { %62 = vadd.xlane.f32.xlu0 %v61_v9  ;;  %68 = vadd.xlane.f32.xlu1 %v67_v10  ;;  %v100_v34 = vsel %vm57_vm0, %v957_v31, 0.0  ;;  %v103_v35 = vsel %vm57_vm0, %v958_v32, 0.0  ;;  %v82_v39 = vsel %vm57_vm0, %v945_v36, 0.0  ;;  %v85_v40 = vsel %vm57_vm0, %v946_v37, 0.0 }
   0xa   :  { %v961_v41 = vunpack.c.l.bf16 %v1232_v38  ;;  %v962_v42 = vunpack.c.h.bf16 %v1232_v38 }
   0xc   :  { %v106_v43 = vsel %vm57_vm0, %v961_v41, 0.0  ;;  %v109_v44 = vsel %vm57_vm0, %v962_v42, 0.0 }
   0xd   :  { %89 = vadd.xlane.f32.xlu0 %v88_v14  ;;  %92 = vadd.xlane.f32.xlu1 %v91_v15 }
  0x11   :  { %71 = vadd.xlane.f32.xlu0 %v70_v19  ;;  %74 = vadd.xlane.f32.xlu1 %v73_v20 }
  0x15   :  { %95 = vadd.xlane.f32.xlu0 %v94_v24  ;;  %98 = vadd.xlane.f32.xlu1 %v97_v25 }
  0x19   :  { %77 = vadd.xlane.f32.xlu0 %v76_v29  ;;  %80 = vadd.xlane.f32.xlu1 %v79_v30 }
  0x1d   :  { %101 = vadd.xlane.f32.xlu0 %v100_v34  ;;  %104 = vadd.xlane.f32.xlu1 %v103_v35 }
  0x21   :  { %83 = vadd.xlane.f32.xlu0 %v82_v39  ;;  %86 = vadd.xlane.f32.xlu1 %v85_v40 }
  0x25   :  { %107 = vadd.xlane.f32.xlu0 %v106_v43  ;;  %110 = vadd.xlane.f32.xlu1 %v109_v44 }
  0x8e   :  { %v60_v45 = vpop.xlane.xlu0 %59  ;;  %v66_v46 = vpop.xlane.xlu1 %65 }
  0x8f   :  { %v113_v47 = vmul.f32 0.015625, %v60_v45  ;;  %v115_v48 = vmul.f32 0.015625, %v66_v46 }
  0x91   :  { %v1250_v49 = vsub.f32 %v929_v2, %v113_v47  ;;  %v1254_v50 = vsub.f32 %v933_v3, %v115_v48 }
  0x92   :  { %v63_v51 = vpop.xlane.xlu0 %62  ;;  %v69_v52 = vpop.xlane.xlu1 %68 }
  0x93   :  { %v114_v53 = vmul.f32 0.015625, %v63_v51  ;;  %v116_v54 = vmul.f32 0.015625, %v69_v52  ;;  %v149_v55 = vmul.f32 %v1250_v49, %v1250_v49  ;;  %v151_v56 = vmul.f32 %v1254_v50, %v1254_v50 }
  0x95   :  { %v1262_v57 = vsub.f32 %v930_v4, %v114_v53  ;;  %v1266_v58 = vsub.f32 %v934_v5, %v116_v54  ;;  %v167_v59 = vsel %vm57_vm0, %v149_v55, 0.0  ;;  %v173_v62 = vsel %vm57_vm0, %v151_v56, 0.0 }
  0x96   :  { %168 = vadd.xlane.f32.xlu0 %v167_v59  ;;  %v90_v60 = vpop.xlane.xlu0 %89  ;;  %v93_v61 = vpop.xlane.xlu1 %92 }
  0x97   :  { %v123_v63 = vmul.f32 0.015625, %v90_v60  ;;  %v124_v2 = vmul.f32 0.015625, %v93_v61  ;;  %v150_v3 = vmul.f32 %v1262_v57, %v1262_v57  ;;  %v152_v0 = vmul.f32 %v1266_v58, %v1266_v58 }
  0x99   :  { %v1276_v1 = vsub.f32 %v949_v11, %v123_v63  ;;  %v1280_v4 = vsub.f32 %v950_v12, %v124_v2  ;;  %v170_v5 = vsel %vm57_vm0, %v150_v3, 0.0  ;;  %v176_v9 = vsel %vm57_vm0, %v152_v0, 0.0  ;;  %v980_v0 = vld [vmem:[%s1686_s3 + $0x34] ss:$8 sps:$4 sm:$0xff]  }
  0x9a   :  { %174 = vadd.xlane.f32.xlu0 %v173_v62  ;;  %171 = vadd.xlane.f32.xlu1 %v170_v5  ;;  %v72_v7 = vpop.xlane.xlu0 %71  ;;  %v75_v8 = vpop.xlane.xlu1 %74 }
  0x9b   :  { %v117_v10 = vmul.f32 0.015625, %v72_v7  ;;  %v118_v14 = vmul.f32 0.015625, %v75_v8  ;;  %v159_v15 = vmul.f32 %v1276_v1, %v1276_v1  ;;  %v160_v11 = vmul.f32 %v1280_v4, %v1280_v4  ;;  %447 = vmatprep.subr.bf16.mxu0 %v980_v0  ;;  %971 = vmatprep.subr.bf16.mxu1 %v980_v0 }
  0x9d   :  { %v1290_v6 = vsub.f32 %v937_v16, %v117_v10  ;;  %v1294_v12 = vsub.f32 %v938_v17, %v118_v14  ;;  %v197_v19 = vsel %vm57_vm0, %v159_v15, 0.0  ;;  %v200_v25 = vsel %vm57_vm0, %v160_v11, 0.0 }
  0x9e   :  { %177 = vadd.xlane.f32.xlu1 %v176_v9  ;;  %198 = vadd.xlane.f32.xlu0 %v197_v19  ;;  %v96_v20 = vpop.xlane.xlu0 %95  ;;  %v99_v24 = vpop.xlane.xlu1 %98  ;;  %v983_v19 = vld [vmem:[%s1686_s3 + $0x24] ss:$8 sps:$4 sm:$0xff]  }
  0x9f   :  { %v125_v29 = vmul.f32 0.015625, %v96_v20  ;;  %v126_v30 = vmul.f32 0.015625, %v99_v24  ;;  %v153_v34 = vmul.f32 %v1290_v6, %v1290_v6  ;;  %v154_v16 = vmul.f32 %v1294_v12, %v1294_v12  ;;  %v985_v20 = vld [vmem:[%s1686_s3 + $0x20] ss:$8 sps:$4 sm:$0xff]  }
  0xa1   :  { %v1304_v13 = vsub.f32 %v953_v21, %v125_v29  ;;  %v1308_v17 = vsub.f32 %v954_v22, %v126_v30  ;;  %v179_v35 = vsel %vm57_vm0, %v153_v34, 0.0  ;;  %v182_v43 = vsel %vm57_vm0, %v154_v16, 0.0  ;;  %v988_v29 = vld [vmem:[%s1686_s3 + $0x10] ss:$8 sps:$4 sm:$0xff]   ;;  %v989_v34 = vld [vmem:[%s1686_s3 + $0x4] ss:$8 sps:$4 sm:$0xff]  }
  0xa2   :  { %201 = vadd.xlane.f32.xlu1 %v200_v25  ;;  %180 = vadd.xlane.f32.xlu0 %v179_v35  ;;  %v78_v39 = vpop.xlane.xlu0 %77  ;;  %v81_v40 = vpop.xlane.xlu1 %80  ;;  %v986_v25 = vld [vmem:[%s1686_s3 + $0x14] ss:$8 sps:$4 sm:$0xff]   ;;  %v991_v16 = vld [vmem:[%s1686_s3] ss:$8 sps:$4 sm:$0xff]   ;;  %v1100_v35 = vmov 0  }
  0xa3   :  { %v119_v44 = vmul.f32 0.015625, %v78_v39  ;;  %v120_v45 = vmul.f32 0.015625, %v81_v40  ;;  %v161_v46 = vmul.f32 %v1304_v13, %v1304_v13  ;;  %v162_v21 = vmul.f32 %v1308_v17, %v1308_v17  ;;  %471 = vmatprep.mubr.bf16.mxu0 %v1100_v35  ;;  %521 = vmatprep.mubr.bf16.mxu1 %v1100_v35 }
  0xa5   :  { %v1318_v18 = vsub.f32 %v941_v26, %v119_v44  ;;  %v1322_v22 = vsub.f32 %v942_v27, %v120_v45  ;;  %v203_v47 = vsel %vm57_vm0, %v161_v46, 0.0  ;;  %v206_v52 = vsel %vm57_vm0, %v162_v21, 0.0 }
  0xa6   :  { %183 = vadd.xlane.f32.xlu1 %v182_v43  ;;  %204 = vadd.xlane.f32.xlu0 %v203_v47  ;;  %v102_v48 = vpop.xlane.xlu0 %101  ;;  %v105_v51 = vpop.xlane.xlu1 %104 }
  0xa7   :  { %v127_v53 = vmul.f32 0.015625, %v102_v48  ;;  %v128_v54 = vmul.f32 0.015625, %v105_v51  ;;  %v155_v55 = vmul.f32 %v1318_v18, %v1318_v18  ;;  %v156_v26 = vmul.f32 %v1322_v22, %v1322_v22 }
  0xa9   :  { %v1332_v23 = vsub.f32 %v957_v31, %v127_v53  ;;  %v1336_v27 = vsub.f32 %v958_v32, %v128_v54  ;;  %v185_v56 = vsel %vm57_vm0, %v155_v55, 0.0  ;;  %v188_v61 = vsel %vm57_vm0, %v156_v26, 0.0 }
  0xaa   :  { %207 = vadd.xlane.f32.xlu1 %v206_v52  ;;  %186 = vadd.xlane.f32.xlu0 %v185_v56  ;;  %v84_v59 = vpop.xlane.xlu0 %83  ;;  %v87_v60 = vpop.xlane.xlu1 %86 }
  0xab   :  { %v121_v62 = vmul.f32 0.015625, %v84_v59  ;;  %v122_v63 = vmul.f32 0.015625, %v87_v60  ;;  %v163_v2 = vmul.f32 %v1332_v23, %v1332_v23  ;;  %v164_v31 = vmul.f32 %v1336_v27, %v1336_v27 }
  0xad   :  { %v1346_v28 = vsub.f32 %v945_v36, %v121_v62  ;;  %v1350_v32 = vsub.f32 %v946_v37, %v122_v63  ;;  %v209_v3 = vsel %vm57_vm0, %v163_v2, 0.0  ;;  %v212_v8 = vsel %vm57_vm0, %v164_v31, 0.0  ;;  %v982_v36 = vld [vmem:[%s1686_s3 + $0x30] ss:$8 sps:$4 sm:$0xff]  }
  0xae   :  { %189 = vadd.xlane.f32.xlu1 %v188_v61  ;;  %210 = vadd.xlane.f32.xlu0 %v209_v3  ;;  %v108_v5 = vpop.xlane.xlu0 %107  ;;  %v111_v7 = vpop.xlane.xlu1 %110 }
  0xaf   :  { %v129_v9 = vmul.f32 0.015625, %v108_v5  ;;  %v130_v33 = vmul.f32 0.015625, %v111_v7  ;;  %v157_v37 = vmul.f32 %v1346_v28, %v1346_v28  ;;  %v158_v10 = vmul.f32 %v1350_v32, %v1350_v32  ;;  %448 = vmatpush1.bf16.msra.mxu0 %v982_v36  ;;  %975 = vmatpush1.bf16.msra.mxu1 %v982_v36 }
  0xb0   :  { %449 = vmatprep.subr.bf16.mxu0 %v983_v19  ;;  %972 = vmatprep.subr.bf16.mxu1 %v983_v19 }
  0xb1   :  { %v1366_v14 = vsub.f32 %v961_v41, %v129_v9  ;;  %v1370_v15 = vsub.f32 %v962_v42, %v130_v33  ;;  %v191_v11 = vsel %vm57_vm0, %v157_v37, 0.0  ;;  %v194_v24 = vsel %vm57_vm0, %v158_v10, 0.0  ;;  %v1404_v9 = vld [vmem:[%s1687_s1] ss:$0 sm:$0xff] }
  0xb2   :  { %213 = vadd.xlane.f32.xlu1 %v212_v8  ;;  %192 = vadd.xlane.f32.xlu0 %v191_v11 }
  0xb3   :  { %v165_v41 = vmul.f32 %v1366_v14, %v1366_v14  ;;  %v166_v38 = vmul.f32 %v1370_v15, %v1370_v15  ;;  %450 = vmatpush1.bf16.msra.mxu0 %v985_v20  ;;  %976 = vmatpush1.bf16.msra.mxu1 %v985_v20 }
  0xb4   :  { %451 = vmatprep.subr.bf16.mxu0 %v986_v25  ;;  %973 = vmatprep.subr.bf16.mxu1 %v986_v25 }
  0xb5   :  { %v215_v42 = vsel %vm57_vm0, %v165_v41, 0.0  ;;  %v218_v30 = vsel %vm57_vm0, %v166_v38, 0.0 }
  0xb6   :  { %195 = vadd.xlane.f32.xlu1 %v194_v24  ;;  %216 = vadd.xlane.f32.xlu0 %v215_v42 }
  0xb7   :  { %452 = vmatpush1.bf16.msra.mxu0 %v988_v29  ;;  %977 = vmatpush1.bf16.msra.mxu1 %v988_v29 }
  0xb8   :  { %453 = vmatprep.subr.bf16.mxu0 %v989_v34  ;;  %974 = vmatprep.subr.bf16.mxu1 %v989_v34 }
  0xba   :  { %219 = vadd.xlane.f32.xlu1 %v218_v30 }
  0xbb   :  { %454 = vmatpush1.bf16.msra.mxu0 %v991_v16  ;;  %978 = vmatpush1.bf16.msra.mxu1 %v991_v16 }
 0x11f   :  { %v169_v39 = vpop.xlane.xlu0 %168 }
 0x120   :  { %v221_v40 = vmul.f32 0.015625, %v169_v39 }
 0x122   :  { %v239_v43 = vadd.f32 1e-05, %v221_v40 }
 0x123   :  { %v172_v44 = vpop.xlane.xlu1 %171  ;;  %v175_v45 = vpop.xlane.xlu0 %174 }
 0x124   :  { %992 = vrsqrt.f32 %v239_v43  ;;  %v222_v46 = vmul.f32 0.015625, %v172_v44  ;;  %v223_v21 = vmul.f32 0.015625, %v175_v45 }
 0x126   :  { %v240_v47 = vadd.f32 1e-05, %v222_v46  ;;  %v241_v48 = vadd.f32 1e-05, %v223_v21 }
 0x127   :  { %v178_v51 = vpop.xlane.xlu1 %177  ;;  %v199_v52 = vpop.xlane.xlu0 %198 }
 0x128   :  { %994 = vrsqrt.f32 %v240_v47  ;;  %v224_v53 = vmul.f32 0.015625, %v178_v51  ;;  %v231_v54 = vmul.f32 0.015625, %v199_v52 }
 0x129   :  { %996 = vrsqrt.f32 %v241_v48 }
 0x12a   :  { %v242_v55 = vadd.f32 1e-05, %v224_v53  ;;  %v249_v26 = vadd.f32 1e-05, %v231_v54 }
 0x12b   :  { %v202_v56 = vpop.xlane.xlu1 %201  ;;  %v181_v59 = vpop.xlane.xlu0 %180 }
 0x12c   :  { %998 = vrsqrt.f32 %v242_v55  ;;  %v232_v60 = vmul.f32 0.015625, %v202_v56  ;;  %v225_v61 = vmul.f32 0.015625, %v181_v59 }
 0x12d   :  { %1000 = vrsqrt.f32 %v249_v26 }
 0x12e   :  { %v250_v62 = vadd.f32 1e-05, %v232_v60  ;;  %v243_v63 = vadd.f32 1e-05, %v225_v61 }
 0x12f   :  { %v184_v2 = vpop.xlane.xlu1 %183  ;;  %v205_v31 = vpop.xlane.xlu0 %204 }
 0x130   :  { %1002 = vrsqrt.f32 %v250_v62  ;;  %v226_v3 = vmul.f32 0.015625, %v184_v2  ;;  %v233_v0 = vmul.f32 0.015625, %v205_v31 }
 0x131   :  { %v993_v5 = vpop.eup %992  ;;  %1004 = vrsqrt.f32 %v243_v63 }
 0x132   :  { %v244_v7 = vadd.f32 1e-05, %v226_v3  ;;  %v251_v8 = vadd.f32 1e-05, %v233_v0  ;;  %v275_v36 = vmul.f32 %v993_v5, %v1250_v49  ;;  %v1411_v49 = vld [vmem:[%s1688_s2] ss:$0 sm:$0xff] }
 0x133   :  { %v208_v33 = vpop.xlane.xlu1 %207  ;;  %v187_v37 = vpop.xlane.xlu0 %186 }
 0x134   :  { %1006 = vrsqrt.f32 %v244_v7  ;;  %v234_v10 = vmul.f32 0.015625, %v208_v33  ;;  %v227_v11 = vmul.f32 0.015625, %v187_v37  ;;  %v300_v20 = vmul.f32 %v1404_v9, %v275_v36 }
 0x135   :  { %v995_v19 = vpop.eup %994  ;;  %1008 = vrsqrt.f32 %v251_v8 }
 0x136   :  { %v997_v24 = vpop.eup %996  ;;  %v252_v41 = vadd.f32 1e-05, %v234_v10  ;;  %v245_v38 = vadd.f32 1e-05, %v227_v11  ;;  %v276_v42 = vmul.f32 %v995_v19, %v1262_v57  ;;  %v325_v40 = vadd.f32 %v1411_v49, %v300_v20 }
 0x137   :  { %v190_v25 = vpop.xlane.xlu1 %189  ;;  %v211_v29 = vpop.xlane.xlu0 %210  ;;  %v277_v43 = vmul.f32 %v997_v24, %v1254_v50 }
 0x138   :  { %1010 = vrsqrt.f32 %v252_v41  ;;  %v228_v30 = vmul.f32 0.015625, %v190_v25  ;;  %v235_v34 = vmul.f32 0.015625, %v211_v29  ;;  %v301_v16 = vmul.f32 %v1404_v9, %v276_v42 }
 0x139   :  { %v999_v39 = vpop.eup %998  ;;  %1012 = vrsqrt.f32 %v245_v38  ;;  %v302_v26 = vmul.f32 %v1404_v9, %v277_v43 }
 0x13a   :  { %v1001_v44 = vpop.eup %1000  ;;  %v246_v57 = vadd.f32 1e-05, %v228_v30  ;;  %v253_v45 = vadd.f32 1e-05, %v235_v34  ;;  %v326_v46 = vadd.f32 %v1411_v49, %v301_v16  ;;  %v278_v21 = vmul.f32 %v999_v39, %v1266_v58 }
 0x13b   :  { %v214_v47 = vpop.xlane.xlu1 %213  ;;  %v193_v48 = vpop.xlane.xlu0 %192  ;;  %v285_v51 = vmul.f32 %v1001_v44, %v1276_v1  ;;  %v327_v5 = vadd.f32 %v1411_v49, %v302_v26 }
 0x13c   :  { %1014 = vrsqrt.f32 %v246_v57  ;;  %v236_v52 = vmul.f32 0.015625, %v214_v47  ;;  %v229_v53 = vmul.f32 0.015625, %v193_v48  ;;  %v343_v54 = vpack.c.bf16 %v326_v46, %v325_v40 }
 0x13d   :  { %v1003_v55 = vpop.eup %1002  ;;  %1016 = vrsqrt.f32 %v253_v45  ;;  %v303_v50 = vmul.f32 %v1404_v9, %v278_v21  ;;  %v310_v56 = vmul.f32 %v1404_v9, %v285_v51 }
 0x13e   :  { %v1005_v59 = vpop.eup %1004  ;;  %v254_v60 = vadd.f32 1e-05, %v236_v52  ;;  %v247_v61 = vadd.f32 1e-05, %v229_v53  ;;  %882 = vmatmul.mubr.msk.bf16.vlgmr.msra.gmra.mxu0 %vm57_vm0, %v343_v54  ;;  %v286_v58 = vmul.f32 %v1003_v55, %v1280_v4 }
 0x13f   :  { %v196_v1 = vpop.xlane.xlu1 %195  ;;  %v217_v62 = vpop.xlane.xlu0 %216  ;;  %481 = vmatprep.mubr.bf16.mxu0 %v1100_v35  ;;  %v328_v63 = vadd.f32 %v1411_v49, %v303_v50  ;;  %v335_v7 = vadd.f32 %v1411_v49, %v310_v56  ;;  %v279_v8 = vmul.f32 %v1005_v59, %v1290_v6 }
 0x140   :  { %1018 = vrsqrt.f32 %v254_v60  ;;  %v230_v2 = vmul.f32 0.015625, %v196_v1  ;;  %v237_v31 = vmul.f32 0.015625, %v217_v62  ;;  %v311_v3 = vmul.f32 %v1404_v9, %v286_v58 }
 0x141   :  { %v1007_v0 = vpop.eup %1006  ;;  %1020 = vrsqrt.f32 %v247_v61  ;;  %v344_v19 = vpack.c.bf16 %v328_v63, %v327_v5  ;;  %v304_v29 = vmul.f32 %v1404_v9, %v279_v8 }
 0x142   :  { %v1009_v4 = vpop.eup %1008  ;;  %v248_v36 = vadd.f32 1e-05, %v230_v2  ;;  %v255_v33 = vadd.f32 1e-05, %v237_v31  ;;  %v336_v37 = vadd.f32 %v1411_v49, %v311_v3  ;;  %v280_v10 = vmul.f32 %v1007_v0, %v1294_v12 }
 0x143   :  { %v220_v11 = vpop.xlane.xlu1 %219  ;;  %v287_v20 = vmul.f32 %v1009_v4, %v1304_v13  ;;  %v329_v43 = vadd.f32 %v1411_v49, %v304_v29 }
 0x144   :  { %1022 = vrsqrt.f32 %v248_v36  ;;  %v238_v24 = vmul.f32 0.015625, %v220_v11  ;;  %v348_v41 = vpack.c.bf16 %v336_v37, %v335_v7  ;;  %v305_v38 = vmul.f32 %v1404_v9, %v280_v10 }
 0x145   :  { %v1011_v42 = vpop.eup %1010  ;;  %1024 = vrsqrt.f32 %v255_v33  ;;  %v312_v30 = vmul.f32 %v1404_v9, %v287_v20 }
 0x146   :  { %v1013_v25 = vpop.eup %1012  ;;  %v256_v6 = vadd.f32 1e-05, %v238_v24  ;;  %883 = vmatmul.mubr.msk.bf16.gmra.mxu0 %vm57_vm0, %v344_v19  ;;  %887 = vmatmul.mubr.msk.bf16.vlgmr.msra.gmra.mxu1 %vm57_vm0, %v348_v41  ;;  %v288_v12 = vmul.f32 %v1011_v42, %v1308_v17  ;;  %v330_v13 = vadd.f32 %v1411_v49, %v305_v38 }
 0x147   :  { %491 = vmatprep.mubr.bf16.mxu0 %v1100_v35  ;;  %531 = vmatprep.mubr.bf16.mxu1 %v1100_v35  ;;  %v281_v39 = vmul.f32 %v1013_v25, %v1318_v18  ;;  %v337_v44 = vadd.f32 %v1411_v49, %v312_v30 }
 0x148   :  { %1026 = vrsqrt.f32 %v256_v6  ;;  %v313_v34 = vmul.f32 %v1404_v9, %v288_v12  ;;  %v345_v46 = vpack.c.bf16 %v330_v13, %v329_v43 }
 0x149   :  { %v1015_v16 = vpop.eup %1014  ;;  %v306_v51 = vmul.f32 %v1404_v9, %v281_v39 }
 0x14a   :  { %v1017_v40 = vpop.eup %1016  ;;  %v338_v17 = vadd.f32 %v1411_v49, %v313_v34  ;;  %v282_v57 = vmul.f32 %v1015_v16, %v1322_v22 }
 0x14b   :  { %v289_v45 = vmul.f32 %v1017_v40, %v1332_v23  ;;  %v331_v55 = vadd.f32 %v1411_v49, %v306_v51 }
 0x14c   :  { %v349_v21 = vpack.c.bf16 %v338_v17, %v337_v44  ;;  %v307_v47 = vmul.f32 %v1404_v9, %v282_v57 }
 0x14d   :  { %v1019_v48 = vpop.eup %1018  ;;  %v314_v53 = vmul.f32 %v1404_v9, %v289_v45 }
 0x14e   :  { %v1021_v52 = vpop.eup %1020  ;;  %884 = vmatmul.mubr.msk.bf16.gmra.mxu0 %vm57_vm0, %v345_v46  ;;  %888 = vmatmul.mubr.msk.bf16.gmra.mxu1 %vm57_vm0, %v349_v21  ;;  %v290_v18 = vmul.f32 %v1019_v48, %v1336_v27  ;;  %v332_v22 = vadd.f32 %v1411_v49, %v307_v47 }
 0x14f   :  { %501 = vmatprep.mubr.bf16.mxu0 %v1100_v35  ;;  %541 = vmatprep.mubr.bf16.mxu1 %v1100_v35  ;;  %v339_v50 = vadd.f32 %v1411_v49, %v314_v53  ;;  %v283_v27 = vmul.f32 %v1021_v52, %v1346_v28 }
 0x150   :  { %v315_v23 = vmul.f32 %v1404_v9, %v290_v18  ;;  %v346_v61 = vpack.c.bf16 %v332_v22, %v331_v55 }
 0x151   :  { %v1023_v54 = vpop.eup %1022  ;;  %v308_v63 = vmul.f32 %v1404_v9, %v283_v27 }
 0x152   :  { %v1025_v26 = vpop.eup %1024  ;;  %v340_v56 = vadd.f32 %v1411_v49, %v315_v23  ;;  %v284_v59 = vmul.f32 %v1023_v54, %v1350_v32 }
 0x153   :  { %v291_v60 = vmul.f32 %v1025_v26, %v1366_v14  ;;  %v333_v14 = vadd.f32 %v1411_v49, %v308_v63 }
 0x154   :  { %v350_v58 = vpack.c.bf16 %v340_v56, %v339_v50  ;;  %v309_v1 = vmul.f32 %v1404_v9, %v284_v59 }
 0x155   :  { %v1027_v62 = vpop.eup %1026  ;;  %v316_v31 = vmul.f32 %v1404_v9, %v291_v60 }
 0x156   :  { %885 = vmatmul.mubr.msk.bf16.gmra.mxu0 %vm57_vm0, %v346_v61  ;;  %889 = vmatmul.mubr.msk.bf16.gmra.mxu1 %vm57_vm0, %v350_v58  ;;  %v292_v2 = vmul.f32 %v1027_v62, %v1370_v15  ;;  %v334_v28 = vadd.f32 %v1411_v49, %v309_v1  ;;  %v362_v15 = vlaneseq }
 0x157   :  { %511 = vmatprep.mubr.bf16.mxu0 %v1100_v35  ;;  %551 = vmatprep.mubr.bf16.mxu1 %v1100_v35  ;;  %v341_v3 = vadd.f32 %v1411_v49, %v316_v31  ;;  %v360_v35 = vld [vmem:[%s1689_s4] sm:$0x3] }
 0x158   :  { %v317_v32 = vmul.f32 %v1404_v9, %v292_v2  ;;  %v347_v5 = vpack.c.bf16 %v334_v28, %v333_v14  ;;  %v363_v8 = vshrl.u32 %v362_v15, 7 }
 0x15a   :  { %v342_v0 = vadd.f32 %v1411_v49, %v317_v32  ;;  %v364_v4 = vsub.s32 0, %v363_v8  ;;  %v368_v9 = vsub.s32 1, %v363_v8 }
 0x15c   :  { %v351_v7 = vpack.c.bf16 %v342_v0, %v341_v3  ;;  %v1483_v36 = vrot.slane %v360_v35, %v364_v4  ;;  %v1485_v33 = vrot.slane %v360_v35, %v368_v9 }
 0x15e   :  { %886 = vmatmul.mubr.msk.bf16.gmra.mxu0 %vm57_vm0, %v347_v5  ;;  %890 = vmatmul.mubr.msk.bf16.gmra.mxu1 %vm57_vm0, %v351_v7 }
 0x1fe   :  { %v473_v37 = vpop.f32.mrf.mxu0 }
 0x1ff   :  { %v474_v49 = vadd.f32 %v473_v37, %v1483_v36 }
 0x200   :  { %v475_v10 = vpop.f32.mrf.mxu0 }
 0x201   :  { %v598_v11 = vmul.f32 0.70710677, %v474_v49  ;;  %v476_v19 = vadd.f32 %v475_v10, %v1485_v33  ;;  %v562_v53 = vmul.f32 0.5, %v474_v49 }
 0x202   :  { %v477_v20 = vpop.f32.mrf.mxu0 }
 0x203   :  { %1028 = verf.f32 %v598_v11  ;;  %v599_v24 = vmul.f32 0.70710677, %v476_v19  ;;  %v478_v41 = vadd.f32 %v477_v20, %v1483_v36  ;;  %v563_v26 = vmul.f32 0.5, %v476_v19 }
 0x204   :  { %v479_v38 = vpop.f32.mrf.mxu0 }
 0x205   :  { %1030 = verf.f32 %v599_v24  ;;  %v600_v42 = vmul.f32 0.70710677, %v478_v41  ;;  %v480_v25 = vadd.f32 %v479_v38, %v1485_v33  ;;  %v564_v59 = vmul.f32 0.5, %v478_v41 }
 0x206   :  { %v483_v6 = vpop.f32.mrf.mxu0  ;;  %v523_v29 = vpop.f32.mrf.mxu1 }
 0x207   :  { %1032 = verf.f32 %v600_v42  ;;  %v601_v12 = vmul.f32 0.70710677, %v480_v25  ;;  %v484_v30 = vadd.f32 %v483_v6, %v1483_v36  ;;  %v524_v13 = vadd.f32 %v523_v29, %v1483_v36 }
 0x208   :  { %v485_v34 = vpop.f32.mrf.mxu0  ;;  %v525_v16 = vpop.f32.mrf.mxu1  ;;  %v565_v63 = vmul.f32 0.5, %v480_v25 }
 0x209   :  { %1034 = verf.f32 %v601_v12  ;;  %v602_v39 = vmul.f32 0.70710677, %v484_v30  ;;  %v486_v40 = vadd.f32 %v485_v34, %v1485_v33  ;;  %v618_v43 = vmul.f32 0.70710677, %v524_v13 }
 0x20a   :  { %v526_v44 = vadd.f32 %v525_v16, %v1485_v33  ;;  %v487_v17 = vpop.f32.mrf.mxu0  ;;  %v527_v57 = vpop.f32.mrf.mxu1  ;;  %v566_v28 = vmul.f32 0.5, %v484_v30  ;;  %v582_v7 = vmul.f32 0.5, %v524_v13 }
 0x20b   :  { %1036 = verf.f32 %v602_v39  ;;  %v603_v45 = vmul.f32 0.70710677, %v486_v40  ;;  %v488_v46 = vadd.f32 %v487_v17, %v1483_v36  ;;  %v1497_v47 = vadd.f32 %v527_v57, %v1483_v36 }
 0x20c   :  { %1038 = verf.f32 %v618_v43  ;;  %v619_v21 = vmul.f32 0.70710677, %v526_v44  ;;  %v489_v48 = vpop.f32.mrf.mxu0  ;;  %v529_v51 = vpop.f32.mrf.mxu1  ;;  %v567_v4 = vmul.f32 0.5, %v486_v40  ;;  %v583_v41 = vmul.f32 0.5, %v526_v44 }
 0x20d   :  { %1040 = verf.f32 %v603_v45  ;;  %v604_v52 = vmul.f32 0.70710677, %v488_v46  ;;  %v1500_v18 = vadd.f32 %v489_v48, %v1485_v33  ;;  %v620_v22 = vmul.f32 0.70710677, %v1497_v47 }
 0x20e   :  { %1042 = verf.f32 %v619_v21  ;;  %v1504_v23 = vadd.f32 %v529_v51, %v1485_v33  ;;  %v493_v54 = vpop.f32.mrf.mxu0  ;;  %v533_v55 = vpop.f32.mrf.mxu1  ;;  %v568_v30 = vmul.f32 0.5, %v488_v46  ;;  %v584_v48 = vmul.f32 0.5, %v1497_v47 }
 0x20f   :  { %1044 = verf.f32 %v604_v52  ;;  %v605_v50 = vmul.f32 0.70710677, %v1500_v18  ;;  %v1508_v56 = vadd.f32 %v493_v54, %v1483_v36  ;;  %v1512_v61 = vadd.f32 %v533_v55, %v1483_v36 }
 0x210   :  { %v1029_v27 = vpop.eup %1028  ;;  %1046 = verf.f32 %v620_v22  ;;  %v621_v60 = vmul.f32 0.70710677, %v1504_v23  ;;  %v495_v58 = vpop.f32.mrf.mxu0 }
 0x211   :  { %v535_v1 = vpop.f32.mrf.mxu1  ;;  %v670_v62 = vadd.f32 1.0, %v1029_v27  ;;  %1048 = verf.f32 %v605_v50  ;;  %v606_v2 = vmul.f32 0.70710677, %v1508_v56  ;;  %v622_v32 = vmul.f32 0.70710677, %v1512_v61 }
 0x212   :  { %v1031_v31 = vpop.eup %1030  ;;  %1050 = verf.f32 %v621_v60  ;;  %v1517_v14 = vadd.f32 %v495_v58, %v1485_v33  ;;  %v497_v3 = vpop.f32.mrf.mxu0  ;;  %v1520_v15 = vadd.f32 %v535_v1, %v1485_v33  ;;  %v585_v50 = vmul.f32 0.5, %v1504_v23 }
 0x213   :  { %v537_v0 = vpop.f32.mrf.mxu1  ;;  %v671_v5 = vadd.f32 1.0, %v1031_v31  ;;  %1052 = verf.f32 %v606_v2  ;;  %v1524_v9 = vadd.f32 %v497_v3, %v1483_v36  ;;  %v706_v10 = vmul.f32 %v670_v62, %v562_v53 }
 0x214   :  { %v1033_v8 = vpop.eup %1032  ;;  %1054 = verf.f32 %v622_v32  ;;  %v607_v35 = vmul.f32 0.70710677, %v1517_v14  ;;  %v499_v37 = vpop.f32.mrf.mxu0  ;;  %v623_v20 = vmul.f32 0.70710677, %v1520_v15  ;;  %v1529_v42 = vadd.f32 %v537_v0, %v1483_v36 }
 0x215   :  { %v539_v49 = vpop.f32.mrf.mxu1  ;;  %v707_v11 = vmul.f32 %v671_v5, %v563_v26  ;;  %v672_v19 = vadd.f32 1.0, %v1033_v8  ;;  %v608_v38 = vmul.f32 0.70710677, %v1524_v9  ;;  %v1533_v39 = vadd.f32 %v499_v37, %v1485_v33 }
 0x216   :  { %v1035_v24 = vpop.eup %1034  ;;  %1056 = verf.f32 %v607_v35  ;;  %v503_v25 = vpop.f32.mrf.mxu0  ;;  %v624_v16 = vmul.f32 0.70710677, %v1529_v42  ;;  %v1539_v57 = vadd.f32 %v539_v49, %v1485_v33  ;;  %v569_v26 = vmul.f32 0.5, %v1500_v18 }
 0x217   :  { %v543_v6 = vpop.f32.mrf.mxu1  ;;  %v909_v29 = vpack.c.bf16 %v707_v11, %v706_v10  ;;  %v673_v12 = vadd.f32 1.0, %v1035_v24  ;;  %1058 = verf.f32 %v623_v20  ;;  %v708_v34 = vmul.f32 %v672_v19, %v564_v59 }
 0x218   :  { %v1037_v13 = vpop.eup %1036  ;;  %1060 = verf.f32 %v608_v38  ;;  %v505_v40 = vpop.f32.mrf.mxu0  ;;  %v1542_v45 = vadd.f32 %v503_v25, %v1483_v36  ;;  %v609_v51 = vmul.f32 0.70710677, %v1533_v39  ;;  %v625_v58 = vmul.f32 0.70710677, %v1539_v57 }
 0x219   :  { %v1039_v43 = vpop.eup %1038  ;;  %850 = vst [vmem:[%s1690_s5] sm:$0xff] %v909_v29  ;;  %v709_v44 = vmul.f32 %v673_v12, %v565_v63  ;;  %v674_v17 = vadd.f32 1.0, %v1037_v13  ;;  %1062 = verf.f32 %v624_v16  ;;  %v545_v52 = vpop.f32.mrf.mxu1  ;;  %v1554_v23 = vadd.f32 %v543_v6, %v1483_v36 }
 0x21a   :  { %v1041_v46 = vpop.eup %1040  ;;  %v690_v21 = vadd.f32 1.0, %v1039_v43  ;;  %v507_v53 = vpop.f32.mrf.mxu0  ;;  %1064 = verf.f32 %v609_v51  ;;  %v610_v2 = vmul.f32 0.70710677, %v1542_v45  ;;  %v570_v37 = vmul.f32 0.5, %v1508_v56 }
 0x21b   :  { %v1043_v22 = vpop.eup %1042  ;;  %v910_v54 = vpack.c.bf16 %v709_v44, %v708_v34  ;;  %v675_v55 = vadd.f32 1.0, %v1041_v46  ;;  %v710_v59 = vmul.f32 %v674_v17, %v566_v28  ;;  %1066 = verf.f32 %v625_v58  ;;  %v547_v28 = vpop.f32.mrf.mxu1 }
 0x21c   :  { %v1045_v27 = vpop.eup %1044  ;;  %v691_v60 = vadd.f32 1.0, %v1043_v22  ;;  %v726_v47 = vmul.f32 %v690_v21, %v582_v7  ;;  %v509_v3 = vpop.f32.mrf.mxu0  ;;  %1068 = verf.f32 %v610_v2  ;;  %v626_v24 = vmul.f32 0.70710677, %v1554_v23 }
 0x21d   :  { %v1047_v1 = vpop.eup %1046  ;;  %851 = vst [vmem:[%s1690_s5 + $0x8] sm:$0xff] %v910_v54  ;;  %v711_v62 = vmul.f32 %v675_v55, %v567_v4  ;;  %v676_v63 = vadd.f32 1.0, %v1045_v27  ;;  %v1568_v25 = vadd.f32 %v545_v52, %v1485_v33  ;;  %v1571_v6 = vadd.f32 %v507_v53, %v1483_v36  ;;  %v549_v29 = vpop.f32.mrf.mxu1 }
 0x21e   :  { %v1049_v31 = vpop.eup %1048  ;;  %v727_v18 = vmul.f32 %v691_v60, %v583_v41  ;;  %v692_v32 = vadd.f32 1.0, %v1047_v1  ;;  %v1562_v41 = vadd.f32 %v505_v40, %v1485_v33  ;;  %v513_v12 = vpop.f32.mrf.mxu0  ;;  %v586_v34 = vmul.f32 0.5, %v1512_v61 }
 0x21f   :  { %v1051_v0 = vpop.eup %1050  ;;  %v911_v5 = vpack.c.bf16 %v711_v62, %v710_v59  ;;  %v712_v8 = vmul.f32 %v676_v63, %v568_v30  ;;  %v677_v35 = vadd.f32 1.0, %v1049_v31  ;;  %v571_v16 = vmul.f32 0.5, %v1517_v14  ;;  %v553_v22 = vpop.f32.mrf.mxu1 }
 0x220   :  { %v1053_v7 = vpop.eup %1052  ;;  %v919_v4 = vpack.c.bf16 %v727_v18, %v726_v47  ;;  %v728_v49 = vmul.f32 %v692_v32, %v584_v48  ;;  %v693_v10 = vadd.f32 1.0, %v1051_v0  ;;  %1070 = verf.f32 %v626_v24  ;;  %v515_v54 = vpop.f32.mrf.mxu0 }
 0x221   :  { %v1055_v11 = vpop.eup %1054  ;;  %852 = vst [vmem:[%s1690_s5 + $0x10] sm:$0xff] %v911_v5  ;;  %v713_v19 = vmul.f32 %v677_v35, %v569_v26  ;;  %v678_v20 = vadd.f32 1.0, %v1053_v7  ;;  %v587_v17 = vmul.f32 0.5, %v1520_v15  ;;  %v611_v46 = vmul.f32 0.70710677, %v1562_v41 }
 0x222   :  { %860 = vst [vmem:[%s1690_s5 + $0x50] sm:$0xff] %v919_v4  ;;  %v729_v56 = vmul.f32 %v693_v10, %v585_v50  ;;  %v694_v38 = vadd.f32 1.0, %v1055_v11  ;;  %v572_v52 = vmul.f32 0.5, %v1524_v9  ;;  %v627_v61 = vmul.f32 0.70710677, %v1568_v25 }
 0x223   :  { %v1057_v30 = vpop.eup %1056  ;;  %v912_v13 = vpack.c.bf16 %v713_v19, %v712_v8  ;;  %v714_v48 = vmul.f32 %v678_v20, %v570_v37  ;;  %1072 = verf.f32 %v611_v46  ;;  %v612_v15 = vmul.f32 0.70710677, %v1571_v6 }
 0x224   :  { %v1059_v40 = vpop.eup %1058  ;;  %v920_v43 = vpack.c.bf16 %v729_v56, %v728_v49  ;;  %v679_v44 = vadd.f32 1.0, %v1057_v30  ;;  %v730_v14 = vmul.f32 %v694_v38, %v586_v34  ;;  %1074 = verf.f32 %v627_v61 }
 0x225   :  { %v1061_v21 = vpop.eup %1060  ;;  %853 = vst [vmem:[%s1690_s5 + $0x18] sm:$0xff] %v912_v13  ;;  %v695_v51 = vadd.f32 1.0, %v1059_v40  ;;  %v1587_v50 = vadd.f32 %v547_v28, %v1483_v36  ;;  %v1590_v9 = vadd.f32 %v509_v3, %v1485_v33  ;;  %v588_v60 = vmul.f32 0.5, %v1529_v42  ;;  %v555_v42 = vpop.f32.mrf.mxu1 }
 0x226   :  { %861 = vst [vmem:[%s1690_s5 + $0x58] sm:$0xff] %v920_v43  ;;  %v715_v53 = vmul.f32 %v679_v44, %v571_v16  ;;  %v1063_v55 = vpop.eup %1062  ;;  %v680_v59 = vadd.f32 1.0, %v1061_v21  ;;  %1076 = verf.f32 %v612_v15  ;;  %v573_v47 = vmul.f32 0.5, %v1533_v39  ;;  %v517_v28 = vpop.f32.mrf.mxu0 }
 0x227   :  { %v731_v26 = vmul.f32 %v695_v51, %v587_v17  ;;  %v1065_v58 = vpop.eup %1064  ;;  %v589_v62 = vmul.f32 0.5, %v1539_v57  ;;  %v628_v63 = vmul.f32 0.70710677, %v1587_v50  ;;  %v696_v2 = vadd.f32 1.0, %v1063_v55  ;;  %v557_v20 = vpop.f32.mrf.mxu1 }
 0x228   :  { %v913_v27 = vpack.c.bf16 %v715_v53, %v714_v48  ;;  %v681_v31 = vadd.f32 1.0, %v1065_v58  ;;  %v613_v18 = vmul.f32 0.70710677, %v1590_v9  ;;  %v1601_v32 = vadd.f32 %v549_v29, %v1485_v33  ;;  %v1067_v3 = vpop.eup %1066  ;;  %v519_v24 = vpop.f32.mrf.mxu0 }
 0x229   :  { %v921_v1 = vpack.c.bf16 %v731_v26, %v730_v14  ;;  %1078 = verf.f32 %v628_v63  ;;  %v1607_v39 = vadd.f32 %v513_v12, %v1483_v36  ;;  %v1610_v57 = vadd.f32 %v553_v22, %v1483_v36  ;;  %v1069_v37 = vpop.eup %1068  ;;  %v559_v44 = vpop.f32.mrf.mxu1 }
 0x22a   :  { %854 = vst [vmem:[%s1690_s5 + $0x20] sm:$0xff] %v913_v27  ;;  %v1613_v0 = vadd.f32 %v515_v54, %v1485_v33  ;;  %v716_v5 = vmul.f32 %v680_v59, %v572_v52  ;;  %v717_v8 = vmul.f32 %v681_v31, %v573_v47  ;;  %v697_v35 = vadd.f32 1.0, %v1067_v3 }
 0x22b   :  { %862 = vst [vmem:[%s1690_s5 + $0x60] sm:$0xff] %v921_v1  ;;  %1080 = verf.f32 %v613_v18  ;;  %v629_v7 = vmul.f32 0.70710677, %v1601_v32  ;;  %v614_v4 = vmul.f32 0.70710677, %v1607_v39  ;;  %v732_v49 = vmul.f32 %v696_v2, %v588_v60 }
 0x22c   :  { %v914_v10 = vpack.c.bf16 %v717_v8, %v716_v5  ;;  %v733_v11 = vmul.f32 %v697_v35, %v589_v62  ;;  %v630_v19 = vmul.f32 0.70710677, %v1610_v57  ;;  %v615_v56 = vmul.f32 0.70710677, %v1613_v0 }
 0x22d   :  { %1082 = verf.f32 %v629_v7  ;;  %v1071_v38 = vpop.eup %1070  ;;  %v1623_v12 = vadd.f32 %v555_v42, %v1485_v33  ;;  %v1626_v30 = vadd.f32 %v517_v28, %v1483_v36  ;;  %v1629_v13 = vadd.f32 %v557_v20, %v1483_v36 }
 0x22e   :  { %855 = vst [vmem:[%s1690_s5 + $0x28] sm:$0xff] %v914_v10  ;;  %v922_v29 = vpack.c.bf16 %v733_v11, %v732_v49  ;;  %1084 = verf.f32 %v614_v4  ;;  %v1632_v34 = vadd.f32 %v519_v24, %v1485_v33  ;;  %v574_v16 = vmul.f32 0.5, %v1542_v45 }
 0x22f   :  { %1086 = verf.f32 %v630_v19  ;;  %v682_v40 = vadd.f32 1.0, %v1069_v37  ;;  %v631_v43 = vmul.f32 0.70710677, %v1623_v12  ;;  %v590_v46 = vmul.f32 0.5, %v1554_v23 }
 0x230   :  { %863 = vst [vmem:[%s1690_s5 + $0x68] sm:$0xff] %v922_v29  ;;  %1088 = verf.f32 %v615_v56  ;;  %v1073_v17 = vpop.eup %1072  ;;  %v698_v21 = vadd.f32 1.0, %v1071_v38  ;;  %v616_v36 = vmul.f32 0.70710677, %v1626_v30  ;;  %v632_v48 = vmul.f32 0.70710677, %v1629_v13 }
 0x231   :  { %v1075_v51 = vpop.eup %1074  ;;  %v575_v52 = vmul.f32 0.5, %v1562_v41  ;;  %v683_v61 = vadd.f32 1.0, %v1073_v17  ;;  %1090 = verf.f32 %v631_v43  ;;  %v617_v45 = vmul.f32 0.70710677, %v1632_v34 }
 0x232   :  { %v591_v53 = vmul.f32 0.5, %v1568_v25  ;;  %v699_v15 = vadd.f32 1.0, %v1075_v51  ;;  %1092 = verf.f32 %v616_v36  ;;  %v1646_v22 = vadd.f32 %v559_v44, %v1485_v33 }
 0x233   :  { %v1077_v14 = vpop.eup %1076  ;;  %v718_v23 = vmul.f32 %v682_v40, %v574_v16  ;;  %v719_v54 = vmul.f32 %v683_v61, %v575_v52  ;;  %1094 = verf.f32 %v632_v48  ;;  %v734_v55 = vmul.f32 %v698_v21, %v590_v46 }
 0x234   :  { %v735_v26 = vmul.f32 %v699_v15, %v591_v53  ;;  %1096 = verf.f32 %v617_v45  ;;  %v633_v41 = vmul.f32 0.70710677, %v1646_v22  ;;  %v684_v60 = vadd.f32 1.0, %v1077_v14 }
 0x235   :  { %v915_v59 = vpack.c.bf16 %v719_v54, %v718_v23  ;;  %v576_v33 = vmul.f32 0.5, %v1571_v6  ;;  %v577_v25 = vmul.f32 0.5, %v1590_v9  ;;  %v592_v42 = vmul.f32 0.5, %v1587_v50 }
 0x236   :  { %v1079_v27 = vpop.eup %1078  ;;  %v923_v1 = vpack.c.bf16 %v735_v26, %v734_v55  ;;  %1098 = verf.f32 %v633_v41  ;;  %v593_v28 = vmul.f32 0.5, %v1601_v32  ;;  %v578_v7 = vmul.f32 0.5, %v1607_v39 }
 0x237   :  { %856 = vst [vmem:[%s1690_s5 + $0x30] sm:$0xff] %v915_v59  ;;  %v700_v62 = vadd.f32 1.0, %v1079_v27  ;;  %v720_v2 = vmul.f32 %v684_v60, %v576_v33  ;;  %v579_v49 = vmul.f32 0.5, %v1613_v0  ;;  %v594_v32 = vmul.f32 0.5, %v1610_v57 }
 0x238   :  { %v1081_v58 = vpop.eup %1080  ;;  %864 = vst [vmem:[%s1690_s5 + $0x70] sm:$0xff] %v923_v1  ;;  %v595_v56 = vmul.f32 0.5, %v1623_v12  ;;  %v580_v44 = vmul.f32 0.5, %v1626_v30  ;;  %v581_v57 = vmul.f32 0.5, %v1632_v34  ;;  %v596_v36 = vmul.f32 0.5, %v1629_v13 }
 0x239   :  { %v685_v47 = vadd.f32 1.0, %v1081_v58  ;;  %v736_v9 = vmul.f32 %v700_v62, %v592_v42  ;;  %v597_v52 = vmul.f32 0.5, %v1646_v22 }
 0x23a   :  { %v1083_v63 = vpop.eup %1082 }
 0x23b   :  { %v721_v31 = vmul.f32 %v685_v47, %v577_v25  ;;  %v1085_v18 = vpop.eup %1084  ;;  %v701_v3 = vadd.f32 1.0, %v1083_v63 }
 0x23c   :  { %v1087_v5 = vpop.eup %1086  ;;  %v686_v6 = vadd.f32 1.0, %v1085_v18 }
 0x23d   :  { %v916_v8 = vpack.c.bf16 %v721_v31, %v720_v2  ;;  %v1089_v35 = vpop.eup %1088  ;;  %v737_v37 = vmul.f32 %v701_v3, %v593_v28  ;;  %v702_v4 = vadd.f32 1.0, %v1087_v5 }
 0x23e   :  { %v687_v10 = vadd.f32 1.0, %v1089_v35  ;;  %v1091_v50 = vpop.eup %1090  ;;  %v722_v20 = vmul.f32 %v686_v6, %v578_v7 }
 0x23f   :  { %857 = vst [vmem:[%s1690_s5 + $0x38] sm:$0xff] %v916_v8  ;;  %v924_v11 = vpack.c.bf16 %v737_v37, %v736_v9  ;;  %v1093_v19 = vpop.eup %1092  ;;  %v703_v38 = vadd.f32 1.0, %v1091_v50  ;;  %v738_v40 = vmul.f32 %v702_v4, %v594_v32 }
 0x240   :  { %v723_v24 = vmul.f32 %v687_v10, %v579_v49  ;;  %v1095_v29 = vpop.eup %1094  ;;  %v688_v39 = vadd.f32 1.0, %v1093_v19 }
 0x241   :  { %865 = vst [vmem:[%s1690_s5 + $0x78] sm:$0xff] %v924_v11  ;;  %v1097_v16 = vpop.eup %1096  ;;  %v739_v43 = vmul.f32 %v703_v38, %v595_v56  ;;  %v704_v17 = vadd.f32 1.0, %v1095_v29 }
 0x242   :  { %v917_v0 = vpack.c.bf16 %v723_v24, %v722_v20  ;;  %v689_v46 = vadd.f32 1.0, %v1097_v16  ;;  %v724_v48 = vmul.f32 %v688_v39, %v580_v44 }
 0x243   :  { %v1099_v21 = vpop.eup %1098  ;;  %v925_v12 = vpack.c.bf16 %v739_v43, %v738_v40  ;;  %v740_v30 = vmul.f32 %v704_v17, %v596_v36 }
 0x244   :  { %858 = vst [vmem:[%s1690_s5 + $0x40] sm:$0xff] %v917_v0  ;;  %v725_v51 = vmul.f32 %v689_v46, %v581_v57  ;;  %v705_v61 = vadd.f32 1.0, %v1099_v21 }
 0x245   :  { %866 = vst [vmem:[%s1690_s5 + $0x80] sm:$0xff] %v925_v12 }
 0x246   :  { %v918_v34 = vpack.c.bf16 %v725_v51, %v724_v48  ;;  %v741_v45 = vmul.f32 %v705_v61, %v597_v52 }
 0x248   :  { %859 = vst [vmem:[%s1690_s5 + $0x48] sm:$0xff] %v918_v34  ;;  %v926_v14 = vpack.c.bf16 %v741_v45, %v740_v30 }
 0x24a   :  { %867 = vst [vmem:[%s1690_s5 + $0x88] sm:$0xff] %v926_v14 }

// kernel: relative_mhsa_block.9
= control target key start
LH: loop header
LB: loop body
LE: loop exit
PB: predicated region body
PF: predicated region fallthrough
CT: control target
= control target key end

     0   :  { %vm438_vm0 = vcmask 523264   ;;  %s918_s1 = inlined_call_operand.vmem [shape: bf16[256,64], index: 1, kind: input, shape index: {}]   ;;  %s919_s0 = inlined_call_operand.vmem [shape: bf16[144,256], index: 0, kind: input, shape index: {}]   ;;  %s920_s3 = inlined_call_operand.vmem [shape: bf16[144,64], index: 3, kind: input, shape index: {}]   ;;  %s921_s2 = inlined_call_operand.vmem [shape: f32[1,64], index: 2, kind: input, shape index: {}]   ;;  %s922_s4 = inlined_call_operand.vmem [shape: f32[144,64], index: 4, kind: output, shape index: {}]  }
   0x1   :  { %v626_v0 = vld [vmem:[%s918_s1 + $0x78] sm:$0xff]   ;;  %v628_v2 = vld [vmem:[%s918_s1 + $0x70] sm:$0xff]   ;;  %v630_v4 = vld [vmem:[%s918_s1 + $0x68] sm:$0xff]  }
   0x2   :  { %v627_v1 = vld [vmem:[%s918_s1 + $0x38] sm:$0xff]   ;;  %540 = vmatprep.subr.bf16.mxu0 %v626_v0  ;;  %610 = vmatprep.subr.bf16.mxu1 %v626_v0  ;;  %v629_v3 = vld [vmem:[%s918_s1 + $0x30] sm:$0xff]   ;;  %v631_v5 = vld [vmem:[%s918_s1 + $0x28] sm:$0xff]  }
   0x3   :  { %541 = vmatpush3.bf16.msra.mxu0 %v627_v1  ;;  %618 = vmatpush3.bf16.msra.mxu1 %v627_v1  ;;  %v632_v6 = vld [vmem:[%s918_s1 + $0x60] sm:$0xff]   ;;  %v634_v8 = vld [vmem:[%s918_s1 + $0x58] sm:$0xff]   ;;  %v636_v10 = vld [vmem:[%s918_s1 + $0x50] sm:$0xff]  }
   0x4   :  { %542 = vmatprep.subr.bf16.mxu0 %v628_v2  ;;  %611 = vmatprep.subr.bf16.mxu1 %v628_v2  ;;  %v633_v7 = vld [vmem:[%s918_s1 + $0x20] sm:$0xff]   ;;  %v635_v9 = vld [vmem:[%s918_s1 + $0x18] sm:$0xff]   ;;  %v637_v13 = vld [vmem:[%s918_s1 + $0x10] sm:$0xff]  }
   0x5   :  { %v644_v11 = vld [vmem:[%s919_s0 + $0x4] ss:$8 sps:$4 sm:$0xff]   ;;  %v647_v12 = vld [vmem:[%s919_s0 + $0x54] ss:$8 sps:$4 sm:$0xff]   ;;  %v642_v18 = vld [vmem:[%s919_s0] ss:$8 sps:$4 sm:$0xff]  }
   0x6   :  { %v638_v14 = vld [vmem:[%s918_s1 + $0x48] sm:$0xff]   ;;  %286 = vmatprep.mubr.bf16.mxu0 %v644_v11  ;;  %326 = vmatprep.mubr.bf16.mxu1 %v647_v12  ;;  %v640_v16 = vld [vmem:[%s918_s1 + $0x40] sm:$0xff]   ;;  %v645_v19 = vld [vmem:[%s919_s0 + $0x50] ss:$8 sps:$4 sm:$0xff]  }
   0x7   :  { %543 = vmatpush3.bf16.msra.mxu0 %v629_v3  ;;  %619 = vmatpush3.bf16.msra.mxu1 %v629_v3  ;;  %v639_v15 = vld [vmem:[%s918_s1 + $0x8] sm:$0xff]   ;;  %v641_v17 = vld [vmem:[%s918_s1] sm:$0xff]   ;;  %v648_v20 = vld [vmem:[%s919_s0 + $0x14] ss:$8 sps:$4 sm:$0xff]  }
   0x8   :  { %544 = vmatprep.subr.bf16.mxu0 %v630_v4  ;;  %612 = vmatprep.subr.bf16.mxu1 %v630_v4  ;;  %v651_v21 = vld [vmem:[%s919_s0 + $0x64] ss:$8 sps:$4 sm:$0xff]   ;;  %v650_v22 = vld [vmem:[%s919_s0 + $0x10] ss:$8 sps:$4 sm:$0xff]   ;;  %v653_v23 = vld [vmem:[%s919_s0 + $0x60] ss:$8 sps:$4 sm:$0xff]  }
   0x9   :  { %v654_v24 = vld [vmem:[%s919_s0 + $0x24] ss:$8 sps:$4 sm:$0xff]   ;;  %v657_v25 = vld [vmem:[%s919_s0 + $0x74] ss:$8 sps:$4 sm:$0xff]   ;;  %v656_v26 = vld [vmem:[%s919_s0 + $0x20] ss:$8 sps:$4 sm:$0xff]  }
   0xa   :  { %v659_v27 = vld [vmem:[%s919_s0 + $0x70] ss:$8 sps:$4 sm:$0xff]   ;;  %v660_v28 = vld [vmem:[%s919_s0 + $0x34] ss:$8 sps:$4 sm:$0xff]   ;;  %v663_v29 = vld [vmem:[%s919_s0 + $0x84] ss:$8 sps:$4 sm:$0xff]  }
   0xb   :  { %545 = vmatpush3.bf16.msra.mxu0 %v631_v5  ;;  %620 = vmatpush3.bf16.msra.mxu1 %v631_v5  ;;  %v662_v30 = vld [vmem:[%s919_s0 + $0x30] ss:$8 sps:$4 sm:$0xff]   ;;  %v665_v31 = vld [vmem:[%s919_s0 + $0x80] ss:$8 sps:$4 sm:$0xff]   ;;  %v666_v32 = vld [vmem:[%s919_s0 + $0x44] ss:$8 sps:$4 sm:$0xff]  }
   0xc   :  { %546 = vmatprep.subr.bf16.mxu0 %v632_v6  ;;  %613 = vmatprep.subr.bf16.mxu1 %v632_v6  ;;  %v668_v33 = vld [vmem:[%s919_s0 + $0x40] ss:$8 sps:$4 sm:$0xff]   ;;  %v537_v54 = vld [vmem:[%s920_s3 + $0x30] sm:$0xff]  }
   0xd   :  { %v497_v34 = vld [vmem:[%s920_s3] sm:$0xff]   ;;  %v536_v35 = vld [vmem:[%s920_s3 + $0x28] sm:$0xff]   ;;  %v522_v0 = vunpack.c.l.bf16 %v537_v54  ;;  %v523_v12 = vunpack.c.h.bf16 %v537_v54 }
   0xe   :  { %v498_v38 = vunpack.c.l.bf16 %v497_v34  ;;  %v518_v39 = vunpack.c.l.bf16 %v536_v35  ;;  %v805_v44 = vld [vmem:[%s921_s2] ss:$0 sm:$0xff]  ;;  %v499_v49 = vunpack.c.h.bf16 %v497_v34  ;;  %v519_v50 = vunpack.c.h.bf16 %v536_v35  ;;  %v532_v53 = vld [vmem:[%s920_s3 + $0x8] sm:$0xff]  }
   0xf   :  { %547 = vmatpush3.bf16.msra.mxu0 %v633_v7  ;;  %621 = vmatpush3.bf16.msra.mxu1 %v633_v7  ;;  %v502_v63 = vunpack.c.l.bf16 %v532_v53  ;;  %v503_v11 = vunpack.c.h.bf16 %v532_v53 }
  0x10   :  { %548 = vmatprep.subr.bf16.mxu0 %v634_v8  ;;  %614 = vmatprep.subr.bf16.mxu1 %v634_v8 }
  0x13   :  { %549 = vmatpush3.bf16.msra.mxu0 %v635_v9  ;;  %622 = vmatpush3.bf16.msra.mxu1 %v635_v9 }
  0x14   :  { %550 = vmatprep.subr.bf16.mxu0 %v636_v10  ;;  %615 = vmatprep.subr.bf16.mxu1 %v636_v10 }
  0x17   :  { %551 = vmatpush3.bf16.msra.mxu0 %v637_v13  ;;  %623 = vmatpush3.bf16.msra.mxu1 %v637_v13 }
  0x18   :  { %552 = vmatprep.subr.bf16.mxu0 %v638_v14  ;;  %616 = vmatprep.subr.bf16.mxu1 %v638_v14 }
  0x1b   :  { %553 = vmatpush3.bf16.msra.mxu0 %v639_v15  ;;  %624 = vmatpush3.bf16.msra.mxu1 %v639_v15  ;;  %v533_v15 = vld [vmem:[%s920_s3 + $0x10] sm:$0xff]  }
  0x1c   :  { %554 = vmatprep.subr.bf16.mxu0 %v640_v16  ;;  %617 = vmatprep.subr.bf16.mxu1 %v640_v16  ;;  %v538_v16 = vld [vmem:[%s920_s3 + $0x38] sm:$0xff]  }
  0x1f   :  { %555 = vmatpush3.bf16.msra.mxu0 %v641_v17  ;;  %625 = vmatpush3.bf16.msra.mxu1 %v641_v17 }
  0x22   :  { %287 = vmatmul.mubr.bf16.vlgmr.msra.gmra.mxu0 %v642_v18  ;;  %327 = vmatmul.mubr.bf16.vlgmr.msra.gmra.mxu1 %v645_v19 }
  0x23   :  { %294 = vmatprep.mubr.bf16.mxu0 %v648_v20  ;;  %334 = vmatprep.mubr.bf16.mxu1 %v651_v21 }
  0x2a   :  { %295 = vmatmul.mubr.bf16.gmra.mxu0 %v650_v22  ;;  %335 = vmatmul.mubr.bf16.gmra.mxu1 %v653_v23 }
  0x2b   :  { %302 = vmatprep.mubr.bf16.mxu0 %v654_v24  ;;  %342 = vmatprep.mubr.bf16.mxu1 %v657_v25  ;;  %v506_v25 = vunpack.c.l.bf16 %v533_v15 }
  0x32   :  { %303 = vmatmul.mubr.bf16.gmra.mxu0 %v656_v26  ;;  %343 = vmatmul.mubr.bf16.gmra.mxu1 %v659_v27  ;;  %v526_v26 = vunpack.c.l.bf16 %v538_v16 }
  0x33   :  { %310 = vmatprep.mubr.bf16.mxu0 %v660_v28  ;;  %350 = vmatprep.mubr.bf16.mxu1 %v663_v29 }
  0x3a   :  { %311 = vmatmul.mubr.bf16.gmra.mxu0 %v662_v30  ;;  %351 = vmatmul.mubr.bf16.gmra.mxu1 %v665_v31 }
  0x3b   :  { %318 = vmatprep.mubr.bf16.mxu0 %v666_v32 }
  0x42   :  { %319 = vmatmul.mubr.bf16.gmra.mxu0 %v668_v33 }
  0xe2   :  { %v556_v36 = vpop.f32.mrf.mxu0  ;;  %v586_v37 = vpop.f32.mrf.mxu1 }
  0xe4   :  { %v557_v40 = vpop.f32.mrf.mxu0  ;;  %v587_v41 = vpop.f32.mrf.mxu1 }
  0xe5   :  { %v558_v42 = vadd.f32 %v557_v40, %v556_v36  ;;  %v588_v43 = vadd.f32 %v587_v41, %v586_v37  ;;  %v507_v37 = vunpack.c.h.bf16 %v533_v15  ;;  %v534_v41 = vld [vmem:[%s920_s3 + $0x18] sm:$0xff]  }
  0xe6   :  { %v559_v45 = vpop.f32.mrf.mxu0  ;;  %v589_v46 = vpop.f32.mrf.mxu1 }
  0xe7   :  { %v395_v47 = vadd.f32 %v558_v42, %v498_v38  ;;  %v405_v48 = vadd.f32 %v588_v43, %v518_v39  ;;  %v527_v38 = vunpack.c.h.bf16 %v538_v16  ;;  %v539_v42 = vld [vmem:[%s920_s3 + $0x40] sm:$0xff]  }
  0xe8   :  { %v560_v51 = vpop.f32.mrf.mxu0  ;;  %v590_v52 = vpop.f32.mrf.mxu1  ;;  %v530_v53 = vunpack.c.l.bf16 %v539_v42 }
  0xe9   :  { %v420_v55 = vadd.f32 %v805_v44, %v395_v47  ;;  %v430_v56 = vadd.f32 %v805_v44, %v405_v48  ;;  %v561_v57 = vadd.f32 %v560_v51, %v559_v45  ;;  %v591_v58 = vadd.f32 %v590_v52, %v589_v46 }
  0xea   :  { %v562_v59 = vpop.f32.mrf.mxu0  ;;  %v592_v60 = vpop.f32.mrf.mxu1  ;;  %v510_v52 = vunpack.c.l.bf16 %v534_v41 }
  0xeb   :  { %439 = vst.msk [vmem:[%s922_s4] sm:$0xff] %vm438_vm0, %v420_v55  ;;  %449 = vst.msk [vmem:[%s922_s4 + $0x50] sm:$0xff] %vm438_vm0, %v430_v56  ;;  %v396_v61 = vadd.f32 %v561_v57, %v499_v49  ;;  %v406_v62 = vadd.f32 %v591_v58, %v519_v50 }
  0xec   :  { %v563_v1 = vpop.f32.mrf.mxu0  ;;  %v593_v2 = vpop.f32.mrf.mxu1 }
  0xed   :  { %v421_v3 = vadd.f32 %v805_v44, %v396_v61  ;;  %v431_v4 = vadd.f32 %v805_v44, %v406_v62  ;;  %v564_v5 = vadd.f32 %v563_v1, %v562_v59  ;;  %v594_v6 = vadd.f32 %v593_v2, %v592_v60 }
  0xee   :  { %v565_v7 = vpop.f32.mrf.mxu0  ;;  %v595_v8 = vpop.f32.mrf.mxu1  ;;  %v531_v1 = vunpack.c.h.bf16 %v539_v42 }
  0xef   :  { %440 = vst.msk [vmem:[%s922_s4 + $0x8] sm:$0xff] %vm438_vm0, %v421_v3  ;;  %450 = vst.msk [vmem:[%s922_s4 + $0x58] sm:$0xff] %vm438_vm0, %v431_v4  ;;  %v397_v9 = vadd.f32 %v564_v5, %v502_v63  ;;  %v407_v10 = vadd.f32 %v594_v6, %v522_v0  ;;  %v511_v0 = vunpack.c.h.bf16 %v534_v41  ;;  %v535_v4 = vld [vmem:[%s920_s3 + $0x20] sm:$0xff]  }
  0xf0   :  { %v566_v13 = vpop.f32.mrf.mxu0  ;;  %v596_v14 = vpop.f32.mrf.mxu1 }
  0xf1   :  { %v422_v17 = vadd.f32 %v805_v44, %v397_v9  ;;  %v432_v18 = vadd.f32 %v805_v44, %v407_v10  ;;  %v567_v19 = vadd.f32 %v566_v13, %v565_v7  ;;  %v597_v20 = vadd.f32 %v596_v14, %v595_v8 }
  0xf2   :  { %v568_v21 = vpop.f32.mrf.mxu0  ;;  %v598_v22 = vpop.f32.mrf.mxu1 }
  0xf3   :  { %441 = vst.msk [vmem:[%s922_s4 + $0x10] sm:$0xff] %vm438_vm0, %v422_v17  ;;  %451 = vst.msk [vmem:[%s922_s4 + $0x60] sm:$0xff] %vm438_vm0, %v432_v18  ;;  %v398_v23 = vadd.f32 %v567_v19, %v503_v11  ;;  %v408_v24 = vadd.f32 %v597_v20, %v523_v12  ;;  %v514_v12 = vunpack.c.l.bf16 %v535_v4  ;;  %v515_v19 = vunpack.c.h.bf16 %v535_v4 }
  0xf4   :  { %v569_v27 = vpop.f32.mrf.mxu0  ;;  %v599_v28 = vpop.f32.mrf.mxu1 }
  0xf5   :  { %v423_v29 = vadd.f32 %v805_v44, %v398_v23  ;;  %v433_v30 = vadd.f32 %v805_v44, %v408_v24  ;;  %v570_v31 = vadd.f32 %v569_v27, %v568_v21  ;;  %v600_v32 = vadd.f32 %v599_v28, %v598_v22 }
  0xf6   :  { %v571_v33 = vpop.f32.mrf.mxu0  ;;  %v601_v34 = vpop.f32.mrf.mxu1 }
  0xf7   :  { %442 = vst.msk [vmem:[%s922_s4 + $0x18] sm:$0xff] %vm438_vm0, %v423_v29  ;;  %452 = vst.msk [vmem:[%s922_s4 + $0x68] sm:$0xff] %vm438_vm0, %v433_v30  ;;  %v399_v35 = vadd.f32 %v570_v31, %v506_v25  ;;  %v409_v36 = vadd.f32 %v600_v32, %v526_v26 }
  0xf8   :  { %v572_v39 = vpop.f32.mrf.mxu0  ;;  %v602_v40 = vpop.f32.mrf.mxu1 }
  0xf9   :  { %v424_v43 = vadd.f32 %v805_v44, %v399_v35  ;;  %v434_v45 = vadd.f32 %v805_v44, %v409_v36  ;;  %v573_v46 = vadd.f32 %v572_v39, %v571_v33  ;;  %v603_v47 = vadd.f32 %v602_v40, %v601_v34 }
  0xfa   :  { %v574_v48 = vpop.f32.mrf.mxu0  ;;  %v604_v49 = vpop.f32.mrf.mxu1 }
  0xfb   :  { %443 = vst.msk [vmem:[%s922_s4 + $0x20] sm:$0xff] %vm438_vm0, %v424_v43  ;;  %453 = vst.msk [vmem:[%s922_s4 + $0x70] sm:$0xff] %vm438_vm0, %v434_v45  ;;  %v400_v50 = vadd.f32 %v573_v46, %v507_v37  ;;  %v410_v51 = vadd.f32 %v603_v47, %v527_v38 }
  0xfc   :  { %v575_v54 = vpop.f32.mrf.mxu0  ;;  %v605_v55 = vpop.f32.mrf.mxu1 }
  0xfd   :  { %v425_v56 = vadd.f32 %v805_v44, %v400_v50  ;;  %v435_v57 = vadd.f32 %v805_v44, %v410_v51  ;;  %v576_v58 = vadd.f32 %v575_v54, %v574_v48  ;;  %v606_v59 = vadd.f32 %v605_v55, %v604_v49 }
  0xfe   :  { %v577_v60 = vpop.f32.mrf.mxu0  ;;  %v607_v61 = vpop.f32.mrf.mxu1 }
  0xff   :  { %444 = vst.msk [vmem:[%s922_s4 + $0x28] sm:$0xff] %vm438_vm0, %v425_v56  ;;  %454 = vst.msk [vmem:[%s922_s4 + $0x78] sm:$0xff] %vm438_vm0, %v435_v57  ;;  %v401_v62 = vadd.f32 %v576_v58, %v510_v52  ;;  %v411_v63 = vadd.f32 %v606_v59, %v530_v53 }
 0x100   :  { %v578_v2 = vpop.f32.mrf.mxu0  ;;  %v608_v3 = vpop.f32.mrf.mxu1 }
 0x101   :  { %v426_v5 = vadd.f32 %v805_v44, %v401_v62  ;;  %v436_v6 = vadd.f32 %v805_v44, %v411_v63  ;;  %v579_v7 = vadd.f32 %v578_v2, %v577_v60  ;;  %v609_v8 = vadd.f32 %v608_v3, %v607_v61 }
 0x102   :  { %v580_v9 = vpop.f32.mrf.mxu0 }
 0x103   :  { %445 = vst.msk [vmem:[%s922_s4 + $0x30] sm:$0xff] %vm438_vm0, %v426_v5  ;;  %455 = vst.msk [vmem:[%s922_s4 + $0x80] sm:$0xff] %vm438_vm0, %v436_v6  ;;  %v402_v10 = vadd.f32 %v579_v7, %v511_v0  ;;  %v412_v11 = vadd.f32 %v609_v8, %v531_v1 }
 0x104   :  { %v581_v13 = vpop.f32.mrf.mxu0 }
 0x105   :  { %v427_v14 = vadd.f32 %v805_v44, %v402_v10  ;;  %v437_v15 = vadd.f32 %v805_v44, %v412_v11  ;;  %v582_v16 = vadd.f32 %v581_v13, %v580_v9 }
 0x106   :  { %v583_v17 = vpop.f32.mrf.mxu0 }
 0x107   :  { %446 = vst.msk [vmem:[%s922_s4 + $0x38] sm:$0xff] %vm438_vm0, %v427_v14  ;;  %456 = vst.msk [vmem:[%s922_s4 + $0x88] sm:$0xff] %vm438_vm0, %v437_v15  ;;  %v403_v18 = vadd.f32 %v582_v16, %v514_v12 }
 0x108   :  { %v584_v20 = vpop.f32.mrf.mxu0 }
 0x109   :  { %v428_v21 = vadd.f32 %v805_v44, %v403_v18  ;;  %v585_v22 = vadd.f32 %v584_v20, %v583_v17 }
 0x10b   :  { %447 = vst.msk [vmem:[%s922_s4 + $0x40] sm:$0xff] %vm438_vm0, %v428_v21  ;;  %v404_v23 = vadd.f32 %v585_v22, %v515_v19 }
 0x10d   :  { %v429_v24 = vadd.f32 %v805_v44, %v404_v23 }
 0x10f   :  { %448 = vst.msk [vmem:[%s922_s4 + $0x48] sm:$0xff] %vm438_vm0, %v429_v24 }

// kernel: relative_mhsa_block.7
= control target key start
LH: loop header
LB: loop body
LE: loop exit
PB: predicated region body
PF: predicated region fallthrough
CT: control target
= control target key end

     0   :  { %s4387_s21 = smov 0   ;;  %s4389_s22 = smov 0   ;;  %s6308_s0 = inlined_call_operand.vmem [shape: bf16[4,72,72], index: 0, kind: input, shape index: {}]   ;;  %s6309_s1 = inlined_call_operand.vmem [shape: bf16[2,72,64], index: 1, kind: input, shape index: {}]   ;;  %s6310_s2 = inlined_call_operand.vmem [shape: bf16[2,72,128], index: 2, kind: input, shape index: {}]   ;;  %s6311_s3 = inlined_call_operand.vmem [shape: bf16[2,72,64], index: 3, kind: input, shape index: {}]   ;;  %s6312_s4 = inlined_call_operand.vmem [shape: bf16[64,64], index: 4, kind: input, shape index: {}]   ;;  %s6313_s5 = inlined_call_operand.vmem [shape: f32[1,64], index: 5, kind: input, shape index: {}]   ;;  %s6314_s6 = inlined_call_operand.vmem [shape: bf16[2,72,64], index: 6, kind: output, shape index: {}]  }
   0x1   :  { %s4391_s23 = smov 0  }
   0x2 LB: > { %s28_s24 = sadd.s32 1, %s4335_s22  ;;  %p3469_p0 = scmp.ge.s32.totalorder %s4339_s23, 1  ;;  %s4339_s23 = sphi %s4391_s23, %s16_s23   ;;  %s4335_s22 = sphi %s4389_s22, %s6468_s22   ;;  %s4331_s21 = sphi %s4387_s21, %s6467_s21  }
   0x3   : > { %p30_p1 = scmp.ge.s32.totalorder %s28_s24, 2  ;;  %p260_p2 = scmp.lt.s32.totalorder %s4339_s23, 3 }
   0x5   : > { %s6470_s24 = smov (%p30_p1, %s28_s24), 0  ;;  %p261_p3 = pnand %p3469_p0, %p260_p2 }
   0x7   : > { %264 = sbr.rel (%p261_p3) target bundleno = 1896 (0x768), region = 44 }
   0xc   : > { %p312_p4 = scmp.lt.s32.totalorder %s4331_s21, 1  ;;  %v6315_v0 = vmov 0.0   ;;  %vm4342_vm0 = vmmov 0   ;;  %vm507_vm1 = vcmask 130048   ;;  %vm342_vm2 = vcmask 7168   ;;  %v3582_v17 = vld [vmem:[%s6308_s0] sm:$0xff]  }
   0xd   : > { %3768 = vmatprep.subr.bf16.mxu0 %v6315_v0  ;;  %3778 = vmatprep.mubr.msk.bf16.mxu0 %vm4342_vm0, %v6315_v0  ;;  %v4343_v16 = vmov -inf   ;;  %379 = vst.msk [vmem:[#allocation3] sm:$0xff] %vm342_vm2, %v6315_v0  ;;  %380 = vst.msk [vmem:[#allocation3 + $0x8] sm:$0xff] %vm342_vm2, %v6315_v0  ;;  %v3583_v18 = vunpack.c.l.bf16 %v3582_v17  ;;  %vm619_vm3 = vcmask 588800   ;;  %v3584_v21 = vunpack.c.h.bf16 %v3582_v17  ;;  %v3661_v23 = vld [vmem:[%s6308_s0 + $0x8] sm:$0xff]   ;;  %v3662_v34 = vld [vmem:[%s6308_s0 + $0x10] sm:$0xff]  }
   0xe   : > { %s6472_s21 = smov (!%p312_p4, %s4331_s21), 1  ;;  %3798 = vmatprep.subr.bf16.mxu1 %v6315_v0  ;;  %3808 = vmatprep.mubr.msk.bf16.mxu1 %vm4342_vm0, %v6315_v0  ;;  %343 = vst.msk [vmem:[#allocation2] sm:$0xff] %vm342_vm2, %v4343_v16  ;;  %344 = vst.msk [vmem:[#allocation2 + $0x8] sm:$0xff] %vm342_vm2, %v4343_v16  ;;  %v3587_v27 = vunpack.c.l.bf16 %v3661_v23  ;;  %v3588_v32 = vunpack.c.h.bf16 %v3661_v23  ;;  %v3591_v38 = vunpack.c.l.bf16 %v3662_v34  ;;  %v4344_v41 = vmov 0   ;;  %v3663_v46 = vld [vmem:[%s6308_s0 + $0x18] sm:$0xff]   ;;  %s4345_s18 = smov 64  }
   0xf   : > { %s4411_s25 = smul.u32 36, %s6472_s21  ;;  %345 = vst.msk [vmem:[#allocation2 + $0x10] sm:$0xff] %vm342_vm2, %v4343_v16  ;;  %346 = vst.msk [vmem:[#allocation2 + $0x18] sm:$0xff] %vm342_vm2, %v4343_v16  ;;  %4080 = vset.pattern.permute.xlu1 %v4344_v41  ;;  %4081 = vset.pattern.permute.xlu0 %v4344_v41  ;;  %v3592_v44 = vunpack.c.h.bf16 %v3662_v34  ;;  %v3595_v50 = vunpack.c.l.bf16 %v3663_v46  ;;  %v3596_v55 = vunpack.c.h.bf16 %v3663_v46  ;;  %v451_v57 = vld [vmem:[%s6308_s0 + $0x20] sm:$0xf]  ;;  %s4346_s19 = smov 112  }
  0x10   : > { %347 = vst.msk [vmem:[#allocation2 + $0x20] sm:$0xff] %vm342_vm2, %v4343_v16  ;;  %348 = vst.msk [vmem:[#allocation2 + $0x28] sm:$0xff] %vm342_vm2, %v4343_v16  ;;  %v460_v61 = vunpack.c.l.bf16 %v451_v57  ;;  %s4347_s20 = smov 96   ;;  %s4348_s21 = smov 80   ;;  %vm415_vm4 = vcmask 523264   ;;  %vm916_vm5 = vcmask 1043456  }
  0x11   : > { %s4417_s28 = scalar_lea.vmem %s6310_s2, %s4411_s25  ;;  %s316_s7 = scalar_lea.vmem %s6309_s1, %s4411_s25  ;;  %349 = vst.msk [vmem:[#allocation2 + $0x30] sm:$0xff] %vm342_vm2, %v4343_v16  ;;  %350 = vst.msk [vmem:[#allocation2 + $0x38] sm:$0xff] %vm342_vm2, %v4343_v16  ;;  %vm1586_vm6 = vcmask 261248   ;;  %vm2172_vm7 = vcmask 392448   ;;  %vm2758_vm8 = vcmask 523648   ;;  %vm3345_vm9 = vcmask 519168  }
  0x12   : > { %v4420_v1 = vld [vmem:[%s4417_s28 + $0x20] ss:$0 sps:$4 sm:$0xff]   ;;  %v4430_v3 = vld [vmem:[%s4417_s28 + $0x18] sm:$0xff]   ;;  %v4436_v5 = vld [vmem:[%s4417_s28 + $0x10] sm:$0xff]   ;;  %351 = vst.msk [vmem:[#allocation2 + $0x40] sm:$0xff] %vm342_vm2, %v4343_v16  ;;  %s4349_s26 = smov 48   ;;  %s6265_s30 = scalar_lea.vmem %s6311_s3, %s4411_s25 }
  0x13   : > { %v536_v2 = vsel %vm507_vm1, %v4420_v1, 0  ;;  %v533_v4 = vsel %vm507_vm1, %v4430_v3, 0  ;;  %v530_v6 = vsel %vm507_vm1, %v4436_v5, 0  ;;  %v4442_v7 = vld [vmem:[%s4417_s28 + $0x8] sm:$0xff]   ;;  %v4448_v9 = vld [vmem:[%s4417_s28] sm:$0xff]   ;;  %v4465_v13 = vld [vmem:[%s316_s7 + $0x10] sm:$0xff]   ;;  %s6275_s11 = scalar_lea.vmem %s6314_s6, %s4411_s25 }
  0x14   : > { %3769 = vmatpush3.bf16.xpose.msra.mxu0 %v536_v2  ;;  %v527_v8 = vsel %vm507_vm1, %v4442_v7, 0  ;;  %v524_v10 = vsel %vm507_vm1, %v4448_v9, 0  ;;  %v4453_v11 = vld [vmem:[%s316_s7] sm:$0xff]   ;;  %v4459_v12 = vld [vmem:[%s316_s7 + $0x8] sm:$0xff]   ;;  %v4471_v14 = vld [vmem:[%s316_s7 + $0x18] sm:$0xff]   ;;  %352 = vst.msk [vmem:[#allocation2 + $0x48] sm:$0xff] %vm342_vm2, %v4343_v16 }
  0x15   : > { %3770 = vmatprep.subr.bf16.mxu0 %v6315_v0  ;;  %v4477_v15 = vld [vmem:[%s316_s7 + $0x20] ss:$0 sps:$4 sm:$0xff]   ;;  %353 = vst.msk [vmem:[#allocation2 + $0x50] sm:$0xff] %vm342_vm2, %v4343_v16  ;;  %354 = vst.msk [vmem:[#allocation2 + $0x58] sm:$0xff] %vm342_vm2, %v4343_v16  ;;  %s4350_s14 = smov 32   ;;  %s4351_s15 = smov 16  }
  0x16   : > { %355 = vst.msk [vmem:[#allocation2 + $0x60] sm:$0xff] %vm342_vm2, %v4343_v16  ;;  %356 = vst.msk [vmem:[#allocation2 + $0x68] sm:$0xff] %vm342_vm2, %v4343_v16  ;;  %v4642_v17 = vld [vmem:[#allocation2] sm:$0xff] }
  0x17   : > { %357 = vst.msk [vmem:[#allocation2 + $0x70] sm:$0xff] %vm342_vm2, %v4343_v16  ;;  %358 = vst.msk [vmem:[#allocation2 + $0x78] sm:$0xff] %vm342_vm2, %v4343_v16 }
  0x18   : > { %359 = vst.msk [vmem:[#allocation2 + $0x80] sm:$0xff] %vm342_vm2, %v4343_v16  ;;  %360 = vst.msk [vmem:[#allocation2 + $0x88] sm:$0xff] %vm342_vm2, %v4343_v16 }
  0x19   : > { %361 = vst.msk [vmem:[#allocation2 + $0x90] sm:$0xff] %vm342_vm2, %v4343_v16  ;;  %362 = vst.msk [vmem:[#allocation2 + $0x98] sm:$0xff] %vm342_vm2, %v4343_v16 }
  0x1a   : > { %363 = vst.msk [vmem:[#allocation2 + $0xa0] sm:$0xff] %vm342_vm2, %v4343_v16  ;;  %364 = vst.msk [vmem:[#allocation2 + $0xa8] sm:$0xff] %vm342_vm2, %v4343_v16 }
  0x1b   : > { %365 = vst.msk [vmem:[#allocation2 + $0xb0] sm:$0xff] %vm342_vm2, %v4343_v16  ;;  %366 = vst.msk [vmem:[#allocation2 + $0xb8] sm:$0xff] %vm342_vm2, %v4343_v16 }
  0x1c   : > { %3771 = vmatpush3.bf16.xpose.msra.mxu0 %v533_v4  ;;  %367 = vst.msk [vmem:[#allocation2 + $0xc0] sm:$0xff] %vm342_vm2, %v4343_v16  ;;  %368 = vst.msk [vmem:[#allocation2 + $0xc8] sm:$0xff] %vm342_vm2, %v4343_v16 }
  0x1d   : > { %3772 = vmatprep.subr.bf16.mxu0 %v6315_v0  ;;  %369 = vst.msk [vmem:[#allocation2 + $0xd0] sm:$0xff] %vm342_vm2, %v4343_v16  ;;  %370 = vst.msk [vmem:[#allocation2 + $0xd8] sm:$0xff] %vm342_vm2, %v4343_v16 }
  0x1e   : > { %371 = vst.msk [vmem:[#allocation2 + $0xe0] sm:$0xff] %vm342_vm2, %v4343_v16  ;;  %372 = vst.msk [vmem:[#allocation2 + $0xe8] sm:$0xff] %vm342_vm2, %v4343_v16 }
  0x1f   : > { %373 = vst.msk [vmem:[#allocation2 + $0xf0] sm:$0xff] %vm342_vm2, %v4343_v16  ;;  %374 = vst.msk [vmem:[#allocation2 + $0xf8] sm:$0xff] %vm342_vm2, %v4343_v16 }
  0x20   : > { %375 = vst.msk [vmem:[#allocation2 + $0x100] sm:$0xff] %vm342_vm2, %v4343_v16  ;;  %376 = vst.msk [vmem:[#allocation2 + $0x108] sm:$0xff] %vm342_vm2, %v4343_v16 }
  0x21   : > { %377 = vst.msk [vmem:[#allocation2 + $0x110] sm:$0xff] %vm342_vm2, %v4343_v16  ;;  %378 = vst.msk [vmem:[#allocation2 + $0x118] sm:$0xff] %vm342_vm2, %v4343_v16 }
  0x22   : > { %381 = vst.msk [vmem:[#allocation3 + $0x10] sm:$0xff] %vm342_vm2, %v6315_v0  ;;  %382 = vst.msk [vmem:[#allocation3 + $0x18] sm:$0xff] %vm342_vm2, %v6315_v0 }
  0x23   : > { %383 = vst.msk [vmem:[#allocation3 + $0x20] sm:$0xff] %vm342_vm2, %v6315_v0  ;;  %384 = vst.msk [vmem:[#allocation3 + $0x28] sm:$0xff] %vm342_vm2, %v6315_v0 }
  0x24   : > { %3773 = vmatpush3.bf16.xpose.msra.mxu0 %v530_v6  ;;  %385 = vst.msk [vmem:[#allocation3 + $0x30] sm:$0xff] %vm342_vm2, %v6315_v0  ;;  %386 = vst.msk [vmem:[#allocation3 + $0x38] sm:$0xff] %vm342_vm2, %v6315_v0 }
  0x25   : > { %3774 = vmatprep.subr.bf16.mxu0 %v6315_v0  ;;  %387 = vst.msk [vmem:[#allocation3 + $0x40] sm:$0xff] %vm342_vm2, %v6315_v0  ;;  %388 = vst.msk [vmem:[#allocation3 + $0x48] sm:$0xff] %vm342_vm2, %v6315_v0 }
  0x26   : > { %389 = vst.msk [vmem:[#allocation3 + $0x50] sm:$0xff] %vm342_vm2, %v6315_v0  ;;  %390 = vst.msk [vmem:[#allocation3 + $0x58] sm:$0xff] %vm342_vm2, %v6315_v0 }
  0x27   : > { %391 = vst.msk [vmem:[#allocation3 + $0x60] sm:$0xff] %vm342_vm2, %v6315_v0  ;;  %392 = vst.msk [vmem:[#allocation3 + $0x68] sm:$0xff] %vm342_vm2, %v6315_v0 }
  0x28   : > { %393 = vst.msk [vmem:[#allocation3 + $0x70] sm:$0xff] %vm342_vm2, %v6315_v0  ;;  %394 = vst.msk [vmem:[#allocation3 + $0x78] sm:$0xff] %vm342_vm2, %v6315_v0 }
  0x29   : > { %395 = vst.msk [vmem:[#allocation3 + $0x80] sm:$0xff] %vm342_vm2, %v6315_v0  ;;  %396 = vst.msk [vmem:[#allocation3 + $0x88] sm:$0xff] %vm342_vm2, %v6315_v0 }
  0x2a   : > { %397 = vst.msk [vmem:[#allocation3 + $0x90] sm:$0xff] %vm342_vm2, %v6315_v0  ;;  %398 = vst.msk [vmem:[#allocation3 + $0x98] sm:$0xff] %vm342_vm2, %v6315_v0 }
  0x2b   : > { %399 = vst.msk [vmem:[#allocation3 + $0xa0] sm:$0xff] %vm342_vm2, %v6315_v0  ;;  %400 = vst.msk [vmem:[#allocation3 + $0xa8] sm:$0xff] %vm342_vm2, %v6315_v0 }
  0x2c   : > { %3775 = vmatpush3.bf16.xpose.msra.mxu0 %v527_v8  ;;  %401 = vst.msk [vmem:[#allocation3 + $0xb0] sm:$0xff] %vm342_vm2, %v6315_v0  ;;  %402 = vst.msk [vmem:[#allocation3 + $0xb8] sm:$0xff] %vm342_vm2, %v6315_v0 }
  0x2d   : > { %3776 = vmatprep.subr.bf16.mxu0 %v6315_v0  ;;  %403 = vst.msk [vmem:[#allocation3 + $0xc0] sm:$0xff] %vm342_vm2, %v6315_v0  ;;  %404 = vst.msk [vmem:[#allocation3 + $0xc8] sm:$0xff] %vm342_vm2, %v6315_v0 }
  0x2e   : > { %405 = vst.msk [vmem:[#allocation3 + $0xd0] sm:$0xff] %vm342_vm2, %v6315_v0  ;;  %406 = vst.msk [vmem:[#allocation3 + $0xd8] sm:$0xff] %vm342_vm2, %v6315_v0 }
  0x2f   : > { %407 = vst.msk [vmem:[#allocation3 + $0xe0] sm:$0xff] %vm342_vm2, %v6315_v0  ;;  %408 = vst.msk [vmem:[#allocation3 + $0xe8] sm:$0xff] %vm342_vm2, %v6315_v0 }
  0x30   : > { %409 = vst.msk [vmem:[#allocation3 + $0xf0] sm:$0xff] %vm342_vm2, %v6315_v0  ;;  %410 = vst.msk [vmem:[#allocation3 + $0xf8] sm:$0xff] %vm342_vm2, %v6315_v0 }
  0x31   : > { %411 = vst.msk [vmem:[#allocation3 + $0x100] sm:$0xff] %vm342_vm2, %v6315_v0  ;;  %412 = vst.msk [vmem:[#allocation3 + $0x108] sm:$0xff] %vm342_vm2, %v6315_v0 }
  0x32   : > { %413 = vst.msk [vmem:[#allocation3 + $0x110] sm:$0xff] %vm342_vm2, %v6315_v0  ;;  %414 = vst.msk [vmem:[#allocation3 + $0x118] sm:$0xff] %vm342_vm2, %v6315_v0 }
  0x33   : > { %416 = vst.msk [vmem:[#allocation4] sm:$0xff] %vm415_vm4, %v6315_v0  ;;  %417 = vst.msk [vmem:[#allocation4 + $0x8] sm:$0xff] %vm415_vm4, %v6315_v0 }
  0x34   : > { %3777 = vmatpush3.bf16.xpose.msra.mxu0 %v524_v10  ;;  %418 = vst.msk [vmem:[#allocation4 + $0x10] sm:$0xff] %vm415_vm4, %v6315_v0  ;;  %419 = vst.msk [vmem:[#allocation4 + $0x18] sm:$0xff] %vm415_vm4, %v6315_v0 }
  0x35   : > { %3858 = vmatprep.subr.bf16.mxu0 %v6315_v0  ;;  %420 = vst.msk [vmem:[#allocation4 + $0x20] sm:$0xff] %vm415_vm4, %v6315_v0  ;;  %421 = vst.msk [vmem:[#allocation4 + $0x28] sm:$0xff] %vm415_vm4, %v6315_v0 }
  0x36   : > { %422 = vst.msk [vmem:[#allocation4 + $0x30] sm:$0xff] %vm415_vm4, %v6315_v0  ;;  %423 = vst.msk [vmem:[#allocation4 + $0x38] sm:$0xff] %vm415_vm4, %v6315_v0 }
  0x37   : > { %424 = vst.msk [vmem:[#allocation4 + $0x40] sm:$0xff] %vm415_vm4, %v6315_v0 }
  0x3b   : > { %3779 = vmatmul.mubr.msk.bf16.vlgmr.msra.gmra.mxu0 %vm507_vm1, %v4453_v11 }
  0x3c   : > { %3782 = vmatprep.mubr.msk.bf16.mxu0 %vm4342_vm0, %v6315_v0 }
  0x43   : > { %3783 = vmatmul.mubr.msk.bf16.gmra.mxu0 %vm507_vm1, %v4459_v12 }
  0x44   : > { %3786 = vmatprep.mubr.msk.bf16.mxu0 %vm4342_vm0, %v6315_v0 }
  0x4b   : > { %3787 = vmatmul.mubr.msk.bf16.gmra.mxu0 %vm507_vm1, %v4465_v13 }
  0x4c   : > { %3790 = vmatprep.mubr.msk.bf16.mxu0 %vm4342_vm0, %v6315_v0 }
  0x53   : > { %3791 = vmatmul.mubr.msk.bf16.gmra.mxu0 %vm507_vm1, %v4471_v14 }
  0x54   : > { %3794 = vmatprep.mubr.msk.bf16.mxu0 %vm4342_vm0, %v6315_v0 }
  0x5b   : > { %3795 = vmatmul.mubr.msk.bf16.gmra.mxu0 %vm507_vm1, %v4477_v15 }
  0x5c   : > { %3868 = vmatprep.mubr.msk.bf16.mxu0 %vm4342_vm0, %v6315_v0 }
  0xfb   : > { %v572_v19 = vpop.f32.mrf.mxu0 }
  0xfc   : > { %v4594_v20 = vadd.f32 %v3583_v18, %v572_v19 }
  0xfd   : > { %v3780_v22 = vpop.f32.mrf.mxu0 }
  0xfe   : > { %v620_v24 = vsel %vm619_vm3, %v4594_v20, -inf }
  0xff   : > { %621 = vmax.xlane.f32.xlu0 %v620_v24  ;;  %v575_v25 = vpop.f32.mrf.mxu0 }
 0x100   : > { %v4601_v26 = vadd.f32 %v3584_v21, %v575_v25  ;;  %v4647_v21 = vld [vmem:[#allocation2 + $0x8] sm:$0xff]  ;;  %v4657_v25 = vld [vmem:[#allocation2 + $0x10] sm:$0xff] }
 0x101   : > { %v3781_v28 = vpop.f32.mrf.mxu0 }
 0x102   : > { %v623_v29 = vsel %vm619_vm3, %v4601_v26, -inf }
 0x103   : > { %624 = vmax.xlane.f32.xlu0 %v623_v29  ;;  %v580_v30 = vpop.f32.mrf.mxu0 }
 0x104   : > { %v4605_v31 = vadd.f32 %v3587_v27, %v580_v30  ;;  %v4669_v30 = vld [vmem:[#allocation2 + $0x18] sm:$0xff] }
 0x105   : > { %v3784_v33 = vpop.f32.mrf.mxu0 }
 0x106   : > { %v626_v35 = vsel %vm619_vm3, %v4605_v31, -inf }
 0x107   : > { %v583_v36 = vpop.f32.mrf.mxu0  ;;  %627 = vmax.xlane.f32.xlu1 %v626_v35  ;;  %v4682_v35 = vld [vmem:[#allocation2 + $0x20] sm:$0xff] }
 0x108   : > { %v4612_v37 = vadd.f32 %v3588_v32, %v583_v36 }
 0x109   : > { %v3785_v39 = vpop.f32.mrf.mxu0 }
 0x10a   : > { %v629_v40 = vsel %vm619_vm3, %v4612_v37, -inf }
 0x10b   : > { %v588_v42 = vpop.f32.mrf.mxu0  ;;  %630 = vmax.xlane.f32.xlu1 %v629_v40  ;;  %v4693_v40 = vld [vmem:[#allocation2 + $0x28] sm:$0xff] }
 0x10c   : > { %v4616_v43 = vadd.f32 %v3591_v38, %v588_v42 }
 0x10d   : > { %v3788_v45 = vpop.f32.mrf.mxu0 }
 0x10e   : > { %v632_v47 = vsel %vm619_vm3, %v4616_v43, -inf  ;;  %v4703_v45 = vld [vmem:[#allocation2 + $0x30] sm:$0xff] }
 0x10f   : > { %v591_v48 = vpop.f32.mrf.mxu0  ;;  %633 = vmax.xlane.f32.xlu0 %v632_v47 }
 0x110   : > { %v4623_v49 = vadd.f32 %v3592_v44, %v591_v48 }
 0x111   : > { %v3789_v51 = vpop.f32.mrf.mxu0 }
 0x112   : > { %v635_v52 = vsel %vm619_vm3, %v4623_v49, -inf }
 0x113   : > { %v596_v53 = vpop.f32.mrf.mxu0  ;;  %636 = vmax.xlane.f32.xlu1 %v635_v52 }
 0x114   : > { %v4627_v54 = vadd.f32 %v3595_v50, %v596_v53  ;;  %v4713_v50 = vld [vmem:[#allocation2 + $0x38] sm:$0xff] }
 0x115   : > { %v3792_v56 = vpop.f32.mrf.mxu0 }
 0x116   : > { %v638_v58 = vsel %vm619_vm3, %v4627_v54, -inf }
 0x117   : > { %v599_v59 = vpop.f32.mrf.mxu0  ;;  %639 = vmax.xlane.f32.xlu0 %v638_v58 }
 0x118   : > { %v4634_v60 = vadd.f32 %v3596_v55, %v599_v59  ;;  %v4723_v55 = vld [vmem:[#allocation2 + $0x40] sm:$0xff] }
 0x119   : > { %v3793_v62 = vpop.f32.mrf.mxu0 }
 0x11a   : > { %v641_v63 = vsel %vm619_vm3, %v4634_v60, -inf }
 0x11b   : > { %642 = vmax.xlane.f32.xlu1 %v641_v63  ;;  %v604_v2 = vpop.f32.mrf.mxu0 }
 0x11c   : > { %v4638_v4 = vadd.f32 %v604_v2, %v460_v61 }
 0x11d   : > { %v3796_v6 = vpop.f32.mrf.mxu0 }
 0x11e   : > { %v644_v8 = vsel %vm619_vm3, %v4638_v4, -inf }
 0x11f   : > { %645 = vmax.xlane.f32.xlu0 %v644_v8  ;;  %v607_v10 = vpop.f32.mrf.mxu0 }
 0x121   : > { %v3797_v16 = vpop.f32.mrf.mxu0 }
 0x188   : > { %v622_v18 = vpop.xlane.xlu0 %621 }
 0x189   : > { %v4645_v19 = vmax.f32 %v4642_v17, %v622_v18 }
 0x18b   : > { %v656_v22 = vsub.f32 %v4642_v17, %v4645_v19  ;;  %1010 = vst.msk [vmem:[#allocation2] sm:$0xff] %vm342_vm2, %v4645_v19  ;;  %685 = vperm.xlu1 %4080, %v4645_v19  }
 0x18c   : > { %v625_v23 = vpop.xlane.xlu0 %624 }
 0x18d   : > { %v4655_v24 = vmax.f32 %v4647_v21, %v625_v23  ;;  %v665_v61 = vmul.f32 1.442695, %v656_v22 }
 0x18f   : > { %v657_v27 = vsub.f32 %v4647_v21, %v4655_v24  ;;  %1011 = vst.msk [vmem:[#allocation2 + $0x8] sm:$0xff] %vm342_vm2, %v4655_v24  ;;  %895 = vrot.lane.b32.xlu1 %v4420_v1, %s4345_s18  ;;  %690 = vperm.xlu0 %4081, %v4655_v24   ;;  %4096 = vpow2.f32 %v665_v61 }
 0x190   : > { %v628_v28 = vpop.xlane.xlu1 %627 }
 0x191   : > { %v4667_v29 = vmax.f32 %v4657_v25, %v628_v28 }
 0x193   : > { %893 = vrot.lane.b32.xlu1 %v4430_v3, %s4345_s18  ;;  %v658_v32 = vsub.f32 %v4657_v25, %v4667_v29  ;;  %1012 = vst.msk [vmem:[#allocation2 + $0x10] sm:$0xff] %vm342_vm2, %v4667_v29  ;;  %887 = vrot.lane.b32.xlu0 %v4448_v9, %s4345_s18 }
 0x194   : > { %v631_v33 = vpop.xlane.xlu1 %630 }
 0x195   : > { %v4680_v34 = vmax.f32 %v4669_v30, %v631_v33  ;;  %v669_v62 = vmul.f32 1.442695, %v658_v32 }
 0x197   : > { %891 = vrot.lane.b32.xlu1 %v4436_v5, %s4345_s18  ;;  %v659_v36 = vsub.f32 %v4669_v30, %v4680_v34  ;;  %1013 = vst.msk [vmem:[#allocation2 + $0x18] sm:$0xff] %vm342_vm2, %v4680_v34  ;;  %4098 = vpow2.f32 %v669_v62 }
 0x198   : > { %v634_v38 = vpop.xlane.xlu0 %633 }
 0x199   : > { %v4691_v39 = vmax.f32 %v4682_v35, %v634_v38 }
 0x19b   : > { %695 = vperm.xlu1 %4080, %v4667_v29   ;;  %v660_v41 = vsub.f32 %v4682_v35, %v4691_v39  ;;  %1014 = vst.msk [vmem:[#allocation2 + $0x20] sm:$0xff] %vm342_vm2, %v4691_v39 }
 0x19c   : > { %v637_v42 = vpop.xlane.xlu1 %636  ;;  %v4813_v63 = vpop.eup %4096 }
 0x19d   : > { %v4701_v44 = vmax.f32 %v4693_v40, %v637_v42 }
 0x19f   : > { %700 = vperm.xlu1 %4080, %v4680_v34   ;;  %v661_v46 = vsub.f32 %v4693_v40, %v4701_v44  ;;  %1015 = vst.msk [vmem:[#allocation2 + $0x28] sm:$0xff] %vm342_vm2, %v4701_v44 }
 0x1a0   : > { %v640_v47 = vpop.xlane.xlu0 %639 }
 0x1a1   : > { %v4711_v48 = vmax.f32 %v4703_v45, %v640_v47  ;;  %v675_v30 = vmul.f32 1.442695, %v661_v46 }
 0x1a3   : > { %705 = vperm.xlu1 %4080, %v4691_v39   ;;  %v662_v51 = vsub.f32 %v4703_v45, %v4711_v48  ;;  %1016 = vst.msk [vmem:[#allocation2 + $0x30] sm:$0xff] %vm342_vm2, %v4711_v48  ;;  %v757_v39 = vld [vmem:[#allocation3 + $0x10] sm:$0xff] }
 0x1a4   : > { %v643_v52 = vpop.xlane.xlu1 %642  ;;  %v4818_v2 = vpop.eup %4098 }
 0x1a5   : > { %v4721_v53 = vmax.f32 %v4713_v50, %v643_v52  ;;  %v677_v40 = vmul.f32 1.442695, %v662_v51 }
 0x1a7   : > { %v663_v56 = vsub.f32 %v4713_v50, %v4721_v53  ;;  %1017 = vst.msk [vmem:[#allocation2 + $0x38] sm:$0xff] %vm342_vm2, %v4721_v53  ;;  %710 = vperm.xlu1 %4080, %v4701_v44   ;;  %720 = vperm.xlu0 %4081, %v4721_v53   ;;  %v758_v50 = vld [vmem:[#allocation3 + $0x18] sm:$0xff] }
 0x1a8   : > { %v646_v57 = vpop.xlane.xlu0 %645 }
 0x1a9   : > { %v4732_v58 = vmax.f32 %v4723_v55, %v646_v57  ;;  %v679_v35 = vmul.f32 1.442695, %v663_v56 }
 0x1ab   : > { %v664_v59 = vsub.f32 %v4723_v55, %v4732_v58  ;;  %1018 = vst.msk [vmem:[#allocation2 + $0x40] sm:$0xff] %vm342_vm2, %v4732_v58  ;;  %889 = vrot.lane.b32.xlu1 %v4442_v7, %s4345_s18  ;;  %725 = vperm.xlu0 %4081, %v4732_v58  }
 0x1ad   : > { %v681_v56 = vmul.f32 1.442695, %v664_v59 }
 0x1af   : > { %715 = vperm.xlu1 %4080, %v4711_v48   ;;  %1052 = vrot.lane.b32.xlu0 %v4436_v5, %s4346_s19  ;;  %v759_v48 = vld [vmem:[#allocation3 + $0x20] sm:$0xff] }
 0x1b3   : > { %1056 = vrot.lane.b32.xlu1 %v4420_v1, %s4346_s19  ;;  %1048 = vrot.lane.b32.xlu0 %v4448_v9, %s4346_s19 }
 0x1b7   : > { %1054 = vrot.lane.b32.xlu1 %v4430_v3, %s4346_s19  ;;  %1642 = vrot.lane.b32.xlu0 %v4420_v1, %s4347_s20 }
 0x1bb   : > { %1050 = vrot.lane.b32.xlu1 %v4442_v7, %s4346_s19  ;;  %1640 = vrot.lane.b32.xlu0 %v4430_v3, %s4347_s20 }
 0x1bf   : > { %1038 = vrot.lane.b32.xlu1 %v4453_v11, %s4346_s19  ;;  %1638 = vrot.lane.b32.xlu0 %v4436_v5, %s4347_s20 }
 0x1c3   : > { %1040 = vrot.lane.b32.xlu1 %v4459_v12, %s4346_s19  ;;  %1636 = vrot.lane.b32.xlu0 %v4442_v7, %s4347_s20 }
 0x1c7   : > { %1042 = vrot.lane.b32.xlu1 %v4465_v13, %s4346_s19  ;;  %1634 = vrot.lane.b32.xlu0 %v4448_v9, %s4347_s20 }
 0x1cb   : > { %1044 = vrot.lane.b32.xlu1 %v4471_v14, %s4346_s19  ;;  %2228 = vrot.lane.b32.xlu0 %v4420_v1, %s4348_s21 }
 0x1cf   : > { %1046 = vrot.lane.b32.xlu1 %v4477_v15, %s4346_s19  ;;  %2226 = vrot.lane.b32.xlu0 %v4430_v3, %s4348_s21 }
 0x1d3   : > { %1624 = vrot.lane.b32.xlu1 %v4453_v11, %s4347_s20  ;;  %2224 = vrot.lane.b32.xlu0 %v4436_v5, %s4348_s21 }
 0x1d7   : > { %1626 = vrot.lane.b32.xlu1 %v4459_v12, %s4347_s20  ;;  %2222 = vrot.lane.b32.xlu0 %v4442_v7, %s4348_s21 }
 0x1db   : > { %1628 = vrot.lane.b32.xlu1 %v4465_v13, %s4347_s20  ;;  %2220 = vrot.lane.b32.xlu0 %v4448_v9, %s4348_s21  ;;  %v667_v9 = vmul.f32 1.442695, %v657_v27 }
 0x1dd   : > { %4100 = vpow2.f32 %v667_v9 }
 0x1df   : > { %1630 = vrot.lane.b32.xlu1 %v4471_v14, %s4347_s20  ;;  %2212 = vrot.lane.b32.xlu0 %v4459_v12, %s4348_s21 }
 0x1e3   : > { %1632 = vrot.lane.b32.xlu1 %v4477_v15, %s4347_s20  ;;  %2216 = vrot.lane.b32.xlu0 %v4471_v14, %s4348_s21 }
 0x1e7   : > { %2210 = vrot.lane.b32.xlu1 %v4453_v11, %s4348_s21  ;;  %830 = vperm.xlu0 %4081, %v4813_v63  }
 0x1ea   : > { %v4827_v12 = vpop.eup %4100 }
 0x1eb   : > { %2214 = vrot.lane.b32.xlu1 %v4465_v13, %s4348_s21  ;;  %840 = vperm.xlu0 %4081, %v4818_v2  }
 0x1ef   : > { %2218 = vrot.lane.b32.xlu1 %v4477_v15, %s4348_s21  ;;  %1441 = vrot.lane.b32.xlu0 %v4436_v5, %s4349_s26 }
 0x1f3   : > { %835 = vperm.xlu1 %4080, %v4827_v12  }
 0x1f7   : > { %1445 = vrot.lane.b32.xlu1 %v4420_v1, %s4349_s26 }
 0x1fb   : > { %1443 = vrot.lane.b32.xlu1 %v4430_v3, %s4349_s26 }
 0x1ff   : > { %1439 = vrot.lane.b32.xlu1 %v4442_v7, %s4349_s26 }
 0x206   : > { %v686_v11 = vpop.permute.xlu1 %685 }
 0x207   : > { %v728_v13 = vsub.f32 %v4594_v20, %v686_v11 }
 0x209   : > { %v737_v14 = vmul.f32 1.442695, %v728_v13 }
 0x20a   : > { %v896_v15 = vpop.permute.xlu1 %895  ;;  %v691_v5 = vpop.permute.xlu0 %690 }
 0x20b   : > { %4102 = vpow2.f32 %v737_v14  ;;  %v729_v6 = vsub.f32 %v4601_v26, %v691_v5  ;;  %v918_v8 = vsel %vm916_vm5, %v896_v15, 0 }
 0x20c   : > { %3799 = vmatpush3.bf16.msra.mxu1 %v918_v8 }
 0x20d   : > { %3800 = vmatprep.subr.bf16.mxu1 %v6315_v0  ;;  %v739_v1 = vmul.f32 1.442695, %v729_v6 }
 0x20e   : > { %v894_v3 = vpop.permute.xlu1 %893  ;;  %v888_v21 = vpop.permute.xlu0 %887 }
 0x20f   : > { %4104 = vpow2.f32 %v739_v1 }
 0x210   : > { %3801 = vmatpush3.bf16.msra.mxu1 %v894_v3 }
 0x211   : > { %3802 = vmatprep.subr.bf16.mxu1 %v6315_v0 }
 0x212   : > { %v892_v7 = vpop.permute.xlu1 %891 }
 0x214   : > { %3803 = vmatpush3.bf16.msra.mxu1 %v892_v7 }
 0x215   : > { %3804 = vmatprep.subr.bf16.mxu1 %v6315_v0 }
 0x216   : > { %v696_v20 = vpop.permute.xlu1 %695 }
 0x217   : > { %v730_v10 = vsub.f32 %v4605_v31, %v696_v20 }
 0x218   : > { %v4103_v16 = vpop.eup %4102 }
 0x219   : > { %v741_v26 = vmul.f32 1.442695, %v730_v10  ;;  %v773_v17 = vsel %vm619_vm3, %v4103_v16, 0.0 }
 0x21a   : > { %v701_v18 = vpop.permute.xlu1 %700  ;;  %774 = vadd.xlane.f32.xlu0 %v773_v17 }
 0x21b   : > { %4106 = vpow2.f32 %v741_v26  ;;  %v731_v19 = vsub.f32 %v4612_v37, %v701_v18 }
 0x21c   : > { %v4105_v24 = vpop.eup %4104 }
 0x21d   : > { %v743_v22 = vmul.f32 1.442695, %v731_v19  ;;  %v776_v31 = vsel %vm619_vm3, %v4105_v24, 0.0  ;;  %v882_v9 = vpack.c.bf16 %v4105_v24, %v4103_v16 }
 0x21e   : > { %v706_v23 = vpop.permute.xlu1 %705 }
 0x21f   : > { %4108 = vpow2.f32 %v743_v22  ;;  %v732_v25 = vsub.f32 %v4616_v43, %v706_v23 }
 0x221   : > { %v745_v27 = vmul.f32 1.442695, %v732_v25 }
 0x222   : > { %v711_v28 = vpop.permute.xlu1 %710  ;;  %v721_v29 = vpop.permute.xlu0 %720 }
 0x223   : > { %4110 = vpow2.f32 %v745_v27  ;;  %v733_v32 = vsub.f32 %v4623_v49, %v711_v28  ;;  %v735_v33 = vsub.f32 %v4634_v60, %v721_v29  ;;  %777 = vadd.xlane.f32.xlu1 %v776_v31 }
 0x225   : > { %v747_v38 = vmul.f32 1.442695, %v733_v32  ;;  %v751_v37 = vmul.f32 1.442695, %v735_v33 }
 0x226   : > { %v890_v42 = vpop.permute.xlu1 %889  ;;  %v726_v47 = vpop.permute.xlu0 %725 }
 0x227   : > { %4112 = vpow2.f32 %v747_v38  ;;  %3805 = vmatpush3.bf16.msra.mxu1 %v890_v42  ;;  %v736_v43 = vsub.f32 %v4638_v4, %v726_v47 }
 0x228   : > { %v4107_v52 = vpop.eup %4106  ;;  %3806 = vmatprep.subr.bf16.mxu1 %v6315_v0  ;;  %4114 = vpow2.f32 %v751_v37 }
 0x229   : > { %v779_v57 = vsel %vm619_vm3, %v4107_v52, 0.0  ;;  %v753_v11 = vmul.f32 1.442695, %v736_v43 }
 0x22a   : > { %v716_v61 = vpop.permute.xlu1 %715  ;;  %780 = vadd.xlane.f32.xlu0 %v779_v57  ;;  %v1053_v49 = vpop.permute.xlu0 %1052 }
 0x22b   : > { %v734_v60 = vsub.f32 %v4627_v54, %v716_v61  ;;  %3807 = vmatpush3.bf16.msra.mxu1 %v888_v21  ;;  %v1080_v24 = vsel %vm507_vm1, %v1053_v49, 0 }
 0x22c   : > { %v4109_v62 = vpop.eup %4108  ;;  %3828 = vmatprep.subr.bf16.mxu1 %v6315_v0 }
 0x22d   : > { %v749_v13 = vmul.f32 1.442695, %v734_v60  ;;  %v782_v14 = vsel %vm619_vm3, %v4109_v62, 0.0  ;;  %v883_v7 = vpack.c.bf16 %v4109_v62, %v4107_v52 }
 0x22e   : > { %v1057_v15 = vpop.permute.xlu1 %1056  ;;  %783 = vadd.xlane.f32.xlu0 %v782_v14  ;;  %3809 = vmatmul.mubr.msk.bf16.vlgmr.msra.gmra.mxu1 %vm619_vm3, %v882_v9  ;;  %v1049_v4 = vpop.permute.xlu0 %1048 }
 0x22f   : > { %4116 = vpow2.f32 %v749_v13  ;;  %v1086_v5 = vsel %vm507_vm1, %v1057_v15, 0  ;;  %3812 = vmatprep.mubr.msk.bf16.mxu1 %vm4342_vm0, %v6315_v0  ;;  %v1074_v57 = vsel %vm507_vm1, %v1049_v4, 0 }
 0x230   : > { %v4111_v54 = vpop.eup %4110  ;;  %3829 = vmatpush3.bf16.xpose.msra.mxu1 %v1086_v5  ;;  %4118 = vpow2.f32 %v753_v11 }
 0x231   : > { %v785_v6 = vsel %vm619_vm3, %v4111_v54, 0.0  ;;  %3830 = vmatprep.subr.bf16.mxu1 %v6315_v0 }
 0x232   : > { %v1055_v8 = vpop.permute.xlu1 %1054  ;;  %786 = vadd.xlane.f32.xlu1 %v785_v6  ;;  %v1643_v1 = vpop.permute.xlu0 %1642 }
 0x233   : > { %v1083_v20 = vsel %vm507_vm1, %v1055_v8, 0  ;;  %v1672_v9 = vsel %vm507_vm1, %v1643_v1, 0 }
 0x234   : > { %v4113_v3 = vpop.eup %4112 }
 0x235   : > { %v788_v10 = vsel %vm619_vm3, %v4113_v3, 0.0  ;;  %v4115_v16 = vpop.eup %4114  ;;  %v884_v23 = vpack.c.bf16 %v4113_v3, %v4111_v54 }
 0x236   : > { %v1051_v26 = vpop.permute.xlu1 %1050  ;;  %789 = vadd.xlane.f32.xlu0 %v788_v10  ;;  %3813 = vmatmul.mubr.msk.bf16.gmra.mxu1 %vm619_vm3, %v883_v7  ;;  %v1641_v17 = vpop.permute.xlu0 %1640  ;;  %v794_v18 = vsel %vm619_vm3, %v4115_v16, 0.0 }
 0x237   : > { %3816 = vmatprep.mubr.msk.bf16.mxu1 %vm4342_vm0, %v6315_v0  ;;  %v1077_v37 = vsel %vm507_vm1, %v1051_v26, 0  ;;  %v1669_v15 = vsel %vm507_vm1, %v1641_v17, 0 }
 0x238   : > { %3831 = vmatpush3.bf16.xpose.msra.mxu1 %v1083_v20 }
 0x239   : > { %3832 = vmatprep.subr.bf16.mxu1 %v6315_v0 }
 0x23a   : > { %v1039_v19 = vpop.permute.xlu1 %1038  ;;  %795 = vadd.xlane.f32.xlu0 %v794_v18  ;;  %v1639_v21 = vpop.permute.xlu0 %1638 }
 0x23b   : > { %v1666_v6 = vsel %vm507_vm1, %v1639_v21, 0 }
 0x23c   : > { %v4117_v22 = vpop.eup %4116 }
 0x23d   : > { %v791_v25 = vsel %vm619_vm3, %v4117_v22, 0.0  ;;  %v4119_v27 = vpop.eup %4118  ;;  %v885_v38 = vpack.c.bf16 %v4115_v16, %v4117_v22 }
 0x23e   : > { %v1041_v28 = vpop.permute.xlu1 %1040  ;;  %792 = vadd.xlane.f32.xlu1 %v791_v25  ;;  %3817 = vmatmul.mubr.msk.bf16.gmra.mxu1 %vm619_vm3, %v884_v23  ;;  %v1637_v29 = vpop.permute.xlu0 %1636  ;;  %v797_v31 = vsel %vm619_vm3, %v4119_v27, 0.0  ;;  %v886_v43 = vpack.c.bf16 %v4119_v27, %v4119_v27 }
 0x23f   : > { %3820 = vmatprep.mubr.msk.bf16.mxu1 %vm4342_vm0, %v6315_v0  ;;  %v1663_v20 = vsel %vm507_vm1, %v1637_v29, 0 }
 0x240   : > { %3833 = vmatpush3.bf16.xpose.msra.mxu1 %v1080_v24 }
 0x241   : > { %3834 = vmatprep.subr.bf16.mxu1 %v6315_v0 }
 0x242   : > { %v1043_v32 = vpop.permute.xlu1 %1042  ;;  %798 = vadd.xlane.f32.xlu1 %v797_v31  ;;  %v1635_v33 = vpop.permute.xlu0 %1634  ;;  %v755_v31 = vld [vmem:[#allocation3] sm:$0xff] }
 0x243   : > { %v1660_v18 = vsel %vm507_vm1, %v1635_v33, 0  ;;  %v764_v33 = vmul.f32 %v4813_v63, %v755_v31 }
 0x246   : > { %v1045_v42 = vpop.permute.xlu1 %1044  ;;  %3821 = vmatmul.mubr.msk.bf16.gmra.mxu1 %vm619_vm3, %v885_v38  ;;  %v2229_v47 = vpop.permute.xlu0 %2228 }
 0x247   : > { %3824 = vmatprep.mubr.msk.bf16.mxu1 %vm4342_vm0, %v6315_v0  ;;  %v2258_v23 = vsel %vm507_vm1, %v2229_v47, 0  ;;  %v756_v47 = vld [vmem:[#allocation3 + $0x8] sm:$0xff] }
 0x248   : > { %3835 = vmatpush3.bf16.xpose.msra.mxu1 %v1077_v37  ;;  %v765_v34 = vmul.f32 %v4827_v12, %v756_v47 }
 0x249   : > { %3836 = vmatprep.subr.bf16.mxu1 %v6315_v0 }
 0x24a   : > { %v1047_v52 = vpop.permute.xlu1 %1046  ;;  %v4881_v61 = vpop.permute.xlu0 %2226 }
 0x24b   : > { %v2255_v25 = vsel %vm507_vm1, %v4881_v61, 0 }
 0x24e   : > { %v1625_v49 = vpop.permute.xlu1 %1624  ;;  %3825 = vmatmul.mubr.msk.bf16.gmra.mxu1 %vm619_vm3, %v886_v43  ;;  %v2225_v62 = vpop.permute.xlu0 %2224 }
 0x24f   : > { %3838 = vmatprep.mubr.msk.bf16.mxu1 %vm4342_vm0, %v6315_v0  ;;  %v2252_v27 = vsel %vm507_vm1, %v2225_v62, 0 }
 0x250   : > { %3837 = vmatpush3.bf16.xpose.msra.mxu1 %v1074_v57 }
 0x251   : > { %3888 = vmatprep.subr.bf16.mxu1 %v6315_v0 }
 0x252   : > { %v1627_v60 = vpop.permute.xlu1 %1626  ;;  %v2223_v13 = vpop.permute.xlu0 %2222 }
 0x256   : > { %v1629_v11 = vpop.permute.xlu1 %1628  ;;  %v2221_v5 = vpop.permute.xlu0 %2220 }
 0x257   : > { %3839 = vmatmul.mubr.msk.bf16.vlgmr.msra.gmra.mxu1 %vm507_vm1, %v1039_v19  ;;  %v2246_v29 = vsel %vm507_vm1, %v2221_v5, 0 }
 0x258   : > { %3889 = vmatpush3.bf16.xpose.msra.mxu1 %v1672_v9  ;;  %3842 = vmatprep.mubr.msk.bf16.mxu1 %vm4342_vm0, %v6315_v0 }
 0x259   : > { %3890 = vmatprep.subr.bf16.mxu1 %v6315_v0 }
 0x25a   : > { %v1631_v14 = vpop.permute.xlu1 %1630  ;;  %v4902_v8 = vpop.permute.xlu0 %2212 }
 0x25e   : > { %v4893_v4 = vpop.permute.xlu1 %1632  ;;  %v4912_v7 = vpop.permute.xlu0 %2216 }
 0x25f   : > { %3843 = vmatmul.mubr.msk.bf16.gmra.mxu1 %vm507_vm1, %v1041_v28  ;;  %v2249_v28 = vsel %vm507_vm1, %v2223_v13, 0 }
 0x260   : > { %3891 = vmatpush3.bf16.xpose.msra.mxu1 %v1669_v15  ;;  %3846 = vmatprep.mubr.msk.bf16.mxu1 %vm4342_vm0, %v6315_v0 }
 0x261   : > { %3892 = vmatprep.subr.bf16.mxu1 %v6315_v0 }
 0x262   : > { %v4899_v54 = vpop.permute.xlu1 %2210  ;;  %v4921_v16 = vpop.permute.xlu0 %830 }
 0x266   : > { %v4904_v1 = vpop.permute.xlu1 %2214  ;;  %v4927_v19 = vpop.permute.xlu0 %840 }
 0x267   : > { %3847 = vmatmul.mubr.msk.bf16.gmra.mxu1 %vm507_vm1, %v1043_v32  ;;  %v671_v32 = vmul.f32 1.442695, %v659_v36 }
 0x268   : > { %3893 = vmatpush3.bf16.xpose.msra.mxu1 %v1666_v6  ;;  %3850 = vmatprep.mubr.msk.bf16.mxu1 %vm4342_vm0, %v6315_v0  ;;  %v763_v6 = vld [vmem:[#allocation3 + $0x40] sm:$0xff] }
 0x269   : > { %3894 = vmatprep.subr.bf16.mxu1 %v6315_v0  ;;  %4120 = vpow2.f32 %v671_v32 }
 0x26a   : > { %v4910_v3 = vpop.permute.xlu1 %2218  ;;  %v1442_v22 = vpop.permute.xlu0 %1441 }
 0x26e   : > { %v4915_v10 = vpop.permute.xlu1 %835 }
 0x26f   : > { %3851 = vmatmul.mubr.msk.bf16.gmra.mxu1 %vm507_vm1, %v1045_v42  ;;  %v673_v42 = vmul.f32 1.442695, %v660_v41  ;;  %v766_v41 = vmul.f32 %v4818_v2, %v757_v39  ;;  %v760_v2 = vld [vmem:[#allocation3 + $0x28] sm:$0xff]  ;;  %v3494_v39 = vld [vmem:[%s6308_s0 + $0x24] sm:$0xf] }
 0x270   : > { %3895 = vmatpush3.bf16.xpose.msra.mxu1 %v1663_v20  ;;  %3854 = vmatprep.mubr.msk.bf16.mxu1 %vm4342_vm0, %v6315_v0 }
 0x271   : > { %3896 = vmatprep.subr.bf16.mxu1 %v6315_v0  ;;  %4122 = vpow2.f32 %v673_v42 }
 0x272   : > { %v1446_v26 = vpop.permute.xlu1 %1445  ;;  %4124 = vpow2.f32 %v675_v30 }
 0x273   : > { %v1467_v17 = vsel %vm916_vm5, %v1446_v26, 0  ;;  %4126 = vpow2.f32 %v679_v35  ;;  %v819_v26 = vld [vmem:[#allocation4] sm:$0xff] }
 0x274   : > { %3859 = vmatpush3.bf16.msra.mxu0 %v1467_v17  ;;  %4128 = vpow2.f32 %v677_v40  ;;  %v873_v17 = vmul.f32 %v4921_v16, %v819_v26 }
 0x275   : > { %3860 = vmatprep.subr.bf16.mxu0 %v6315_v0  ;;  %4130 = vpow2.f32 %v681_v56 }
 0x276   : > { %v1444_v21 = vpop.permute.xlu1 %1443  ;;  %v4990_v44 = vpop.eup %4120 }
 0x277   : > { %3855 = vmatmul.mubr.msk.bf16.gmra.mxu1 %vm507_vm1, %v1047_v52  ;;  %v767_v12 = vmul.f32 %v4990_v44, %v758_v50  ;;  %v3664_v50 = vld [vmem:[%s6308_s0 + $0x28] sm:$0xff]  }
 0x278   : > { %3897 = vmatpush3.bf16.xpose.msra.mxu1 %v1660_v18  ;;  %3898 = vmatprep.mubr.msk.bf16.mxu1 %vm4342_vm0, %v6315_v0  ;;  %v820_v18 = vld [vmem:[#allocation4 + $0x8] sm:$0xff] }
 0x279   : > { %3948 = vmatprep.subr.bf16.mxu1 %v6315_v0  ;;  %3861 = vmatpush3.bf16.msra.mxu0 %v1444_v21 }
 0x27a   : > { %3862 = vmatprep.subr.bf16.mxu0 %v6315_v0  ;;  %v1440_v24 = vpop.permute.xlu1 %1439 }
 0x27d   : > { %3863 = vmatpush3.bf16.msra.mxu0 %v1442_v22 }
 0x27e   : > { %3864 = vmatprep.subr.bf16.mxu0 %v6315_v0  ;;  %v4997_v52 = vpop.eup %4122 }
 0x27f   : > { %3899 = vmatmul.mubr.msk.bf16.vlgmr.msra.gmra.mxu1 %vm507_vm1, %v1625_v49  ;;  %v768_v55 = vmul.f32 %v4997_v52, %v759_v48  ;;  %v5005_v58 = vpop.eup %4124 }
 0x280   : > { %3949 = vmatpush3.bf16.xpose.msra.mxu1 %v2258_v23  ;;  %3902 = vmatprep.mubr.msk.bf16.mxu1 %vm4342_vm0, %v6315_v0  ;;  %v769_v57 = vmul.f32 %v5005_v58, %v760_v2  ;;  %v5009_v61 = vpop.eup %4126 }
 0x281   : > { %3950 = vmatprep.subr.bf16.mxu1 %v6315_v0  ;;  %3865 = vmatpush3.bf16.msra.mxu0 %v1440_v24  ;;  %6346 = vst [vmem:[#allocation5_spill] sm:$0xff] %v5009_v61  ;;  %v821_v24 = vld [vmem:[#allocation4 + $0x10] sm:$0xff] }
 0x282   : > { %3866 = vmatprep.subr.bf16.mxu0 %v6315_v0 }
 0x287   : > { %3903 = vmatmul.mubr.msk.bf16.gmra.mxu1 %vm507_vm1, %v1627_v60  ;;  %v762_v60 = vld [vmem:[#allocation3 + $0x38] sm:$0xff] }
 0x288   : > { %3951 = vmatpush3.bf16.xpose.msra.mxu1 %v2255_v25  ;;  %3906 = vmatprep.mubr.msk.bf16.mxu1 %vm4342_vm0, %v6315_v0  ;;  %v771_v9 = vmul.f32 %v5009_v61, %v762_v60 }
 0x289   : > { %3952 = vmatprep.subr.bf16.mxu1 %v6315_v0 }
 0x28f   : > { %3907 = vmatmul.mubr.msk.bf16.gmra.mxu1 %vm507_vm1, %v1629_v11  ;;  %v5017_v11 = vpop.eup %4128 }
 0x290   : > { %3953 = vmatpush3.bf16.xpose.msra.mxu1 %v2252_v27  ;;  %3910 = vmatprep.mubr.msk.bf16.mxu1 %vm4342_vm0, %v6315_v0  ;;  %6347 = vst [vmem:[#allocation6_spill] sm:$0xff] %v5017_v11  ;;  %v5021_v5 = vpop.eup %4130 }
 0x291   : > { %3954 = vmatprep.subr.bf16.mxu1 %v6315_v0  ;;  %6348 = vst [vmem:[#allocation7_spill] sm:$0xff] %v5021_v5 }
 0x297   : > { %3911 = vmatmul.mubr.msk.bf16.gmra.mxu1 %vm507_vm1, %v1631_v14  ;;  %v761_v14 = vld [vmem:[#allocation3 + $0x30] sm:$0xff] }
 0x298   : > { %3955 = vmatpush3.bf16.xpose.msra.mxu1 %v2249_v28  ;;  %3914 = vmatprep.mubr.msk.bf16.mxu1 %vm4342_vm0, %v6315_v0 }
 0x299   : > { %3956 = vmatprep.subr.bf16.mxu1 %v6315_v0 }
 0x29f   : > { %3915 = vmatmul.mubr.msk.bf16.gmra.mxu1 %vm507_vm1, %v4893_v4  ;;  %v770_v4 = vmul.f32 %v5017_v11, %v761_v14  ;;  %v5462_v11 = vld [vmem:[#allocation2 + $0x110] sm:$0xff] }
 0x2a0   : > { %3957 = vmatpush3.bf16.xpose.msra.mxu1 %v2246_v29  ;;  %3958 = vmatprep.mubr.msk.bf16.mxu1 %vm4342_vm0, %v6315_v0  ;;  %v875_v29 = vmul.f32 %v4927_v19, %v821_v24 }
 0x2a1   : > { %4036 = vmatprep.subr.bf16.mxu1 %v6315_v0 }
 0x2a3   : > { %v775_v38 = vpop.xlane.xlu0 %774 }
 0x2a4   : > { %v800_v37 = vadd.f32 %v775_v38, %v764_v33 }
 0x2a6   : > { %810 = vst.msk [vmem:[#allocation3] sm:$0xff] %vm342_vm2, %v800_v37 }
 0x2a7   : > { %3959 = vmatmul.mubr.msk.bf16.vlgmr.msra.gmra.mxu1 %vm507_vm1, %v4899_v54 }
 0x2a8   : > { %3962 = vmatprep.mubr.msk.bf16.mxu1 %vm4342_vm0, %v6315_v0 }
 0x2ac   : > { %v778_v36 = vpop.xlane.xlu1 %777 }
 0x2ad   : > { %v801_v63 = vadd.f32 %v778_v36, %v765_v34 }
 0x2af   : > { %811 = vst.msk [vmem:[#allocation3 + $0x8] sm:$0xff] %vm342_vm2, %v801_v63  ;;  %3963 = vmatmul.mubr.msk.bf16.gmra.mxu1 %vm507_vm1, %v4902_v8 }
 0x2b0   : > { %3966 = vmatprep.mubr.msk.bf16.mxu1 %vm4342_vm0, %v6315_v0 }
 0x2b3   : > { %v781_v46 = vpop.xlane.xlu0 %780 }
 0x2b4   : > { %v802_v53 = vadd.f32 %v781_v46, %v766_v41  ;;  %v1029_v46 = vunpack.c.l.bf16 %v3494_v39 }
 0x2b6   : > { %812 = vst.msk [vmem:[#allocation3 + $0x10] sm:$0xff] %vm342_vm2, %v802_v53 }
 0x2b7   : > { %v784_v45 = vpop.xlane.xlu0 %783  ;;  %3967 = vmatmul.mubr.msk.bf16.gmra.mxu1 %vm507_vm1, %v4904_v1  ;;  %v772_v1 = vmul.f32 %v5021_v5, %v763_v6  ;;  %v5402_v5 = vld [vmem:[#allocation2 + $0xe8] sm:$0xff] }
 0x2b8   : > { %v803_v51 = vadd.f32 %v784_v45, %v767_v12  ;;  %3970 = vmatprep.mubr.msk.bf16.mxu1 %vm4342_vm0, %v6315_v0  ;;  %v3599_v12 = vunpack.c.l.bf16 %v3664_v50  ;;  %6379 = vst [vmem:[#allocation38_spill] sm:$0xff] %v5402_v5 }
 0x2ba   : > { %813 = vst.msk [vmem:[#allocation3 + $0x18] sm:$0xff] %vm342_vm2, %v803_v51 }
 0x2bb   : > { %v787_v59 = vpop.xlane.xlu1 %786 }
 0x2bc   : > { %v804_v43 = vadd.f32 %v787_v59, %v768_v55  ;;  %v3600_v59 = vunpack.c.h.bf16 %v3664_v50  ;;  %v3669_v50 = vld [vmem:[%s6308_s0 + $0x50] sm:$0xff]  }
 0x2be   : > { %814 = vst.msk [vmem:[#allocation3 + $0x20] sm:$0xff] %vm342_vm2, %v804_v43  ;;  %v5063_v43 = vld [vmem:[%s6308_s0 + $0x30] sm:$0xff]  }
 0x2bf   : > { %v790_v49 = vpop.xlane.xlu0 %789  ;;  %3971 = vmatmul.mubr.msk.bf16.gmra.mxu1 %vm507_vm1, %v4912_v7 }
 0x2c0   : > { %v805_v62 = vadd.f32 %v790_v49, %v769_v57  ;;  %3974 = vmatprep.mubr.msk.bf16.mxu1 %vm4342_vm0, %v6315_v0 }
 0x2c2   : > { %815 = vst.msk [vmem:[#allocation3 + $0x28] sm:$0xff] %vm342_vm2, %v805_v62  ;;  %v3603_v62 = vunpack.c.l.bf16 %v5063_v43 }
 0x2c3   : > { %v796_v13 = vpop.xlane.xlu0 %795 }
 0x2c4   : > { %v807_v15 = vadd.f32 %v796_v13, %v771_v9 }
 0x2c6   : > { %817 = vst.msk [vmem:[#allocation3 + $0x38] sm:$0xff] %vm342_vm2, %v807_v15 }
 0x2c7   : > { %v793_v54 = vpop.xlane.xlu1 %792  ;;  %3975 = vmatmul.mubr.msk.bf16.gmra.mxu1 %vm507_vm1, %v4910_v3  ;;  %v874_v3 = vmul.f32 %v4915_v10, %v820_v18  ;;  %v3667_v18 = vld [vmem:[%s6308_s0 + $0x40] sm:$0xff]  }
 0x2c8   : > { %v806_v8 = vadd.f32 %v793_v54, %v770_v4  ;;  %4020 = vmatprep.mubr.msk.bf16.mxu1 %vm4342_vm0, %v6315_v0  ;;  %v5077_v54 = vld [vmem:[%s6308_s0 + $0x38] sm:$0xff]  }
 0x2ca   : > { %816 = vst.msk [vmem:[#allocation3 + $0x30] sm:$0xff] %vm342_vm2, %v806_v8 }
 0x2cb   : > { %v799_v7 = vpop.xlane.xlu1 %798 }
 0x2cc   : > { %v808_v20 = vadd.f32 %v799_v7, %v772_v1  ;;  %v3607_v1 = vunpack.c.l.bf16 %v5077_v54 }
 0x2ce   : > { %818 = vst.msk [vmem:[#allocation3 + $0x40] sm:$0xff] %vm342_vm2, %v808_v20 }
 0x2ee   : > { %v954_v21 = vpop.f32.mrf.mxu1 }
 0x2ef   : > { %v992_v22 = vadd.f32 %v954_v21, %v873_v17 }
 0x2f0   : > { %v3810_v23 = vpop.f32.mrf.mxu1 }
 0x2f1   : > { %1001 = vst.msk [vmem:[#allocation4] sm:$0xff] %vm507_vm1, %v992_v22  ;;  %v3611_v23 = vunpack.c.l.bf16 %v3667_v18 }
 0x2f2   : > { %v957_v25 = vpop.f32.mrf.mxu1 }
 0x2f3   : > { %v993_v27 = vadd.f32 %v957_v25, %v874_v3 }
 0x2f4   : > { %v3811_v28 = vpop.f32.mrf.mxu1 }
 0x2f5   : > { %1002 = vst.msk [vmem:[#allocation4 + $0x8] sm:$0xff] %vm507_vm1, %v993_v27  ;;  %v3612_v27 = vunpack.c.h.bf16 %v3667_v18 }
 0x2f6   : > { %v962_v31 = vpop.f32.mrf.mxu1 }
 0x2f7   : > { %v994_v32 = vadd.f32 %v962_v31, %v875_v29 }
 0x2f8   : > { %v3814_v33 = vpop.f32.mrf.mxu1 }
 0x2f9   : > { %1003 = vst.msk [vmem:[#allocation4 + $0x10] sm:$0xff] %vm507_vm1, %v994_v32  ;;  %v5096_v33 = vld [vmem:[%s4417_s28] sm:$0xff]  }
 0x2fa   : > { %v5036_v16 = vpop.f32.mrf.mxu1 }
 0x2fb   : > { %6349 = vst [vmem:[#allocation8_spill] sm:$0xff] %v5036_v16  ;;  %v5385_v16 = vld [vmem:[#allocation2 + $0xd8] sm:$0xff] }
 0x2fc   : > { %v3815_v38 = vpop.f32.mrf.mxu1 }
 0x2fe   : > { %v5038_v37 = vpop.f32.mrf.mxu1 }
 0x2ff   : > { %6350 = vst [vmem:[#allocation9_spill] sm:$0xff] %v5038_v37  ;;  %v5320_v37 = vld [vmem:[#allocation2 + $0x68] sm:$0xff] }
 0x300   : > { %v3818_v10 = vpop.f32.mrf.mxu1 }
 0x301   : > { %v3668_v10 = vld [vmem:[%s6308_s0 + $0x48] sm:$0xff]  }
 0x302   : > { %v5040_v42 = vpop.f32.mrf.mxu1 }
 0x303   : > { %6351 = vst [vmem:[#allocation10_spill] sm:$0xff] %v5040_v42  ;;  %v5345_v42 = vld [vmem:[#allocation2 + $0xc8] sm:$0xff] }
 0x304   : > { %v3819_v47 = vpop.f32.mrf.mxu1 }
 0x306   : > { %v5042_v30 = vpop.f32.mrf.mxu1 }
 0x307   : > { %6352 = vst [vmem:[#allocation11_spill] sm:$0xff] %v5042_v30 }
 0x308   : > { %v3822_v34 = vpop.f32.mrf.mxu1 }
 0x30a   : > { %v5044_v19 = vpop.f32.mrf.mxu1 }
 0x30b   : > { %6353 = vst [vmem:[#allocation12_spill] sm:$0xff] %v5044_v19 }
 0x30c   : > { %v3823_v36 = vpop.f32.mrf.mxu1 }
 0x30d   : > { %v3615_v36 = vunpack.c.l.bf16 %v3668_v10 }
 0x30e   : > { %v5046_v63 = vpop.f32.mrf.mxu1 }
 0x30f   : > { %6354 = vst [vmem:[#allocation13_spill] sm:$0xff] %v5046_v63  ;;  %v5305_v63 = vld [vmem:[#allocation2 + $0xa8] sm:$0xff] }
 0x310   : > { %v3826_v35 = vpop.f32.mrf.mxu1  ;;  %6374 = vst [vmem:[#allocation33_spill] sm:$0xff] %v5305_v63 }
 0x312   : > { %v989_v40 = vpop.f32.mrf.mxu1 }
 0x314   : > { %v3827_v41 = vpop.f32.mrf.mxu1 }
 0x315   : > { %v3616_v41 = vunpack.c.h.bf16 %v3668_v10 }
 0x317   : > { %v1122_v53 = vpop.f32.mrf.mxu1 }
 0x318   : > { %v5054_v56 = vadd.f32 %v1122_v53, %v1029_v46 }
 0x319   : > { %v3840_v45 = vpop.f32.mrf.mxu1 }
 0x31a   : > { %v1170_v48 = vsel %vm619_vm3, %v5054_v56, -inf }
 0x31b   : > { %1171 = vmax.xlane.f32.xlu1 %v1170_v48  ;;  %v1125_v51 = vpop.f32.mrf.mxu1  ;;  %v3619_v48 = vunpack.c.l.bf16 %v3669_v50 }
 0x31c   : > { %v5058_v55 = vadd.f32 %v3599_v12, %v1125_v51 }
 0x31d   : > { %v3841_v2 = vpop.f32.mrf.mxu1 }
 0x31e   : > { %v1173_v57 = vsel %vm619_vm3, %v5058_v55, -inf }
 0x31f   : > { %1174 = vmax.xlane.f32.xlu0 %v1173_v57  ;;  %v1130_v49 = vpop.f32.mrf.mxu1 }
 0x320   : > { %v5067_v60 = vadd.f32 %v3600_v59, %v1130_v49  ;;  %v3620_v49 = vunpack.c.h.bf16 %v3669_v50 }
 0x321   : > { %v3844_v9 = vpop.f32.mrf.mxu1 }
 0x322   : > { %v1176_v13 = vsel %vm619_vm3, %v5067_v60, -inf }
 0x323   : > { %1177 = vmax.xlane.f32.xlu0 %v1176_v13  ;;  %v1133_v14 = vpop.f32.mrf.mxu1 }
 0x324   : > { %v5072_v15 = vadd.f32 %v3603_v62, %v1133_v14 }
 0x325   : > { %v3845_v4 = vpop.f32.mrf.mxu1 }
 0x326   : > { %v1179_v6 = vsel %vm619_vm3, %v5072_v15, -inf }
 0x327   : > { %1180 = vmax.xlane.f32.xlu1 %v1179_v6  ;;  %v1138_v8 = vpop.f32.mrf.mxu1  ;;  %v3670_v6 = vld [vmem:[%s6308_s0 + $0x58] sm:$0xff]  }
 0x329   : > { %v3848_v7 = vpop.f32.mrf.mxu1 }
 0x32a   : > { %v3604_v7 = vunpack.c.h.bf16 %v5063_v43 }
 0x32b   : > { %v1141_v20 = vpop.f32.mrf.mxu1 }
 0x32c   : > { %v5082_v26 = vadd.f32 %v3607_v1, %v1141_v20 }
 0x32d   : > { %v3849_v17 = vpop.f32.mrf.mxu1 }
 0x32e   : > { %v1185_v21 = vsel %vm619_vm3, %v5082_v26, -inf  ;;  %v3624_v17 = vunpack.c.h.bf16 %v3670_v6 }
 0x32f   : > { %1186 = vmax.xlane.f32.xlu1 %v1185_v21  ;;  %v1146_v22 = vpop.f32.mrf.mxu1  ;;  %v3671_v21 = vld [vmem:[%s6308_s0 + $0x60] sm:$0xff]  }
 0x331   : > { %v3852_v3 = vpop.f32.mrf.mxu1 }
 0x332   : > { %v3608_v3 = vunpack.c.h.bf16 %v5077_v54  ;;  %v3628_v54 = vunpack.c.h.bf16 %v3671_v21 }
 0x333   : > { %v1149_v24 = vpop.f32.mrf.mxu1 }
 0x334   : > { %v5089_v25 = vadd.f32 %v3611_v23, %v1149_v24  ;;  %v5131_v23 = vadd.f32 %v3604_v7, %v1138_v8 }
 0x335   : > { %v3853_v28 = vpop.f32.mrf.mxu1 }
 0x336   : > { %v1191_v29 = vsel %vm619_vm3, %v5089_v25, -inf  ;;  %v3627_v28 = vunpack.c.l.bf16 %v3671_v21  ;;  %v1182_v10 = vsel %vm619_vm3, %v5131_v23, -inf }
 0x337   : > { %1192 = vmax.xlane.f32.xlu1 %v1191_v29  ;;  %v1154_v31 = vpop.f32.mrf.mxu1  ;;  %v3623_v29 = vunpack.c.l.bf16 %v3670_v6 }
 0x338   : > { %v5093_v32 = vadd.f32 %v3612_v27, %v1154_v31 }
 0x339   : > { %1437 = vrot.lane.b32.xlu0 %v5096_v33, %s4349_s26  ;;  %v3856_v38 = vpop.f32.mrf.mxu1 }
 0x33a   : > { %v1194_v47 = vsel %vm619_vm3, %v5093_v32, -inf  ;;  %v5138_v38 = vadd.f32 %v3608_v3, %v1146_v22 }
 0x33b   : > { %1195 = vmax.xlane.f32.xlu1 %v1194_v47  ;;  %v1157_v34 = vpop.f32.mrf.mxu1 }
 0x33d   : > { %v3857_v35 = vpop.f32.mrf.mxu1 }
 0x33e   : > { %v3521_v35 = vld [vmem:[%s6308_s0 + $0x68] sm:$0xff]  }
 0x33f   : > { %v1708_v39 = vpop.f32.mrf.mxu1  ;;  %v1623_v50 = vunpack.c.l.bf16 %v3521_v35 }
 0x340   : > { %v5105_v40 = vadd.f32 %v3615_v36, %v1708_v39  ;;  %v1188_v39 = vsel %vm619_vm3, %v5138_v38, -inf }
 0x341   : > { %v3900_v46 = vpop.f32.mrf.mxu1 }
 0x342   : > { %v1756_v53 = vsel %vm619_vm3, %v5105_v40, -inf }
 0x343   : > { %1757 = vmax.xlane.f32.xlu1 %v1756_v53  ;;  %v1711_v12 = vpop.f32.mrf.mxu1 }
 0x344   : > { %v5112_v45 = vadd.f32 %v3616_v41, %v1711_v12 }
 0x345   : > { %v3901_v51 = vpop.f32.mrf.mxu1 }
 0x346   : > { %v1759_v59 = vsel %vm619_vm3, %v5112_v45, -inf }
 0x347   : > { %1760 = vmax.xlane.f32.xlu1 %v1759_v59  ;;  %v1716_v2 = vpop.f32.mrf.mxu1 }
 0x348   : > { %v5116_v57 = vadd.f32 %v3619_v48, %v1716_v2 }
 0x349   : > { %v3904_v62 = vpop.f32.mrf.mxu1 }
 0x34a   : > { %v1762_v9 = vsel %vm619_vm3, %v5116_v57, -inf }
 0x34b   : > { %v1719_v13 = vpop.f32.mrf.mxu1  ;;  %1763 = vmax.xlane.f32.xlu1 %v1762_v9  ;;  %v2201_v9 = vunpack.c.h.bf16 %v3521_v35 }
 0x34c   : > { %v5120_v14 = vadd.f32 %v3620_v49, %v1719_v13 }
 0x34d   : > { %v3905_v4 = vpop.f32.mrf.mxu1 }
 0x34e   : > { %v1765_v1 = vsel %vm619_vm3, %v5120_v14, -inf  ;;  %v3672_v4 = vld [vmem:[%s6308_s0 + $0x70] sm:$0xff]  }
 0x34f   : > { %v1724_v20 = vpop.f32.mrf.mxu1  ;;  %1766 = vmax.xlane.f32.xlu1 %v1765_v1  ;;  %v3631_v7 = vunpack.c.l.bf16 %v3672_v4  ;;  %v3632_v3 = vunpack.c.h.bf16 %v3672_v4  ;;  %v5197_v4 = vld [vmem:[%s6308_s0 + $0x88] sm:$0xff]  }
 0x350   : > { %v5144_v34 = vadd.f32 %v3623_v29, %v1724_v20  ;;  %v3644_v30 = vunpack.c.h.bf16 %v5197_v4 }
 0x351   : > { %v3908_v18 = vpop.f32.mrf.mxu1 }
 0x352   : > { %6357 = vst [vmem:[#allocation16_spill] sm:$0xff] %v5144_v34  ;;  %v1768_v12 = vsel %vm619_vm3, %v5144_v34, -inf }
 0x353   : > { %v1727_v24 = vpop.f32.mrf.mxu1 }
 0x354   : > { %v5134_v27 = vadd.f32 %v3624_v17, %v1727_v24 }
 0x355   : > { %v3909_v31 = vpop.f32.mrf.mxu1 }
 0x356   : > { %6355 = vst [vmem:[#allocation14_spill] sm:$0xff] %v5134_v27  ;;  %v1771_v43 = vsel %vm619_vm3, %v5134_v27, -inf  ;;  %v5427_v27 = vld [vmem:[#allocation2 + $0xf8] sm:$0xff] }
 0x357   : > { %v1732_v47 = vpop.f32.mrf.mxu1  ;;  %1772 = vmax.xlane.f32.xlu1 %v1771_v43 }
 0x358   : > { %1183 = vmax.xlane.f32.xlu0 %v1182_v10  ;;  %v5142_v8 = vadd.f32 %v3627_v28, %v1732_v47  ;;  %v3673_v28 = vld [vmem:[%s6308_s0 + $0x78] sm:$0xff]  }
 0x359   : > { %v3912_v36 = vpop.f32.mrf.mxu1  ;;  %v3635_v10 = vunpack.c.l.bf16 %v3673_v28 }
 0x35a   : > { %6356 = vst [vmem:[#allocation15_spill] sm:$0xff] %v5142_v8  ;;  %v1774_v22 = vsel %vm619_vm3, %v5142_v8, -inf }
 0x35b   : > { %v1735_v41 = vpop.f32.mrf.mxu1  ;;  %1775 = vmax.xlane.f32.xlu1 %v1774_v22  ;;  %v3636_v22 = vunpack.c.h.bf16 %v3673_v28 }
 0x35c   : > { %1189 = vmax.xlane.f32.xlu0 %v1188_v39  ;;  %v5153_v46 = vadd.f32 %v3628_v54, %v1735_v41  ;;  %v3674_v41 = vld [vmem:[%s6308_s0 + $0x80] sm:$0xff]  }
 0x35d   : > { %v3913_v53 = vpop.f32.mrf.mxu1 }
 0x35e   : > { %6358 = vst [vmem:[#allocation17_spill] sm:$0xff] %v5153_v46  ;;  %v1777_v48 = vsel %vm619_vm3, %v5153_v46, -inf }
 0x35f   : > { %v1740_v51 = vpop.f32.mrf.mxu1  ;;  %1778 = vmax.xlane.f32.xlu1 %v1777_v48  ;;  %v3639_v48 = vunpack.c.l.bf16 %v3674_v41 }
 0x360   : > { %v5159_v59 = vadd.f32 %v1740_v51, %v1623_v50  ;;  %1769 = vmax.xlane.f32.xlu0 %v1768_v12 }
 0x361   : > { %v3916_v2 = vpop.f32.mrf.mxu1 }
 0x362   : > { %6359 = vst [vmem:[#allocation18_spill] sm:$0xff] %v5159_v59  ;;  %v1780_v49 = vsel %vm619_vm3, %v5159_v59, -inf  ;;  %v5391_v59 = vld [vmem:[#allocation2 + $0xe0] sm:$0xff] }
 0x363   : > { %v1743_v62 = vpop.f32.mrf.mxu1  ;;  %6378 = vst [vmem:[#allocation37_spill] sm:$0xff] %v5391_v59 }
 0x364   : > { %1781 = vmax.xlane.f32.xlu0 %v1780_v49 }
 0x365   : > { %v3917_v13 = vpop.f32.mrf.mxu1 }
 0x367   : > { %v2294_v6 = vpop.f32.mrf.mxu1 }
 0x368   : > { %v5166_v1 = vadd.f32 %v2294_v6, %v2201_v9  ;;  %v3640_v9 = vunpack.c.h.bf16 %v3674_v41 }
 0x369   : > { %v3960_v20 = vpop.f32.mrf.mxu1 }
 0x36a   : > { %6360 = vst [vmem:[#allocation19_spill] sm:$0xff] %v5166_v1  ;;  %v2342_v17 = vsel %vm619_vm3, %v5166_v1, -inf  ;;  %v5366_v1 = vld [vmem:[#allocation2 + $0xd0] sm:$0xff] }
 0x36b   : > { %v2297_v18 = vpop.f32.mrf.mxu1  ;;  %2343 = vmax.xlane.f32.xlu1 %v2342_v17  ;;  %v3643_v17 = vunpack.c.l.bf16 %v5197_v4 }
 0x36c   : > { %v5170_v21 = vadd.f32 %v3631_v7, %v2297_v18 }
 0x36d   : > { %v3961_v24 = vpop.f32.mrf.mxu1 }
 0x36e   : > { %6361 = vst [vmem:[#allocation20_spill] sm:$0xff] %v5170_v21  ;;  %v2345_v29 = vsel %vm619_vm3, %v5170_v21, -inf  ;;  %v5348_v21 = vld [vmem:[#allocation2 + $0xb0] sm:$0xff] }
 0x36f   : > { %v2302_v31 = vpop.f32.mrf.mxu1  ;;  %2346 = vmax.xlane.f32.xlu0 %v2345_v29 }
 0x370   : > { %v5177_v43 = vadd.f32 %v3632_v3, %v2302_v31 }
 0x371   : > { %v3964_v47 = vpop.f32.mrf.mxu1 }
 0x372   : > { %6362 = vst [vmem:[#allocation21_spill] sm:$0xff] %v5177_v43  ;;  %v2348_v54 = vsel %vm619_vm3, %v5177_v43, -inf }
 0x373   : > { %v2305_v36 = vpop.f32.mrf.mxu1  ;;  %2349 = vmax.xlane.f32.xlu1 %v2348_v54 }
 0x374   : > { %v5181_v35 = vadd.f32 %v3635_v10, %v2305_v36 }
 0x375   : > { %v3965_v39 = vpop.f32.mrf.mxu1 }
 0x376   : > { %6363 = vst [vmem:[#allocation22_spill] sm:$0xff] %v5181_v35  ;;  %v2351_v50 = vsel %vm619_vm3, %v5181_v35, -inf }
 0x377   : > { %2352 = vmax.xlane.f32.xlu0 %v2351_v50  ;;  %v2310_v53 = vpop.f32.mrf.mxu1  ;;  %v5217_v50 = vld [vmem:[#allocation2 + $0x50] sm:$0xff] }
 0x378   : > { %v5188_v12 = vadd.f32 %v3636_v22, %v2310_v53  ;;  %v5212_v22 = vld [vmem:[#allocation2 + $0x48] sm:$0xff]  ;;  %6368 = vst [vmem:[#allocation27_spill] sm:$0xff] %v5217_v50 }
 0x379   : > { %v3968_v51 = vpop.f32.mrf.mxu1 }
 0x37a   : > { %6364 = vst [vmem:[#allocation23_spill] sm:$0xff] %v5188_v12  ;;  %v2354_v2 = vsel %vm619_vm3, %v5188_v12, -inf  ;;  %v5330_v12 = vld [vmem:[#allocation2 + $0x78] sm:$0xff] }
 0x37b   : > { %v2313_v49 = vpop.f32.mrf.mxu1  ;;  %2355 = vmax.xlane.f32.xlu0 %v2354_v2  ;;  %v5227_v2 = vld [vmem:[#allocation2 + $0x58] sm:$0xff] }
 0x37c   : > { %v5192_v62 = vadd.f32 %v3639_v48, %v2313_v49  ;;  %v5295_v49 = vld [vmem:[#allocation2 + $0xa0] sm:$0xff] }
 0x37d   : > { %v3969_v13 = vpop.f32.mrf.mxu1 }
 0x37e   : > { %6365 = vst [vmem:[#allocation24_spill] sm:$0xff] %v5192_v62  ;;  %v2357_v6 = vsel %vm619_vm3, %v5192_v62, -inf }
 0x37f   : > { %2358 = vmax.xlane.f32.xlu1 %v2357_v6  ;;  %v2318_v7 = vpop.f32.mrf.mxu1  ;;  %v5237_v6 = vld [vmem:[#allocation2 + $0x60] sm:$0xff] }
 0x380   : > { %v5201_v20 = vadd.f32 %v3640_v9, %v2318_v7 }
 0x381   : > { %v3972_v18 = vpop.f32.mrf.mxu1 }
 0x382   : > { %6366 = vst [vmem:[#allocation25_spill] sm:$0xff] %v5201_v20  ;;  %v2360_v3 = vsel %vm619_vm3, %v5201_v20, -inf }
 0x383   : > { %2361 = vmax.xlane.f32.xlu1 %v2360_v3  ;;  %v2321_v24 = vpop.f32.mrf.mxu1 }
 0x384   : > { %v5206_v28 = vadd.f32 %v3643_v17, %v2321_v24  ;;  %v5286_v24 = vld [vmem:[#allocation2 + $0x98] sm:$0xff] }
 0x385   : > { %v3973_v29 = vpop.f32.mrf.mxu1  ;;  %6372 = vst [vmem:[#allocation31_spill] sm:$0xff] %v5286_v24 }
 0x386   : > { %6367 = vst [vmem:[#allocation26_spill] sm:$0xff] %v5206_v28  ;;  %v2363_v31 = vsel %vm619_vm3, %v5206_v28, -inf  ;;  %v5253_v29 = vld [vmem:[#allocation2 + $0x70] sm:$0xff] }
 0x387   : > { %2364 = vmax.xlane.f32.xlu1 %v2363_v31  ;;  %v5210_v10 = vpop.f32.mrf.mxu1 }
 0x389   : > { %v3976_v47 = vpop.f32.mrf.mxu1 }
 0x38b   : > { %v2329_v54 = vpop.f32.mrf.mxu1 }
 0x38d   : > { %v3977_v36 = vpop.f32.mrf.mxu1 }
 0x38e   : > { %v5262_v36 = vld [vmem:[#allocation2 + $0x80] sm:$0xff] }
 0x38f   : > { %6370 = vst [vmem:[#allocation29_spill] sm:$0xff] %v5262_v36 }
 0x3a4   : > { %v1172_v39 = vpop.xlane.xlu1 %1171 }
 0x3a5   : > { %v5215_v41 = vmax.f32 %v5212_v22, %v1172_v39 }
 0x3a7   : > { %1596 = vst.msk [vmem:[#allocation2 + $0x48] sm:$0xff] %vm342_vm2, %v5215_v41  ;;  %1235 = vperm.xlu1 %4080, %v5215_v41  }
 0x3a8   : > { %v1175_v48 = vpop.xlane.xlu0 %1174 }
 0x3a9   : > { %v5225_v51 = vmax.f32 %v5217_v50, %v1175_v48 }
 0x3ab   : > { %6369 = vst [vmem:[#allocation28_spill] sm:$0xff] %v5225_v51  ;;  %1597 = vst.msk [vmem:[#allocation2 + $0x50] sm:$0xff] %vm342_vm2, %v5225_v51  ;;  %1240 = vperm.xlu1 %4080, %v5225_v51  }
 0x3ac   : > { %v1178_v9 = vpop.xlane.xlu0 %1177 }
 0x3ad   : > { %v5235_v13 = vmax.f32 %v5227_v2, %v1178_v9  ;;  %v5267_v9 = vld [vmem:[#allocation2 + $0x88] sm:$0xff] }
 0x3af   : > { %1598 = vst.msk [vmem:[#allocation2 + $0x58] sm:$0xff] %vm342_vm2, %v5235_v13  ;;  %1245 = vperm.xlu0 %4081, %v5235_v13  }
 0x3b0   : > { %v1181_v17 = vpop.xlane.xlu1 %1180  ;;  %v1438_v18 = vpop.permute.xlu0 %1437 }
 0x3b1   : > { %v5245_v3 = vmax.f32 %v5237_v6, %v1181_v17  ;;  %3867 = vmatpush3.bf16.msra.mxu0 %v1438_v18 }
 0x3b2   : > { %3918 = vmatprep.subr.bf16.mxu0 %v6315_v0 }
 0x3b3   : > { %1599 = vst.msk [vmem:[#allocation2 + $0x60] sm:$0xff] %vm342_vm2, %v5245_v3  ;;  %1250 = vperm.xlu1 %4080, %v5245_v3  }
 0x3b8   : > { %v1187_v31 = vpop.xlane.xlu1 %1186 }
 0x3b9   : > { %v5256_v47 = vmax.f32 %v5253_v29, %v1187_v31 }
 0x3bb   : > { %1601 = vst.msk [vmem:[#allocation2 + $0x70] sm:$0xff] %vm342_vm2, %v5256_v47 }
 0x3c0   : > { %v1193_v39 = vpop.xlane.xlu1 %1192 }
 0x3c1   : > { %v5265_v48 = vmax.f32 %v5262_v36, %v1193_v39  ;;  %v5281_v39 = vld [vmem:[#allocation2 + $0x90] sm:$0xff] }
 0x3c3   : > { %6371 = vst [vmem:[#allocation30_spill] sm:$0xff] %v5265_v48  ;;  %1603 = vst.msk [vmem:[#allocation2 + $0x80] sm:$0xff] %vm342_vm2, %v5265_v48 }
 0x3c4   : > { %v1196_v18 = vpop.xlane.xlu1 %1195 }
 0x3c5   : > { %v5274_v31 = vmax.f32 %v5267_v9, %v1196_v18 }
 0x3c7   : > { %1604 = vst.msk [vmem:[#allocation2 + $0x88] sm:$0xff] %vm342_vm2, %v5274_v31  ;;  %1275 = vperm.xlu0 %4081, %v5274_v31  }
 0x3cc   : > { %v1758_v54 = vpop.xlane.xlu1 %1757 }
 0x3cd   : > { %v5284_v17 = vmax.f32 %v5281_v39, %v1758_v54 }
 0x3cf   : > { %2182 = vst.msk [vmem:[#allocation2 + $0x90] sm:$0xff] %vm342_vm2, %v5284_v17 }
 0x3d0   : > { %v1761_v7 = vpop.xlane.xlu1 %1760 }
 0x3d1   : > { %v5293_v0 = vmax.f32 %v5286_v24, %v1761_v7  ;;  %v5364_v24 = vadd.f32 %v3644_v30, %v5210_v10  ;;  %v4313_v10 = vld [vmem:[%s4417_s28 + $0x20] ss:$0 sps:$4 sm:$0xff]  }
 0x3d3   : > { %6373 = vst [vmem:[#allocation32_spill] sm:$0xff] %v5293_v0  ;;  %2183 = vst.msk [vmem:[#allocation2 + $0x98] sm:$0xff] %vm342_vm2, %v5293_v0  ;;  %1826 = vperm.xlu0 %4081, %v5293_v0   ;;  %v2366_v30 = vsel %vm619_vm3, %v5364_v24, -inf }
 0x3d4   : > { %v1764_v54 = vpop.xlane.xlu1 %1763  ;;  %6377 = vst [vmem:[#allocation36_spill] sm:$0xff] %v5364_v24  ;;  %v5409_v24 = vld [vmem:[%s4417_s28 + $0x18] sm:$0xff]  }
 0x3d5   : > { %v5303_v18 = vmax.f32 %v5295_v49, %v1764_v54  ;;  %v5318_v54 = vld [vmem:[#allocation2 + $0xb8] sm:$0xff] }
 0x3d6   : > { %6375 = vst [vmem:[#allocation34_spill] sm:$0xff] %v5318_v54 }
 0x3d7   : > { %2184 = vst.msk [vmem:[#allocation2 + $0xa0] sm:$0xff] %vm342_vm2, %v5303_v18 }
 0x3d8   : > { %v1767_v19 = vpop.xlane.xlu1 %1766 }
 0x3d9   : > { %v5312_v53 = vmax.f32 %v5305_v63, %v1767_v19  ;;  %v5328_v19 = vld [vmem:[#allocation2 + $0xc0] sm:$0xff] }
 0x3da   : > { %6376 = vst [vmem:[#allocation35_spill] sm:$0xff] %v5328_v19 }
 0x3db   : > { %2185 = vst.msk [vmem:[#allocation2 + $0xa8] sm:$0xff] %vm342_vm2, %v5312_v53 }
 0x3e0   : > { %v1773_v28 = vpop.xlane.xlu1 %1772 }
 0x3e1   : > { %v1184_v20 = vpop.xlane.xlu0 %1183  ;;  %v5323_v7 = vmax.f32 %v5318_v54, %v1773_v28 }
 0x3e2   : > { %v5326_v62 = vmax.f32 %v5320_v37, %v1184_v20 }
 0x3e3   : > { %2187 = vst.msk [vmem:[#allocation2 + $0xb8] sm:$0xff] %vm342_vm2, %v5323_v7 }
 0x3e4   : > { %1600 = vst.msk [vmem:[#allocation2 + $0x68] sm:$0xff] %vm342_vm2, %v5326_v62  ;;  %1255 = vperm.xlu1 %4080, %v5326_v62   ;;  %v1776_v28 = vpop.xlane.xlu1 %1775 }
 0x3e5   : > { %v1190_v35 = vpop.xlane.xlu0 %1189  ;;  %v5340_v20 = vmax.f32 %v5328_v19, %v1776_v28 }
 0x3e6   : > { %v5343_v43 = vmax.f32 %v5330_v12, %v1190_v35 }
 0x3e7   : > { %2188 = vst.msk [vmem:[#allocation2 + $0xc0] sm:$0xff] %vm342_vm2, %v5340_v20 }
 0x3e8   : > { %1602 = vst.msk [vmem:[#allocation2 + $0x78] sm:$0xff] %vm342_vm2, %v5343_v43  ;;  %1260 = vperm.xlu1 %4080, %v5256_v47   ;;  %v1779_v28 = vpop.xlane.xlu1 %1778 }
 0x3e9   : > { %v1770_v35 = vpop.xlane.xlu0 %1769  ;;  %v5358_v0 = vmax.f32 %v5345_v42, %v1779_v28 }
 0x3ea   : > { %v5361_v4 = vmax.f32 %v5348_v21, %v1770_v35 }
 0x3eb   : > { %2189 = vst.msk [vmem:[#allocation2 + $0xc8] sm:$0xff] %vm342_vm2, %v5358_v0 }
 0x3ec   : > { %1265 = vperm.xlu1 %4080, %v5343_v43   ;;  %2186 = vst.msk [vmem:[#allocation2 + $0xb0] sm:$0xff] %vm342_vm2, %v5361_v4 }
 0x3ed   : > { %v1782_v28 = vpop.xlane.xlu0 %1781 }
 0x3ee   : > { %v5376_v35 = vmax.f32 %v5366_v1, %v1782_v28 }
 0x3f0   : > { %1270 = vperm.xlu1 %4080, %v5265_v48   ;;  %2190 = vst.msk [vmem:[#allocation2 + $0xd0] sm:$0xff] %vm342_vm2, %v5376_v35 }
 0x3f2   : > { %2367 = vmax.xlane.f32.xlu0 %v2366_v30 }
 0x3f4   : > { %1821 = vperm.xlu1 %4080, %v5284_v17   ;;  %v2344_v19 = vpop.xlane.xlu1 %2343 }
 0x3f5   : > { %v5389_v28 = vmax.f32 %v5385_v16, %v2344_v19  ;;  %v4315_v19 = vld [vmem:[%s4417_s28 + $0x10] sm:$0xff]  }
 0x3f7   : > { %2768 = vst.msk [vmem:[#allocation2 + $0xd8] sm:$0xff] %vm342_vm2, %v5389_v28 }
 0x3f8   : > { %2031 = vrot.lane.b32.xlu1 %v4313_v10, %s4350_s14  ;;  %v2347_v30 = vpop.xlane.xlu0 %2346 }
 0x3f9   : > { %v5400_v46 = vmax.f32 %v5391_v59, %v2347_v30  ;;  %v5416_v30 = vld [vmem:[#allocation2 + $0xf0] sm:$0xff] }
 0x3fb   : > { %2769 = vst.msk [vmem:[#allocation2 + $0xe0] sm:$0xff] %vm342_vm2, %v5400_v46 }
 0x3fc   : > { %2029 = vrot.lane.b32.xlu1 %v5409_v24, %s4350_s14  ;;  %v2350_v54 = vpop.xlane.xlu1 %2349 }
 0x3fd   : > { %v5414_v8 = vmax.f32 %v5402_v5, %v2350_v54  ;;  %v5436_v5 = vld [vmem:[#allocation2 + $0x100] sm:$0xff] }
 0x3ff   : > { %2770 = vst.msk [vmem:[#allocation2 + $0xe8] sm:$0xff] %vm342_vm2, %v5414_v8 }
 0x400   : > { %2027 = vrot.lane.b32.xlu1 %v4315_v19, %s4350_s14  ;;  %v2353_v59 = vpop.xlane.xlu0 %2352 }
 0x401   : > { %v5425_v50 = vmax.f32 %v5416_v30, %v2353_v59  ;;  %v5443_v59 = vld [vmem:[%s4417_s28 + $0x8] sm:$0xff]  }
 0x403   : > { %2771 = vst.msk [vmem:[#allocation2 + $0xf0] sm:$0xff] %vm342_vm2, %v5425_v50 }
 0x404   : > { %2023 = vrot.lane.b32.xlu1 %v5096_v33, %s4350_s14  ;;  %v2356_v54 = vpop.xlane.xlu0 %2355 }
 0x405   : > { %v5434_v51 = vmax.f32 %v5427_v27, %v2356_v54  ;;  %v5451_v54 = vld [vmem:[#allocation2 + $0x108] sm:$0xff] }
 0x406   : > { %6380 = vst [vmem:[#allocation39_spill] sm:$0xff] %v5451_v54 }
 0x407   : > { %2772 = vst.msk [vmem:[#allocation2 + $0xf8] sm:$0xff] %vm342_vm2, %v5434_v51 }
 0x408   : > { %2025 = vrot.lane.b32.xlu0 %v5443_v59, %s4350_s14  ;;  %1831 = vperm.xlu1 %4080, %v5303_v18   ;;  %v2359_v48 = vpop.xlane.xlu1 %2358 }
 0x409   : > { %v5449_v36 = vmax.f32 %v5436_v5, %v2359_v48  ;;  %v1210_v48 = vsub.f32 %v5320_v37, %v5326_v62  ;;  %v1796_v37 = vsub.f32 %v5348_v21, %v5361_v4  ;;  %v6381_v62 = vsub.f32 %v5212_v22, %v5215_v41 }
 0x40a   : > { %v2381_v21 = vsub.f32 %v5416_v30, %v5425_v50 }
 0x40b   : > { %2773 = vst.msk [vmem:[#allocation2 + $0x100] sm:$0xff] %vm342_vm2, %v5449_v36 }
 0x40c   : > { %2617 = vrot.lane.b32.xlu0 %v4313_v10, %s4351_s15  ;;  %1836 = vperm.xlu1 %4080, %v5312_v53   ;;  %v2362_v61 = vpop.xlane.xlu1 %2361 }
 0x40d   : > { %v5460_v63 = vmax.f32 %v5451_v54, %v2362_v61  ;;  %v1223_v54 = vmul.f32 1.442695, %v1210_v48 }
 0x40f   : > { %2774 = vst.msk [vmem:[#allocation2 + $0x108] sm:$0xff] %vm342_vm2, %v5460_v63  ;;  %4132 = vpow2.f32 %v1223_v54 }
 0x410   : > { %1841 = vperm.xlu1 %4080, %v5361_v4   ;;  %2422 = vperm.xlu0 %4081, %v5425_v50   ;;  %v2365_v34 = vpop.xlane.xlu1 %2364 }
 0x411   : > { %v5471_v10 = vmax.f32 %v5462_v11, %v2365_v34  ;;  %v1212_v34 = vsub.f32 %v5330_v12, %v5343_v43 }
 0x413   : > { %2775 = vst.msk [vmem:[#allocation2 + $0x110] sm:$0xff] %vm342_vm2, %v5471_v10  ;;  %v1227_v61 = vmul.f32 1.442695, %v1212_v34 }
 0x414   : > { %1846 = vperm.xlu1 %4080, %v5323_v7   ;;  %2613 = vrot.lane.b32.xlu0 %v4315_v19, %s4351_s15  ;;  %v1215_v19 = vmul.f32 1.442695, %v6381_v62 }
 0x415   : > { %4134 = vpow2.f32 %v1227_v61  ;;  %v2393_v61 = vmul.f32 1.442695, %v2381_v21 }
 0x416   : > { %4136 = vpow2.f32 %v1215_v19 }
 0x418   : > { %1851 = vperm.xlu1 %4080, %v5340_v20   ;;  %2432 = vperm.xlu0 %4081, %v5449_v36  }
 0x41c   : > { %1856 = vperm.xlu1 %4080, %v5358_v0   ;;  %2609 = vrot.lane.b32.xlu0 %v5096_v33, %s4351_s15  ;;  %v1809_v33 = vmul.f32 1.442695, %v1796_v37  ;;  %v5506_v4 = vpop.eup %4132 }
 0x41e   : > { %4138 = vpow2.f32 %v1809_v33 }
 0x420   : > { %1861 = vperm.xlu1 %4080, %v5376_v35   ;;  %2442 = vperm.xlu0 %4081, %v5471_v10  }
 0x422   : > { %v1236_v43 = vpop.permute.xlu1 %1235  ;;  %v5511_v30 = vpop.eup %4134 }
 0x423   : > { %v1278_v12 = vsub.f32 %v5054_v56, %v1236_v43  ;;  %v6382_v56 = vsub.f32 %v5267_v9, %v5274_v31  ;;  %v5520_v62 = vpop.eup %4136 }
 0x424   : > { %2407 = vperm.xlu1 %4080, %v5389_v28   ;;  %845 = vperm.xlu0 %4081, %v4990_v44  }
 0x425   : > { %v1287_v54 = vmul.f32 1.442695, %v1278_v12  ;;  %v1231_v41 = vmul.f32 1.442695, %v6382_v56 }
 0x426   : > { %v1241_v48 = vpop.permute.xlu1 %1240 }
 0x427   : > { %v1279_v34 = vsub.f32 %v5058_v55, %v1241_v48  ;;  %4140 = vpow2.f32 %v1287_v54  ;;  %v6386_v54 = vmov 0.0   ;;  %v2783_v48 = vld [vmem:[#allocation3 + $0x18] sm:$0xff] }
 0x428   : > { %2412 = vperm.xlu1 %4080, %v5400_v46   ;;  %855 = vperm.xlu0 %4081, %v5005_v58  }
 0x429   : > { %v1289_v22 = vmul.f32 1.442695, %v1279_v34 }
 0x42a   : > { %v1246_v44 = vpop.permute.xlu0 %1245 }
 0x42b   : > { %4142 = vpow2.f32 %v1289_v22  ;;  %v1280_v55 = vsub.f32 %v5067_v60, %v1246_v44  ;;  %v6383_v60 = vsub.f32 %v5345_v42, %v5358_v0  ;;  %v6385_v42 = vsub.f32 %v5366_v1, %v5376_v35  ;;  %v2780_v44 = vld [vmem:[#allocation3] sm:$0xff] }
 0x42c   : > { %2417 = vperm.xlu1 %4080, %v5414_v8   ;;  %1400 = vperm.xlu0 %4081, %v5506_v4   ;;  %4144 = vpow2.f32 %v1231_v41  ;;  %v6387_v35 = vsub.f32 %v5385_v16, %v5389_v28  ;;  %v2787_v16 = vld [vmem:[#allocation3 + $0x38] sm:$0xff] }
 0x42d   : > { %v1291_v58 = vmul.f32 1.442695, %v1280_v55  ;;  %4146 = vpow2.f32 %v2393_v61  ;;  %v1815_v37 = vmul.f32 1.442695, %v6383_v60  ;;  %v1817_v33 = vmul.f32 1.442695, %v6385_v42 }
 0x42e   : > { %v1251_v50 = vpop.permute.xlu1 %1250  ;;  %v2387_v21 = vmul.f32 1.442695, %v6387_v35  ;;  %v6388_v55 = vsub.f32 %v5427_v27, %v5434_v51 }
 0x42f   : > { %v1281_v9 = vsub.f32 %v5072_v15, %v1251_v50  ;;  %4148 = vpow2.f32 %v1291_v58  ;;  %v5524_v15 = vpop.eup %4138  ;;  %v6389_v50 = vsub.f32 %v5462_v11, %v5471_v10 }
 0x430   : > { %2615 = vrot.lane.b32.xlu1 %v5409_v24, %s4351_s15  ;;  %1410 = vperm.xlu0 %4081, %v5511_v30   ;;  %v6384_v24 = vsub.f32 %v5281_v39, %v5284_v17  ;;  %v2395_v61 = vmul.f32 1.442695, %v6388_v55 }
 0x431   : > { %v1293_v31 = vmul.f32 1.442695, %v1281_v9  ;;  %v2401_v9 = vmul.f32 1.442695, %v6389_v50  ;;  %v6391_v50 = vsub.f32 %v5237_v6, %v5245_v3  ;;  %v2341_v6 = vld [vmem:[#allocation2 + $0x118] sm:$0xff] }
 0x432   : > { %v1801_v19 = vmul.f32 1.442695, %v6384_v24 }
 0x433   : > { %4150 = vpow2.f32 %v1293_v31 }
 0x434   : > { %1380 = vperm.xlu0 %4081, %v5520_v62   ;;  %2427 = vperm.xlu1 %4080, %v5434_v51   ;;  %4152 = vpow2.f32 %v1815_v37  ;;  %v5529_v43 = vpop.eup %4140 }
 0x435   : > { %4154 = vpow2.f32 %v1801_v19 }
 0x436   : > { %4156 = vpow2.f32 %v1817_v33 }
 0x437   : > { %4158 = vrcp.f32 %v2783_v48 }
 0x438   : > { %v5531_v12 = vpop.eup %4142  ;;  %1986 = vperm.xlu0 %4081, %v5524_v15   ;;  %2611 = vrot.lane.b32.xlu1 %v5443_v59, %s4351_s15  ;;  %4160 = vpow2.f32 %v2387_v21 }
 0x439   : > { %v1432_v0 = vpack.c.bf16 %v5531_v12, %v5529_v43  ;;  %v5541_v17 = vpop.eup %4144 }
 0x43a   : > { %v5546_v39 = vpop.eup %4146 }
 0x43b   : > { %3869 = vmatmul.mubr.msk.bf16.vlgmr.msra.gmra.mxu0 %vm619_vm3, %v1432_v0 }
 0x43c   : > { %1420 = vperm.xlu0 %4081, %v5541_v17   ;;  %2437 = vperm.xlu1 %4080, %v5460_v63   ;;  %v5550_v59 = vpop.eup %4148 }
 0x43d   : > { %3872 = vmatprep.mubr.msk.bf16.mxu0 %vm4342_vm0, %v6386_v54 }
 0x440   : > { %v5552_v34 = vpop.eup %4150  ;;  %2567 = vperm.xlu0 %4081, %v5546_v39   ;;  %850 = vperm.xlu1 %4080, %v4997_v52   ;;  %v2784_v52 = vld [vmem:[#allocation3 + $0x20] sm:$0xff] }
 0x441   : > { %v1433_v1 = vpack.c.bf16 %v5552_v34, %v5550_v59  ;;  %v5561_v22 = vpop.eup %4152  ;;  %4162 = vrcp.f32 %v2784_v52 }
 0x442   : > { %v5567_v56 = vpop.eup %4154  ;;  %4164 = vrcp.f32 %v2787_v16 }
 0x443   : > { %3873 = vmatmul.mubr.msk.bf16.gmra.mxu0 %vm619_vm3, %v1433_v1  ;;  %v5570_v41 = vpop.eup %4156  ;;  %4166 = vrcp.f32 %v2780_v44 }
 0x444   : > { %2001 = vperm.xlu0 %4081, %v5561_v22   ;;  %3876 = vmatprep.mubr.msk.bf16.mxu0 %vm4342_vm0, %v6386_v54  ;;  %v4159_v28 = vpop.eup %4158  ;;  %4168 = vpow2.f32 %v2395_v61 }
 0x445   : > { %v5576_v58 = vpop.eup %4160  ;;  %4170 = vpow2.f32 %v2401_v9  ;;  %v1221_v9 = vmul.f32 1.442695, %v6391_v50 }
 0x448   : > { %1966 = vperm.xlu0 %4081, %v5567_v56  }
 0x44c   : > { %2006 = vperm.xlu0 %4081, %v5570_v41  }
 0x44e   : > { %v4163_v31 = vpop.eup %4162 }
 0x44f   : > { %v4165_v60 = vpop.eup %4164 }
 0x450   : > { %2824 = vperm.xlu0 %4081, %v4159_v28   ;;  %v4167_v37 = vpop.eup %4166  ;;  %v6390_v28 = vsub.f32 %v5227_v2, %v5235_v13 }
 0x451   : > { %v5583_v27 = vpop.eup %4168 }
 0x452   : > { %v5587_v10 = vpop.eup %4170  ;;  %v1219_v44 = vmul.f32 1.442695, %v6390_v28  ;;  %v6393_v28 = vsub.f32 %v5295_v49, %v5303_v18  ;;  %v6394_v49 = vld [vmem:[#allocation6_spill] sm:$0xff] }
 0x454   : > { %2552 = vperm.xlu0 %4081, %v5576_v58  }
 0x458   : > { %2829 = vperm.xlu0 %4081, %v4163_v31  }
 0x45c   : > { %2844 = vperm.xlu0 %4081, %v4165_v60  }
 0x45f   : > { %v1256_v24 = vpop.permute.xlu1 %1255 }
 0x460   : > { %v1282_v19 = vsub.f32 %v5131_v23, %v1256_v24  ;;  %2809 = vperm.xlu0 %4081, %v4167_v37   ;;  %v1276_v23 = vpop.permute.xlu0 %1275 }
 0x461   : > { %v1286_v52 = vsub.f32 %v5093_v32, %v1276_v23  ;;  %v6392_v23 = vsub.f32 %v5253_v29, %v5256_v47 }
 0x462   : > { %v1295_v51 = vmul.f32 1.442695, %v1282_v19 }
 0x463   : > { %v1261_v0 = vpop.permute.xlu1 %1260  ;;  %v1303_v55 = vmul.f32 1.442695, %v1286_v52 }
 0x464   : > { %v1283_v11 = vsub.f32 %v5082_v26, %v1261_v0  ;;  %2572 = vperm.xlu0 %4081, %v5583_v27   ;;  %4172 = vpow2.f32 %v1295_v51  ;;  %v1827_v31 = vpop.permute.xlu0 %1826 }
 0x465   : > { %v1865_v37 = vsub.f32 %v5112_v45, %v1827_v31 }
 0x466   : > { %v1297_v42 = vmul.f32 1.442695, %v1283_v11 }
 0x467   : > { %v1266_v33 = vpop.permute.xlu1 %1265  ;;  %v1875_v51 = vmul.f32 1.442695, %v1865_v37 }
 0x468   : > { %4174 = vpow2.f32 %v1297_v42  ;;  %v1284_v48 = vsub.f32 %v5138_v38, %v1266_v33  ;;  %2587 = vperm.xlu0 %4081, %v5587_v10  }
 0x46a   : > { %v1299_v1 = vmul.f32 1.442695, %v1284_v48 }
 0x46b   : > { %v1271_v35 = vpop.permute.xlu1 %1270 }
 0x46c   : > { %v1285_v21 = vsub.f32 %v5089_v25, %v1271_v35  ;;  %4176 = vpow2.f32 %v1299_v1  ;;  %v1225_v1 = vmul.f32 1.442695, %v6392_v23 }
 0x46e   : > { %v1301_v26 = vmul.f32 1.442695, %v1285_v21 }
 0x46f   : > { %v1822_v16 = vpop.permute.xlu1 %1821 }
 0x470   : > { %4178 = vpow2.f32 %v1301_v26  ;;  %v1864_v2 = vsub.f32 %v5105_v40, %v1822_v16 }
 0x471   : > { %v5596_v38 = vpop.eup %4172  ;;  %4180 = vpow2.f32 %v1219_v44  ;;  %v1805_v44 = vmul.f32 1.442695, %v6393_v28 }
 0x472   : > { %4182 = vpow2.f32 %v1303_v55  ;;  %v1873_v3 = vmul.f32 1.442695, %v1864_v2  ;;  %v6395_v2 = vld [vmem:[#allocation33_spill] sm:$0xff] }
 0x473   : > { %v2032_v61 = vpop.permute.xlu1 %2031  ;;  %4184 = vpow2.f32 %v1221_v9 }
 0x474   : > { %v2053_v25 = vsel %vm916_vm5, %v2032_v61, 0  ;;  %4186 = vpow2.f32 %v1873_v3  ;;  %v6398_v3 = vld [vmem:[#allocation29_spill] sm:$0xff] }
 0x475   : > { %v5602_v32 = vpop.eup %4174  ;;  %3919 = vmatpush3.bf16.msra.mxu0 %v2053_v25  ;;  %4188 = vpow2.f32 %v1875_v51 }
 0x476   : > { %v1434_v13 = vpack.c.bf16 %v5602_v32, %v5596_v38  ;;  %3920 = vmatprep.subr.bf16.mxu0 %v6386_v54 }
 0x477   : > { %v2030_v60 = vpop.permute.xlu1 %2029 }
 0x478   : > { %3877 = vmatmul.mubr.msk.bf16.gmra.mxu0 %vm619_vm3, %v1434_v13  ;;  %v6396_v13 = vsub.f32 %v6395_v2, %v5312_v53 }
 0x479   : > { %3880 = vmatprep.mubr.msk.bf16.mxu0 %vm4342_vm0, %v6386_v54  ;;  %3921 = vmatpush3.bf16.msra.mxu0 %v2030_v60  ;;  %v5613_v19 = vpop.eup %4176 }
 0x47a   : > { %3922 = vmatprep.subr.bf16.mxu0 %v6386_v54  ;;  %v1807_v60 = vmul.f32 1.442695, %v6396_v13  ;;  %v6409_v13 = vld [vmem:[#allocation7_spill] sm:$0xff] }
 0x47b   : > { %v2028_v40 = vpop.permute.xlu1 %2027  ;;  %v2368_v24 = vpop.xlane.xlu0 %2367 }
 0x47c   : > { %v2377_v0 = vmax.f32 %v2341_v6, %v2368_v24 }
 0x47d   : > { %v5615_v11 = vpop.eup %4178  ;;  %3923 = vmatpush3.bf16.msra.mxu0 %v2028_v40  ;;  %v6399_v40 = vld [vmem:[#allocation30_spill] sm:$0xff] }
 0x47e   : > { %v2386_v45 = vsub.f32 %v2341_v6, %v2377_v0  ;;  %2776 = vst.msk [vmem:[#allocation2 + $0x118] sm:$0xff] %vm342_vm2, %v2377_v0  ;;  %2447 = vperm.xlu1 %4080, %v2377_v0   ;;  %v1435_v42 = vpack.c.bf16 %v5615_v11, %v5613_v19  ;;  %3924 = vmatprep.subr.bf16.mxu0 %v6386_v54  ;;  %v5625_v21 = vpop.eup %4180 }
 0x47f   : > { %v2024_v33 = vpop.permute.xlu1 %2023  ;;  %v2026_v48 = vpop.permute.xlu0 %2025  ;;  %v6400_v24 = vsub.f32 %v6398_v3, %v6399_v40 }
 0x480   : > { %v2403_v35 = vmul.f32 1.442695, %v2386_v45  ;;  %3881 = vmatmul.mubr.msk.bf16.gmra.mxu0 %vm619_vm3, %v1435_v42  ;;  %v5631_v52 = vpop.eup %4182  ;;  %v6401_v42 = vld [vmem:[#allocation5_spill] sm:$0xff] }
 0x481   : > { %3884 = vmatprep.mubr.msk.bf16.mxu0 %vm4342_vm0, %v6386_v54  ;;  %3925 = vmatpush3.bf16.msra.mxu0 %v2026_v48  ;;  %v5634_v47 = vpop.eup %4184  ;;  %v1436_v55 = vpack.c.bf16 %v5631_v52, %v5631_v52  ;;  %v1229_v51 = vmul.f32 1.442695, %v6400_v24  ;;  %v6410_v24 = vld [vmem:[#allocation17_spill] sm:$0xff] }
 0x482   : > { %4190 = vpow2.f32 %v2403_v35  ;;  %1390 = vperm.xlu1 %4080, %v5625_v21   ;;  %3926 = vmatprep.subr.bf16.mxu0 %v6386_v54  ;;  %v5648_v18 = vpop.eup %4186 }
 0x483   : > { %v1832_v26 = vpop.permute.xlu1 %1831  ;;  %4192 = vpow2.f32 %v1225_v1  ;;  %v2618_v16 = vpop.permute.xlu0 %2617  ;;  %v6402_v1 = vld [vmem:[#allocation14_spill] sm:$0xff] }
 0x484   : > { %v1866_v29 = vsub.f32 %v5116_v57, %v1832_v26  ;;  %4194 = vpow2.f32 %v1805_v44  ;;  %v5656_v6 = vpop.eup %4188  ;;  %v2639_v45 = vsel %vm916_vm5, %v2618_v16, 0  ;;  %v6403_v44 = vld [vmem:[#allocation27_spill] sm:$0xff] }
 0x485   : > { %3927 = vmatpush3.bf16.msra.mxu0 %v2024_v33  ;;  %v2018_v0 = vpack.c.bf16 %v5656_v6, %v5648_v18 }
 0x486   : > { %1395 = vperm.xlu1 %4080, %v5634_v47   ;;  %3978 = vmatprep.subr.bf16.mxu0 %v6386_v54  ;;  %v1877_v61 = vmul.f32 1.442695, %v1866_v29 }
 0x487   : > { %v1837_v50 = vpop.permute.xlu1 %1836 }
 0x488   : > { %v1867_v9 = vsub.f32 %v5120_v14, %v1837_v50  ;;  %3885 = vmatmul.mubr.msk.bf16.gmra.mxu0 %vm619_vm3, %v1436_v55  ;;  %4196 = vpow2.f32 %v1877_v61  ;;  %v6397_v14 = vld [vmem:[#allocation16_spill] sm:$0xff] }
 0x489   : > { %3928 = vmatprep.mubr.msk.bf16.mxu0 %vm4342_vm0, %v6386_v54  ;;  %v6404_v55 = vld [vmem:[#allocation28_spill] sm:$0xff] }
 0x48a   : > { %v1879_v57 = vmul.f32 1.442695, %v1867_v9  ;;  %860 = vperm.xlu1 %4080, %v6394_v49   ;;  %v6405_v61 = vsub.f32 %v6403_v44, %v6404_v55  ;;  %v6406_v9 = vld [vmem:[#allocation15_spill] sm:$0xff]  ;;  %v6407_v49 = vld [vmem:[#allocation34_spill] sm:$0xff] }
 0x48b   : > { %v1842_v25 = vpop.permute.xlu1 %1841  ;;  %v5650_v31 = vpop.permute.xlu0 %2422  ;;  %v822_v55 = vld [vmem:[#allocation4 + $0x18] sm:$0xff] }
 0x48c   : > { %4198 = vpow2.f32 %v1879_v57  ;;  %v1868_v37 = vsub.f32 %v6397_v14, %v1842_v25  ;;  %v1217_v50 = vmul.f32 1.442695, %v6405_v61  ;;  %v6408_v25 = vsub.f32 %v6407_v49, %v5323_v7  ;;  %v6414_v49 = vld [vmem:[#allocation35_spill] sm:$0xff] }
 0x48d   : > { %4200 = vpow2.f32 %v1807_v60 }
 0x48e   : > { %865 = vperm.xlu1 %4080, %v6401_v42   ;;  %v1881_v53 = vmul.f32 1.442695, %v1868_v37  ;;  %4202 = vpow2.f32 %v1229_v51  ;;  %v1811_v2 = vmul.f32 1.442695, %v6408_v25  ;;  %v6415_v25 = vsub.f32 %v6414_v49, %v5340_v20 }
 0x48f   : > { %v5665_v33 = vpop.eup %4190  ;;  %v1847_v48 = vpop.permute.xlu1 %1846 }
 0x490   : > { %v5667_v23 = vpop.permute.xlu0 %2613  ;;  %v1869_v35 = vsub.f32 %v6402_v1, %v1847_v48  ;;  %2592 = vperm.xlu0 %4081, %v5665_v33   ;;  %3929 = vmatmul.mubr.msk.bf16.vlgmr.msra.gmra.mxu0 %vm619_vm3, %v2018_v0  ;;  %v5672_v26 = vpop.eup %4192  ;;  %4204 = vpow2.f32 %v1881_v53  ;;  %v6411_v48 = vld [vmem:[#allocation38_spill] sm:$0xff] }
 0x491   : > { %3932 = vmatprep.mubr.msk.bf16.mxu0 %vm4342_vm0, %v6386_v54  ;;  %3979 = vmatpush3.bf16.msra.mxu0 %v2639_v45  ;;  %v5688_v60 = vpop.eup %4194  ;;  %v6412_v1 = vsub.f32 %v6411_v48, %v5414_v8 }
 0x492   : > { %v1883_v29 = vmul.f32 1.442695, %v1869_v35  ;;  %1405 = vperm.xlu1 %4080, %v5672_v26   ;;  %3980 = vmatprep.subr.bf16.mxu0 %v6386_v54 }
 0x493   : > { %v1852_v16 = vpop.permute.xlu1 %1851  ;;  %v2391_v35 = vmul.f32 1.442695, %v6412_v1 }
 0x494   : > { %v5678_v28 = vpop.permute.xlu0 %2432  ;;  %4206 = vpow2.f32 %v1883_v29  ;;  %v1870_v57 = vsub.f32 %v6406_v9, %v1852_v16  ;;  %v6413_v29 = vld [vmem:[#allocation18_spill] sm:$0xff] }
 0x495   : > { %v5692_v40 = vpop.eup %4196  ;;  %4208 = vpow2.f32 %v1217_v50 }
 0x496   : > { %870 = vperm.xlu1 %4080, %v6409_v13   ;;  %v1885_v14 = vmul.f32 1.442695, %v1870_v57  ;;  %4210 = vpow2.f32 %v1811_v2  ;;  %v1813_v2 = vmul.f32 1.442695, %v6415_v25 }
 0x497   : > { %v1857_v37 = vpop.permute.xlu1 %1856 }
 0x498   : > { %v5690_v3 = vpop.permute.xlu0 %2609  ;;  %v1871_v51 = vsub.f32 %v6410_v24, %v1857_v37  ;;  %4212 = vpow2.f32 %v1885_v14  ;;  %v824_v37 = vld [vmem:[#allocation4 + $0x28] sm:$0xff]  ;;  %v6416_v24 = vld [vmem:[#allocation8_spill] sm:$0xff] }
 0x499   : > { %v5695_v0 = vpop.eup %4198 }
 0x49a   : > { %v1887_v45 = vmul.f32 1.442695, %v1871_v51  ;;  %1976 = vperm.xlu1 %4080, %v5688_v60   ;;  %v2019_v7 = vpack.c.bf16 %v5695_v0, %v5692_v40  ;;  %v5707_v44 = vpop.eup %4200 }
 0x49b   : > { %v1862_v42 = vpop.permute.xlu1 %1861  ;;  %v5712_v50 = vpop.eup %4202 }
 0x49c   : > { %v5700_v53 = vpop.permute.xlu0 %2442  ;;  %4214 = vpow2.f32 %v1887_v45  ;;  %v1872_v16 = vsub.f32 %v6413_v29, %v1862_v42  ;;  %3933 = vmatmul.mubr.msk.bf16.gmra.mxu0 %vm619_vm3, %v2019_v7  ;;  %v6417_v7 = vld [vmem:[#allocation31_spill] sm:$0xff]  ;;  %v6418_v42 = vld [vmem:[#allocation32_spill] sm:$0xff] }
 0x49d   : > { %3936 = vmatprep.mubr.msk.bf16.mxu0 %vm4342_vm0, %v6386_v54  ;;  %v5714_v8 = vpop.eup %4204  ;;  %4216 = vpow2.f32 %v2391_v35  ;;  %v6419_v48 = vsub.f32 %v6417_v7, %v6418_v42  ;;  %v6420_v35 = vld [vmem:[#allocation19_spill] sm:$0xff]  ;;  %v6423_v42 = vld [vmem:[#allocation21_spill] sm:$0xff] }
 0x49e   : > { %v1889_v61 = vmul.f32 1.442695, %v1872_v16  ;;  %1981 = vperm.xlu1 %4080, %v5707_v44  }
 0x49f   : > { %v2408_v9 = vpop.permute.xlu1 %2407  ;;  %v1803_v1 = vmul.f32 1.442695, %v6419_v48 }
 0x4a0   : > { %v846_v57 = vpop.permute.xlu0 %845  ;;  %4218 = vpow2.f32 %v1889_v61  ;;  %v2450_v16 = vsub.f32 %v6420_v35, %v2408_v9  ;;  %v6424_v35 = vld [vmem:[#allocation37_spill] sm:$0xff] }
 0x4a1   : > { %v876_v13 = vmul.f32 %v846_v57, %v822_v55  ;;  %v5719_v14 = vpop.eup %4206  ;;  %4220 = vpow2.f32 %v1813_v2  ;;  %v6421_v55 = vld [vmem:[#allocation20_spill] sm:$0xff] }
 0x4a2   : > { %1415 = vperm.xlu1 %4080, %v5712_v50   ;;  %v2020_v45 = vpack.c.bf16 %v5719_v14, %v5714_v8  ;;  %v5732_v49 = vpop.eup %4208  ;;  %4222 = vpow2.f32 %v1803_v1  ;;  %v6426_v1 = vld [vmem:[#allocation22_spill] sm:$0xff] }
 0x4a3   : > { %v995_v51 = vadd.f32 %v6416_v24, %v876_v13  ;;  %v2413_v29 = vpop.permute.xlu1 %2412  ;;  %v6422_v13 = vld [vmem:[#allocation10_spill] sm:$0xff]  ;;  %v5738_v2 = vpop.eup %4210 }
 0x4a4   : > { %v856_v20 = vpop.permute.xlu0 %855  ;;  %v2451_v61 = vsub.f32 %v6421_v55, %v2413_v29  ;;  %3937 = vmatmul.mubr.msk.bf16.gmra.mxu0 %vm619_vm3, %v2020_v45  ;;  %v6425_v55 = vsub.f32 %v6424_v35, %v5400_v46 }
 0x4a5   : > { %1004 = vst.msk [vmem:[#allocation4 + $0x18] sm:$0xff] %vm507_vm1, %v995_v51  ;;  %v878_v57 = vmul.f32 %v856_v20, %v824_v37  ;;  %3940 = vmatprep.mubr.msk.bf16.mxu0 %vm4342_vm0, %v6386_v54  ;;  %v5740_v7 = vpop.eup %4212  ;;  %v2782_v51 = vld [vmem:[#allocation3 + $0x10] sm:$0xff]  ;;  %v2459_v37 = vmul.f32 1.442695, %v2450_v16  ;;  %v2453_v16 = vsub.f32 %v6426_v1, %v5650_v31 }
 0x4a6   : > { %v2461_v25 = vmul.f32 1.442695, %v2451_v61  ;;  %1385 = vperm.xlu1 %4080, %v5732_v49   ;;  %v2389_v61 = vmul.f32 1.442695, %v6425_v55  ;;  %v2786_v55 = vld [vmem:[#allocation3 + $0x30] sm:$0xff] }
 0x4a7   : > { %v997_v24 = vadd.f32 %v6422_v13, %v878_v57  ;;  %v2418_v9 = vpop.permute.xlu1 %2417  ;;  %v1324_v13 = vsel %vm619_vm3, %v5529_v43, 0.0  ;;  %v1330_v43 = vsel %vm619_vm3, %v5550_v59, 0.0 }
 0x4a8   : > { %4224 = vpow2.f32 %v2461_v25  ;;  %v2452_v48 = vsub.f32 %v6423_v42, %v2418_v9  ;;  %v2465_v9 = vmul.f32 1.442695, %v2453_v16 }
 0x4a9   : > { %1006 = vst.msk [vmem:[#allocation4 + $0x28] sm:$0xff] %vm507_vm1, %v997_v24  ;;  %v5743_v45 = vpop.eup %4214  ;;  %4226 = vrcp.f32 %v2782_v51  ;;  %v2785_v24 = vld [vmem:[#allocation3 + $0x28] sm:$0xff] }
 0x4aa   : > { %1991 = vperm.xlu1 %4080, %v5738_v2   ;;  %v2021_v29 = vpack.c.bf16 %v5743_v45, %v5740_v7  ;;  %4228 = vpow2.f32 %v2459_v37  ;;  %v5755_v57 = vpop.eup %4216  ;;  %v2463_v25 = vmul.f32 1.442695, %v2452_v48  ;;  %v6427_v37 = vld [vmem:[#allocation23_spill] sm:$0xff] }
 0x4ab   : > { %v2616_v20 = vpop.permute.xlu1 %2615  ;;  %4230 = vpow2.f32 %v2389_v61  ;;  %v1336_v61 = vsel %vm619_vm3, %v5596_v38, 0.0  ;;  %v6429_v38 = vld [vmem:[#allocation25_spill] sm:$0xff] }
 0x4ac   : > { %3941 = vmatmul.mubr.msk.bf16.gmra.mxu0 %vm619_vm3, %v2021_v29  ;;  %4232 = vpow2.f32 %v2463_v25  ;;  %v2781_v25 = vld [vmem:[#allocation3 + $0x8] sm:$0xff] }
 0x4ad   : > { %3981 = vmatpush3.bf16.msra.mxu0 %v2616_v20  ;;  %3944 = vmatprep.mubr.msk.bf16.mxu0 %vm4342_vm0, %v6386_v54  ;;  %v5763_v46 = vpop.eup %4218  ;;  %4234 = vrcp.f32 %v2785_v24  ;;  %v6428_v20 = vld [vmem:[#allocation24_spill] sm:$0xff] }
 0x4ae   : > { %2562 = vperm.xlu1 %4080, %v5755_v57   ;;  %3982 = vmatprep.subr.bf16.mxu0 %v6386_v54  ;;  %v5765_v51 = vpop.eup %4220  ;;  %v2022_v48 = vpack.c.bf16 %v5763_v46, %v5763_v46  ;;  %4236 = vpow2.f32 %v2465_v9  ;;  %v823_v24 = vld [vmem:[#allocation4 + $0x20] sm:$0xff] }
 0x4af   : > { %v2428_v31 = vpop.permute.xlu1 %2427  ;;  %1325 = vadd.xlane.f32.xlu0 %v1324_v13  ;;  %v5778_v35 = vpop.eup %4222  ;;  %4238 = vrcp.f32 %v2786_v55 }
 0x4b0   : > { %v2454_v42 = vsub.f32 %v6427_v37, %v2428_v31 }
 0x4b1   : > { %3983 = vmatpush3.bf16.msra.mxu0 %v5667_v23  ;;  %v2455_v23 = vsub.f32 %v6428_v20, %v5678_v28 }
 0x4b2   : > { %1996 = vperm.xlu1 %4080, %v5765_v51   ;;  %3984 = vmatprep.subr.bf16.mxu0 %v6386_v54  ;;  %v2467_v59 = vmul.f32 1.442695, %v2454_v42  ;;  %v1339_v42 = vsel %vm619_vm3, %v5602_v32, 0.0 }
 0x4b3   : > { %v2612_v29 = vpop.permute.xlu1 %2611  ;;  %1331 = vadd.xlane.f32.xlu0 %v1330_v43  ;;  %v2469_v13 = vmul.f32 1.442695, %v2455_v23 }
 0x4b4   : > { %3945 = vmatmul.mubr.msk.bf16.gmra.mxu0 %vm619_vm3, %v2022_v48  ;;  %4240 = vpow2.f32 %v2467_v59  ;;  %v6430_v48 = vsub.f32 %v5436_v5, %v5449_v36  ;;  %v6432_v59 = vld [vmem:[#allocation9_spill] sm:$0xff]  ;;  %v1342_v5 = vsel %vm619_vm3, %v5613_v19, 0.0 }
 0x4b5   : > { %3985 = vmatpush3.bf16.msra.mxu0 %v2612_v29  ;;  %3988 = vmatprep.mubr.msk.bf16.mxu0 %vm4342_vm0, %v6386_v54  ;;  %v5786_v1 = vpop.eup %4224  ;;  %4242 = vrcp.f32 %v2781_v25  ;;  %v6431_v29 = vld [vmem:[#allocation26_spill] sm:$0xff] }
 0x4b6   : > { %1971 = vperm.xlu1 %4080, %v5778_v35   ;;  %3986 = vmatprep.subr.bf16.mxu0 %v6386_v54  ;;  %v4227_v16 = vpop.eup %4226  ;;  %4244 = vpow2.f32 %v2469_v13  ;;  %v2457_v20 = vsub.f32 %v6431_v29, %v5700_v53 }
 0x4b7   : > { %v2438_v28 = vpop.permute.xlu1 %2437  ;;  %1337 = vadd.xlane.f32.xlu0 %v1336_v61  ;;  %v5788_v31 = vpop.eup %4228 }
 0x4b8   : > { %v2604_v9 = vpack.c.bf16 %v5786_v1, %v5788_v31  ;;  %v2456_v37 = vsub.f32 %v6429_v38, %v2438_v28  ;;  %v5803_v55 = vpop.eup %4230  ;;  %v6433_v28 = vld [vmem:[#allocation39_spill] sm:$0xff]  ;;  %v2473_v13 = vmul.f32 1.442695, %v2457_v20  ;;  %v1913_v38 = vsel %vm619_vm3, %v5656_v6, 0.0 }
 0x4b9   : > { %3987 = vmatpush3.bf16.msra.mxu0 %v5690_v3  ;;  %v2397_v3 = vmul.f32 1.442695, %v6430_v48  ;;  %v4233_v36 = vpop.eup %4232  ;;  %v6434_v53 = vsub.f32 %v6433_v28, %v5460_v63  ;;  %v1922_v6 = vsel %vm619_vm3, %v5714_v8, 0.0  ;;  %v5852_v8 = vpop.permute.xlu0 %1400 }
 0x4ba   : > { %2819 = vperm.xlu1 %4080, %v4227_v16   ;;  %4008 = vmatprep.subr.bf16.mxu0 %v6386_v54  ;;  %v2471_v32 = vmul.f32 1.442695, %v2456_v37  ;;  %v4235_v25 = vpop.eup %4234 }
 0x4bb   : > { %v851_v43 = vpop.permute.xlu1 %850  ;;  %1340 = vadd.xlane.f32.xlu0 %v1339_v42  ;;  %v2399_v16 = vmul.f32 1.442695, %v6434_v53  ;;  %4246 = vpow2.f32 %v2397_v3 }
 0x4bc   : > { %v877_v23 = vmul.f32 %v851_v43, %v823_v24  ;;  %3989 = vmatmul.mubr.msk.bf16.vlgmr.msra.gmra.mxu0 %vm619_vm3, %v2604_v9  ;;  %v5815_v24 = vpop.eup %4236  ;;  %4248 = vpow2.f32 %v2471_v32  ;;  %v1348_v9 = vsel %vm619_vm3, %v5631_v52, 0.0  ;;  %v1916_v43 = vsel %vm619_vm3, %v5692_v40, 0.0 }
 0x4bd   : > { %3992 = vmatprep.mubr.msk.bf16.mxu0 %vm4342_vm0, %v6386_v54  ;;  %v2605_v19 = vpack.c.bf16 %v5815_v24, %v4233_v36  ;;  %4250 = vpow2.f32 %v2399_v16  ;;  %v4239_v63 = vpop.eup %4238 }
 0x4be   : > { %v996_v61 = vadd.f32 %v6432_v59, %v877_v23  ;;  %2557 = vperm.xlu1 %4080, %v5803_v55   ;;  %4252 = vpow2.f32 %v2473_v13  ;;  %v1931_v23 = vsel %vm619_vm3, %v5743_v45, 0.0  ;;  %v2502_v59 = vsel %vm619_vm3, %v4233_v36, 0.0 }
 0x4bf   : > { %1343 = vadd.xlane.f32.xlu0 %v1342_v5  ;;  %v5856_v5 = vpop.permute.xlu0 %1410  ;;  %v1333_v36 = vsel %vm619_vm3, %v5552_v34, 0.0 }
 0x4c0   : > { %1005 = vst.msk [vmem:[#allocation4 + $0x20] sm:$0xff] %vm507_vm1, %v996_v61 }
 0x4c1   : > { %v5825_v37 = vpop.eup %4240 }
 0x4c2   : > { %2834 = vperm.xlu1 %4080, %v4235_v25   ;;  %v4243_v42 = vpop.eup %4242  ;;  %v1327_v25 = vsel %vm619_vm3, %v5531_v12, 0.0 }
 0x4c3   : > { %1349 = vadd.xlane.f32.xlu0 %v1348_v9  ;;  %v4245_v52 = vpop.eup %4244  ;;  %v5858_v45 = vpop.permute.xlu0 %1380 }
 0x4c4   : > { %3993 = vmatmul.mubr.msk.bf16.gmra.mxu0 %vm619_vm3, %v2605_v19  ;;  %v2606_v48 = vpack.c.bf16 %v4245_v52, %v5825_v37  ;;  %v2511_v61 = vsel %vm619_vm3, %v4245_v52, 0.0  ;;  %v6437_v19 = vld [vmem:[#allocation36_spill] sm:$0xff] }
 0x4c5   : > { %3996 = vmatprep.mubr.msk.bf16.mxu0 %vm4342_vm0, %v6386_v54 }
 0x4c6   : > { %2839 = vperm.xlu1 %4080, %v4239_v63  }
 0x4c7   : > { %1914 = vadd.xlane.f32.xlu0 %v1913_v38  ;;  %v5860_v28 = vpop.permute.xlu0 %1986 }
 0x4c8   : > { %v5831_v3 = vpop.eup %4246 }
 0x4c9   : > { %v5838_v29 = vpop.eup %4248 }
 0x4ca   : > { %2814 = vperm.xlu1 %4080, %v4243_v42   ;;  %v5840_v20 = vpop.eup %4250 }
 0x4cb   : > { %1917 = vadd.xlane.f32.xlu0 %v1916_v43  ;;  %v5842_v40 = vpop.eup %4252  ;;  %v5862_v53 = vpop.permute.xlu0 %1420 }
 0x4cc   : > { %3997 = vmatmul.mubr.msk.bf16.gmra.mxu0 %vm619_vm3, %v2606_v48  ;;  %v2607_v32 = vpack.c.bf16 %v5842_v40, %v5838_v29  ;;  %v1345_v48 = vsel %vm619_vm3, %v5615_v11, 0.0  ;;  %v1919_v11 = vsel %vm619_vm3, %v5695_v0, 0.0 }
 0x4cd   : > { %4000 = vmatprep.mubr.msk.bf16.mxu0 %vm4342_vm0, %v6386_v54 }
 0x4ce   : > { %2577 = vperm.xlu1 %4080, %v5831_v3  }
 0x4cf   : > { %1923 = vadd.xlane.f32.xlu0 %v1922_v6  ;;  %v5864_v16 = vpop.permute.xlu0 %2567 }
 0x4d0   : > { %6435 = vst [vmem:[#allocation6_spill] sm:$0xff] %v5864_v16 }
 0x4d2   : > { %2582 = vperm.xlu1 %4080, %v5840_v20  }
 0x4d3   : > { %1932 = vadd.xlane.f32.xlu0 %v1931_v23  ;;  %v5870_v9 = vpop.permute.xlu0 %2001 }
 0x4d4   : > { %4001 = vmatmul.mubr.msk.bf16.gmra.mxu0 %vm619_vm3, %v2607_v32  ;;  %6436 = vst [vmem:[#allocation33_spill] sm:$0xff] %v5870_v9  ;;  %v1910_v32 = vsel %vm619_vm3, %v5648_v18, 0.0 }
 0x4d5   : > { %4004 = vmatprep.mubr.msk.bf16.mxu0 %vm4342_vm0, %v6386_v54 }
 0x4d7   : > { %2503 = vadd.xlane.f32.xlu0 %v2502_v59  ;;  %v5881_v6 = vpop.permute.xlu0 %1966 }
 0x4db   : > { %2512 = vadd.xlane.f32.xlu0 %v2511_v61  ;;  %v825_v61 = vld [vmem:[#allocation4 + $0x30] sm:$0xff] }
 0x4f6   : > { %1328 = vadd.xlane.f32.xlu1 %v1327_v25 }
 0x4f9   : > { %v2448_v13 = vpop.permute.xlu1 %2447 }
 0x4fa   : > { %v2458_v63 = vsub.f32 %v6437_v19, %v2448_v13  ;;  %1334 = vadd.xlane.f32.xlu1 %v1333_v36  ;;  %v5891_v36 = vpop.permute.xlu0 %2006 }
 0x4fb   : > { %v5873_v38 = vpop.f32.mrf.mxu0  ;;  %6438 = vst [vmem:[#allocation16_spill] sm:$0xff] %v5891_v36  ;;  %v6441_v36 = vld [vmem:[#allocation12_spill] sm:$0xff] }
 0x4fc   : > { %v2475_v42 = vmul.f32 1.442695, %v2458_v63 }
 0x4fd   : > { %v5875_v52 = vpop.permute.xlu1 %1390  ;;  %v3870_v43 = vpop.f32.mrf.mxu0 }
 0x4fe   : > { %4254 = vpow2.f32 %v2475_v42  ;;  %1346 = vadd.xlane.f32.xlu1 %v1345_v48  ;;  %v826_v42 = vld [vmem:[#allocation4 + $0x38] sm:$0xff]  ;;  %v5899_v0 = vpop.permute.xlu0 %2824 }
 0x4ff   : > { %v5879_v12 = vpop.f32.mrf.mxu0  ;;  %v6439_v43 = vld [vmem:[#allocation11_spill] sm:$0xff]  ;;  %6440 = vst [vmem:[#allocation29_spill] sm:$0xff] %v5899_v0 }
 0x501   : > { %v5883_v34 = vpop.permute.xlu1 %1395  ;;  %v3871_v23 = vpop.f32.mrf.mxu0 }
 0x502   : > { %1911 = vadd.xlane.f32.xlu1 %v1910_v32  ;;  %v1925_v32 = vsel %vm619_vm3, %v5719_v14, 0.0  ;;  %v827_v14 = vld [vmem:[#allocation4 + $0x40] sm:$0xff] }
 0x503   : > { %v5887_v59 = vpop.f32.mrf.mxu0 }
 0x505   : > { %v861_v25 = vpop.permute.xlu1 %860  ;;  %v3874_v13 = vpop.f32.mrf.mxu0 }
 0x506   : > { %v879_v19 = vmul.f32 %v861_v25, %v825_v61  ;;  %1920 = vadd.xlane.f32.xlu1 %v1919_v11 }
 0x507   : > { %v5893_v63 = vpop.f32.mrf.mxu0 }
 0x508   : > { %v998_v48 = vadd.f32 %v6439_v43, %v879_v19  ;;  %v1928_v19 = vsel %vm619_vm3, %v5740_v7, 0.0  ;;  %v2496_v7 = vsel %vm619_vm3, %v5788_v31, 0.0 }
 0x509   : > { %v866_v23 = vpop.permute.xlu1 %865  ;;  %v3875_v18 = vpop.f32.mrf.mxu0 }
 0x50a   : > { %1007 = vst.msk [vmem:[#allocation4 + $0x30] sm:$0xff] %vm507_vm1, %v998_v48  ;;  %v880_v13 = vmul.f32 %v866_v23, %v826_v42  ;;  %1926 = vadd.xlane.f32.xlu1 %v1925_v32  ;;  %v6443_v48 = vld [vmem:[#allocation13_spill] sm:$0xff]  ;;  %v2499_v32 = vsel %vm619_vm3, %v5786_v1, 0.0  ;;  %v2517_v1 = vsel %vm619_vm3, %v5842_v40, 0.0 }
 0x50b   : > { %v4255_v16 = vpop.eup %4254 }
 0x50c   : > { %v999_v61 = vadd.f32 %v6441_v36, %v880_v13  ;;  %v2520_v25 = vsel %vm619_vm3, %v4255_v16, 0.0  ;;  %v2608_v11 = vpack.c.bf16 %v4255_v16, %v4255_v16  ;;  %v1934_v36 = vsel %vm619_vm3, %v5763_v46, 0.0  ;;  %v5913_v16 = vpop.permute.xlu0 %2552 }
 0x50d   : > { %v5903_v9 = vpop.permute.xlu1 %1405  ;;  %2521 = vadd.xlane.f32.xlu0 %v2520_v25  ;;  %6442 = vst [vmem:[#allocation30_spill] sm:$0xff] %v5913_v16  ;;  %v2505_v46 = vsel %vm619_vm3, %v5815_v24, 0.0  ;;  %v2514_v25 = vsel %vm619_vm3, %v5838_v29, 0.0  ;;  %v2480_v16 = vld [vmem:[#allocation3 + $0xe8] sm:$0xff] }
 0x50e   : > { %1008 = vst.msk [vmem:[#allocation4 + $0x38] sm:$0xff] %vm507_vm1, %v999_v61  ;;  %1929 = vadd.xlane.f32.xlu1 %v1928_v19  ;;  %4005 = vmatmul.mubr.msk.bf16.gmra.mxu0 %vm619_vm3, %v2608_v11  ;;  %v2508_v61 = vsel %vm619_vm3, %v5825_v37, 0.0 }
 0x50f   : > { %4016 = vmatprep.mubr.msk.bf16.mxu0 %vm4342_vm0, %v6386_v54 }
 0x510   : > { %v5919_v18 = vpop.permute.xlu0 %2829 }
 0x511   : > { %v871_v42 = vpop.permute.xlu1 %870  ;;  %6444 = vst [vmem:[#allocation5_spill] sm:$0xff] %v5919_v18 }
 0x512   : > { %v881_v43 = vmul.f32 %v871_v42, %v827_v14  ;;  %1935 = vadd.xlane.f32.xlu1 %v1934_v36  ;;  %v1306_v36 = vld [vmem:[#allocation3 + $0x48] sm:$0xff] }
 0x513   : > { %v1315_v29 = vmul.f32 %v5520_v62, %v1306_v36 }
 0x514   : > { %v1000_v23 = vadd.f32 %v6443_v48, %v881_v43  ;;  %v5925_v13 = vpop.permute.xlu0 %2844 }
 0x515   : > { %6445 = vst [vmem:[#allocation14_spill] sm:$0xff] %v5925_v13  ;;  %v5933_v11 = vpop.permute.xlu1 %1976 }
 0x516   : > { %1009 = vst.msk [vmem:[#allocation4 + $0x40] sm:$0xff] %vm507_vm1, %v1000_v23  ;;  %2497 = vadd.xlane.f32.xlu1 %v2496_v7  ;;  %v1308_v23 = vld [vmem:[#allocation3 + $0x58] sm:$0xff] }
 0x518   : > { %v5929_v31 = vpop.permute.xlu0 %2809 }
 0x519   : > { %6446 = vst [vmem:[#allocation27_spill] sm:$0xff] %v5929_v31  ;;  %v5939_v24 = vpop.permute.xlu1 %1981 }
 0x51a   : > { %2500 = vadd.xlane.f32.xlu1 %v2499_v32 }
 0x51c   : > { %v5937_v19 = vpop.permute.xlu0 %2572 }
 0x51d   : > { %6447 = vst [vmem:[#allocation28_spill] sm:$0xff] %v5937_v19  ;;  %v5943_v37 = vpop.permute.xlu1 %1415 }
 0x51e   : > { %2506 = vadd.xlane.f32.xlu1 %v2505_v46  ;;  %v1317_v46 = vmul.f32 %v5625_v21, %v1308_v23 }
 0x520   : > { %v5941_v14 = vpop.permute.xlu0 %2587 }
 0x521   : > { %6448 = vst [vmem:[#allocation15_spill] sm:$0xff] %v5941_v14  ;;  %v5950_v7 = vpop.permute.xlu1 %1385 }
 0x522   : > { %2509 = vadd.xlane.f32.xlu1 %v2508_v61 }
 0x524   : > { %v5945_v42 = vpop.permute.xlu0 %2592 }
 0x525   : > { %6449 = vst [vmem:[#allocation34_spill] sm:$0xff] %v5945_v42  ;;  %v5956_v18 = vpop.permute.xlu1 %1991 }
 0x526   : > { %2515 = vadd.xlane.f32.xlu1 %v2514_v25 }
 0x52a   : > { %2518 = vadd.xlane.f32.xlu1 %v2517_v1  ;;  %v1310_v1 = vld [vmem:[#allocation3 + $0x68] sm:$0xff] }
 0x52b   : > { %v1319_v62 = vmul.f32 %v5506_v4, %v1310_v1 }
 0x538   : > { %v1326_v43 = vpop.xlane.xlu0 %1325  ;;  %v5948_v48 = vpop.f32.mrf.mxu0 }
 0x539   : > { %v1351_v40 = vadd.f32 %v1326_v43, %v1315_v29  ;;  %v1311_v29 = vld [vmem:[#allocation3 + $0x70] sm:$0xff] }
 0x53a   : > { %v3878_v32 = vpop.f32.mrf.mxu0  ;;  %v1320_v21 = vmul.f32 %v5672_v26, %v1311_v29 }
 0x53b   : > { %1360 = vst.msk [vmem:[#allocation3 + $0x48] sm:$0xff] %vm342_vm2, %v1351_v40 }
 0x53c   : > { %v1332_v61 = vpop.xlane.xlu0 %1331  ;;  %v5954_v25 = vpop.f32.mrf.mxu0 }
 0x53d   : > { %v1353_v13 = vadd.f32 %v1332_v61, %v1317_v46  ;;  %v5966_v46 = vpop.permute.xlu1 %2562 }
 0x53e   : > { %v3879_v42 = vpop.f32.mrf.mxu0 }
 0x53f   : > { %1362 = vst.msk [vmem:[#allocation3 + $0x58] sm:$0xff] %vm342_vm2, %v1353_v13  ;;  %v1312_v42 = vld [vmem:[#allocation3 + $0x78] sm:$0xff] }
 0x540   : > { %v1338_v36 = vpop.xlane.xlu0 %1337  ;;  %v5960_v14 = vpop.f32.mrf.mxu0  ;;  %v1321_v4 = vmul.f32 %v5511_v30, %v1312_v42 }
 0x541   : > { %v1355_v43 = vadd.f32 %v1338_v36, %v1319_v62  ;;  %v1314_v36 = vld [vmem:[#allocation3 + $0x88] sm:$0xff]  ;;  %v5972_v29 = vpop.permute.xlu1 %1996 }
 0x542   : > { %v3882_v40 = vpop.f32.mrf.mxu0 }
 0x543   : > { %1364 = vst.msk [vmem:[#allocation3 + $0x68] sm:$0xff] %vm342_vm2, %v1355_v43  ;;  %v1323_v40 = vmul.f32 %v5541_v17, %v1314_v36 }
 0x544   : > { %v1341_v23 = vpop.xlane.xlu0 %1340  ;;  %v5964_v32 = vpop.f32.mrf.mxu0 }
 0x545   : > { %v1356_v61 = vadd.f32 %v1341_v23, %v1320_v21 }
 0x546   : > { %v2872_v13 = vld [vmem:[#allocation3 + $0x58] sm:$0xff]  ;;  %v3883_v0 = vpop.f32.mrf.mxu0 }
 0x547   : > { %4256 = vrcp.f32 %v2872_v13  ;;  %1365 = vst.msk [vmem:[#allocation3 + $0x70] sm:$0xff] %vm342_vm2, %v1356_v61  ;;  %v1893_v0 = vld [vmem:[#allocation3 + $0x98] sm:$0xff] }
 0x548   : > { %v1344_v1 = vpop.xlane.xlu0 %1343  ;;  %v5970_v62 = vpop.f32.mrf.mxu0  ;;  %v1902_v30 = vmul.f32 %v5778_v35, %v1893_v0 }
 0x549   : > { %v1357_v43 = vadd.f32 %v1344_v1, %v1321_v4  ;;  %v1894_v1 = vld [vmem:[#allocation3 + $0xa0] sm:$0xff] }
 0x54a   : > { %v3886_v26 = vpop.f32.mrf.mxu0  ;;  %v1903_v17 = vmul.f32 %v5688_v60, %v1894_v1 }
 0x54b   : > { %1366 = vst.msk [vmem:[#allocation3 + $0x78] sm:$0xff] %vm342_vm2, %v1357_v43  ;;  %v5980_v26 = vpop.permute.xlu1 %1971 }
 0x54c   : > { %v1350_v21 = vpop.xlane.xlu0 %1349  ;;  %v1538_v23 = vpop.f32.mrf.mxu0 }
 0x54d   : > { %v1359_v13 = vadd.f32 %v1350_v21, %v1323_v40 }
 0x54e   : > { %v2875_v31 = vld [vmem:[#allocation3 + $0x70] sm:$0xff]  ;;  %v3887_v61 = vpop.f32.mrf.mxu0 }
 0x54f   : > { %4258 = vrcp.f32 %v2875_v31  ;;  %1368 = vst.msk [vmem:[#allocation3 + $0x88] sm:$0xff] %vm342_vm2, %v1359_v13  ;;  %v1896_v31 = vld [vmem:[#allocation3 + $0xb0] sm:$0xff]  ;;  %v5984_v35 = vpop.permute.xlu1 %2819 }
 0x550   : > { %v1915_v42 = vpop.xlane.xlu0 %1914  ;;  %v5978_v4 = vpop.f32.mrf.mxu0  ;;  %6450 = vst [vmem:[#allocation7_spill] sm:$0xff] %v5984_v35  ;;  %v1905_v0 = vmul.f32 %v5524_v15, %v1896_v31  ;;  %v2489_v15 = vmul.f32 %v5755_v57, %v2480_v16 }
 0x551   : > { %v1938_v43 = vadd.f32 %v1915_v42, %v1902_v30  ;;  %v1899_v30 = vld [vmem:[#allocation3 + $0xc8] sm:$0xff] }
 0x552   : > { %v3930_v19 = vpop.f32.mrf.mxu0  ;;  %v1908_v60 = vmul.f32 %v5561_v22, %v1899_v30 }
 0x553   : > { %1947 = vst.msk [vmem:[#allocation3 + $0x98] sm:$0xff] %vm342_vm2, %v1938_v43 }
 0x554   : > { %v4257_v36 = vpop.eup %4256  ;;  %v1918_v40 = vpop.xlane.xlu0 %1917 }
 0x555   : > { %v2092_v21 = vpop.f32.mrf.mxu0  ;;  %v1939_v23 = vadd.f32 %v1918_v40, %v1903_v17  ;;  %2909 = vperm.xlu0 %4081, %v4257_v36   ;;  %v5990_v17 = vpop.permute.xlu1 %2557 }
 0x557   : > { %v3931_v13 = vpop.f32.mrf.mxu0  ;;  %1948 = vst.msk [vmem:[#allocation3 + $0xa0] sm:$0xff] %vm342_vm2, %v1939_v23 }
 0x558   : > { %v1924_v61 = vpop.xlane.xlu0 %1923  ;;  %v2483_v13 = vld [vmem:[#allocation3 + $0x100] sm:$0xff] }
 0x559   : > { %v1941_v19 = vadd.f32 %v1924_v61, %v1905_v0  ;;  %v5998_v61 = vpop.permute.xlu1 %2834  ;;  %v2492_v30 = vmul.f32 %v5831_v3, %v2483_v13 }
 0x55a   : > { %6451 = vst [vmem:[#allocation17_spill] sm:$0xff] %v5998_v61 }
 0x55b   : > { %1950 = vst.msk [vmem:[#allocation3 + $0xb0] sm:$0xff] %vm342_vm2, %v1941_v19 }
 0x55c   : > { %v4259_v42 = vpop.eup %4258  ;;  %v1933_v1 = vpop.xlane.xlu0 %1932 }
 0x55d   : > { %v2097_v43 = vpop.f32.mrf.mxu0  ;;  %v1944_v36 = vadd.f32 %v1933_v1, %v1908_v60  ;;  %2924 = vperm.xlu0 %4081, %v4259_v42   ;;  %v6007_v1 = vpop.permute.xlu1 %2839 }
 0x55f   : > { %v3934_v40 = vpop.f32.mrf.mxu0  ;;  %1953 = vst.msk [vmem:[#allocation3 + $0xc8] sm:$0xff] %vm342_vm2, %v1944_v36 }
 0x560   : > { %v2504_v31 = vpop.xlane.xlu0 %2503 }
 0x561   : > { %v5994_v23 = vpop.f32.mrf.mxu0  ;;  %v2525_v0 = vadd.f32 %v2504_v31, %v2489_v15  ;;  %1552 = vrot.lane.b32.xlu0 %v5879_v12, %s4351_s15  ;;  %v6011_v40 = vpop.permute.xlu1 %2814 }
 0x563   : > { %v3935_v22 = vpop.f32.mrf.mxu0  ;;  %2534 = vst.msk [vmem:[#allocation3 + $0xe8] sm:$0xff] %vm342_vm2, %v2525_v0 }
 0x564   : > { %v2513_v19 = vpop.xlane.xlu0 %2512 }
 0x565   : > { %v6002_v60 = vpop.f32.mrf.mxu0  ;;  %v2528_v42 = vadd.f32 %v2513_v19, %v2492_v30  ;;  %1562 = vrot.lane.b32.xlu0 %v5960_v14, %s4351_s15  ;;  %v6018_v13 = vpop.permute.xlu1 %2577 }
 0x566   : > { %6452 = vst [vmem:[#allocation38_spill] sm:$0xff] %v6018_v13 }
 0x567   : > { %v3938_v57 = vpop.f32.mrf.mxu0  ;;  %2537 = vst.msk [vmem:[#allocation3 + $0x100] sm:$0xff] %vm342_vm2, %v2528_v42 }
 0x569   : > { %v2108_v16 = vpop.f32.mrf.mxu0  ;;  %2138 = vrot.lane.b32.xlu0 %v2092_v21, %s4350_s14  ;;  %v2962_v21 = vld [vmem:[#allocation3 + $0xa0] sm:$0xff]  ;;  %v6021_v19 = vpop.permute.xlu1 %2582 }
 0x56a   : > { %4260 = vrcp.f32 %v2962_v21  ;;  %v2788_v21 = vld [vmem:[#allocation3 + $0x40] sm:$0xff] }
 0x56b   : > { %v3939_v12 = vpop.f32.mrf.mxu0  ;;  %4262 = vrcp.f32 %v2788_v21 }
 0x56d   : > { %v2113_v36 = vpop.f32.mrf.mxu0  ;;  %2140 = vrot.lane.b32.xlu0 %v2097_v43, %s4350_s14  ;;  %v1307_v43 = vld [vmem:[#allocation3 + $0x50] sm:$0xff] }
 0x56f   : > { %v3942_v3 = vpop.f32.mrf.mxu0 }
 0x570   : > { %v1309_v3 = vld [vmem:[#allocation3 + $0x60] sm:$0xff] }
 0x571   : > { %v6013_v15 = vpop.f32.mrf.mxu0  ;;  %2146 = vrot.lane.b32.xlu0 %v2108_v16, %s4350_s14  ;;  %v1316_v16 = vmul.f32 %v5732_v49, %v1307_v43 }
 0x573   : > { %v3943_v14 = vpop.f32.mrf.mxu0 }
 0x575   : > { %v6016_v31 = vpop.f32.mrf.mxu0  ;;  %2148 = vrot.lane.b32.xlu0 %v2113_v36, %s4350_s14 }
 0x577   : > { %v3946_v0 = vpop.f32.mrf.mxu0 }
 0x578   : > { %v1318_v0 = vmul.f32 %v5634_v47, %v1309_v3 }
 0x579   : > { %v2124_v22 = vpop.f32.mrf.mxu0 }
 0x57b   : > { %v3947_v30 = vpop.f32.mrf.mxu0 }
 0x57c   : > { %v1313_v30 = vld [vmem:[#allocation3 + $0x80] sm:$0xff] }
 0x57d   : > { %v6023_v42 = vpop.f32.mrf.mxu0  ;;  %v1322_v43 = vmul.f32 %v5712_v50, %v1313_v30  ;;  %v2874_v50 = vld [vmem:[#allocation3 + $0x68] sm:$0xff] }
 0x57f   : > { %v3990_v57 = vpop.f32.mrf.mxu0  ;;  %v1329_v12 = vpop.xlane.xlu1 %1328 }
 0x580   : > { %v1352_v14 = vadd.f32 %v1329_v12, %v1316_v16  ;;  %v4261_v16 = vpop.eup %4260 }
 0x581   : > { %v2678_v61 = vpop.f32.mrf.mxu0 }
 0x582   : > { %2724 = vrot.lane.b32.xlu0 %v2678_v61, %s4349_s26  ;;  %1361 = vst.msk [vmem:[#allocation3 + $0x50] sm:$0xff] %vm342_vm2, %v1352_v14  ;;  %v1892_v61 = vld [vmem:[#allocation3 + $0x90] sm:$0xff] }
 0x583   : > { %v3991_v36 = vpop.f32.mrf.mxu0  ;;  %v1335_v22 = vpop.xlane.xlu1 %1334  ;;  %v1901_v3 = vmul.f32 %v5567_v56, %v1892_v61 }
 0x584   : > { %v1354_v35 = vadd.f32 %v1335_v22, %v1318_v0 }
 0x585   : > { %v2683_v13 = vpop.f32.mrf.mxu0 }
 0x586   : > { %2726 = vrot.lane.b32.xlu0 %v2683_v13, %s4349_s26  ;;  %1363 = vst.msk [vmem:[#allocation3 + $0x60] sm:$0xff] %vm342_vm2, %v1354_v35  ;;  %v1895_v13 = vld [vmem:[#allocation3 + $0xa8] sm:$0xff] }
 0x587   : > { %v3994_v49 = vpop.f32.mrf.mxu0  ;;  %v1347_v57 = vpop.xlane.xlu1 %1346  ;;  %v1904_v21 = vmul.f32 %v5707_v44, %v1895_v13 }
 0x588   : > { %v1358_v12 = vadd.f32 %v1347_v57, %v1322_v43  ;;  %v1897_v43 = vld [vmem:[#allocation3 + $0xb8] sm:$0xff] }
 0x589   : > { %v6032_v14 = vpop.f32.mrf.mxu0  ;;  %v1906_v61 = vmul.f32 %v5738_v2, %v1897_v43 }
 0x58a   : > { %2999 = vperm.xlu0 %4081, %v4261_v16   ;;  %1367 = vst.msk [vmem:[#allocation3 + $0x80] sm:$0xff] %vm342_vm2, %v1358_v12 }
 0x58b   : > { %v3995_v47 = vpop.f32.mrf.mxu0  ;;  %v1912_v36 = vpop.xlane.xlu1 %1911 }
 0x58c   : > { %v1937_v0 = vadd.f32 %v1912_v36, %v1901_v3  ;;  %v2486_v47 = vld [vmem:[#allocation3 + $0x118] sm:$0xff]  ;;  %v1898_v36 = vld [vmem:[#allocation3 + $0xc0] sm:$0xff] }
 0x58d   : > { %v6036_v35 = vpop.f32.mrf.mxu0  ;;  %v2873_v22 = vld [vmem:[#allocation3 + $0x60] sm:$0xff]  ;;  %v2495_v13 = vmul.f32 %v5665_v33, %v2486_v47  ;;  %v2478_v47 = vld [vmem:[#allocation3 + $0xd8] sm:$0xff] }
 0x58e   : > { %4264 = vrcp.f32 %v2873_v22  ;;  %1946 = vst.msk [vmem:[#allocation3 + $0x90] sm:$0xff] %vm342_vm2, %v1937_v0  ;;  %v4263_v0 = vpop.eup %4262 }
 0x58f   : > { %v3998_v30 = vpop.f32.mrf.mxu0  ;;  %v1921_v49 = vpop.xlane.xlu1 %1920  ;;  %4266 = vrcp.f32 %v2874_v50 }
 0x590   : > { %v1940_v57 = vadd.f32 %v1921_v49, %v1904_v21  ;;  %v1907_v21 = vmul.f32 %v5765_v51, %v1898_v36 }
 0x591   : > { %v2694_v16 = vpop.f32.mrf.mxu0  ;;  %v2877_v12 = vld [vmem:[#allocation3 + $0x80] sm:$0xff] }
 0x592   : > { %2732 = vrot.lane.b32.xlu0 %v2694_v16, %s4349_s26  ;;  %4268 = vrcp.f32 %v2877_v12  ;;  %1949 = vst.msk [vmem:[#allocation3 + $0xa8] sm:$0xff] %vm342_vm2, %v1940_v57  ;;  %v1900_v16 = vld [vmem:[#allocation3 + $0xd0] sm:$0xff] }
 0x593   : > { %v3999_v56 = vpop.f32.mrf.mxu0  ;;  %v1927_v3 = vpop.xlane.xlu1 %1926  ;;  %v1909_v33 = vmul.f32 %v5570_v41, %v1900_v16 }
 0x594   : > { %v1942_v22 = vadd.f32 %v1927_v3, %v1906_v61 }
 0x595   : > { %v2699_v44 = vpop.f32.mrf.mxu0 }
 0x596   : > { %2849 = vperm.xlu0 %4081, %v4263_v0   ;;  %1951 = vst.msk [vmem:[#allocation3 + $0xb8] sm:$0xff] %vm342_vm2, %v1942_v22  ;;  %v2522_v50 = vpop.xlane.xlu0 %2521  ;;  %v2487_v0 = vmul.f32 %v5576_v58, %v2478_v47 }
 0x597   : > { %v4002_v30 = vpop.f32.mrf.mxu0  ;;  %v2531_v49 = vadd.f32 %v2522_v50, %v2495_v13  ;;  %v1930_v57 = vpop.xlane.xlu1 %1929  ;;  %v2871_v13 = vld [vmem:[#allocation3 + $0x50] sm:$0xff]  ;;  %v2479_v50 = vld [vmem:[#allocation3 + $0xe0] sm:$0xff] }
 0x598   : > { %v1943_v12 = vadd.f32 %v1930_v57, %v1907_v21  ;;  %v2488_v41 = vmul.f32 %v5803_v55, %v2479_v50 }
 0x599   : > { %v6046_v2 = vpop.f32.mrf.mxu0  ;;  %2540 = vst.msk [vmem:[#allocation3 + $0x118] sm:$0xff] %vm342_vm2, %v2531_v49  ;;  %v2481_v49 = vld [vmem:[#allocation3 + $0xf0] sm:$0xff] }
 0x59a   : > { %2734 = vrot.lane.b32.xlu0 %v2699_v44, %s4349_s26  ;;  %1952 = vst.msk [vmem:[#allocation3 + $0xc0] sm:$0xff] %vm342_vm2, %v1943_v12  ;;  %v2490_v58 = vmul.f32 %v5546_v39, %v2481_v49  ;;  %v2482_v12 = vld [vmem:[#allocation3 + $0xf8] sm:$0xff] }
 0x59b   : > { %v4003_v43 = vpop.f32.mrf.mxu0  ;;  %v4265_v56 = vpop.eup %4264  ;;  %v2491_v55 = vmul.f32 %v5583_v27, %v2482_v12 }
 0x59c   : > { %v1936_v61 = vpop.xlane.xlu1 %1935  ;;  %2914 = vperm.xlu1 %4080, %v4265_v56   ;;  %v4267_v36 = vpop.eup %4266 }
 0x59d   : > { %v1945_v3 = vadd.f32 %v1936_v61, %v1909_v33  ;;  %v2965_v51 = vld [vmem:[#allocation3 + $0xb8] sm:$0xff]  ;;  %v2484_v61 = vld [vmem:[#allocation3 + $0x108] sm:$0xff] }
 0x59e   : > { %4270 = vrcp.f32 %v2965_v51  ;;  %v2493_v39 = vmul.f32 %v5840_v20, %v2484_v61  ;;  %v2485_v51 = vld [vmem:[#allocation3 + $0x110] sm:$0xff] }
 0x59f   : > { %1954 = vst.msk [vmem:[#allocation3 + $0xd0] sm:$0xff] %vm342_vm2, %v1945_v3  ;;  %v4269_v22 = vpop.eup %4268  ;;  %4272 = vrcp.f32 %v2871_v13 }
 0x5a0   : > { %v2498_v44 = vpop.xlane.xlu1 %2497  ;;  %2919 = vperm.xlu1 %4080, %v4267_v36   ;;  %2934 = vperm.xlu0 %4081, %v4269_v22   ;;  %v2494_v36 = vmul.f32 %v5587_v10, %v2485_v51  ;;  %v3052_v51 = vld [vmem:[#allocation3 + $0xe8] sm:$0xff] }
 0x5a1   : > { %v2523_v30 = vadd.f32 %v2498_v44, %v2487_v0 }
 0x5a3   : > { %2532 = vst.msk [vmem:[#allocation3 + $0xd8] sm:$0xff] %vm342_vm2, %v2523_v30  ;;  %v2963_v30 = vld [vmem:[#allocation3 + $0xa8] sm:$0xff] }
 0x5a4   : > { %v2501_v21 = vpop.xlane.xlu1 %2500  ;;  %1550 = vrot.lane.b32.xlu1 %v5873_v38, %s4351_s15 }
 0x5a5   : > { %v2524_v57 = vadd.f32 %v2501_v21, %v2488_v41 }
 0x5a6   : > { %v2968_v13 = vld [vmem:[#allocation3 + $0xd0] sm:$0xff] }
 0x5a7   : > { %2533 = vst.msk [vmem:[#allocation3 + $0xe0] sm:$0xff] %vm342_vm2, %v2524_v57  ;;  %v2876_v57 = vld [vmem:[#allocation3 + $0x78] sm:$0xff] }
 0x5a8   : > { %v2507_v16 = vpop.xlane.xlu1 %2506  ;;  %1554 = vrot.lane.b32.xlu1 %v5887_v59, %s4351_s15 }
 0x5a9   : > { %v2526_v43 = vadd.f32 %v2507_v16, %v2490_v58 }
 0x5ab   : > { %2535 = vst.msk [vmem:[#allocation3 + $0xf0] sm:$0xff] %vm342_vm2, %v2526_v43  ;;  %v4271_v33 = vpop.eup %4270 }
 0x5ac   : > { %v2510_v56 = vpop.xlane.xlu1 %2509  ;;  %1556 = vrot.lane.b32.xlu1 %v5893_v63, %s4351_s15  ;;  %3014 = vperm.xlu0 %4081, %v4271_v33   ;;  %v4273_v38 = vpop.eup %4272  ;;  %v2966_v63 = vld [vmem:[#allocation3 + $0xc0] sm:$0xff] }
 0x5ad   : > { %v2527_v47 = vadd.f32 %v2510_v56, %v2491_v55  ;;  %v2964_v55 = vld [vmem:[#allocation3 + $0xb0] sm:$0xff] }
 0x5ae   : > { %v3051_v50 = vld [vmem:[#allocation3 + $0xe0] sm:$0xff]  ;;  %v1375_v56 = vld [vmem:[#allocation4 + $0x30] sm:$0xff] }
 0x5af   : > { %2536 = vst.msk [vmem:[#allocation3 + $0xf8] sm:$0xff] %vm342_vm2, %v2527_v47  ;;  %v1429_v61 = vmul.f32 %v5856_v5, %v1375_v56 }
 0x5b0   : > { %v2516_v3 = vpop.xlane.xlu1 %2515  ;;  %1558 = vrot.lane.b32.xlu1 %v5948_v48, %s4351_s15  ;;  %2904 = vperm.xlu0 %4081, %v4273_v38   ;;  %v2960_v48 = vld [vmem:[#allocation3 + $0x90] sm:$0xff]  ;;  %v2870_v38 = vld [vmem:[#allocation3 + $0x48] sm:$0xff] }
 0x5b1   : > { %v2529_v59 = vadd.f32 %v2516_v3, %v2493_v39 }
 0x5b2   : > { %v3053_v27 = vld [vmem:[#allocation3 + $0xf0] sm:$0xff] }
 0x5b3   : > { %4274 = vrcp.f32 %v3053_v27  ;;  %2538 = vst.msk [vmem:[#allocation3 + $0x108] sm:$0xff] %vm342_vm2, %v2529_v59 }
 0x5b4   : > { %v2519_v0 = vpop.xlane.xlu1 %2518  ;;  %1560 = vrot.lane.b32.xlu1 %v5954_v25, %s4351_s15  ;;  %4276 = vrcp.f32 %v2966_v63 }
 0x5b5   : > { %v2530_v22 = vadd.f32 %v2519_v0, %v2494_v36  ;;  %v2878_v36 = vld [vmem:[#allocation3 + $0x88] sm:$0xff] }
 0x5b6   : > { %v3054_v20 = vld [vmem:[#allocation3 + $0xf8] sm:$0xff] }
 0x5b7   : > { %2539 = vst.msk [vmem:[#allocation3 + $0x110] sm:$0xff] %vm342_vm2, %v2530_v22  ;;  %4278 = vrcp.f32 %v3054_v20  ;;  %v2967_v22 = vld [vmem:[#allocation3 + $0xc8] sm:$0xff] }
 0x5b8   : > { %1564 = vrot.lane.b32.xlu1 %v5964_v32, %s4351_s15  ;;  %4280 = vrcp.f32 %v2960_v48 }
 0x5b9   : > { %4282 = vrcp.f32 %v2968_v13  ;;  %v3055_v13 = vld [vmem:[#allocation3 + $0x100] sm:$0xff] }
 0x5bc   : > { %1566 = vrot.lane.b32.xlu1 %v5970_v62, %s4351_s15 }
 0x5be   : > { %v3057_v44 = vld [vmem:[#allocation3 + $0x110] sm:$0xff] }
 0x5bf   : > { %4284 = vrcp.f32 %v3057_v44 }
 0x5c0   : > { %v4275_v10 = vpop.eup %4274  ;;  %2136 = vrot.lane.b32.xlu1 %v5978_v4, %s4350_s14  ;;  %4286 = vrcp.f32 %v3051_v50 }
 0x5c1   : > { %3094 = vperm.xlu0 %4081, %v4275_v10   ;;  %v4277_v25 = vpop.eup %4276  ;;  %4288 = vrcp.f32 %v2963_v30 }
 0x5c2   : > { %4290 = vrcp.f32 %v2876_v57  ;;  %v4094_v57 = vld [vmem:[%s6312_s4 + $0x8] sm:$0xff]  }
 0x5c3   : > { %4292 = vrcp.f32 %v2964_v55 }
 0x5c4   : > { %2142 = vrot.lane.b32.xlu1 %v5994_v23, %s4350_s14  ;;  %v4279_v32 = vpop.eup %4278  ;;  %4294 = vrcp.f32 %v2870_v38 }
 0x5c5   : > { %3019 = vperm.xlu0 %4081, %v4277_v25   ;;  %v4281_v62 = vpop.eup %4280  ;;  %4296 = vrcp.f32 %v3052_v51  ;;  %v1369_v51 = vld [vmem:[#allocation4] sm:$0xff] }
 0x5c6   : > { %v4283_v41 = vpop.eup %4282  ;;  %4298 = vrcp.f32 %v2878_v36 }
 0x5c7   : > { %4300 = vrcp.f32 %v2967_v22  ;;  %v1371_v22 = vld [vmem:[#allocation4 + $0x10] sm:$0xff] }
 0x5c8   : > { %2144 = vrot.lane.b32.xlu1 %v6002_v60, %s4350_s14  ;;  %4302 = vrcp.f32 %v3055_v13 }
 0x5c9   : > { %3099 = vperm.xlu0 %4081, %v4279_v32  }
 0x5cc   : > { %2150 = vrot.lane.b32.xlu1 %v6013_v15, %s4350_s14  ;;  %v4285_v49 = vpop.eup %4284 }
 0x5cd   : > { %2989 = vperm.xlu0 %4081, %v4281_v62   ;;  %v4287_v15 = vpop.eup %4286  ;;  %v2961_v62 = vld [vmem:[#allocation3 + $0x98] sm:$0xff] }
 0x5ce   : > { %v2707_v4 = vpop.f32.mrf.mxu0  ;;  %v4289_v12 = vpop.eup %4288  ;;  %4304 = vrcp.f32 %v2961_v62 }
 0x5cf   : > { %v4291_v39 = vpop.eup %4290 }
 0x5d0   : > { %2152 = vrot.lane.b32.xlu1 %v6016_v31, %s4350_s14  ;;  %v4006_v23 = vpop.f32.mrf.mxu0  ;;  %v6089_v60 = vpop.permute.xlu0 %2909  ;;  %v1370_v31 = vld [vmem:[#allocation4 + $0x8] sm:$0xff] }
 0x5d1   : > { %3029 = vperm.xlu0 %4081, %v4283_v41   ;;  %v1424_v43 = vmul.f32 %v5950_v7, %v1370_v31  ;;  %v3058_v31 = vld [vmem:[#allocation3 + $0x118] sm:$0xff] }
 0x5d2   : > { %v2710_v21 = vpop.f32.mrf.mxu0 }
 0x5d3   : > { %v3050_v21 = vld [vmem:[#allocation3 + $0xd8] sm:$0xff] }
 0x5d4   : > { %2722 = vrot.lane.b32.xlu1 %v6023_v42, %s4349_s26  ;;  %v4007_v58 = vpop.f32.mrf.mxu0 }
 0x5d5   : > { %3114 = vperm.xlu0 %4081, %v4285_v49  }
 0x5d8   : > { %v6093_v16 = vpop.permute.xlu0 %2924  ;;  %2728 = vrot.lane.b32.xlu1 %v6032_v14, %s4349_s26 }
 0x5d9   : > { %3084 = vperm.xlu0 %4081, %v4287_v15  }
 0x5dc   : > { %v1553_v33 = vpop.permute.xlu0 %1552  ;;  %3004 = vperm.xlu1 %4080, %v4289_v12  }
 0x5dd   : > { %v1578_v42 = vadd.f32 %v1553_v33, %v1424_v43 }
 0x5df   : > { %1588 = vst.msk [vmem:[#allocation4 + $0x8] sm:$0xff] %vm1586_vm6, %v1578_v42 }
 0x5e0   : > { %v1563_v47 = vpop.permute.xlu0 %1562  ;;  %2730 = vrot.lane.b32.xlu1 %v6036_v35, %s4349_s26  ;;  %v4293_v35 = vpop.eup %4292 }
 0x5e1   : > { %v1583_v14 = vadd.f32 %v1563_v47, %v1429_v61  ;;  %v4295_v10 = vpop.eup %4294 }
 0x5e2   : > { %v4297_v50 = vpop.eup %4296 }
 0x5e3   : > { %1593 = vst.msk [vmem:[#allocation4 + $0x30] sm:$0xff] %vm1586_vm6, %v1583_v14  ;;  %v4299_v30 = vpop.eup %4298 }
 0x5e4   : > { %v2139_v7 = vpop.permute.xlu0 %2138  ;;  %2929 = vperm.xlu1 %4080, %v4291_v39   ;;  %v4301_v23 = vpop.eup %4300 }
 0x5e5   : > { %v4303_v15 = vpop.eup %4302 }
 0x5e6   : > { %v1956_v3 = vld [vmem:[#allocation4 + $0x8] sm:$0xff]  ;;  %v4305_v43 = vpop.eup %4304 }
 0x5e7   : > { %v2010_v59 = vmul.f32 %v5980_v26, %v1956_v3 }
 0x5e8   : > { %v6104_v27 = vpop.permute.xlu0 %2140  ;;  %2736 = vrot.lane.b32.xlu1 %v6046_v2, %s4349_s26 }
 0x5e9   : > { %v2164_v5 = vadd.f32 %v2139_v7, %v2010_v59  ;;  %v1423_v59 = vmul.f32 %v5858_v45, %v1369_v51 }
 0x5ea   : > { %v1961_v0 = vld [vmem:[#allocation4 + $0x30] sm:$0xff] }
 0x5eb   : > { %2174 = vst.msk [vmem:[#allocation4 + $0x8] sm:$0xff] %vm2172_vm7, %v2164_v5  ;;  %v2015_v26 = vmul.f32 %v5972_v29, %v1961_v0  ;;  %v4092_v29 = vld [vmem:[%s6312_s4 + $0x18] sm:$0xff]  }
 0x5ec   : > { %v6109_v63 = vpop.permute.xlu0 %2146  ;;  %3009 = vperm.xlu1 %4080, %v4293_v35   ;;  %4040 = vmatpush3.bf16.msra.mxu1 %v4092_v29 }
 0x5ed   : > { %4009 = vmatpush3.bf16.msra.mxu0 %v4092_v29  ;;  %4037 = vmatprep.subr.bf16.mxu1 %v6386_v54 }
 0x5ee   : > { %4010 = vmatprep.subr.bf16.mxu0 %v6386_v54 }
 0x5f0   : > { %v2149_v20 = vpop.permute.xlu0 %2148  ;;  %2738 = vrot.lane.b32.xlu1 %v2707_v4, %s4349_s26  ;;  %v3056_v4 = vld [vmem:[#allocation3 + $0x108] sm:$0xff] }
 0x5f1   : > { %v2169_v48 = vadd.f32 %v2149_v20, %v2015_v26  ;;  %4306 = vrcp.f32 %v3056_v4 }
 0x5f2   : > { %v2542_v2 = vld [vmem:[#allocation4 + $0x8] sm:$0xff]  ;;  %4308 = vrcp.f32 %v3050_v21 }
 0x5f3   : > { %2179 = vst.msk [vmem:[#allocation4 + $0x30] sm:$0xff] %vm2172_vm7, %v2169_v48  ;;  %v2596_v25 = vmul.f32 %v5990_v17, %v2542_v2  ;;  %v4093_v17 = vld [vmem:[%s6312_s4 + $0x10] sm:$0xff]   ;;  %4310 = vrcp.f32 %v3058_v31  ;;  %v1372_v2 = vld [vmem:[#allocation4 + $0x18] sm:$0xff] }
 0x5f4   : > { %v2725_v44 = vpop.permute.xlu0 %2724  ;;  %2899 = vperm.xlu1 %4080, %v4295_v10   ;;  %4041 = vmatpush3.bf16.msra.mxu1 %v4093_v17  ;;  %v1426_v10 = vmul.f32 %v5883_v34, %v1372_v2 }
 0x5f5   : > { %v2750_v32 = vadd.f32 %v2725_v44, %v2596_v25  ;;  %4011 = vmatpush3.bf16.msra.mxu0 %v4093_v17  ;;  %4038 = vmatprep.subr.bf16.mxu1 %v6386_v54 }
 0x5f6   : > { %4012 = vmatprep.subr.bf16.mxu0 %v6386_v54 }
 0x5f7   : > { %2760 = vst.msk [vmem:[#allocation4 + $0x8] sm:$0xff] %vm2758_vm8, %v2750_v32 }
 0x5f8   : > { %3089 = vperm.xlu1 %4080, %v4297_v50   ;;  %v6131_v58 = vpop.permute.xlu0 %2726  ;;  %4042 = vmatpush3.bf16.msra.mxu1 %v4094_v57 }
 0x5f9   : > { %4013 = vmatpush3.bf16.msra.mxu0 %v4094_v57  ;;  %4039 = vmatprep.subr.bf16.mxu1 %v6386_v54 }
 0x5fa   : > { %4014 = vmatprep.subr.bf16.mxu0 %v6386_v54  ;;  %v2547_v61 = vld [vmem:[#allocation4 + $0x30] sm:$0xff] }
 0x5fb   : > { %v2601_v14 = vmul.f32 %v6021_v19, %v2547_v61  ;;  %v1425_v19 = vmul.f32 %v5875_v52, %v1371_v22 }
 0x5fc   : > { %2939 = vperm.xlu1 %4080, %v4299_v30   ;;  %v1374_v30 = vld [vmem:[#allocation4 + $0x28] sm:$0xff] }
 0x5fd   : > { %v1428_v34 = vmul.f32 %v5903_v9, %v1374_v30 }
 0x5fe   : > { %v2799_v41 = vld [vmem:[#allocation4 + $0x8] sm:$0xff]  ;;  %v4307_v55 = vpop.eup %4306 }
 0x5ff   : > { %v2853_v49 = vmul.f32 %v6011_v40, %v2799_v41  ;;  %v4095_v40 = vld [vmem:[%s6312_s4] sm:$0xff]   ;;  %v4309_v56 = vpop.eup %4308 }
 0x600   : > { %3024 = vperm.xlu1 %4080, %v4301_v23   ;;  %4043 = vmatpush3.bf16.msra.mxu1 %v4095_v40  ;;  %v4311_v47 = vpop.eup %4310 }
 0x601   : > { %2862 = vst.msk [vmem:[#allocation4 + $0x8] sm:$0xff] %vm507_vm1, %v2853_v49  ;;  %4015 = vmatpush3.bf16.msra.mxu0 %v4095_v40 }
 0x604   : > { %3104 = vperm.xlu1 %4080, %v4303_v15   ;;  %v1377_v15 = vld [vmem:[#allocation4 + $0x40] sm:$0xff] }
 0x605   : > { %v6138_v12 = vpop.permute.xlu0 %2999 }
 0x608   : > { %2994 = vperm.xlu1 %4080, %v4305_v43   ;;  %v2889_v32 = vld [vmem:[#allocation4 + $0x8] sm:$0xff] }
 0x609   : > { %v6140_v33 = vpop.permute.xlu0 %2732 }
 0x60c   : > { %3109 = vperm.xlu1 %4080, %v4307_v55  }
 0x610   : > { %3079 = vperm.xlu1 %4080, %v4309_v56  }
 0x611   : > { %v6142_v42 = vpop.permute.xlu0 %2849 }
 0x614   : > { %3119 = vperm.xlu1 %4080, %v4311_v47  }
 0x615   : > { %v2735_v39 = vpop.permute.xlu0 %2734 }
 0x616   : > { %v2755_v38 = vadd.f32 %v2735_v39, %v2601_v14 }
 0x617   : > { %v6146_v7 = vpop.permute.xlu1 %2914 }
 0x618   : > { %2765 = vst.msk [vmem:[#allocation4 + $0x30] sm:$0xff] %vm2758_vm8, %v2755_v38 }
 0x61b   : > { %v6148_v3 = vpop.permute.xlu1 %2919  ;;  %v6155_v26 = vpop.permute.xlu0 %2934 }
 0x61f   : > { %v2804_v5 = vld [vmem:[#allocation4 + $0x30] sm:$0xff]  ;;  %v1551_v35 = vpop.permute.xlu1 %1550 }
 0x620   : > { %v2858_v36 = vmul.f32 %v6007_v1, %v2804_v5  ;;  %v1577_v0 = vadd.f32 %v1551_v35, %v1423_v59  ;;  %v1373_v1 = vld [vmem:[#allocation4 + $0x20] sm:$0xff] }
 0x621   : > { %v1427_v52 = vmul.f32 %v5852_v8, %v1373_v1  ;;  %v1376_v8 = vld [vmem:[#allocation4 + $0x38] sm:$0xff] }
 0x622   : > { %2867 = vst.msk [vmem:[#allocation4 + $0x30] sm:$0xff] %vm507_vm1, %v2858_v36  ;;  %v1430_v49 = vmul.f32 %v5943_v37, %v1376_v8 }
 0x623   : > { %1587 = vst.msk [vmem:[#allocation4] sm:$0xff] %vm1586_vm6, %v1577_v0  ;;  %v1555_v20 = vpop.permute.xlu1 %1554  ;;  %v6453_v0 = vld [vmem:[#allocation38_spill] sm:$0xff] }
 0x624   : > { %v1579_v48 = vadd.f32 %v1555_v20, %v1425_v19  ;;  %v6454_v19 = vld [vmem:[#allocation33_spill] sm:$0xff] }
 0x626   : > { %1589 = vst.msk [vmem:[#allocation4 + $0x10] sm:$0xff] %vm1586_vm6, %v1579_v48  ;;  %v6455_v48 = vld [vmem:[#allocation7_spill] sm:$0xff] }
 0x627   : > { %v1557_v45 = vpop.permute.xlu1 %1556  ;;  %v6159_v13 = vpop.permute.xlu0 %3014 }
 0x628   : > { %v1580_v25 = vadd.f32 %v1557_v45, %v1426_v10 }
 0x62a   : > { %1590 = vst.msk [vmem:[#allocation4 + $0x18] sm:$0xff] %vm1586_vm6, %v1580_v25  ;;  %v1955_v40 = vld [vmem:[#allocation4] sm:$0xff] }
 0x62b   : > { %v1559_v44 = vpop.permute.xlu1 %1558  ;;  %v2905_v50 = vpop.permute.xlu0 %2904  ;;  %v2009_v61 = vmul.f32 %v5881_v6, %v1955_v40 }
 0x62c   : > { %v1581_v62 = vadd.f32 %v1559_v44, %v1427_v52  ;;  %v2943_v29 = vmul.f32 %v2905_v50, %v2889_v32  ;;  %v6457_v50 = vld [vmem:[#allocation30_spill] sm:$0xff] }
 0x62d   : > { %v1957_v4 = vld [vmem:[#allocation4 + $0x10] sm:$0xff] }
 0x62e   : > { %v2011_v17 = vmul.f32 %v5933_v11, %v1957_v4  ;;  %1591 = vst.msk [vmem:[#allocation4 + $0x20] sm:$0xff] %vm1586_vm6, %v1581_v62  ;;  %2952 = vst.msk [vmem:[#allocation4 + $0x8] sm:$0xff] %vm1586_vm6, %v2943_v29  ;;  %v1431_v11 = vmul.f32 %v5862_v53, %v1377_v15 }
 0x62f   : > { %v1561_v41 = vpop.permute.xlu1 %1560 }
 0x630   : > { %v2165_v23 = vadd.f32 %v6104_v27, %v2011_v17  ;;  %v1582_v21 = vadd.f32 %v1561_v41, %v1428_v34  ;;  %v6458_v41 = vld [vmem:[#allocation6_spill] sm:$0xff] }
 0x631   : > { %v1958_v14 = vld [vmem:[#allocation4 + $0x18] sm:$0xff] }
 0x632   : > { %2175 = vst.msk [vmem:[#allocation4 + $0x10] sm:$0xff] %vm2172_vm7, %v2165_v23 }
 0x633   : > { %1592 = vst.msk [vmem:[#allocation4 + $0x28] sm:$0xff] %vm1586_vm6, %v1582_v21  ;;  %v1565_v57 = vpop.permute.xlu1 %1564  ;;  %v6459_v21 = vld [vmem:[#allocation17_spill] sm:$0xff] }
 0x634   : > { %v1584_v9 = vadd.f32 %v1565_v57, %v1430_v49 }
 0x635   : > { %v1959_v51 = vld [vmem:[#allocation4 + $0x20] sm:$0xff] }
 0x636   : > { %1594 = vst.msk [vmem:[#allocation4 + $0x38] sm:$0xff] %vm1586_vm6, %v1584_v9  ;;  %v2013_v6 = vmul.f32 %v5860_v28, %v1959_v51  ;;  %v6456_v28 = vld [vmem:[#allocation16_spill] sm:$0xff]  ;;  %v6463_v51 = vld [vmem:[#allocation15_spill] sm:$0xff] }
 0x637   : > { %v1567_v31 = vpop.permute.xlu1 %1566 }
 0x638   : > { %v1585_v43 = vadd.f32 %v1567_v31, %v1431_v11 }
 0x639   : > { %v2543_v55 = vld [vmem:[#allocation4 + $0x10] sm:$0xff] }
 0x63a   : > { %v1960_v27 = vld [vmem:[#allocation4 + $0x28] sm:$0xff]  ;;  %v2597_v56 = vmul.f32 %v5966_v46, %v2543_v55  ;;  %1595 = vst.msk [vmem:[#allocation4 + $0x40] sm:$0xff] %vm1586_vm6, %v1585_v43  ;;  %v2012_v46 = vmul.f32 %v5939_v24, %v1958_v14  ;;  %v6461_v43 = vld [vmem:[#allocation27_spill] sm:$0xff] }
 0x63b   : > { %v2014_v37 = vmul.f32 %v5956_v18, %v1960_v27  ;;  %v2137_v47 = vpop.permute.xlu1 %2136 }
 0x63c   : > { %v2751_v39 = vadd.f32 %v6131_v58, %v2597_v56  ;;  %v2163_v53 = vadd.f32 %v2137_v47, %v2009_v61 }
 0x63d   : > { %v2168_v38 = vadd.f32 %v6109_v63, %v2014_v37  ;;  %v1962_v58 = vld [vmem:[#allocation4 + $0x38] sm:$0xff] }
 0x63e   : > { %2761 = vst.msk [vmem:[#allocation4 + $0x10] sm:$0xff] %vm2758_vm8, %v2751_v39  ;;  %v2016_v20 = vmul.f32 %v6454_v19, %v1962_v58  ;;  %v6462_v39 = vld [vmem:[#allocation29_spill] sm:$0xff] }
 0x63f   : > { %2178 = vst.msk [vmem:[#allocation4 + $0x28] sm:$0xff] %vm2172_vm7, %v2168_v38  ;;  %2173 = vst.msk [vmem:[#allocation4] sm:$0xff] %vm2172_vm7, %v2163_v53  ;;  %v2143_v18 = vpop.permute.xlu1 %2142 }
 0x640   : > { %v2166_v59 = vadd.f32 %v2143_v18, %v2012_v46  ;;  %v2894_v46 = vld [vmem:[#allocation4 + $0x30] sm:$0xff] }
 0x641   : > { %v1963_v10 = vld [vmem:[#allocation4 + $0x40] sm:$0xff] }
 0x642   : > { %2176 = vst.msk [vmem:[#allocation4 + $0x18] sm:$0xff] %vm2172_vm7, %v2166_v59  ;;  %v2017_v25 = vmul.f32 %v6456_v28, %v1963_v10  ;;  %v6465_v10 = vld [vmem:[#allocation34_spill] sm:$0xff] }
 0x643   : > { %v2145_v5 = vpop.permute.xlu1 %2144 }
 0x644   : > { %v2167_v35 = vadd.f32 %v2145_v5, %v2013_v6  ;;  %v3095_v6 = vpop.permute.xlu0 %3094 }
 0x645   : > { %v2800_v36 = vld [vmem:[#allocation4 + $0x10] sm:$0xff] }
 0x646   : > { %v2546_v63 = vld [vmem:[#allocation4 + $0x28] sm:$0xff]  ;;  %2177 = vst.msk [vmem:[#allocation4 + $0x20] sm:$0xff] %vm2172_vm7, %v2167_v35  ;;  %v2854_v24 = vmul.f32 %v6455_v48, %v2800_v36  ;;  %v2541_v44 = vld [vmem:[#allocation4] sm:$0xff] }
 0x647   : > { %v2600_v22 = vmul.f32 %v6453_v0, %v2546_v63  ;;  %v2151_v2 = vpop.permute.xlu1 %2150  ;;  %v2595_v62 = vmul.f32 %v6457_v50, %v2541_v44  ;;  %v6464_v63 = vld [vmem:[#allocation5_spill] sm:$0xff] }
 0x648   : > { %v2170_v1 = vadd.f32 %v2151_v2, %v2016_v20  ;;  %2863 = vst.msk [vmem:[#allocation4 + $0x10] sm:$0xff] %vm507_vm1, %v2854_v24  ;;  %v3020_v24 = vpop.permute.xlu0 %3019 }
 0x649   : > { %v2754_v45 = vadd.f32 %v6140_v33, %v2600_v22  ;;  %v2544_v30 = vld [vmem:[#allocation4 + $0x18] sm:$0xff] }
 0x64a   : > { %2180 = vst.msk [vmem:[#allocation4 + $0x38] sm:$0xff] %vm2172_vm7, %v2170_v1  ;;  %v2598_v23 = vmul.f32 %v6458_v41, %v2544_v30 }
 0x64b   : > { %2764 = vst.msk [vmem:[#allocation4 + $0x28] sm:$0xff] %vm2758_vm8, %v2754_v45  ;;  %v2153_v52 = vpop.permute.xlu1 %2152 }
 0x64c   : > { %v2171_v32 = vadd.f32 %v2153_v52, %v2017_v25  ;;  %v6466_v52 = vld [vmem:[#allocation14_spill] sm:$0xff] }
 0x64d   : > { %v2545_v9 = vld [vmem:[#allocation4 + $0x20] sm:$0xff] }
 0x64e   : > { %2181 = vst.msk [vmem:[#allocation4 + $0x40] sm:$0xff] %vm2172_vm7, %v2171_v32 }
 0x64f   : > { %v2723_v29 = vpop.permute.xlu1 %2722  ;;  %v2890_v4 = vld [vmem:[#allocation4 + $0x10] sm:$0xff] }
 0x650   : > { %v2749_v33 = vadd.f32 %v2723_v29, %v2595_v62  ;;  %v2944_v34 = vmul.f32 %v6089_v60, %v2890_v4  ;;  %v6460_v60 = vld [vmem:[#allocation28_spill] sm:$0xff] }
 0x651   : > { %v2599_v40 = vmul.f32 %v6460_v60, %v2545_v9  ;;  %v2548_v18 = vld [vmem:[#allocation4 + $0x38] sm:$0xff] }
 0x652   : > { %v2803_v17 = vld [vmem:[#allocation4 + $0x28] sm:$0xff]  ;;  %2759 = vst.msk [vmem:[#allocation4] sm:$0xff] %vm2758_vm8, %v2749_v33  ;;  %v2602_v59 = vmul.f32 %v6463_v51, %v2548_v18  ;;  %v3100_v33 = vpop.permute.xlu0 %3099 }
 0x653   : > { %2953 = vst.msk [vmem:[#allocation4 + $0x10] sm:$0xff] %vm1586_vm6, %v2944_v34  ;;  %v2857_v8 = vmul.f32 %v6459_v21, %v2803_v17  ;;  %v2729_v49 = vpop.permute.xlu1 %2728 }
 0x654   : > { %v2752_v57 = vadd.f32 %v2729_v49, %v2598_v23 }
 0x655   : > { %2866 = vst.msk [vmem:[#allocation4 + $0x28] sm:$0xff] %vm507_vm1, %v2857_v8  ;;  %v2549_v20 = vld [vmem:[#allocation4 + $0x40] sm:$0xff] }
 0x656   : > { %2762 = vst.msk [vmem:[#allocation4 + $0x18] sm:$0xff] %vm2758_vm8, %v2752_v57  ;;  %v2603_v45 = vmul.f32 %v6465_v10, %v2549_v20  ;;  %v2990_v57 = vpop.permute.xlu0 %2989 }
 0x657   : > { %v3005_v15 = vpop.permute.xlu1 %3004 }
 0x659   : > { %v2798_v11 = vld [vmem:[#allocation4] sm:$0xff] }
 0x65a   : > { %v2980_v31 = vld [vmem:[#allocation4 + $0x10] sm:$0xff]  ;;  %v2852_v55 = vmul.f32 %v6461_v43, %v2798_v11 }
 0x65b   : > { %v3034_v27 = vmul.f32 %v6138_v12, %v2980_v31  ;;  %v2731_v56 = vpop.permute.xlu1 %2730 }
 0x65c   : > { %v2893_v37 = vld [vmem:[#allocation4 + $0x28] sm:$0xff]  ;;  %v2753_v61 = vadd.f32 %v2731_v56, %v2599_v40  ;;  %2861 = vst.msk [vmem:[#allocation4] sm:$0xff] %vm507_vm1, %v2852_v55 }
 0x65d   : > { %3043 = vst.msk [vmem:[#allocation4 + $0x10] sm:$0xff] %vm2172_vm7, %v3034_v27  ;;  %v2947_v47 = vmul.f32 %v6093_v16, %v2893_v37  ;;  %v2801_v14 = vld [vmem:[#allocation4 + $0x18] sm:$0xff]  ;;  %v3030_v37 = vpop.permute.xlu0 %3029 }
 0x65e   : > { %v2855_v38 = vmul.f32 %v6462_v39, %v2801_v14  ;;  %2763 = vst.msk [vmem:[#allocation4 + $0x20] sm:$0xff] %vm2758_vm8, %v2753_v61  ;;  %v2979_v39 = vld [vmem:[#allocation4 + $0x8] sm:$0xff] }
 0x65f   : > { %2956 = vst.msk [vmem:[#allocation4 + $0x28] sm:$0xff] %vm1586_vm6, %v2947_v47  ;;  %v2930_v53 = vpop.permute.xlu1 %2929 }
 0x660   : > { %2864 = vst.msk [vmem:[#allocation4 + $0x18] sm:$0xff] %vm507_vm1, %v2855_v38  ;;  %v2948_v12 = vmul.f32 %v2930_v53, %v2894_v46 }
 0x662   : > { %2957 = vst.msk [vmem:[#allocation4 + $0x30] sm:$0xff] %vm1586_vm6, %v2948_v12 }
 0x663   : > { %v2737_v5 = vpop.permute.xlu1 %2736  ;;  %v2888_v32 = vld [vmem:[#allocation4] sm:$0xff] }
 0x664   : > { %v2756_v16 = vadd.f32 %v2737_v5, %v2602_v59  ;;  %v3070_v34 = vld [vmem:[#allocation4 + $0x10] sm:$0xff]  ;;  %v3115_v59 = vpop.permute.xlu0 %3114 }
 0x665   : > { %v2802_v58 = vld [vmem:[#allocation4 + $0x20] sm:$0xff] }
 0x666   : > { %v2983_v35 = vld [vmem:[#allocation4 + $0x28] sm:$0xff]  ;;  %v2856_v36 = vmul.f32 %v6464_v63, %v2802_v58  ;;  %2766 = vst.msk [vmem:[#allocation4 + $0x38] sm:$0xff] %vm2758_vm8, %v2756_v16 }
 0x667   : > { %v3037_v0 = vmul.f32 %v6159_v13, %v2983_v35  ;;  %v2891_v22 = vld [vmem:[#allocation4 + $0x18] sm:$0xff]  ;;  %v3010_v19 = vpop.permute.xlu1 %3009 }
 0x668   : > { %v2945_v48 = vmul.f32 %v6146_v7, %v2891_v22  ;;  %2865 = vst.msk [vmem:[#allocation4 + $0x20] sm:$0xff] %vm507_vm1, %v2856_v36  ;;  %v3085_v20 = vpop.permute.xlu0 %3084 }
 0x669   : > { %3046 = vst.msk [vmem:[#allocation4 + $0x28] sm:$0xff] %vm2172_vm7, %v3037_v0  ;;  %v2984_v2 = vld [vmem:[#allocation4 + $0x30] sm:$0xff] }
 0x66a   : > { %2954 = vst.msk [vmem:[#allocation4 + $0x18] sm:$0xff] %vm1586_vm6, %v2945_v48  ;;  %v3038_v1 = vmul.f32 %v3020_v24, %v2984_v2 }
 0x66b   : > { %v2739_v28 = vpop.permute.xlu1 %2738 }
 0x66c   : > { %v2757_v25 = vadd.f32 %v2739_v28, %v2603_v45  ;;  %3047 = vst.msk [vmem:[#allocation4 + $0x30] sm:$0xff] %vm2172_vm7, %v3038_v1 }
 0x66d   : > { %v2805_v13 = vld [vmem:[#allocation4 + $0x38] sm:$0xff] }
 0x66e   : > { %v2859_v44 = vmul.f32 %v6466_v52, %v2805_v13  ;;  %2767 = vst.msk [vmem:[#allocation4 + $0x40] sm:$0xff] %vm2758_vm8, %v2757_v25 }
 0x66f   : > { %v2892_v7 = vld [vmem:[#allocation4 + $0x20] sm:$0xff]  ;;  %v2900_v50 = vpop.permute.xlu1 %2899 }
 0x670   : > { %2868 = vst.msk [vmem:[#allocation4 + $0x38] sm:$0xff] %vm507_vm1, %v2859_v44  ;;  %v2946_v62 = vmul.f32 %v6148_v3, %v2892_v7  ;;  %v2942_v29 = vmul.f32 %v2900_v50, %v2888_v32  ;;  %v3073_v55 = vld [vmem:[#allocation4 + $0x28] sm:$0xff] }
 0x671   : > { %v2981_v30 = vld [vmem:[#allocation4 + $0x18] sm:$0xff] }
 0x672   : > { %v3035_v4 = vmul.f32 %v3005_v15, %v2981_v30  ;;  %2955 = vst.msk [vmem:[#allocation4 + $0x20] sm:$0xff] %vm1586_vm6, %v2946_v62  ;;  %2951 = vst.msk [vmem:[#allocation4] sm:$0xff] %vm1586_vm6, %v2942_v29  ;;  %v3676_v30 = vld [vmem:[%s6265_s30 + $0x8] sm:$0xff]  }
 0x673   : > { %v3090_v17 = vpop.permute.xlu1 %3089 }
 0x674   : > { %3044 = vst.msk [vmem:[#allocation4 + $0x18] sm:$0xff] %vm2172_vm7, %v3035_v4  ;;  %v3124_v41 = vmul.f32 %v3090_v17, %v3070_v34  ;;  %v3551_v4 = vld [vmem:[%s6313_s5] ss:$0 sm:$0xff] }
 0x675   : > { %v2806_v23 = vld [vmem:[#allocation4 + $0x40] sm:$0xff] }
 0x676   : > { %3133 = vst.msk [vmem:[#allocation4 + $0x10] sm:$0xff] %vm2758_vm8, %v3124_v41  ;;  %v2860_v21 = vmul.f32 %v6142_v42, %v2806_v23  ;;  %v3652_v23 = vunpack.c.h.bf16 %v3676_v30 }
 0x677   : > { %v2940_v8 = vpop.permute.xlu1 %2939  ;;  %v2895_v3 = vld [vmem:[#allocation4 + $0x38] sm:$0xff] }
 0x678   : > { %2869 = vst.msk [vmem:[#allocation4 + $0x40] sm:$0xff] %vm507_vm1, %v2860_v21  ;;  %v2949_v49 = vmul.f32 %v6155_v26, %v2895_v3 }
 0x679   : > { %v2982_v15 = vld [vmem:[#allocation4 + $0x20] sm:$0xff] }
 0x67a   : > { %v2978_v9 = vld [vmem:[#allocation4] sm:$0xff]  ;;  %v3036_v11 = vmul.f32 %v3010_v19, %v2982_v15  ;;  %2958 = vst.msk [vmem:[#allocation4 + $0x38] sm:$0xff] %vm1586_vm6, %v2949_v49 }
 0x67b   : > { %v3032_v31 = vmul.f32 %v2990_v57, %v2978_v9  ;;  %v3071_v60 = vld [vmem:[#allocation4 + $0x18] sm:$0xff]  ;;  %v3025_v40 = vpop.permute.xlu1 %3024 }
 0x67c   : > { %v3125_v43 = vmul.f32 %v3095_v6, %v3071_v60  ;;  %3045 = vst.msk [vmem:[#allocation4 + $0x20] sm:$0xff] %vm2172_vm7, %v3036_v11  ;;  %v3074_v6 = vld [vmem:[#allocation4 + $0x30] sm:$0xff] }
 0x67d   : > { %3041 = vst.msk [vmem:[#allocation4] sm:$0xff] %vm2172_vm7, %v3032_v31  ;;  %v3142_v18 = vld [vmem:[#allocation4 + $0x10] sm:$0xff] }
 0x67e   : > { %3134 = vst.msk [vmem:[#allocation4 + $0x18] sm:$0xff] %vm2758_vm8, %v3125_v43 }
 0x67f   : > { %v2896_v42 = vld [vmem:[#allocation4 + $0x40] sm:$0xff]  ;;  %v3105_v27 = vpop.permute.xlu1 %3104 }
 0x680   : > { %v2950_v26 = vmul.f32 %v2940_v8, %v2896_v42  ;;  %v3127_v56 = vmul.f32 %v3105_v27, %v3073_v55  ;;  %v3677_v8 = vld [vmem:[%s6265_s30 + $0x10] sm:$0xff]   ;;  %v3678_v27 = vld [vmem:[%s6265_s30 + $0x18] sm:$0xff]  }
 0x681   : > { %v2985_v61 = vld [vmem:[#allocation4 + $0x38] sm:$0xff]  ;;  %v3655_v9 = vunpack.c.l.bf16 %v3677_v8  ;;  %v3656_v42 = vunpack.c.h.bf16 %v3677_v8 }
 0x682   : > { %2959 = vst.msk [vmem:[#allocation4 + $0x40] sm:$0xff] %vm1586_vm6, %v2950_v26  ;;  %v3039_v47 = vmul.f32 %v3025_v40, %v2985_v61  ;;  %v3646_v61 = vld [vmem:[%s6265_s30] sm:$0xff]  }
 0x683   : > { %3136 = vst.msk [vmem:[#allocation4 + $0x28] sm:$0xff] %vm2758_vm8, %v3127_v56  ;;  %v3072_v14 = vld [vmem:[#allocation4 + $0x20] sm:$0xff]  ;;  %v2995_v38 = vpop.permute.xlu1 %2994 }
 0x684   : > { %v3126_v53 = vmul.f32 %v3100_v33, %v3072_v14  ;;  %3048 = vst.msk [vmem:[#allocation4 + $0x38] sm:$0xff] %vm2172_vm7, %v3039_v47  ;;  %v3033_v46 = vmul.f32 %v2995_v38, %v2979_v39  ;;  %v3068_v36 = vld [vmem:[#allocation4] sm:$0xff]  ;;  %v3651_v33 = vunpack.c.l.bf16 %v3676_v30  ;;  %v3659_v14 = vunpack.c.l.bf16 %v3678_v27 }
 0x685   : > { %v3143_v12 = vld [vmem:[#allocation4 + $0x18] sm:$0xff] }
 0x686   : > { %3135 = vst.msk [vmem:[#allocation4 + $0x20] sm:$0xff] %vm2758_vm8, %v3126_v53  ;;  %v3150_v51 = vpack.c.bf16 %v3143_v12, %v3142_v18 }
 0x687   : > { %3042 = vst.msk [vmem:[#allocation4 + $0x8] sm:$0xff] %vm2172_vm7, %v3033_v46  ;;  %v3110_v5 = vpop.permute.xlu1 %3109  ;;  %v3647_v46 = vunpack.c.l.bf16 %v3646_v61 }
 0x688   : > { %v3128_v16 = vmul.f32 %v3110_v5, %v3074_v6  ;;  %4021 = vmatmul.mubr.msk.bf16.vlgmr.msra.gmra.mxu1 %vm415_vm4, %v3150_v51  ;;  %v3660_v6 = vunpack.c.h.bf16 %v3678_v27 }
 0x689   : > { %4024 = vmatprep.mubr.msk.bf16.mxu1 %vm4342_vm0, %v6386_v54  ;;  %v2986_v58 = vld [vmem:[#allocation4 + $0x40] sm:$0xff] }
 0x68a   : > { %3137 = vst.msk [vmem:[#allocation4 + $0x30] sm:$0xff] %vm2758_vm8, %v3128_v16  ;;  %v3040_v35 = vmul.f32 %v3030_v37, %v2986_v58  ;;  %v3145_v2 = vld [vmem:[#allocation4 + $0x28] sm:$0xff]  ;;  %v3289_v58 = vld [vmem:[%s6265_s30 + $0x20] sm:$0xf] }
 0x68b   : > { %v3075_v63 = vld [vmem:[#allocation4 + $0x38] sm:$0xff]  ;;  %v3080_v0 = vpop.permute.xlu1 %3079 }
 0x68c   : > { %v3129_v22 = vmul.f32 %v3115_v59, %v3075_v63  ;;  %v3122_v19 = vmul.f32 %v3080_v0, %v3068_v36  ;;  %3049 = vst.msk [vmem:[#allocation4 + $0x40] sm:$0xff] %vm2172_vm7, %v3040_v35  ;;  %v3648_v0 = vunpack.c.h.bf16 %v3646_v61 }
 0x68d   : > { %v3144_v24 = vld [vmem:[#allocation4 + $0x20] sm:$0xff] }
 0x68e   : > { %v3069_v48 = vld [vmem:[#allocation4 + $0x8] sm:$0xff]  ;;  %3138 = vst.msk [vmem:[#allocation4 + $0x38] sm:$0xff] %vm2758_vm8, %v3129_v22  ;;  %3131 = vst.msk [vmem:[#allocation4] sm:$0xff] %vm2758_vm8, %v3122_v19  ;;  %v3151_v45 = vpack.c.bf16 %v3145_v2, %v3144_v24  ;;  %v3298_v2 = vunpack.c.l.bf16 %v3289_v58 }
 0x68f   : > { %v3123_v10 = vmul.f32 %v3085_v20, %v3069_v48  ;;  %v3120_v28 = vpop.permute.xlu1 %3119 }
 0x690   : > { %4025 = vmatmul.mubr.msk.bf16.gmra.mxu1 %vm415_vm4, %v3151_v45 }
 0x691   : > { %3132 = vst.msk [vmem:[#allocation4 + $0x8] sm:$0xff] %vm2758_vm8, %v3123_v10  ;;  %4028 = vmatprep.mubr.msk.bf16.mxu1 %vm4342_vm0, %v6386_v54  ;;  %v3146_v13 = vld [vmem:[#allocation4 + $0x30] sm:$0xff] }
 0x693   : > { %v3076_v1 = vld [vmem:[#allocation4 + $0x40] sm:$0xff] }
 0x694   : > { %v3130_v25 = vmul.f32 %v3120_v28, %v3076_v1 }
 0x695   : > { %v3147_v52 = vld [vmem:[#allocation4 + $0x38] sm:$0xff]  ;;  %v3140_v7 = vld [vmem:[#allocation4] sm:$0xff] }
 0x696   : > { %3139 = vst.msk [vmem:[#allocation4 + $0x40] sm:$0xff] %vm2758_vm8, %v3130_v25  ;;  %v3152_v44 = vpack.c.bf16 %v3147_v52, %v3146_v13 }
 0x698   : > { %v3141_v32 = vld [vmem:[#allocation4 + $0x8] sm:$0xff]  ;;  %4029 = vmatmul.mubr.msk.bf16.gmra.mxu1 %vm415_vm4, %v3152_v44 }
 0x699   : > { %v3149_v50 = vpack.c.bf16 %v3141_v32, %v3140_v7  ;;  %4032 = vmatprep.mubr.msk.bf16.mxu1 %vm4342_vm0, %v6386_v54 }
 0x69b   : > { %4017 = vmatmul.mubr.msk.bf16.vlgmr.msra.gmra.mxu0 %vm415_vm4, %v3149_v50 }
 0x69d   : > { %v3148_v62 = vld [vmem:[#allocation4 + $0x40] sm:$0xff] }
 0x69e   : > { %v3153_v29 = vpack.c.bf16 %v3148_v62, %v3148_v62 }
 0x6a0   : > { %4033 = vmatmul.mubr.msk.bf16.gmra.mxu1 %vm415_vm4, %v3153_v29 }
 0x748   : > { %v3251_v54 = vpop.f32.mrf.mxu1 }
 0x749   : > { %v3252_v34 = vadd.f32 %v3551_v4, %v3251_v54 }
 0x74a   : > { %v4022_v17 = vpop.f32.mrf.mxu1 }
 0x74b   : > { %v3301_v41 = vadd.f32 %v3651_v33, %v3252_v34 }
 0x74c   : > { %v3254_v21 = vpop.f32.mrf.mxu1 }
 0x74d   : > { %v3574_v3 = vpack.c.bf16 %v3301_v41, %v3301_v41  ;;  %v3255_v49 = vadd.f32 %v3551_v4, %v3254_v21 }
 0x74e   : > { %v4023_v57 = vpop.f32.mrf.mxu1 }
 0x74f   : > { %3348 = vst.msk [vmem:[%s6275_s11 + $0x8] sm:$0xf] %vm3345_vm9, %v3574_v3  ;;  %v3302_v15 = vadd.f32 %v3652_v23, %v3255_v49 }
 0x750   : > { %v3259_v11 = vpop.f32.mrf.mxu1 }
 0x751   : > { %v3575_v31 = vpack.c.bf16 %v3302_v15, %v3302_v15  ;;  %v3260_v60 = vadd.f32 %v3551_v4, %v3259_v11 }
 0x752   : > { %v4026_v40 = vpop.f32.mrf.mxu1 }
 0x753   : > { %3349 = vst.msk [vmem:[%s6275_s11 + $0xc] sm:$0xf] %vm3345_vm9, %v3575_v31  ;;  %v3303_v43 = vadd.f32 %v3655_v9, %v3260_v60 }
 0x754   : > { %v3262_v55 = vpop.f32.mrf.mxu1 }
 0x755   : > { %v3576_v26 = vpack.c.bf16 %v3303_v43, %v3303_v43  ;;  %v3263_v56 = vadd.f32 %v3551_v4, %v3262_v55 }
 0x756   : > { %v4027_v37 = vpop.f32.mrf.mxu1 }
 0x757   : > { %3350 = vst.msk [vmem:[%s6275_s11 + $0x10] sm:$0xf] %vm3345_vm9, %v3576_v26  ;;  %v3304_v47 = vadd.f32 %v3656_v42, %v3263_v56 }
 0x758   : > { %v3267_v39 = vpop.f32.mrf.mxu1 }
 0x759   : > { %v3577_v38 = vpack.c.bf16 %v3304_v47, %v3304_v47  ;;  %v3268_v53 = vadd.f32 %v3551_v4, %v3267_v39 }
 0x75a   : > { %v4030_v12 = vpop.f32.mrf.mxu1 }
 0x75b   : > { %v3243_v18 = vpop.f32.mrf.mxu0  ;;  %3351 = vst.msk [vmem:[%s6275_s11 + $0x14] sm:$0xf] %vm3345_vm9, %v3577_v38  ;;  %v3305_v51 = vadd.f32 %v3659_v14, %v3268_v53 }
 0x75c   : > { %v3244_v59 = vadd.f32 %v3551_v4, %v3243_v18  ;;  %v3270_v16 = vpop.f32.mrf.mxu1 }
 0x75d   : > { %v4018_v5 = vpop.f32.mrf.mxu0  ;;  %v3578_v35 = vpack.c.bf16 %v3305_v51, %v3305_v51  ;;  %v3271_v36 = vadd.f32 %v3551_v4, %v3270_v16 }
 0x75e   : > { %v3299_v63 = vadd.f32 %v3647_v46, %v3244_v59  ;;  %v4031_v19 = vpop.f32.mrf.mxu1 }
 0x75f   : > { %v3246_v22 = vpop.f32.mrf.mxu0  ;;  %3352 = vst.msk [vmem:[%s6275_s11 + $0x18] sm:$0xf] %vm3345_vm9, %v3578_v35  ;;  %v3306_v48 = vadd.f32 %v3660_v6, %v3271_v36 }
 0x760   : > { %v3572_v20 = vpack.c.bf16 %v3299_v63, %v3299_v63  ;;  %v3247_v24 = vadd.f32 %v3551_v4, %v3246_v22  ;;  %v3275_v45 = vpop.f32.mrf.mxu1 }
 0x761   : > { %v4019_v10 = vpop.f32.mrf.mxu0  ;;  %v3579_v1 = vpack.c.bf16 %v3306_v48, %v3306_v48  ;;  %v3276_v25 = vadd.f32 %v3551_v4, %v3275_v45 }
 0x762   : > { %3346 = vst.msk [vmem:[%s6275_s11] sm:$0xf] %vm3345_vm9, %v3572_v20  ;;  %v3300_v28 = vadd.f32 %v3648_v0, %v3247_v24  ;;  %v4034_v13 = vpop.f32.mrf.mxu1 }
 0x763   : > { %3353 = vst.msk [vmem:[%s6275_s11 + $0x1c] sm:$0xf] %vm3345_vm9, %v3579_v1  ;;  %v3307_v44 = vadd.f32 %v3298_v2, %v3276_v25 }
 0x764   : > { %v3573_v52 = vpack.c.bf16 %v3300_v28, %v3300_v28  ;;  %v3278_v7 = vpop.f32.mrf.mxu1 }
 0x765   : > { %v3580_v32 = vpack.c.bf16 %v3307_v44, %v3307_v44 }
 0x766   : > { %3347 = vst.msk [vmem:[%s6275_s11 + $0x4] sm:$0xf] %vm3345_vm9, %v3573_v52  ;;  %v4035_v50 = vpop.f32.mrf.mxu1 }
 0x767   : > { %3354 = vst.msk [vmem:[%s6275_s11 + $0x20] sm:$0xf] %vm3345_vm9, %v3580_v32 }
 0x768 PF: > { %s16_s23 = sadd.s32 1, %s4339_s23   ;;  %s6467_s21 = smov %s4335_s22 }
 0x769   : > { %p13_p5 = scmp.ge.s32.totalorder %s16_s23, 4   ;;  %s6468_s22 = smov %s6470_s24 }
 0x76b   :  { %15 = sbr.rel (!%p13_p5) target bundleno = 2 (0x2), region = 100 }

</bundles_post_ra>
